<compile_context>
chip_gen: v6e
topology: v6e:2x2x1
jax: 0.10.0
libtpu: 0.0.40
codegen_flags: <defaults>
</compile_context>

<pallas_src>
import numpy as np
import jax
import jax.numpy as jnp
from jax import lax
from jax.experimental import pallas as pl
from jax.experimental.pallas import tpu as pltpu


def _round_up(x, m):
    return ((x + m - 1) // m) * m


# ----------------------------------------------------------------------------- kernel
def _bilstm_kernel(x_ref, lens_ref, wih_f_ref, wih_b_ref, b_f_ref, b_b_ref,
                   whh_ref, wc_ref, bc_ref,
                   out_ref, fh_ref, gf_ref, gb_ref):
    T2, B, HP = out_ref.shape
    T = T2 // 2
    G = 4 * HP                                         # per-direction gate width

    # ---- hoisted input projection: two (T*B, E) x (E, 4*HP) bf16 MXU matmuls,
    #      biases folded in, f32 results in per-direction VMEM scratch.
    # TODO(synk): at production T*B*H, chunk this over time (emit_pipeline /
    # double-buffered) instead of one all-timesteps slab (v7x VMEM = 64 MiB).
    x = x_ref[...]
    gf_ref[...] = jnp.dot(x, wih_f_ref[...],
                          preferred_element_type=jnp.float32) + b_f_ref[...]
    gb_ref[...] = jnp.dot(x, wih_b_ref[...],
                          preferred_element_type=jnp.float32) + b_b_ref[...]

    # lens broadcast hoisted out of the unrolled loop (no per-step broadcast op).
    lens_b = jnp.broadcast_to(lens_ref[...], (B, HP)).astype(jnp.int32)

    def sig(z):                                        # 1 EUP push per vreg
        return 0.5 * jnp.tanh(0.5 * z) + 0.5

    def cell(gates, c):
        # gate blocks (i, f, o, g) are each HP=128-lane aligned whole vregs.
        i = sig(gates[:, 0 * HP:1 * HP])
        f = sig(gates[:, 1 * HP:2 * HP])
        o = sig(gates[:, 2 * HP:3 * HP])
        g = jnp.tanh(gates[:, 3 * HP:4 * HP])
        c_new = f * c + i * g                          # c-state stays f32
        h_new = o * jnp.tanh(c_new)
        return h_new, c_new

    zeros = jnp.zeros((B, HP), jnp.float32)

    # ---- both directions fused in one bounded-unroll loop (packed-seq mask).
    # TODO(synk): on v7x the two directions could instead be split across the
    # two TensorCores (grid=(2,), dimension_semantics=("parallel",)); the
    # single-core fused loop is the right choice on v5e/v6e.
    def body(s, carry):
        h_f, c_f, h_b, c_b = carry
        t_b = T - 1 - s

        off_f = pl.multiple_of(s * B, B)
        off_b = pl.multiple_of(t_b * B, B)
        gpre_f = gf_ref[pl.ds(off_f, B), :]            # (B, 4*HP) fwd gates @ s
        gpre_b = gb_ref[pl.ds(off_b, B), :]            # (B, 4*HP) bwd gates @ T-1-s

        # one fused recurrence matmul: [h_f | h_b] x block-diagonal W_hh.
        h_cat = jnp.concatenate([h_f, h_b], axis=1).astype(jnp.bfloat16)
        rec = jnp.dot(h_cat, whh_ref[...],
                      preferred_element_type=jnp.float32)        # (B, 8*HP)

        hf_new, cf_new = cell(gpre_f + rec[:, :G], c_f)
        hb_new, cb_new = cell(gpre_b + rec[:, G:], c_b)

        vf = lens_b > s                                # vector-scalar compares
        vb = lens_b > t_b
        h_f = jnp.where(vf, hf_new, h_f)
        c_f = jnp.where(vf, cf_new, c_f)
        h_b = jnp.where(vb, hb_new, h_b)
        c_b = jnp.where(vb, cb_new, c_b)

        # lane-dense bf16 stores: each is a full (B, 128) aligned block.
        out_ref[s] = jnp.where(vf, hf_new, 0.0).astype(out_ref.dtype)
        out_ref[T + t_b] = jnp.where(vb, hb_new, 0.0).astype(out_ref.dtype)
        return (h_f, c_f, h_b, c_b)

    h_f, _cf, h_b, _cb = lax.fori_loop(0, T, body, (zeros, zeros, zeros, zeros),
                                       unroll=min(T, 8))

    # final_hidden = tanh([h_f | h_b] @ Wc + bc); padded rows/cols of Wc are 0.
    h_cat = jnp.concatenate([h_f, h_b], axis=1).astype(jnp.bfloat16)
    fh_ref[...] = jnp.tanh(jnp.dot(h_cat, wc_ref[...],
                                   preferred_element_type=jnp.float32)
                           + bc_ref[...])


# ----------------------------------------------------------------------------- wrapper
def caption_encoder_forward(src, src_len, params):
    """src: (B, T) int32 token ids; src_len: (B, 1) int32 lengths."""
    H = params["whh_f"].shape[0]
    C = params["bc"].shape[1]
    B, T = src.shape
    E = params["embedding"].shape[1]
    HP = _round_up(H, 128)        # pad hidden so every gate block / per-step
    CP = _round_up(C, 128)        # store is a full 128-lane aligned vreg

    # bf16, time-major embedding gather: no f32 intermediate or extra transpose.
    # TODO(synk): could move the gather in-kernel (PrefetchScalarGridSpec +
    # pl.Element row index_map) at production vocab/seq sizes.
    emb_tab = params["embedding"].astype(jnp.bfloat16)
    x2d = emb_tab[src.T].reshape(T * B, E)                       # (T*B, E) bf16
    lens = src_len.reshape(B, 1).astype(jnp.int32)

    def prep_gates(w):
        # PyTorch gate order (i, f, g, o) -> kernel order (i, f, o, g), each
        # gate column-block zero-padded from H to HP lanes.
        i, f, g, o = (w[:, k * H:(k + 1) * H] for k in range(4))
        pad = lambda m: jnp.pad(m, ((0, 0), (0, HP - H)))
        return jnp.concatenate([pad(i), pad(f), pad(o), pad(g)], axis=1)

    def prep_whh(w):
        return jnp.pad(prep_gates(w), ((0, HP - H), (0, 0)))     # (HP, 4*HP)

    wih_f = prep_gates(params["wih_f"]).astype(jnp.bfloat16)     # (E, 4*HP)
    wih_b = prep_gates(params["wih_b"]).astype(jnp.bfloat16)
    b_f = prep_gates(params["b_f"]).astype(jnp.float32)          # (1, 4*HP)
    b_b = prep_gates(params["b_b"]).astype(jnp.float32)
    zblk = jnp.zeros((HP, 4 * HP), jnp.float32)
    whh_bd = jnp.concatenate(                                    # (2*HP, 8*HP)
        [jnp.concatenate([prep_whh(params["whh_f"]), zblk], axis=1),
         jnp.concatenate([zblk, prep_whh(params["whh_b"])], axis=1)],
        axis=0).astype(jnp.bfloat16)
    wc_p = jnp.concatenate(                                      # (2*HP, CP)
        [jnp.pad(params["wc"][:H], ((0, HP - H), (0, CP - C))),
         jnp.pad(params["wc"][H:], ((0, HP - H), (0, CP - C)))],
        axis=0).astype(jnp.bfloat16)
    bc_p = jnp.pad(params["bc"], ((0, 0), (0, CP - C))).astype(jnp.float32)

    vmem = pl.BlockSpec(memory_space=pltpu.MemorySpace.VMEM)
    out, fh = pl.pallas_call(
        _bilstm_kernel,
        out_shape=(
            jax.ShapeDtypeStruct((2 * T, B, HP), jnp.bfloat16),  # [fwd; bwd], time-major
            jax.ShapeDtypeStruct((B, CP), jnp.float32),          # final_hidden (padded)
        ),
        in_specs=[vmem] * 9,
        out_specs=(vmem, vmem),
        scratch_shapes=[pltpu.VMEM((T * B, 4 * HP), jnp.float32),   # fwd pre-projection
                        pltpu.VMEM((T * B, 4 * HP), jnp.float32)],  # bwd pre-projection
        compiler_params=pltpu.CompilerParams(vmem_limit_bytes=64 * 1024 * 1024),
    )(x2d, lens, wih_f, wih_b, b_f, b_b, whh_bd, wc_p, bc_p)

    # unpad + final (B, T, 2H) layout: one fused slice/transpose/concat.
    out = out.astype(jnp.float32)
    outputs = jnp.concatenate(
        [jnp.transpose(out[:T, :, :H], (1, 0, 2)),
         jnp.transpose(out[T:, :, :H], (1, 0, 2))], axis=-1)     # (B, T, 2H)
    final_hidden = fh[:, :C]
    # prev_cap_mask derived from lengths (== (outputs.sum(-1) != 0) a.s.: padded
    # steps are exactly zero, valid steps are a.s. nonzero).
    prev_cap_mask = (jnp.arange(T, dtype=jnp.int32)[None, :] < lens).astype(jnp.float32)
    # TODO(synk): pad_packed_sequence pads to max(src_len); identical here since
    # max(src_len) == T in the example below.
    return outputs, final_hidden, prev_cap_mask


# ----------------------------------------------------------------------------- params
def init_params(key, vocab_size, emb_dim, enc_hid_dim, concat_output_dim):
    ks = jax.random.split(key, 11)
    H = enc_hid_dim
    bound = 1.0 / np.sqrt(H)

    def u(k, shape):
        return jax.random.uniform(k, shape, jnp.float32, -bound, bound)

    return dict(
        embedding=0.1 * jax.random.normal(ks[0], (vocab_size, emb_dim), jnp.float32),
        # LSTM weights stored transposed as (in, 4H); PyTorch gate order i, f, g, o
        wih_f=u(ks[1], (emb_dim, 4 * H)),
        whh_f=u(ks[2], (H, 4 * H)),
        b_f=u(ks[3], (1, 4 * H)) + u(ks[4], (1, 4 * H)),    # bias_ih + bias_hh
        wih_b=u(ks[5], (emb_dim, 4 * H)),
        whh_b=u(ks[6], (H, 4 * H)),
        b_b=u(ks[7], (1, 4 * H)) + u(ks[8], (1, 4 * H)),
        wc=u(ks[9], (2 * H, concat_output_dim)),
        bc=u(ks[10], (1, concat_output_dim)),
    )


# ----------------------------------------------------------------------------- numpy reference
def _np_lstm_dir(x, lens, wih, whh, b, reverse):
    T, B, _E = x.shape
    H = whh.shape[0]
    h = np.zeros((B, H), np.float32)
    c = np.zeros((B, H), np.float32)
    out = np.zeros((T, B, H), np.float32)
    sig = lambda z: 1.0 / (1.0 + np.exp(-z))
    order = range(T - 1, -1, -1) if reverse else range(T)
    for t in order:
        gates = x[t] @ wih + h @ whh + b               # gate order i, f, g, o
        i = sig(gates[:, :H]); f = sig(gates[:, H:2 * H])
        g = np.tanh(gates[:, 2 * H:3 * H]); o = sig(gates[:, 3 * H:4 * H])
        c_new = f * c + i * g
        h_new = o * np.tanh(c_new)
        valid = lens > t
        h = np.where(valid, h_new, h)
        c = np.where(valid, c_new, c)
        out[t] = np.where(valid, h_new, 0.0)
    return out, h


def reference_forward(src, src_len, params):
    p = {k: np.asarray(v) for k, v in params.items()}
    emb = p["embedding"][np.asarray(src)]
    x = np.transpose(emb, (1, 0, 2)).astype(np.float32)
    lens = np.asarray(src_len).reshape(-1, 1).astype(np.int32)
    H = p["whh_f"].shape[0]
    out_f, h_f = _np_lstm_dir(x, lens, p["wih_f"], p["whh_f"], p["b_f"], reverse=False)
    out_b, h_b = _np_lstm_dir(x, lens, p["wih_b"], p["whh_b"], p["b_b"], reverse=True)
    outputs = np.concatenate([np.transpose(out_f, (1, 0, 2)),
                              np.transpose(out_b, (1, 0, 2))], axis=-1)
    concat_hidden = np.concatenate([h_f, h_b], axis=1)
    final_hidden = np.tanh(concat_hidden @ p["wc"] + p["bc"])
    mask = (outputs.sum(2) != 0).astype(np.float32)
    return outputs, final_hidden, mask


# ----------------------------------------------------------------------------- main
if __name__ == "__main__":
    VOCAB, E, H, C = 50, 32, 32, 32
    B, T = 8, 8                                             # B = full sublane count

    key = jax.random.PRNGKey(0)
    k_param, k_src = jax.random.split(key)

    params = init_params(k_param, VOCAB, E, H, C)
    src = jax.random.randint(k_src, (B, T), 0, VOCAB, dtype=jnp.int32)
    src_len = jnp.array([[8], [5], [3], [6], [8], [1], [7], [4]], dtype=jnp.int32)

    fwd = jax.jit(caption_encoder_forward)
    outputs, final_hidden, prev_cap_mask = jax.block_until_ready(
        fwd(src, src_len, params))

    ref_out, ref_fh, ref_mask = reference_forward(src, src_len, params)

    assert outputs.shape == (B, T, 2 * H)
    assert final_hidden.shape == (B, C)
    assert prev_cap_mask.shape == (B, T)
    assert np.max(np.abs(np.asarray(outputs) - ref_out)) < 5e-2
    assert np.max(np.abs(np.asarray(final_hidden) - ref_fh)) < 5e-2
    assert np.array_equal(np.asarray(prev_cap_mask), ref_mask)

    print("KERNEL_OK")
</pallas_src>

<mosaic_0001>
module attributes {stable_mosaic.version = 11 : i64} {
  func.func @_bilstm_kernel(%arg0: memref<64x32xbf16, #tpu.memory_space<vmem>>, %arg1: memref<8x1xi32, #tpu.memory_space<vmem>>, %arg2: memref<32x512xbf16, #tpu.memory_space<vmem>>, %arg3: memref<32x512xbf16, #tpu.memory_space<vmem>>, %arg4: memref<1x512xf32, #tpu.memory_space<vmem>>, %arg5: memref<1x512xf32, #tpu.memory_space<vmem>>, %arg6: memref<256x1024xbf16, #tpu.memory_space<vmem>>, %arg7: memref<256x128xbf16, #tpu.memory_space<vmem>>, %arg8: memref<1x128xf32, #tpu.memory_space<vmem>>, %arg9: memref<16x8x128xbf16, #tpu.memory_space<vmem>>, %arg10: memref<8x128xf32, #tpu.memory_space<vmem>>, %arg11: memref<64x512xf32, #tpu.memory_space<vmem>>, %arg12: memref<64x512xf32, #tpu.memory_space<vmem>>) attributes {dimension_semantics = [], scalar_prefetch = 0 : i64, scratch_operands = 2 : i64, tpu.core_type = #tpu.core_type<tc>} {
    %c0 = arith.constant 0 : index
    %c0_0 = arith.constant 0 : index
    %0 = vector.load %arg0[%c0, %c0_0] : memref<64x32xbf16, #tpu.memory_space<vmem>>, vector<64x32xbf16>
    %c0_1 = arith.constant 0 : index
    %c0_2 = arith.constant 0 : index
    %1 = vector.load %arg2[%c0_1, %c0_2] : memref<32x512xbf16, #tpu.memory_space<vmem>>, vector<32x512xbf16>
    %cst = arith.constant dense<0.000000e+00> : vector<64x512xf32>
    %2 = tpu.matmul %0, %1, %cst {dimension_numbers = #tpu.dot_dimension_numbers<[1], [0], [0], [1], [0, 0, 1, 1], [], []>} : vector<64x32xbf16>, vector<32x512xbf16>, vector<64x512xf32> -> vector<64x512xf32>
    %c0_3 = arith.constant 0 : index
    %c0_4 = arith.constant 0 : index
    %3 = vector.load %arg4[%c0_3, %c0_4] : memref<1x512xf32, #tpu.memory_space<vmem>>, vector<1x512xf32>
    %4 = vector.broadcast %3 : vector<1x512xf32> to vector<64x512xf32>
    %5 = arith.addf %2, %4 : vector<64x512xf32>
    %c0_5 = arith.constant 0 : index
    %c0_6 = arith.constant 0 : index
    %6 = vector.load %arg11[%c0_5, %c0_6] : memref<64x512xf32, #tpu.memory_space<vmem>>, vector<64x512xf32>
    tpu.vector_store %arg11[%c0_5, %c0_6], %5 {strides = array<i32>} : memref<64x512xf32, #tpu.memory_space<vmem>>, vector<64x512xf32>,
    %c0_7 = arith.constant 0 : index
    %c0_8 = arith.constant 0 : index
    %7 = vector.load %arg3[%c0_7, %c0_8] : memref<32x512xbf16, #tpu.memory_space<vmem>>, vector<32x512xbf16>
    %cst_9 = arith.constant dense<0.000000e+00> : vector<64x512xf32>
    %8 = tpu.matmul %0, %7, %cst_9 {dimension_numbers = #tpu.dot_dimension_numbers<[1], [0], [0], [1], [0, 0, 1, 1], [], []>} : vector<64x32xbf16>, vector<32x512xbf16>, vector<64x512xf32> -> vector<64x512xf32>
    %c0_10 = arith.constant 0 : index
    %c0_11 = arith.constant 0 : index
    %9 = vector.load %arg5[%c0_10, %c0_11] : memref<1x512xf32, #tpu.memory_space<vmem>>, vector<1x512xf32>
    %10 = vector.broadcast %9 : vector<1x512xf32> to vector<64x512xf32>
    %11 = arith.addf %8, %10 : vector<64x512xf32>
    %c0_12 = arith.constant 0 : index
    %c0_13 = arith.constant 0 : index
    %12 = vector.load %arg12[%c0_12, %c0_13] : memref<64x512xf32, #tpu.memory_space<vmem>>, vector<64x512xf32>
    tpu.vector_store %arg12[%c0_12, %c0_13], %11 {strides = array<i32>} : memref<64x512xf32, #tpu.memory_space<vmem>>, vector<64x512xf32>,
    %c0_14 = arith.constant 0 : index
    %c0_15 = arith.constant 0 : index
    %13 = vector.load %arg1[%c0_14, %c0_15] : memref<8x1xi32, #tpu.memory_space<vmem>>, vector<8x1xi32>
    %14 = vector.shape_cast %13 : vector<8x1xi32> to vector<8x1xi32>
    %15 = vector.broadcast %14 : vector<8x1xi32> to vector<8x128xi32>
    %cst_16 = arith.constant 0.000000e+00 : f32
    %16 = vector.broadcast %cst_16 : f32 to vector<8x128xf32>
    %c0_i32 = arith.constant 0 : i32
    %c7_i32 = arith.constant 7 : i32
    %17 = arith.subi %c7_i32, %c0_i32 : i32
    %c8_i32 = arith.constant 8 : i32
    %18 = arith.muli %c0_i32, %c8_i32 : i32
    %19 = tpu.assume_multiple %18, 8 : i32
    %c8_i32_17 = arith.constant 8 : i32
    %20 = arith.muli %17, %c8_i32_17 : i32
    %21 = tpu.assume_multiple %20, 8 : i32
    %22 = arith.index_cast %19 : i32 to index
    %c0_18 = arith.constant 0 : index
    %23 = vector.load %arg11[%22, %c0_18] : memref<64x512xf32, #tpu.memory_space<vmem>>, vector<8x512xf32>
    %24 = arith.index_cast %21 : i32 to index
    %c0_19 = arith.constant 0 : index
    %25 = vector.load %arg12[%24, %c0_19] : memref<64x512xf32, #tpu.memory_space<vmem>>, vector<8x512xf32>
    %26 = tpu.concatenate %16, %16 in 1 : vector<8x128xf32>, vector<8x128xf32> -> vector<8x256xf32>
    %27 = arith.truncf %26 : vector<8x256xf32> to vector<8x256xbf16>
    %c0_20 = arith.constant 0 : index
    %c0_21 = arith.constant 0 : index
    %28 = vector.load %arg6[%c0_20, %c0_21] : memref<256x1024xbf16, #tpu.memory_space<vmem>>, vector<256x1024xbf16>
    %cst_22 = arith.constant dense<0.000000e+00> : vector<8x1024xf32>
    %29 = tpu.matmul %27, %28, %cst_22 {dimension_numbers = #tpu.dot_dimension_numbers<[1], [0], [0], [1], [0, 0, 1, 1], [], []>} : vector<8x256xbf16>, vector<256x1024xbf16>, vector<8x1024xf32> -> vector<8x1024xf32>
    %30 = vector.extract_strided_slice %29 {offsets = [0, 0], sizes = [8, 512], strides = [1, 1]} : vector<8x1024xf32> to vector<8x512xf32>
    %31 = arith.addf %23, %30 : vector<8x512xf32>
    %32 = vector.extract_strided_slice %31 {offsets = [0, 0], sizes = [8, 128], strides = [1, 1]} : vector<8x512xf32> to vector<8x128xf32>
    %cst_23 = arith.constant 5.000000e-01 : f32
    %33 = vector.broadcast %cst_23 : f32 to vector<8x128xf32>
    %34 = arith.mulf %33, %32 : vector<8x128xf32>
    %35 = math.tanh %34 : vector<8x128xf32>
    %cst_24 = arith.constant 5.000000e-01 : f32
    %36 = vector.broadcast %cst_24 : f32 to vector<8x128xf32>
    %37 = arith.mulf %36, %35 : vector<8x128xf32>
    %cst_25 = arith.constant 5.000000e-01 : f32
    %38 = vector.broadcast %cst_25 : f32 to vector<8x128xf32>
    %39 = arith.addf %37, %38 : vector<8x128xf32>
    %40 = vector.extract_strided_slice %31 {offsets = [0, 128], sizes = [8, 128], strides = [1, 1]} : vector<8x512xf32> to vector<8x128xf32>
    %cst_26 = arith.constant 5.000000e-01 : f32
    %41 = vector.broadcast %cst_26 : f32 to vector<8x128xf32>
    %42 = arith.mulf %41, %40 : vector<8x128xf32>
    %43 = math.tanh %42 : vector<8x128xf32>
    %cst_27 = arith.constant 5.000000e-01 : f32
    %44 = vector.broadcast %cst_27 : f32 to vector<8x128xf32>
    %45 = arith.mulf %44, %43 : vector<8x128xf32>
    %cst_28 = arith.constant 5.000000e-01 : f32
    %46 = vector.broadcast %cst_28 : f32 to vector<8x128xf32>
    %47 = arith.addf %45, %46 : vector<8x128xf32>
    %48 = vector.extract_strided_slice %31 {offsets = [0, 256], sizes = [8, 128], strides = [1, 1]} : vector<8x512xf32> to vector<8x128xf32>
    %cst_29 = arith.constant 5.000000e-01 : f32
    %49 = vector.broadcast %cst_29 : f32 to vector<8x128xf32>
    %50 = arith.mulf %49, %48 : vector<8x128xf32>
    %51 = math.tanh %50 : vector<8x128xf32>
    %cst_30 = arith.constant 5.000000e-01 : f32
    %52 = vector.broadcast %cst_30 : f32 to vector<8x128xf32>
    %53 = arith.mulf %52, %51 : vector<8x128xf32>
    %cst_31 = arith.constant 5.000000e-01 : f32
    %54 = vector.broadcast %cst_31 : f32 to vector<8x128xf32>
    %55 = arith.addf %53, %54 : vector<8x128xf32>
    %56 = vector.extract_strided_slice %31 {offsets = [0, 384], sizes = [8, 128], strides = [1, 1]} : vector<8x512xf32> to vector<8x128xf32>
    %57 = math.tanh %56 : vector<8x128xf32>
    %58 = arith.mulf %47, %16 : vector<8x128xf32>
    %59 = arith.mulf %39, %57 : vector<8x128xf32>
    %60 = arith.addf %58, %59 : vector<8x128xf32>
    %61 = math.tanh %60 : vector<8x128xf32>
    %62 = arith.mulf %55, %61 : vector<8x128xf32>
    %63 = vector.extract_strided_slice %29 {offsets = [0, 512], sizes = [8, 512], strides = [1, 1]} : vector<8x1024xf32> to vector<8x512xf32>
    %64 = arith.addf %25, %63 : vector<8x512xf32>
    %65 = vector.extract_strided_slice %64 {offsets = [0, 0], sizes = [8, 128], strides = [1, 1]} : vector<8x512xf32> to vector<8x128xf32>
    %cst_32 = arith.constant 5.000000e-01 : f32
    %66 = vector.broadcast %cst_32 : f32 to vector<8x128xf32>
    %67 = arith.mulf %66, %65 : vector<8x128xf32>
    %68 = math.tanh %67 : vector<8x128xf32>
    %cst_33 = arith.constant 5.000000e-01 : f32
    %69 = vector.broadcast %cst_33 : f32 to vector<8x128xf32>
    %70 = arith.mulf %69, %68 : vector<8x128xf32>
    %cst_34 = arith.constant 5.000000e-01 : f32
    %71 = vector.broadcast %cst_34 : f32 to vector<8x128xf32>
    %72 = arith.addf %70, %71 : vector<8x128xf32>
    %73 = vector.extract_strided_slice %64 {offsets = [0, 128], sizes = [8, 128], strides = [1, 1]} : vector<8x512xf32> to vector<8x128xf32>
    %cst_35 = arith.constant 5.000000e-01 : f32
    %74 = vector.broadcast %cst_35 : f32 to vector<8x128xf32>
    %75 = arith.mulf %74, %73 : vector<8x128xf32>
    %76 = math.tanh %75 : vector<8x128xf32>
    %cst_36 = arith.constant 5.000000e-01 : f32
    %77 = vector.broadcast %cst_36 : f32 to vector<8x128xf32>
    %78 = arith.mulf %77, %76 : vector<8x128xf32>
    %cst_37 = arith.constant 5.000000e-01 : f32
    %79 = vector.broadcast %cst_37 : f32 to vector<8x128xf32>
    %80 = arith.addf %78, %79 : vector<8x128xf32>
    %81 = vector.extract_strided_slice %64 {offsets = [0, 256], sizes = [8, 128], strides = [1, 1]} : vector<8x512xf32> to vector<8x128xf32>
    %cst_38 = arith.constant 5.000000e-01 : f32
    %82 = vector.broadcast %cst_38 : f32 to vector<8x128xf32>
    %83 = arith.mulf %82, %81 : vector<8x128xf32>
    %84 = math.tanh %83 : vector<8x128xf32>
    %cst_39 = arith.constant 5.000000e-01 : f32
    %85 = vector.broadcast %cst_39 : f32 to vector<8x128xf32>
    %86 = arith.mulf %85, %84 : vector<8x128xf32>
    %cst_40 = arith.constant 5.000000e-01 : f32
    %87 = vector.broadcast %cst_40 : f32 to vector<8x128xf32>
    %88 = arith.addf %86, %87 : vector<8x128xf32>
    %89 = vector.extract_strided_slice %64 {offsets = [0, 384], sizes = [8, 128], strides = [1, 1]} : vector<8x512xf32> to vector<8x128xf32>
    %90 = math.tanh %89 : vector<8x128xf32>
    %91 = arith.mulf %80, %16 : vector<8x128xf32>
    %92 = arith.mulf %72, %90 : vector<8x128xf32>
    %93 = arith.addf %91, %92 : vector<8x128xf32>
    %94 = math.tanh %93 : vector<8x128xf32>
    %95 = arith.mulf %88, %94 : vector<8x128xf32>
    %96 = vector.broadcast %c0_i32 : i32 to vector<8x128xi32>
    %97 = arith.cmpi sgt, %15, %96 : vector<8x128xi32>
    %98 = vector.broadcast %17 : i32 to vector<8x128xi32>
    %99 = arith.cmpi sgt, %15, %98 : vector<8x128xi32>
    %100 = arith.select %97, %62, %16 : vector<8x128xi1>, vector<8x128xf32>
    %101 = arith.select %97, %60, %16 : vector<8x128xi1>, vector<8x128xf32>
    %102 = arith.select %99, %95, %16 : vector<8x128xi1>, vector<8x128xf32>
    %103 = arith.select %99, %93, %16 : vector<8x128xi1>, vector<8x128xf32>
    %cst_41 = arith.constant 0.000000e+00 : f32
    %104 = vector.broadcast %cst_41 : f32 to vector<8x128xf32>
    %105 = arith.select %97, %62, %104 : vector<8x128xi1>, vector<8x128xf32>
    %106 = arith.truncf %105 : vector<8x128xf32> to vector<8x128xbf16>
    %107 = arith.index_cast %c0_i32 : i32 to index
    %c0_42 = arith.constant 0 : index
    %c0_43 = arith.constant 0 : index
    %108 = vector.load %arg9[%107, %c0_42, %c0_43] : memref<16x8x128xbf16, #tpu.memory_space<vmem>>, vector<1x8x128xbf16>
    %109 = vector.shape_cast %108 : vector<1x8x128xbf16> to vector<8x128xbf16>
    %110 = vector.shape_cast %106 : vector<8x128xbf16> to vector<1x8x128xbf16>
    tpu.vector_store %arg9[%107, %c0_42, %c0_43], %110 {strides = array<i32>} : memref<16x8x128xbf16, #tpu.memory_space<vmem>>, vector<1x8x128xbf16>,
    %cst_44 = arith.constant 0.000000e+00 : f32
    %111 = vector.broadcast %cst_44 : f32 to vector<8x128xf32>
    %112 = arith.select %99, %95, %111 : vector<8x128xi1>, vector<8x128xf32>
    %113 = arith.truncf %112 : vector<8x128xf32> to vector<8x128xbf16>
    %c8_i32_45 = arith.constant 8 : i32
    %114 = arith.addi %c8_i32_45, %17 : i32
    %115 = arith.index_cast %114 : i32 to index
    %c0_46 = arith.constant 0 : index
    %c0_47 = arith.constant 0 : index
    %116 = vector.load %arg9[%115, %c0_46, %c0_47] : memref<16x8x128xbf16, #tpu.memory_space<vmem>>, vector<1x8x128xbf16>
    %117 = vector.shape_cast %116 : vector<1x8x128xbf16> to vector<8x128xbf16>
    %118 = vector.shape_cast %113 : vector<8x128xbf16> to vector<1x8x128xbf16>
    tpu.vector_store %arg9[%115, %c0_46, %c0_47], %118 {strides = array<i32>} : memref<16x8x128xbf16, #tpu.memory_space<vmem>>, vector<1x8x128xbf16>,
    %c1_i32 = arith.constant 1 : i32
    %c7_i32_48 = arith.constant 7 : i32
    %119 = arith.subi %c7_i32_48, %c1_i32 : i32
    %c8_i32_49 = arith.constant 8 : i32
    %120 = arith.muli %c1_i32, %c8_i32_49 : i32
    %121 = tpu.assume_multiple %120, 8 : i32
    %c8_i32_50 = arith.constant 8 : i32
    %122 = arith.muli %119, %c8_i32_50 : i32
    %123 = tpu.assume_multiple %122, 8 : i32
    %124 = arith.index_cast %121 : i32 to index
    %c0_51 = arith.constant 0 : index
    %125 = vector.load %arg11[%124, %c0_51] : memref<64x512xf32, #tpu.memory_space<vmem>>, vector<8x512xf32>
    %126 = arith.index_cast %123 : i32 to index
    %c0_52 = arith.constant 0 : index
    %127 = vector.load %arg12[%126, %c0_52] : memref<64x512xf32, #tpu.memory_space<vmem>>, vector<8x512xf32>
    %128 = tpu.concatenate %100, %102 in 1 : vector<8x128xf32>, vector<8x128xf32> -> vector<8x256xf32>
    %129 = arith.truncf %128 : vector<8x256xf32> to vector<8x256xbf16>
    %c0_53 = arith.constant 0 : index
    %c0_54 = arith.constant 0 : index
    %130 = vector.load %arg6[%c0_53, %c0_54] : memref<256x1024xbf16, #tpu.memory_space<vmem>>, vector<256x1024xbf16>
    %cst_55 = arith.constant dense<0.000000e+00> : vector<8x1024xf32>
    %131 = tpu.matmul %129, %130, %cst_55 {dimension_numbers = #tpu.dot_dimension_numbers<[1], [0], [0], [1], [0, 0, 1, 1], [], []>} : vector<8x256xbf16>, vector<256x1024xbf16>, vector<8x1024xf32> -> vector<8x1024xf32>
    %132 = vector.extract_strided_slice %131 {offsets = [0, 0], sizes = [8, 512], strides = [1, 1]} : vector<8x1024xf32> to vector<8x512xf32>
    %133 = arith.addf %125, %132 : vector<8x512xf32>
    %134 = vector.extract_strided_slice %133 {offsets = [0, 0], sizes = [8, 128], strides = [1, 1]} : vector<8x512xf32> to vector<8x128xf32>
    %cst_56 = arith.constant 5.000000e-01 : f32
    %135 = vector.broadcast %cst_56 : f32 to vector<8x128xf32>
    %136 = arith.mulf %135, %134 : vector<8x128xf32>
    %137 = math.tanh %136 : vector<8x128xf32>
    %cst_57 = arith.constant 5.000000e-01 : f32
    %138 = vector.broadcast %cst_57 : f32 to vector<8x128xf32>
    %139 = arith.mulf %138, %137 : vector<8x128xf32>
    %cst_58 = arith.constant 5.000000e-01 : f32
    %140 = vector.broadcast %cst_58 : f32 to vector<8x128xf32>
    %141 = arith.addf %139, %140 : vector<8x128xf32>
    %142 = vector.extract_strided_slice %133 {offsets = [0, 128], sizes = [8, 128], strides = [1, 1]} : vector<8x512xf32> to vector<8x128xf32>
    %cst_59 = arith.constant 5.000000e-01 : f32
    %143 = vector.broadcast %cst_59 : f32 to vector<8x128xf32>
    %144 = arith.mulf %143, %142 : vector<8x128xf32>
    %145 = math.tanh %144 : vector<8x128xf32>
    %cst_60 = arith.constant 5.000000e-01 : f32
    %146 = vector.broadcast %cst_60 : f32 to vector<8x128xf32>
    %147 = arith.mulf %146, %145 : vector<8x128xf32>
    %cst_61 = arith.constant 5.000000e-01 : f32
    %148 = vector.broadcast %cst_61 : f32 to vector<8x128xf32>
    %149 = arith.addf %147, %148 : vector<8x128xf32>
    %150 = vector.extract_strided_slice %133 {offsets = [0, 256], sizes = [8, 128], strides = [1, 1]} : vector<8x512xf32> to vector<8x128xf32>
    %cst_62 = arith.constant 5.000000e-01 : f32
    %151 = vector.broadcast %cst_62 : f32 to vector<8x128xf32>
    %152 = arith.mulf %151, %150 : vector<8x128xf32>
    %153 = math.tanh %152 : vector<8x128xf32>
    %cst_63 = arith.constant 5.000000e-01 : f32
    %154 = vector.broadcast %cst_63 : f32 to vector<8x128xf32>
    %155 = arith.mulf %154, %153 : vector<8x128xf32>
    %cst_64 = arith.constant 5.000000e-01 : f32
    %156 = vector.broadcast %cst_64 : f32 to vector<8x128xf32>
    %157 = arith.addf %155, %156 : vector<8x128xf32>
    %158 = vector.extract_strided_slice %133 {offsets = [0, 384], sizes = [8, 128], strides = [1, 1]} : vector<8x512xf32> to vector<8x128xf32>
    %159 = math.tanh %158 : vector<8x128xf32>
    %160 = arith.mulf %149, %101 : vector<8x128xf32>
    %161 = arith.mulf %141, %159 : vector<8x128xf32>
    %162 = arith.addf %160, %161 : vector<8x128xf32>
    %163 = math.tanh %162 : vector<8x128xf32>
    %164 = arith.mulf %157, %163 : vector<8x128xf32>
    %165 = vector.extract_strided_slice %131 {offsets = [0, 512], sizes = [8, 512], strides = [1, 1]} : vector<8x1024xf32> to vector<8x512xf32>
    %166 = arith.addf %127, %165 : vector<8x512xf32>
    %167 = vector.extract_strided_slice %166 {offsets = [0, 0], sizes = [8, 128], strides = [1, 1]} : vector<8x512xf32> to vector<8x128xf32>
    %cst_65 = arith.constant 5.000000e-01 : f32
    %168 = vector.broadcast %cst_65 : f32 to vector<8x128xf32>
    %169 = arith.mulf %168, %167 : vector<8x128xf32>
    %170 = math.tanh %169 : vector<8x128xf32>
    %cst_66 = arith.constant 5.000000e-01 : f32
    %171 = vector.broadcast %cst_66 : f32 to vector<8x128xf32>
    %172 = arith.mulf %171, %170 : vector<8x128xf32>
    %cst_67 = arith.constant 5.000000e-01 : f32
    %173 = vector.broadcast %cst_67 : f32 to vector<8x128xf32>
    %174 = arith.addf %172, %173 : vector<8x128xf32>
    %175 = vector.extract_strided_slice %166 {offsets = [0, 128], sizes = [8, 128], strides = [1, 1]} : vector<8x512xf32> to vector<8x128xf32>
    %cst_68 = arith.constant 5.000000e-01 : f32
    %176 = vector.broadcast %cst_68 : f32 to vector<8x128xf32>
    %177 = arith.mulf %176, %175 : vector<8x128xf32>
    %178 = math.tanh %177 : vector<8x128xf32>
    %cst_69 = arith.constant 5.000000e-01 : f32
    %179 = vector.broadcast %cst_69 : f32 to vector<8x128xf32>
    %180 = arith.mulf %179, %178 : vector<8x128xf32>
    %cst_70 = arith.constant 5.000000e-01 : f32
    %181 = vector.broadcast %cst_70 : f32 to vector<8x128xf32>
    %182 = arith.addf %180, %181 : vector<8x128xf32>
    %183 = vector.extract_strided_slice %166 {offsets = [0, 256], sizes = [8, 128], strides = [1, 1]} : vector<8x512xf32> to vector<8x128xf32>
    %cst_71 = arith.constant 5.000000e-01 : f32
    %184 = vector.broadcast %cst_71 : f32 to vector<8x128xf32>
    %185 = arith.mulf %184, %183 : vector<8x128xf32>
    %186 = math.tanh %185 : vector<8x128xf32>
    %cst_72 = arith.constant 5.000000e-01 : f32
    %187 = vector.broadcast %cst_72 : f32 to vector<8x128xf32>
    %188 = arith.mulf %187, %186 : vector<8x128xf32>
    %cst_73 = arith.constant 5.000000e-01 : f32
    %189 = vector.broadcast %cst_73 : f32 to vector<8x128xf32>
    %190 = arith.addf %188, %189 : vector<8x128xf32>
    %191 = vector.extract_strided_slice %166 {offsets = [0, 384], sizes = [8, 128], strides = [1, 1]} : vector<8x512xf32> to vector<8x128xf32>
    %192 = math.tanh %191 : vector<8x128xf32>
    %193 = arith.mulf %182, %103 : vector<8x128xf32>
    %194 = arith.mulf %174, %192 : vector<8x128xf32>
    %195 = arith.addf %193, %194 : vector<8x128xf32>
    %196 = math.tanh %195 : vector<8x128xf32>
    %197 = arith.mulf %190, %196 : vector<8x128xf32>
    %198 = vector.broadcast %c1_i32 : i32 to vector<8x128xi32>
    %199 = arith.cmpi sgt, %15, %198 : vector<8x128xi32>
    %200 = vector.broadcast %119 : i32 to vector<8x128xi32>
    %201 = arith.cmpi sgt, %15, %200 : vector<8x128xi32>
    %202 = arith.select %199, %164, %100 : vector<8x128xi1>, vector<8x128xf32>
    %203 = arith.select %199, %162, %101 : vector<8x128xi1>, vector<8x128xf32>
    %204 = arith.select %201, %197, %102 : vector<8x128xi1>, vector<8x128xf32>
    %205 = arith.select %201, %195, %103 : vector<8x128xi1>, vector<8x128xf32>
    %cst_74 = arith.constant 0.000000e+00 : f32
    %206 = vector.broadcast %cst_74 : f32 to vector<8x128xf32>
    %207 = arith.select %199, %164, %206 : vector<8x128xi1>, vector<8x128xf32>
    %208 = arith.truncf %207 : vector<8x128xf32> to vector<8x128xbf16>
    %209 = arith.index_cast %c1_i32 : i32 to index
    %c0_75 = arith.constant 0 : index
    %c0_76 = arith.constant 0 : index
    %210 = vector.load %arg9[%209, %c0_75, %c0_76] : memref<16x8x128xbf16, #tpu.memory_space<vmem>>, vector<1x8x128xbf16>
    %211 = vector.shape_cast %210 : vector<1x8x128xbf16> to vector<8x128xbf16>
    %212 = vector.shape_cast %208 : vector<8x128xbf16> to vector<1x8x128xbf16>
    tpu.vector_store %arg9[%209, %c0_75, %c0_76], %212 {strides = array<i32>} : memref<16x8x128xbf16, #tpu.memory_space<vmem>>, vector<1x8x128xbf16>,
    %cst_77 = arith.constant 0.000000e+00 : f32
    %213 = vector.broadcast %cst_77 : f32 to vector<8x128xf32>
    %214 = arith.select %201, %197, %213 : vector<8x128xi1>, vector<8x128xf32>
    %215 = arith.truncf %214 : vector<8x128xf32> to vector<8x128xbf16>
    %c8_i32_78 = arith.constant 8 : i32
    %216 = arith.addi %c8_i32_78, %119 : i32
    %217 = arith.index_cast %216 : i32 to index
    %c0_79 = arith.constant 0 : index
    %c0_80 = arith.constant 0 : index
    %218 = vector.load %arg9[%217, %c0_79, %c0_80] : memref<16x8x128xbf16, #tpu.memory_space<vmem>>, vector<1x8x128xbf16>
    %219 = vector.shape_cast %218 : vector<1x8x128xbf16> to vector<8x128xbf16>
    %220 = vector.shape_cast %215 : vector<8x128xbf16> to vector<1x8x128xbf16>
    tpu.vector_store %arg9[%217, %c0_79, %c0_80], %220 {strides = array<i32>} : memref<16x8x128xbf16, #tpu.memory_space<vmem>>, vector<1x8x128xbf16>,
    %c2_i32 = arith.constant 2 : i32
    %c7_i32_81 = arith.constant 7 : i32
    %221 = arith.subi %c7_i32_81, %c2_i32 : i32
    %c8_i32_82 = arith.constant 8 : i32
    %222 = arith.muli %c2_i32, %c8_i32_82 : i32
    %223 = tpu.assume_multiple %222, 8 : i32
    %c8_i32_83 = arith.constant 8 : i32
    %224 = arith.muli %221, %c8_i32_83 : i32
    %225 = tpu.assume_multiple %224, 8 : i32
    %226 = arith.index_cast %223 : i32 to index
    %c0_84 = arith.constant 0 : index
    %227 = vector.load %arg11[%226, %c0_84] : memref<64x512xf32, #tpu.memory_space<vmem>>, vector<8x512xf32>
    %228 = arith.index_cast %225 : i32 to index
    %c0_85 = arith.constant 0 : index
    %229 = vector.load %arg12[%228, %c0_85] : memref<64x512xf32, #tpu.memory_space<vmem>>, vector<8x512xf32>
    %230 = tpu.concatenate %202, %204 in 1 : vector<8x128xf32>, vector<8x128xf32> -> vector<8x256xf32>
    %231 = arith.truncf %230 : vector<8x256xf32> to vector<8x256xbf16>
    %c0_86 = arith.constant 0 : index
    %c0_87 = arith.constant 0 : index
    %232 = vector.load %arg6[%c0_86, %c0_87] : memref<256x1024xbf16, #tpu.memory_space<vmem>>, vector<256x1024xbf16>
    %cst_88 = arith.constant dense<0.000000e+00> : vector<8x1024xf32>
    %233 = tpu.matmul %231, %232, %cst_88 {dimension_numbers = #tpu.dot_dimension_numbers<[1], [0], [0], [1], [0, 0, 1, 1], [], []>} : vector<8x256xbf16>, vector<256x1024xbf16>, vector<8x1024xf32> -> vector<8x1024xf32>
    %234 = vector.extract_strided_slice %233 {offsets = [0, 0], sizes = [8, 512], strides = [1, 1]} : vector<8x1024xf32> to vector<8x512xf32>
    %235 = arith.addf %227, %234 : vector<8x512xf32>
    %236 = vector.extract_strided_slice %235 {offsets = [0, 0], sizes = [8, 128], strides = [1, 1]} : vector<8x512xf32> to vector<8x128xf32>
    %cst_89 = arith.constant 5.000000e-01 : f32
    %237 = vector.broadcast %cst_89 : f32 to vector<8x128xf32>
    %238 = arith.mulf %237, %236 : vector<8x128xf32>
    %239 = math.tanh %238 : vector<8x128xf32>
    %cst_90 = arith.constant 5.000000e-01 : f32
    %240 = vector.broadcast %cst_90 : f32 to vector<8x128xf32>
    %241 = arith.mulf %240, %239 : vector<8x128xf32>
    %cst_91 = arith.constant 5.000000e-01 : f32
    %242 = vector.broadcast %cst_91 : f32 to vector<8x128xf32>
    %243 = arith.addf %241, %242 : vector<8x128xf32>
    %244 = vector.extract_strided_slice %235 {offsets = [0, 128], sizes = [8, 128], strides = [1, 1]} : vector<8x512xf32> to vector<8x128xf32>
    %cst_92 = arith.constant 5.000000e-01 : f32
    %245 = vector.broadcast %cst_92 : f32 to vector<8x128xf32>
    %246 = arith.mulf %245, %244 : vector<8x128xf32>
    %247 = math.tanh %246 : vector<8x128xf32>
    %cst_93 = arith.constant 5.000000e-01 : f32
    %248 = vector.broadcast %cst_93 : f32 to vector<8x128xf32>
    %249 = arith.mulf %248, %247 : vector<8x128xf32>
    %cst_94 = arith.constant 5.000000e-01 : f32
    %250 = vector.broadcast %cst_94 : f32 to vector<8x128xf32>
    %251 = arith.addf %249, %250 : vector<8x128xf32>
    %252 = vector.extract_strided_slice %235 {offsets = [0, 256], sizes = [8, 128], strides = [1, 1]} : vector<8x512xf32> to vector<8x128xf32>
    %cst_95 = arith.constant 5.000000e-01 : f32
    %253 = vector.broadcast %cst_95 : f32 to vector<8x128xf32>
    %254 = arith.mulf %253, %252 : vector<8x128xf32>
    %255 = math.tanh %254 : vector<8x128xf32>
    %cst_96 = arith.constant 5.000000e-01 : f32
    %256 = vector.broadcast %cst_96 : f32 to vector<8x128xf32>
    %257 = arith.mulf %256, %255 : vector<8x128xf32>
    %cst_97 = arith.constant 5.000000e-01 : f32
    %258 = vector.broadcast %cst_97 : f32 to vector<8x128xf32>
    %259 = arith.addf %257, %258 : vector<8x128xf32>
    %260 = vector.extract_strided_slice %235 {offsets = [0, 384], sizes = [8, 128], strides = [1, 1]} : vector<8x512xf32> to vector<8x128xf32>
    %261 = math.tanh %260 : vector<8x128xf32>
    %262 = arith.mulf %251, %203 : vector<8x128xf32>
    %263 = arith.mulf %243, %261 : vector<8x128xf32>
    %264 = arith.addf %262, %263 : vector<8x128xf32>
    %265 = math.tanh %264 : vector<8x128xf32>
    %266 = arith.mulf %259, %265 : vector<8x128xf32>
    %267 = vector.extract_strided_slice %233 {offsets = [0, 512], sizes = [8, 512], strides = [1, 1]} : vector<8x1024xf32> to vector<8x512xf32>
    %268 = arith.addf %229, %267 : vector<8x512xf32>
    %269 = vector.extract_strided_slice %268 {offsets = [0, 0], sizes = [8, 128], strides = [1, 1]} : vector<8x512xf32> to vector<8x128xf32>
    %cst_98 = arith.constant 5.000000e-01 : f32
    %270 = vector.broadcast %cst_98 : f32 to vector<8x128xf32>
    %271 = arith.mulf %270, %269 : vector<8x128xf32>
    %272 = math.tanh %271 : vector<8x128xf32>
    %cst_99 = arith.constant 5.000000e-01 : f32
    %273 = vector.broadcast %cst_99 : f32 to vector<8x128xf32>
    %274 = arith.mulf %273, %272 : vector<8x128xf32>
    %cst_100 = arith.constant 5.000000e-01 : f32
    %275 = vector.broadcast %cst_100 : f32 to vector<8x128xf32>
    %276 = arith.addf %274, %275 : vector<8x128xf32>
    %277 = vector.extract_strided_slice %268 {offsets = [0, 128], sizes = [8, 128], strides = [1, 1]} : vector<8x512xf32> to vector<8x128xf32>
    %cst_101 = arith.constant 5.000000e-01 : f32
    %278 = vector.broadcast %cst_101 : f32 to vector<8x128xf32>
    %279 = arith.mulf %278, %277 : vector<8x128xf32>
    %280 = math.tanh %279 : vector<8x128xf32>
    %cst_102 = arith.constant 5.000000e-01 : f32
    %281 = vector.broadcast %cst_102 : f32 to vector<8x128xf32>
    %282 = arith.mulf %281, %280 : vector<8x128xf32>
    %cst_103 = arith.constant 5.000000e-01 : f32
    %283 = vector.broadcast %cst_103 : f32 to vector<8x128xf32>
    %284 = arith.addf %282, %283 : vector<8x128xf32>
    %285 = vector.extract_strided_slice %268 {offsets = [0, 256], sizes = [8, 128], strides = [1, 1]} : vector<8x512xf32> to vector<8x128xf32>
    %cst_104 = arith.constant 5.000000e-01 : f32
    %286 = vector.broadcast %cst_104 : f32 to vector<8x128xf32>
    %287 = arith.mulf %286, %285 : vector<8x128xf32>
    %288 = math.tanh %287 : vector<8x128xf32>
    %cst_105 = arith.constant 5.000000e-01 : f32
    %289 = vector.broadcast %cst_105 : f32 to vector<8x128xf32>
    %290 = arith.mulf %289, %288 : vector<8x128xf32>
    %cst_106 = arith.constant 5.000000e-01 : f32
    %291 = vector.broadcast %cst_106 : f32 to vector<8x128xf32>
    %292 = arith.addf %290, %291 : vector<8x128xf32>
    %293 = vector.extract_strided_slice %268 {offsets = [0, 384], sizes = [8, 128], strides = [1, 1]} : vector<8x512xf32> to vector<8x128xf32>
    %294 = math.tanh %293 : vector<8x128xf32>
    %295 = arith.mulf %284, %205 : vector<8x128xf32>
    %296 = arith.mulf %276, %294 : vector<8x128xf32>
    %297 = arith.addf %295, %296 : vector<8x128xf32>
    %298 = math.tanh %297 : vector<8x128xf32>
    %299 = arith.mulf %292, %298 : vector<8x128xf32>
    %300 = vector.broadcast %c2_i32 : i32 to vector<8x128xi32>
    %301 = arith.cmpi sgt, %15, %300 : vector<8x128xi32>
    %302 = vector.broadcast %221 : i32 to vector<8x128xi32>
    %303 = arith.cmpi sgt, %15, %302 : vector<8x128xi32>
    %304 = arith.select %301, %266, %202 : vector<8x128xi1>, vector<8x128xf32>
    %305 = arith.select %301, %264, %203 : vector<8x128xi1>, vector<8x128xf32>
    %306 = arith.select %303, %299, %204 : vector<8x128xi1>, vector<8x128xf32>
    %307 = arith.select %303, %297, %205 : vector<8x128xi1>, vector<8x128xf32>
    %cst_107 = arith.constant 0.000000e+00 : f32
    %308 = vector.broadcast %cst_107 : f32 to vector<8x128xf32>
    %309 = arith.select %301, %266, %308 : vector<8x128xi1>, vector<8x128xf32>
    %310 = arith.truncf %309 : vector<8x128xf32> to vector<8x128xbf16>
    %311 = arith.index_cast %c2_i32 : i32 to index
    %c0_108 = arith.constant 0 : index
    %c0_109 = arith.constant 0 : index
    %312 = vector.load %arg9[%311, %c0_108, %c0_109] : memref<16x8x128xbf16, #tpu.memory_space<vmem>>, vector<1x8x128xbf16>
    %313 = vector.shape_cast %312 : vector<1x8x128xbf16> to vector<8x128xbf16>
    %314 = vector.shape_cast %310 : vector<8x128xbf16> to vector<1x8x128xbf16>
    tpu.vector_store %arg9[%311, %c0_108, %c0_109], %314 {strides = array<i32>} : memref<16x8x128xbf16, #tpu.memory_space<vmem>>, vector<1x8x128xbf16>,
    %cst_110 = arith.constant 0.000000e+00 : f32
    %315 = vector.broadcast %cst_110 : f32 to vector<8x128xf32>
    %316 = arith.select %303, %299, %315 : vector<8x128xi1>, vector<8x128xf32>
    %317 = arith.truncf %316 : vector<8x128xf32> to vector<8x128xbf16>
    %c8_i32_111 = arith.constant 8 : i32
    %318 = arith.addi %c8_i32_111, %221 : i32
    %319 = arith.index_cast %318 : i32 to index
    %c0_112 = arith.constant 0 : index
    %c0_113 = arith.constant 0 : index
    %320 = vector.load %arg9[%319, %c0_112, %c0_113] : memref<16x8x128xbf16, #tpu.memory_space<vmem>>, vector<1x8x128xbf16>
    %321 = vector.shape_cast %320 : vector<1x8x128xbf16> to vector<8x128xbf16>
    %322 = vector.shape_cast %317 : vector<8x128xbf16> to vector<1x8x128xbf16>
    tpu.vector_store %arg9[%319, %c0_112, %c0_113], %322 {strides = array<i32>} : memref<16x8x128xbf16, #tpu.memory_space<vmem>>, vector<1x8x128xbf16>,
    %c3_i32 = arith.constant 3 : i32
    %c7_i32_114 = arith.constant 7 : i32
    %323 = arith.subi %c7_i32_114, %c3_i32 : i32
    %c8_i32_115 = arith.constant 8 : i32
    %324 = arith.muli %c3_i32, %c8_i32_115 : i32
    %325 = tpu.assume_multiple %324, 8 : i32
    %c8_i32_116 = arith.constant 8 : i32
    %326 = arith.muli %323, %c8_i32_116 : i32
    %327 = tpu.assume_multiple %326, 8 : i32
    %328 = arith.index_cast %325 : i32 to index
    %c0_117 = arith.constant 0 : index
    %329 = vector.load %arg11[%328, %c0_117] : memref<64x512xf32, #tpu.memory_space<vmem>>, vector<8x512xf32>
    %330 = arith.index_cast %327 : i32 to index
    %c0_118 = arith.constant 0 : index
    %331 = vector.load %arg12[%330, %c0_118] : memref<64x512xf32, #tpu.memory_space<vmem>>, vector<8x512xf32>
    %332 = tpu.concatenate %304, %306 in 1 : vector<8x128xf32>, vector<8x128xf32> -> vector<8x256xf32>
    %333 = arith.truncf %332 : vector<8x256xf32> to vector<8x256xbf16>
    %c0_119 = arith.constant 0 : index
    %c0_120 = arith.constant 0 : index
    %334 = vector.load %arg6[%c0_119, %c0_120] : memref<256x1024xbf16, #tpu.memory_space<vmem>>, vector<256x1024xbf16>
    %cst_121 = arith.constant dense<0.000000e+00> : vector<8x1024xf32>
    %335 = tpu.matmul %333, %334, %cst_121 {dimension_numbers = #tpu.dot_dimension_numbers<[1], [0], [0], [1], [0, 0, 1, 1], [], []>} : vector<8x256xbf16>, vector<256x1024xbf16>, vector<8x1024xf32> -> vector<8x1024xf32>
    %336 = vector.extract_strided_slice %335 {offsets = [0, 0], sizes = [8, 512], strides = [1, 1]} : vector<8x1024xf32> to vector<8x512xf32>
    %337 = arith.addf %329, %336 : vector<8x512xf32>
    %338 = vector.extract_strided_slice %337 {offsets = [0, 0], sizes = [8, 128], strides = [1, 1]} : vector<8x512xf32> to vector<8x128xf32>
    %cst_122 = arith.constant 5.000000e-01 : f32
    %339 = vector.broadcast %cst_122 : f32 to vector<8x128xf32>
    %340 = arith.mulf %339, %338 : vector<8x128xf32>
    %341 = math.tanh %340 : vector<8x128xf32>
    %cst_123 = arith.constant 5.000000e-01 : f32
    %342 = vector.broadcast %cst_123 : f32 to vector<8x128xf32>
    %343 = arith.mulf %342, %341 : vector<8x128xf32>
    %cst_124 = arith.constant 5.000000e-01 : f32
    %344 = vector.broadcast %cst_124 : f32 to vector<8x128xf32>
    %345 = arith.addf %343, %344 : vector<8x128xf32>
    %346 = vector.extract_strided_slice %337 {offsets = [0, 128], sizes = [8, 128], strides = [1, 1]} : vector<8x512xf32> to vector<8x128xf32>
    %cst_125 = arith.constant 5.000000e-01 : f32
    %347 = vector.broadcast %cst_125 : f32 to vector<8x128xf32>
    %348 = arith.mulf %347, %346 : vector<8x128xf32>
    %349 = math.tanh %348 : vector<8x128xf32>
    %cst_126 = arith.constant 5.000000e-01 : f32
    %350 = vector.broadcast %cst_126 : f32 to vector<8x128xf32>
    %351 = arith.mulf %350, %349 : vector<8x128xf32>
    %cst_127 = arith.constant 5.000000e-01 : f32
    %352 = vector.broadcast %cst_127 : f32 to vector<8x128xf32>
    %353 = arith.addf %351, %352 : vector<8x128xf32>
    %354 = vector.extract_strided_slice %337 {offsets = [0, 256], sizes = [8, 128], strides = [1, 1]} : vector<8x512xf32> to vector<8x128xf32>
    %cst_128 = arith.constant 5.000000e-01 : f32
    %355 = vector.broadcast %cst_128 : f32 to vector<8x128xf32>
    %356 = arith.mulf %355, %354 : vector<8x128xf32>
    %357 = math.tanh %356 : vector<8x128xf32>
    %cst_129 = arith.constant 5.000000e-01 : f32
    %358 = vector.broadcast %cst_129 : f32 to vector<8x128xf32>
    %359 = arith.mulf %358, %357 : vector<8x128xf32>
    %cst_130 = arith.constant 5.000000e-01 : f32
    %360 = vector.broadcast %cst_130 : f32 to vector<8x128xf32>
    %361 = arith.addf %359, %360 : vector<8x128xf32>
    %362 = vector.extract_strided_slice %337 {offsets = [0, 384], sizes = [8, 128], strides = [1, 1]} : vector<8x512xf32> to vector<8x128xf32>
    %363 = math.tanh %362 : vector<8x128xf32>
    %364 = arith.mulf %353, %305 : vector<8x128xf32>
    %365 = arith.mulf %345, %363 : vector<8x128xf32>
    %366 = arith.addf %364, %365 : vector<8x128xf32>
    %367 = math.tanh %366 : vector<8x128xf32>
    %368 = arith.mulf %361, %367 : vector<8x128xf32>
    %369 = vector.extract_strided_slice %335 {offsets = [0, 512], sizes = [8, 512], strides = [1, 1]} : vector<8x1024xf32> to vector<8x512xf32>
    %370 = arith.addf %331, %369 : vector<8x512xf32>
    %371 = vector.extract_strided_slice %370 {offsets = [0, 0], sizes = [8, 128], strides = [1, 1]} : vector<8x512xf32> to vector<8x128xf32>
    %cst_131 = arith.constant 5.000000e-01 : f32
    %372 = vector.broadcast %cst_131 : f32 to vector<8x128xf32>
    %373 = arith.mulf %372, %371 : vector<8x128xf32>
    %374 = math.tanh %373 : vector<8x128xf32>
    %cst_132 = arith.constant 5.000000e-01 : f32
    %375 = vector.broadcast %cst_132 : f32 to vector<8x128xf32>
    %376 = arith.mulf %375, %374 : vector<8x128xf32>
    %cst_133 = arith.constant 5.000000e-01 : f32
    %377 = vector.broadcast %cst_133 : f32 to vector<8x128xf32>
    %378 = arith.addf %376, %377 : vector<8x128xf32>
    %379 = vector.extract_strided_slice %370 {offsets = [0, 128], sizes = [8, 128], strides = [1, 1]} : vector<8x512xf32> to vector<8x128xf32>
    %cst_134 = arith.constant 5.000000e-01 : f32
    %380 = vector.broadcast %cst_134 : f32 to vector<8x128xf32>
    %381 = arith.mulf %380, %379 : vector<8x128xf32>
    %382 = math.tanh %381 : vector<8x128xf32>
    %cst_135 = arith.constant 5.000000e-01 : f32
    %383 = vector.broadcast %cst_135 : f32 to vector<8x128xf32>
    %384 = arith.mulf %383, %382 : vector<8x128xf32>
    %cst_136 = arith.constant 5.000000e-01 : f32
    %385 = vector.broadcast %cst_136 : f32 to vector<8x128xf32>
    %386 = arith.addf %384, %385 : vector<8x128xf32>
    %387 = vector.extract_strided_slice %370 {offsets = [0, 256], sizes = [8, 128], strides = [1, 1]} : vector<8x512xf32> to vector<8x128xf32>
    %cst_137 = arith.constant 5.000000e-01 : f32
    %388 = vector.broadcast %cst_137 : f32 to vector<8x128xf32>
    %389 = arith.mulf %388, %387 : vector<8x128xf32>
    %390 = math.tanh %389 : vector<8x128xf32>
    %cst_138 = arith.constant 5.000000e-01 : f32
    %391 = vector.broadcast %cst_138 : f32 to vector<8x128xf32>
    %392 = arith.mulf %391, %390 : vector<8x128xf32>
    %cst_139 = arith.constant 5.000000e-01 : f32
    %393 = vector.broadcast %cst_139 : f32 to vector<8x128xf32>
    %394 = arith.addf %392, %393 : vector<8x128xf32>
    %395 = vector.extract_strided_slice %370 {offsets = [0, 384], sizes = [8, 128], strides = [1, 1]} : vector<8x512xf32> to vector<8x128xf32>
    %396 = math.tanh %395 : vector<8x128xf32>
    %397 = arith.mulf %386, %307 : vector<8x128xf32>
    %398 = arith.mulf %378, %396 : vector<8x128xf32>
    %399 = arith.addf %397, %398 : vector<8x128xf32>
    %400 = math.tanh %399 : vector<8x128xf32>
    %401 = arith.mulf %394, %400 : vector<8x128xf32>
    %402 = vector.broadcast %c3_i32 : i32 to vector<8x128xi32>
    %403 = arith.cmpi sgt, %15, %402 : vector<8x128xi32>
    %404 = vector.broadcast %323 : i32 to vector<8x128xi32>
    %405 = arith.cmpi sgt, %15, %404 : vector<8x128xi32>
    %406 = arith.select %403, %368, %304 : vector<8x128xi1>, vector<8x128xf32>
    %407 = arith.select %403, %366, %305 : vector<8x128xi1>, vector<8x128xf32>
    %408 = arith.select %405, %401, %306 : vector<8x128xi1>, vector<8x128xf32>
    %409 = arith.select %405, %399, %307 : vector<8x128xi1>, vector<8x128xf32>
    %cst_140 = arith.constant 0.000000e+00 : f32
    %410 = vector.broadcast %cst_140 : f32 to vector<8x128xf32>
    %411 = arith.select %403, %368, %410 : vector<8x128xi1>, vector<8x128xf32>
    %412 = arith.truncf %411 : vector<8x128xf32> to vector<8x128xbf16>
    %413 = arith.index_cast %c3_i32 : i32 to index
    %c0_141 = arith.constant 0 : index
    %c0_142 = arith.constant 0 : index
    %414 = vector.load %arg9[%413, %c0_141, %c0_142] : memref<16x8x128xbf16, #tpu.memory_space<vmem>>, vector<1x8x128xbf16>
    %415 = vector.shape_cast %414 : vector<1x8x128xbf16> to vector<8x128xbf16>
    %416 = vector.shape_cast %412 : vector<8x128xbf16> to vector<1x8x128xbf16>
    tpu.vector_store %arg9[%413, %c0_141, %c0_142], %416 {strides = array<i32>} : memref<16x8x128xbf16, #tpu.memory_space<vmem>>, vector<1x8x128xbf16>,
    %cst_143 = arith.constant 0.000000e+00 : f32
    %417 = vector.broadcast %cst_143 : f32 to vector<8x128xf32>
    %418 = arith.select %405, %401, %417 : vector<8x128xi1>, vector<8x128xf32>
    %419 = arith.truncf %418 : vector<8x128xf32> to vector<8x128xbf16>
    %c8_i32_144 = arith.constant 8 : i32
    %420 = arith.addi %c8_i32_144, %323 : i32
    %421 = arith.index_cast %420 : i32 to index
    %c0_145 = arith.constant 0 : index
    %c0_146 = arith.constant 0 : index
    %422 = vector.load %arg9[%421, %c0_145, %c0_146] : memref<16x8x128xbf16, #tpu.memory_space<vmem>>, vector<1x8x128xbf16>
    %423 = vector.shape_cast %422 : vector<1x8x128xbf16> to vector<8x128xbf16>
    %424 = vector.shape_cast %419 : vector<8x128xbf16> to vector<1x8x128xbf16>
    tpu.vector_store %arg9[%421, %c0_145, %c0_146], %424 {strides = array<i32>} : memref<16x8x128xbf16, #tpu.memory_space<vmem>>, vector<1x8x128xbf16>,
    %c4_i32 = arith.constant 4 : i32
    %c7_i32_147 = arith.constant 7 : i32
    %425 = arith.subi %c7_i32_147, %c4_i32 : i32
    %c8_i32_148 = arith.constant 8 : i32
    %426 = arith.muli %c4_i32, %c8_i32_148 : i32
    %427 = tpu.assume_multiple %426, 8 : i32
    %c8_i32_149 = arith.constant 8 : i32
    %428 = arith.muli %425, %c8_i32_149 : i32
    %429 = tpu.assume_multiple %428, 8 : i32
    %430 = arith.index_cast %427 : i32 to index
    %c0_150 = arith.constant 0 : index
    %431 = vector.load %arg11[%430, %c0_150] : memref<64x512xf32, #tpu.memory_space<vmem>>, vector<8x512xf32>
    %432 = arith.index_cast %429 : i32 to index
    %c0_151 = arith.constant 0 : index
    %433 = vector.load %arg12[%432, %c0_151] : memref<64x512xf32, #tpu.memory_space<vmem>>, vector<8x512xf32>
    %434 = tpu.concatenate %406, %408 in 1 : vector<8x128xf32>, vector<8x128xf32> -> vector<8x256xf32>
    %435 = arith.truncf %434 : vector<8x256xf32> to vector<8x256xbf16>
    %c0_152 = arith.constant 0 : index
    %c0_153 = arith.constant 0 : index
    %436 = vector.load %arg6[%c0_152, %c0_153] : memref<256x1024xbf16, #tpu.memory_space<vmem>>, vector<256x1024xbf16>
    %cst_154 = arith.constant dense<0.000000e+00> : vector<8x1024xf32>
    %437 = tpu.matmul %435, %436, %cst_154 {dimension_numbers = #tpu.dot_dimension_numbers<[1], [0], [0], [1], [0, 0, 1, 1], [], []>} : vector<8x256xbf16>, vector<256x1024xbf16>, vector<8x1024xf32> -> vector<8x1024xf32>
    %438 = vector.extract_strided_slice %437 {offsets = [0, 0], sizes = [8, 512], strides = [1, 1]} : vector<8x1024xf32> to vector<8x512xf32>
    %439 = arith.addf %431, %438 : vector<8x512xf32>
    %440 = vector.extract_strided_slice %439 {offsets = [0, 0], sizes = [8, 128], strides = [1, 1]} : vector<8x512xf32> to vector<8x128xf32>
    %cst_155 = arith.constant 5.000000e-01 : f32
    %441 = vector.broadcast %cst_155 : f32 to vector<8x128xf32>
    %442 = arith.mulf %441, %440 : vector<8x128xf32>
    %443 = math.tanh %442 : vector<8x128xf32>
    %cst_156 = arith.constant 5.000000e-01 : f32
    %444 = vector.broadcast %cst_156 : f32 to vector<8x128xf32>
    %445 = arith.mulf %444, %443 : vector<8x128xf32>
    %cst_157 = arith.constant 5.000000e-01 : f32
    %446 = vector.broadcast %cst_157 : f32 to vector<8x128xf32>
    %447 = arith.addf %445, %446 : vector<8x128xf32>
    %448 = vector.extract_strided_slice %439 {offsets = [0, 128], sizes = [8, 128], strides = [1, 1]} : vector<8x512xf32> to vector<8x128xf32>
    %cst_158 = arith.constant 5.000000e-01 : f32
    %449 = vector.broadcast %cst_158 : f32 to vector<8x128xf32>
    %450 = arith.mulf %449, %448 : vector<8x128xf32>
    %451 = math.tanh %450 : vector<8x128xf32>
    %cst_159 = arith.constant 5.000000e-01 : f32
    %452 = vector.broadcast %cst_159 : f32 to vector<8x128xf32>
    %453 = arith.mulf %452, %451 : vector<8x128xf32>
    %cst_160 = arith.constant 5.000000e-01 : f32
    %454 = vector.broadcast %cst_160 : f32 to vector<8x128xf32>
    %455 = arith.addf %453, %454 : vector<8x128xf32>
    %456 = vector.extract_strided_slice %439 {offsets = [0, 256], sizes = [8, 128], strides = [1, 1]} : vector<8x512xf32> to vector<8x128xf32>
    %cst_161 = arith.constant 5.000000e-01 : f32
    %457 = vector.broadcast %cst_161 : f32 to vector<8x128xf32>
    %458 = arith.mulf %457, %456 : vector<8x128xf32>
    %459 = math.tanh %458 : vector<8x128xf32>
    %cst_162 = arith.constant 5.000000e-01 : f32
    %460 = vector.broadcast %cst_162 : f32 to vector<8x128xf32>
    %461 = arith.mulf %460, %459 : vector<8x128xf32>
    %cst_163 = arith.constant 5.000000e-01 : f32
    %462 = vector.broadcast %cst_163 : f32 to vector<8x128xf32>
    %463 = arith.addf %461, %462 : vector<8x128xf32>
    %464 = vector.extract_strided_slice %439 {offsets = [0, 384], sizes = [8, 128], strides = [1, 1]} : vector<8x512xf32> to vector<8x128xf32>
    %465 = math.tanh %464 : vector<8x128xf32>
    %466 = arith.mulf %455, %407 : vector<8x128xf32>
    %467 = arith.mulf %447, %465 : vector<8x128xf32>
    %468 = arith.addf %466, %467 : vector<8x128xf32>
    %469 = math.tanh %468 : vector<8x128xf32>
    %470 = arith.mulf %463, %469 : vector<8x128xf32>
    %471 = vector.extract_strided_slice %437 {offsets = [0, 512], sizes = [8, 512], strides = [1, 1]} : vector<8x1024xf32> to vector<8x512xf32>
    %472 = arith.addf %433, %471 : vector<8x512xf32>
    %473 = vector.extract_strided_slice %472 {offsets = [0, 0], sizes = [8, 128], strides = [1, 1]} : vector<8x512xf32> to vector<8x128xf32>
    %cst_164 = arith.constant 5.000000e-01 : f32
    %474 = vector.broadcast %cst_164 : f32 to vector<8x128xf32>
    %475 = arith.mulf %474, %473 : vector<8x128xf32>
    %476 = math.tanh %475 : vector<8x128xf32>
    %cst_165 = arith.constant 5.000000e-01 : f32
    %477 = vector.broadcast %cst_165 : f32 to vector<8x128xf32>
    %478 = arith.mulf %477, %476 : vector<8x128xf32>
    %cst_166 = arith.constant 5.000000e-01 : f32
    %479 = vector.broadcast %cst_166 : f32 to vector<8x128xf32>
    %480 = arith.addf %478, %479 : vector<8x128xf32>
    %481 = vector.extract_strided_slice %472 {offsets = [0, 128], sizes = [8, 128], strides = [1, 1]} : vector<8x512xf32> to vector<8x128xf32>
    %cst_167 = arith.constant 5.000000e-01 : f32
    %482 = vector.broadcast %cst_167 : f32 to vector<8x128xf32>
    %483 = arith.mulf %482, %481 : vector<8x128xf32>
    %484 = math.tanh %483 : vector<8x128xf32>
    %cst_168 = arith.constant 5.000000e-01 : f32
    %485 = vector.broadcast %cst_168 : f32 to vector<8x128xf32>
    %486 = arith.mulf %485, %484 : vector<8x128xf32>
    %cst_169 = arith.constant 5.000000e-01 : f32
    %487 = vector.broadcast %cst_169 : f32 to vector<8x128xf32>
    %488 = arith.addf %486, %487 : vector<8x128xf32>
    %489 = vector.extract_strided_slice %472 {offsets = [0, 256], sizes = [8, 128], strides = [1, 1]} : vector<8x512xf32> to vector<8x128xf32>
    %cst_170 = arith.constant 5.000000e-01 : f32
    %490 = vector.broadcast %cst_170 : f32 to vector<8x128xf32>
    %491 = arith.mulf %490, %489 : vector<8x128xf32>
    %492 = math.tanh %491 : vector<8x128xf32>
    %cst_171 = arith.constant 5.000000e-01 : f32
    %493 = vector.broadcast %cst_171 : f32 to vector<8x128xf32>
    %494 = arith.mulf %493, %492 : vector<8x128xf32>
    %cst_172 = arith.constant 5.000000e-01 : f32
    %495 = vector.broadcast %cst_172 : f32 to vector<8x128xf32>
    %496 = arith.addf %494, %495 : vector<8x128xf32>
    %497 = vector.extract_strided_slice %472 {offsets = [0, 384], sizes = [8, 128], strides = [1, 1]} : vector<8x512xf32> to vector<8x128xf32>
    %498 = math.tanh %497 : vector<8x128xf32>
    %499 = arith.mulf %488, %409 : vector<8x128xf32>
    %500 = arith.mulf %480, %498 : vector<8x128xf32>
    %501 = arith.addf %499, %500 : vector<8x128xf32>
    %502 = math.tanh %501 : vector<8x128xf32>
    %503 = arith.mulf %496, %502 : vector<8x128xf32>
    %504 = vector.broadcast %c4_i32 : i32 to vector<8x128xi32>
    %505 = arith.cmpi sgt, %15, %504 : vector<8x128xi32>
    %506 = vector.broadcast %425 : i32 to vector<8x128xi32>
    %507 = arith.cmpi sgt, %15, %506 : vector<8x128xi32>
    %508 = arith.select %505, %470, %406 : vector<8x128xi1>, vector<8x128xf32>
    %509 = arith.select %505, %468, %407 : vector<8x128xi1>, vector<8x128xf32>
    %510 = arith.select %507, %503, %408 : vector<8x128xi1>, vector<8x128xf32>
    %511 = arith.select %507, %501, %409 : vector<8x128xi1>, vector<8x128xf32>
    %cst_173 = arith.constant 0.000000e+00 : f32
    %512 = vector.broadcast %cst_173 : f32 to vector<8x128xf32>
    %513 = arith.select %505, %470, %512 : vector<8x128xi1>, vector<8x128xf32>
    %514 = arith.truncf %513 : vector<8x128xf32> to vector<8x128xbf16>
    %515 = arith.index_cast %c4_i32 : i32 to index
    %c0_174 = arith.constant 0 : index
    %c0_175 = arith.constant 0 : index
    %516 = vector.load %arg9[%515, %c0_174, %c0_175] : memref<16x8x128xbf16, #tpu.memory_space<vmem>>, vector<1x8x128xbf16>
    %517 = vector.shape_cast %516 : vector<1x8x128xbf16> to vector<8x128xbf16>
    %518 = vector.shape_cast %514 : vector<8x128xbf16> to vector<1x8x128xbf16>
    tpu.vector_store %arg9[%515, %c0_174, %c0_175], %518 {strides = array<i32>} : memref<16x8x128xbf16, #tpu.memory_space<vmem>>, vector<1x8x128xbf16>,
    %cst_176 = arith.constant 0.000000e+00 : f32
    %519 = vector.broadcast %cst_176 : f32 to vector<8x128xf32>
    %520 = arith.select %507, %503, %519 : vector<8x128xi1>, vector<8x128xf32>
    %521 = arith.truncf %520 : vector<8x128xf32> to vector<8x128xbf16>
    %c8_i32_177 = arith.constant 8 : i32
    %522 = arith.addi %c8_i32_177, %425 : i32
    %523 = arith.index_cast %522 : i32 to index
    %c0_178 = arith.constant 0 : index
    %c0_179 = arith.constant 0 : index
    %524 = vector.load %arg9[%523, %c0_178, %c0_179] : memref<16x8x128xbf16, #tpu.memory_space<vmem>>, vector<1x8x128xbf16>
    %525 = vector.shape_cast %524 : vector<1x8x128xbf16> to vector<8x128xbf16>
    %526 = vector.shape_cast %521 : vector<8x128xbf16> to vector<1x8x128xbf16>
    tpu.vector_store %arg9[%523, %c0_178, %c0_179], %526 {strides = array<i32>} : memref<16x8x128xbf16, #tpu.memory_space<vmem>>, vector<1x8x128xbf16>,
    %c5_i32 = arith.constant 5 : i32
    %c7_i32_180 = arith.constant 7 : i32
    %527 = arith.subi %c7_i32_180, %c5_i32 : i32
    %c8_i32_181 = arith.constant 8 : i32
    %528 = arith.muli %c5_i32, %c8_i32_181 : i32
    %529 = tpu.assume_multiple %528, 8 : i32
    %c8_i32_182 = arith.constant 8 : i32
    %530 = arith.muli %527, %c8_i32_182 : i32
    %531 = tpu.assume_multiple %530, 8 : i32
    %532 = arith.index_cast %529 : i32 to index
    %c0_183 = arith.constant 0 : index
    %533 = vector.load %arg11[%532, %c0_183] : memref<64x512xf32, #tpu.memory_space<vmem>>, vector<8x512xf32>
    %534 = arith.index_cast %531 : i32 to index
    %c0_184 = arith.constant 0 : index
    %535 = vector.load %arg12[%534, %c0_184] : memref<64x512xf32, #tpu.memory_space<vmem>>, vector<8x512xf32>
    %536 = tpu.concatenate %508, %510 in 1 : vector<8x128xf32>, vector<8x128xf32> -> vector<8x256xf32>
    %537 = arith.truncf %536 : vector<8x256xf32> to vector<8x256xbf16>
    %c0_185 = arith.constant 0 : index
    %c0_186 = arith.constant 0 : index
    %538 = vector.load %arg6[%c0_185, %c0_186] : memref<256x1024xbf16, #tpu.memory_space<vmem>>, vector<256x1024xbf16>
    %cst_187 = arith.constant dense<0.000000e+00> : vector<8x1024xf32>
    %539 = tpu.matmul %537, %538, %cst_187 {dimension_numbers = #tpu.dot_dimension_numbers<[1], [0], [0], [1], [0, 0, 1, 1], [], []>} : vector<8x256xbf16>, vector<256x1024xbf16>, vector<8x1024xf32> -> vector<8x1024xf32>
    %540 = vector.extract_strided_slice %539 {offsets = [0, 0], sizes = [8, 512], strides = [1, 1]} : vector<8x1024xf32> to vector<8x512xf32>
    %541 = arith.addf %533, %540 : vector<8x512xf32>
    %542 = vector.extract_strided_slice %541 {offsets = [0, 0], sizes = [8, 128], strides = [1, 1]} : vector<8x512xf32> to vector<8x128xf32>
    %cst_188 = arith.constant 5.000000e-01 : f32
    %543 = vector.broadcast %cst_188 : f32 to vector<8x128xf32>
    %544 = arith.mulf %543, %542 : vector<8x128xf32>
    %545 = math.tanh %544 : vector<8x128xf32>
    %cst_189 = arith.constant 5.000000e-01 : f32
    %546 = vector.broadcast %cst_189 : f32 to vector<8x128xf32>
    %547 = arith.mulf %546, %545 : vector<8x128xf32>
    %cst_190 = arith.constant 5.000000e-01 : f32
    %548 = vector.broadcast %cst_190 : f32 to vector<8x128xf32>
    %549 = arith.addf %547, %548 : vector<8x128xf32>
    %550 = vector.extract_strided_slice %541 {offsets = [0, 128], sizes = [8, 128], strides = [1, 1]} : vector<8x512xf32> to vector<8x128xf32>
    %cst_191 = arith.constant 5.000000e-01 : f32
    %551 = vector.broadcast %cst_191 : f32 to vector<8x128xf32>
    %552 = arith.mulf %551, %550 : vector<8x128xf32>
    %553 = math.tanh %552 : vector<8x128xf32>
    %cst_192 = arith.constant 5.000000e-01 : f32
    %554 = vector.broadcast %cst_192 : f32 to vector<8x128xf32>
    %555 = arith.mulf %554, %553 : vector<8x128xf32>
    %cst_193 = arith.constant 5.000000e-01 : f32
    %556 = vector.broadcast %cst_193 : f32 to vector<8x128xf32>
    %557 = arith.addf %555, %556 : vector<8x128xf32>
    %558 = vector.extract_strided_slice %541 {offsets = [0, 256], sizes = [8, 128], strides = [1, 1]} : vector<8x512xf32> to vector<8x128xf32>
    %cst_194 = arith.constant 5.000000e-01 : f32
    %559 = vector.broadcast %cst_194 : f32 to vector<8x128xf32>
    %560 = arith.mulf %559, %558 : vector<8x128xf32>
    %561 = math.tanh %560 : vector<8x128xf32>
    %cst_195 = arith.constant 5.000000e-01 : f32
    %562 = vector.broadcast %cst_195 : f32 to vector<8x128xf32>
    %563 = arith.mulf %562, %561 : vector<8x128xf32>
    %cst_196 = arith.constant 5.000000e-01 : f32
    %564 = vector.broadcast %cst_196 : f32 to vector<8x128xf32>
    %565 = arith.addf %563, %564 : vector<8x128xf32>
    %566 = vector.extract_strided_slice %541 {offsets = [0, 384], sizes = [8, 128], strides = [1, 1]} : vector<8x512xf32> to vector<8x128xf32>
    %567 = math.tanh %566 : vector<8x128xf32>
    %568 = arith.mulf %557, %509 : vector<8x128xf32>
    %569 = arith.mulf %549, %567 : vector<8x128xf32>
    %570 = arith.addf %568, %569 : vector<8x128xf32>
    %571 = math.tanh %570 : vector<8x128xf32>
    %572 = arith.mulf %565, %571 : vector<8x128xf32>
    %573 = vector.extract_strided_slice %539 {offsets = [0, 512], sizes = [8, 512], strides = [1, 1]} : vector<8x1024xf32> to vector<8x512xf32>
    %574 = arith.addf %535, %573 : vector<8x512xf32>
    %575 = vector.extract_strided_slice %574 {offsets = [0, 0], sizes = [8, 128], strides = [1, 1]} : vector<8x512xf32> to vector<8x128xf32>
    %cst_197 = arith.constant 5.000000e-01 : f32
    %576 = vector.broadcast %cst_197 : f32 to vector<8x128xf32>
    %577 = arith.mulf %576, %575 : vector<8x128xf32>
    %578 = math.tanh %577 : vector<8x128xf32>
    %cst_198 = arith.constant 5.000000e-01 : f32
    %579 = vector.broadcast %cst_198 : f32 to vector<8x128xf32>
    %580 = arith.mulf %579, %578 : vector<8x128xf32>
    %cst_199 = arith.constant 5.000000e-01 : f32
    %581 = vector.broadcast %cst_199 : f32 to vector<8x128xf32>
    %582 = arith.addf %580, %581 : vector<8x128xf32>
    %583 = vector.extract_strided_slice %574 {offsets = [0, 128], sizes = [8, 128], strides = [1, 1]} : vector<8x512xf32> to vector<8x128xf32>
    %cst_200 = arith.constant 5.000000e-01 : f32
    %584 = vector.broadcast %cst_200 : f32 to vector<8x128xf32>
    %585 = arith.mulf %584, %583 : vector<8x128xf32>
    %586 = math.tanh %585 : vector<8x128xf32>
    %cst_201 = arith.constant 5.000000e-01 : f32
    %587 = vector.broadcast %cst_201 : f32 to vector<8x128xf32>
    %588 = arith.mulf %587, %586 : vector<8x128xf32>
    %cst_202 = arith.constant 5.000000e-01 : f32
    %589 = vector.broadcast %cst_202 : f32 to vector<8x128xf32>
    %590 = arith.addf %588, %589 : vector<8x128xf32>
    %591 = vector.extract_strided_slice %574 {offsets = [0, 256], sizes = [8, 128], strides = [1, 1]} : vector<8x512xf32> to vector<8x128xf32>
    %cst_203 = arith.constant 5.000000e-01 : f32
    %592 = vector.broadcast %cst_203 : f32 to vector<8x128xf32>
    %593 = arith.mulf %592, %591 : vector<8x128xf32>
    %594 = math.tanh %593 : vector<8x128xf32>
    %cst_204 = arith.constant 5.000000e-01 : f32
    %595 = vector.broadcast %cst_204 : f32 to vector<8x128xf32>
    %596 = arith.mulf %595, %594 : vector<8x128xf32>
    %cst_205 = arith.constant 5.000000e-01 : f32
    %597 = vector.broadcast %cst_205 : f32 to vector<8x128xf32>
    %598 = arith.addf %596, %597 : vector<8x128xf32>
    %599 = vector.extract_strided_slice %574 {offsets = [0, 384], sizes = [8, 128], strides = [1, 1]} : vector<8x512xf32> to vector<8x128xf32>
    %600 = math.tanh %599 : vector<8x128xf32>
    %601 = arith.mulf %590, %511 : vector<8x128xf32>
    %602 = arith.mulf %582, %600 : vector<8x128xf32>
    %603 = arith.addf %601, %602 : vector<8x128xf32>
    %604 = math.tanh %603 : vector<8x128xf32>
    %605 = arith.mulf %598, %604 : vector<8x128xf32>
    %606 = vector.broadcast %c5_i32 : i32 to vector<8x128xi32>
    %607 = arith.cmpi sgt, %15, %606 : vector<8x128xi32>
    %608 = vector.broadcast %527 : i32 to vector<8x128xi32>
    %609 = arith.cmpi sgt, %15, %608 : vector<8x128xi32>
    %610 = arith.select %607, %572, %508 : vector<8x128xi1>, vector<8x128xf32>
    %611 = arith.select %607, %570, %509 : vector<8x128xi1>, vector<8x128xf32>
    %612 = arith.select %609, %605, %510 : vector<8x128xi1>, vector<8x128xf32>
    %613 = arith.select %609, %603, %511 : vector<8x128xi1>, vector<8x128xf32>
    %cst_206 = arith.constant 0.000000e+00 : f32
    %614 = vector.broadcast %cst_206 : f32 to vector<8x128xf32>
    %615 = arith.select %607, %572, %614 : vector<8x128xi1>, vector<8x128xf32>
    %616 = arith.truncf %615 : vector<8x128xf32> to vector<8x128xbf16>
    %617 = arith.index_cast %c5_i32 : i32 to index
    %c0_207 = arith.constant 0 : index
    %c0_208 = arith.constant 0 : index
    %618 = vector.load %arg9[%617, %c0_207, %c0_208] : memref<16x8x128xbf16, #tpu.memory_space<vmem>>, vector<1x8x128xbf16>
    %619 = vector.shape_cast %618 : vector<1x8x128xbf16> to vector<8x128xbf16>
    %620 = vector.shape_cast %616 : vector<8x128xbf16> to vector<1x8x128xbf16>
    tpu.vector_store %arg9[%617, %c0_207, %c0_208], %620 {strides = array<i32>} : memref<16x8x128xbf16, #tpu.memory_space<vmem>>, vector<1x8x128xbf16>,
    %cst_209 = arith.constant 0.000000e+00 : f32
    %621 = vector.broadcast %cst_209 : f32 to vector<8x128xf32>
    %622 = arith.select %609, %605, %621 : vector<8x128xi1>, vector<8x128xf32>
    %623 = arith.truncf %622 : vector<8x128xf32> to vector<8x128xbf16>
    %c8_i32_210 = arith.constant 8 : i32
    %624 = arith.addi %c8_i32_210, %527 : i32
    %625 = arith.index_cast %624 : i32 to index
    %c0_211 = arith.constant 0 : index
    %c0_212 = arith.constant 0 : index
    %626 = vector.load %arg9[%625, %c0_211, %c0_212] : memref<16x8x128xbf16, #tpu.memory_space<vmem>>, vector<1x8x128xbf16>
    %627 = vector.shape_cast %626 : vector<1x8x128xbf16> to vector<8x128xbf16>
    %628 = vector.shape_cast %623 : vector<8x128xbf16> to vector<1x8x128xbf16>
    tpu.vector_store %arg9[%625, %c0_211, %c0_212], %628 {strides = array<i32>} : memref<16x8x128xbf16, #tpu.memory_space<vmem>>, vector<1x8x128xbf16>,
    %c6_i32 = arith.constant 6 : i32
    %c7_i32_213 = arith.constant 7 : i32
    %629 = arith.subi %c7_i32_213, %c6_i32 : i32
    %c8_i32_214 = arith.constant 8 : i32
    %630 = arith.muli %c6_i32, %c8_i32_214 : i32
    %631 = tpu.assume_multiple %630, 8 : i32
    %c8_i32_215 = arith.constant 8 : i32
    %632 = arith.muli %629, %c8_i32_215 : i32
    %633 = tpu.assume_multiple %632, 8 : i32
    %634 = arith.index_cast %631 : i32 to index
    %c0_216 = arith.constant 0 : index
    %635 = vector.load %arg11[%634, %c0_216] : memref<64x512xf32, #tpu.memory_space<vmem>>, vector<8x512xf32>
    %636 = arith.index_cast %633 : i32 to index
    %c0_217 = arith.constant 0 : index
    %637 = vector.load %arg12[%636, %c0_217] : memref<64x512xf32, #tpu.memory_space<vmem>>, vector<8x512xf32>
    %638 = tpu.concatenate %610, %612 in 1 : vector<8x128xf32>, vector<8x128xf32> -> vector<8x256xf32>
    %639 = arith.truncf %638 : vector<8x256xf32> to vector<8x256xbf16>
    %c0_218 = arith.constant 0 : index
    %c0_219 = arith.constant 0 : index
    %640 = vector.load %arg6[%c0_218, %c0_219] : memref<256x1024xbf16, #tpu.memory_space<vmem>>, vector<256x1024xbf16>
    %cst_220 = arith.constant dense<0.000000e+00> : vector<8x1024xf32>
    %641 = tpu.matmul %639, %640, %cst_220 {dimension_numbers = #tpu.dot_dimension_numbers<[1], [0], [0], [1], [0, 0, 1, 1], [], []>} : vector<8x256xbf16>, vector<256x1024xbf16>, vector<8x1024xf32> -> vector<8x1024xf32>
    %642 = vector.extract_strided_slice %641 {offsets = [0, 0], sizes = [8, 512], strides = [1, 1]} : vector<8x1024xf32> to vector<8x512xf32>
    %643 = arith.addf %635, %642 : vector<8x512xf32>
    %644 = vector.extract_strided_slice %643 {offsets = [0, 0], sizes = [8, 128], strides = [1, 1]} : vector<8x512xf32> to vector<8x128xf32>
    %cst_221 = arith.constant 5.000000e-01 : f32
    %645 = vector.broadcast %cst_221 : f32 to vector<8x128xf32>
    %646 = arith.mulf %645, %644 : vector<8x128xf32>
    %647 = math.tanh %646 : vector<8x128xf32>
    %cst_222 = arith.constant 5.000000e-01 : f32
    %648 = vector.broadcast %cst_222 : f32 to vector<8x128xf32>
    %649 = arith.mulf %648, %647 : vector<8x128xf32>
    %cst_223 = arith.constant 5.000000e-01 : f32
    %650 = vector.broadcast %cst_223 : f32 to vector<8x128xf32>
    %651 = arith.addf %649, %650 : vector<8x128xf32>
    %652 = vector.extract_strided_slice %643 {offsets = [0, 128], sizes = [8, 128], strides = [1, 1]} : vector<8x512xf32> to vector<8x128xf32>
    %cst_224 = arith.constant 5.000000e-01 : f32
    %653 = vector.broadcast %cst_224 : f32 to vector<8x128xf32>
    %654 = arith.mulf %653, %652 : vector<8x128xf32>
    %655 = math.tanh %654 : vector<8x128xf32>
    %cst_225 = arith.constant 5.000000e-01 : f32
    %656 = vector.broadcast %cst_225 : f32 to vector<8x128xf32>
    %657 = arith.mulf %656, %655 : vector<8x128xf32>
    %cst_226 = arith.constant 5.000000e-01 : f32
    %658 = vector.broadcast %cst_226 : f32 to vector<8x128xf32>
    %659 = arith.addf %657, %658 : vector<8x128xf32>
    %660 = vector.extract_strided_slice %643 {offsets = [0, 256], sizes = [8, 128], strides = [1, 1]} : vector<8x512xf32> to vector<8x128xf32>
    %cst_227 = arith.constant 5.000000e-01 : f32
    %661 = vector.broadcast %cst_227 : f32 to vector<8x128xf32>
    %662 = arith.mulf %661, %660 : vector<8x128xf32>
    %663 = math.tanh %662 : vector<8x128xf32>
    %cst_228 = arith.constant 5.000000e-01 : f32
    %664 = vector.broadcast %cst_228 : f32 to vector<8x128xf32>
    %665 = arith.mulf %664, %663 : vector<8x128xf32>
    %cst_229 = arith.constant 5.000000e-01 : f32
    %666 = vector.broadcast %cst_229 : f32 to vector<8x128xf32>
    %667 = arith.addf %665, %666 : vector<8x128xf32>
    %668 = vector.extract_strided_slice %643 {offsets = [0, 384], sizes = [8, 128], strides = [1, 1]} : vector<8x512xf32> to vector<8x128xf32>
    %669 = math.tanh %668 : vector<8x128xf32>
    %670 = arith.mulf %659, %611 : vector<8x128xf32>
    %671 = arith.mulf %651, %669 : vector<8x128xf32>
    %672 = arith.addf %670, %671 : vector<8x128xf32>
    %673 = math.tanh %672 : vector<8x128xf32>
    %674 = arith.mulf %667, %673 : vector<8x128xf32>
    %675 = vector.extract_strided_slice %641 {offsets = [0, 512], sizes = [8, 512], strides = [1, 1]} : vector<8x1024xf32> to vector<8x512xf32>
    %676 = arith.addf %637, %675 : vector<8x512xf32>
    %677 = vector.extract_strided_slice %676 {offsets = [0, 0], sizes = [8, 128], strides = [1, 1]} : vector<8x512xf32> to vector<8x128xf32>
    %cst_230 = arith.constant 5.000000e-01 : f32
    %678 = vector.broadcast %cst_230 : f32 to vector<8x128xf32>
    %679 = arith.mulf %678, %677 : vector<8x128xf32>
    %680 = math.tanh %679 : vector<8x128xf32>
    %cst_231 = arith.constant 5.000000e-01 : f32
    %681 = vector.broadcast %cst_231 : f32 to vector<8x128xf32>
    %682 = arith.mulf %681, %680 : vector<8x128xf32>
    %cst_232 = arith.constant 5.000000e-01 : f32
    %683 = vector.broadcast %cst_232 : f32 to vector<8x128xf32>
    %684 = arith.addf %682, %683 : vector<8x128xf32>
    %685 = vector.extract_strided_slice %676 {offsets = [0, 128], sizes = [8, 128], strides = [1, 1]} : vector<8x512xf32> to vector<8x128xf32>
    %cst_233 = arith.constant 5.000000e-01 : f32
    %686 = vector.broadcast %cst_233 : f32 to vector<8x128xf32>
    %687 = arith.mulf %686, %685 : vector<8x128xf32>
    %688 = math.tanh %687 : vector<8x128xf32>
    %cst_234 = arith.constant 5.000000e-01 : f32
    %689 = vector.broadcast %cst_234 : f32 to vector<8x128xf32>
    %690 = arith.mulf %689, %688 : vector<8x128xf32>
    %cst_235 = arith.constant 5.000000e-01 : f32
    %691 = vector.broadcast %cst_235 : f32 to vector<8x128xf32>
    %692 = arith.addf %690, %691 : vector<8x128xf32>
    %693 = vector.extract_strided_slice %676 {offsets = [0, 256], sizes = [8, 128], strides = [1, 1]} : vector<8x512xf32> to vector<8x128xf32>
    %cst_236 = arith.constant 5.000000e-01 : f32
    %694 = vector.broadcast %cst_236 : f32 to vector<8x128xf32>
    %695 = arith.mulf %694, %693 : vector<8x128xf32>
    %696 = math.tanh %695 : vector<8x128xf32>
    %cst_237 = arith.constant 5.000000e-01 : f32
    %697 = vector.broadcast %cst_237 : f32 to vector<8x128xf32>
    %698 = arith.mulf %697, %696 : vector<8x128xf32>
    %cst_238 = arith.constant 5.000000e-01 : f32
    %699 = vector.broadcast %cst_238 : f32 to vector<8x128xf32>
    %700 = arith.addf %698, %699 : vector<8x128xf32>
    %701 = vector.extract_strided_slice %676 {offsets = [0, 384], sizes = [8, 128], strides = [1, 1]} : vector<8x512xf32> to vector<8x128xf32>
    %702 = math.tanh %701 : vector<8x128xf32>
    %703 = arith.mulf %692, %613 : vector<8x128xf32>
    %704 = arith.mulf %684, %702 : vector<8x128xf32>
    %705 = arith.addf %703, %704 : vector<8x128xf32>
    %706 = math.tanh %705 : vector<8x128xf32>
    %707 = arith.mulf %700, %706 : vector<8x128xf32>
    %708 = vector.broadcast %c6_i32 : i32 to vector<8x128xi32>
    %709 = arith.cmpi sgt, %15, %708 : vector<8x128xi32>
    %710 = vector.broadcast %629 : i32 to vector<8x128xi32>
    %711 = arith.cmpi sgt, %15, %710 : vector<8x128xi32>
    %712 = arith.select %709, %674, %610 : vector<8x128xi1>, vector<8x128xf32>
    %713 = arith.select %709, %672, %611 : vector<8x128xi1>, vector<8x128xf32>
    %714 = arith.select %711, %707, %612 : vector<8x128xi1>, vector<8x128xf32>
    %715 = arith.select %711, %705, %613 : vector<8x128xi1>, vector<8x128xf32>
    %cst_239 = arith.constant 0.000000e+00 : f32
    %716 = vector.broadcast %cst_239 : f32 to vector<8x128xf32>
    %717 = arith.select %709, %674, %716 : vector<8x128xi1>, vector<8x128xf32>
    %718 = arith.truncf %717 : vector<8x128xf32> to vector<8x128xbf16>
    %719 = arith.index_cast %c6_i32 : i32 to index
    %c0_240 = arith.constant 0 : index
    %c0_241 = arith.constant 0 : index
    %720 = vector.load %arg9[%719, %c0_240, %c0_241] : memref<16x8x128xbf16, #tpu.memory_space<vmem>>, vector<1x8x128xbf16>
    %721 = vector.shape_cast %720 : vector<1x8x128xbf16> to vector<8x128xbf16>
    %722 = vector.shape_cast %718 : vector<8x128xbf16> to vector<1x8x128xbf16>
    tpu.vector_store %arg9[%719, %c0_240, %c0_241], %722 {strides = array<i32>} : memref<16x8x128xbf16, #tpu.memory_space<vmem>>, vector<1x8x128xbf16>,
    %cst_242 = arith.constant 0.000000e+00 : f32
    %723 = vector.broadcast %cst_242 : f32 to vector<8x128xf32>
    %724 = arith.select %711, %707, %723 : vector<8x128xi1>, vector<8x128xf32>
    %725 = arith.truncf %724 : vector<8x128xf32> to vector<8x128xbf16>
    %c8_i32_243 = arith.constant 8 : i32
    %726 = arith.addi %c8_i32_243, %629 : i32
    %727 = arith.index_cast %726 : i32 to index
    %c0_244 = arith.constant 0 : index
    %c0_245 = arith.constant 0 : index
    %728 = vector.load %arg9[%727, %c0_244, %c0_245] : memref<16x8x128xbf16, #tpu.memory_space<vmem>>, vector<1x8x128xbf16>
    %729 = vector.shape_cast %728 : vector<1x8x128xbf16> to vector<8x128xbf16>
    %730 = vector.shape_cast %725 : vector<8x128xbf16> to vector<1x8x128xbf16>
    tpu.vector_store %arg9[%727, %c0_244, %c0_245], %730 {strides = array<i32>} : memref<16x8x128xbf16, #tpu.memory_space<vmem>>, vector<1x8x128xbf16>,
    %c7_i32_246 = arith.constant 7 : i32
    %c7_i32_247 = arith.constant 7 : i32
    %731 = arith.subi %c7_i32_247, %c7_i32_246 : i32
    %c8_i32_248 = arith.constant 8 : i32
    %732 = arith.muli %c7_i32_246, %c8_i32_248 : i32
    %733 = tpu.assume_multiple %732, 8 : i32
    %c8_i32_249 = arith.constant 8 : i32
    %734 = arith.muli %731, %c8_i32_249 : i32
    %735 = tpu.assume_multiple %734, 8 : i32
    %736 = arith.index_cast %733 : i32 to index
    %c0_250 = arith.constant 0 : index
    %737 = vector.load %arg11[%736, %c0_250] : memref<64x512xf32, #tpu.memory_space<vmem>>, vector<8x512xf32>
    %738 = arith.index_cast %735 : i32 to index
    %c0_251 = arith.constant 0 : index
    %739 = vector.load %arg12[%738, %c0_251] : memref<64x512xf32, #tpu.memory_space<vmem>>, vector<8x512xf32>
    %740 = tpu.concatenate %712, %714 in 1 : vector<8x128xf32>, vector<8x128xf32> -> vector<8x256xf32>
    %741 = arith.truncf %740 : vector<8x256xf32> to vector<8x256xbf16>
    %c0_252 = arith.constant 0 : index
    %c0_253 = arith.constant 0 : index
    %742 = vector.load %arg6[%c0_252, %c0_253] : memref<256x1024xbf16, #tpu.memory_space<vmem>>, vector<256x1024xbf16>
    %cst_254 = arith.constant dense<0.000000e+00> : vector<8x1024xf32>
    %743 = tpu.matmul %741, %742, %cst_254 {dimension_numbers = #tpu.dot_dimension_numbers<[1], [0], [0], [1], [0, 0, 1, 1], [], []>} : vector<8x256xbf16>, vector<256x1024xbf16>, vector<8x1024xf32> -> vector<8x1024xf32>
    %744 = vector.extract_strided_slice %743 {offsets = [0, 0], sizes = [8, 512], strides = [1, 1]} : vector<8x1024xf32> to vector<8x512xf32>
    %745 = arith.addf %737, %744 : vector<8x512xf32>
    %746 = vector.extract_strided_slice %745 {offsets = [0, 0], sizes = [8, 128], strides = [1, 1]} : vector<8x512xf32> to vector<8x128xf32>
    %cst_255 = arith.constant 5.000000e-01 : f32
    %747 = vector.broadcast %cst_255 : f32 to vector<8x128xf32>
    %748 = arith.mulf %747, %746 : vector<8x128xf32>
    %749 = math.tanh %748 : vector<8x128xf32>
    %cst_256 = arith.constant 5.000000e-01 : f32
    %750 = vector.broadcast %cst_256 : f32 to vector<8x128xf32>
    %751 = arith.mulf %750, %749 : vector<8x128xf32>
    %cst_257 = arith.constant 5.000000e-01 : f32
    %752 = vector.broadcast %cst_257 : f32 to vector<8x128xf32>
    %753 = arith.addf %751, %752 : vector<8x128xf32>
    %754 = vector.extract_strided_slice %745 {offsets = [0, 128], sizes = [8, 128], strides = [1, 1]} : vector<8x512xf32> to vector<8x128xf32>
    %cst_258 = arith.constant 5.000000e-01 : f32
    %755 = vector.broadcast %cst_258 : f32 to vector<8x128xf32>
    %756 = arith.mulf %755, %754 : vector<8x128xf32>
    %757 = math.tanh %756 : vector<8x128xf32>
    %cst_259 = arith.constant 5.000000e-01 : f32
    %758 = vector.broadcast %cst_259 : f32 to vector<8x128xf32>
    %759 = arith.mulf %758, %757 : vector<8x128xf32>
    %cst_260 = arith.constant 5.000000e-01 : f32
    %760 = vector.broadcast %cst_260 : f32 to vector<8x128xf32>
    %761 = arith.addf %759, %760 : vector<8x128xf32>
    %762 = vector.extract_strided_slice %745 {offsets = [0, 256], sizes = [8, 128], strides = [1, 1]} : vector<8x512xf32> to vector<8x128xf32>
    %cst_261 = arith.constant 5.000000e-01 : f32
    %763 = vector.broadcast %cst_261 : f32 to vector<8x128xf32>
    %764 = arith.mulf %763, %762 : vector<8x128xf32>
    %765 = math.tanh %764 : vector<8x128xf32>
    %cst_262 = arith.constant 5.000000e-01 : f32
    %766 = vector.broadcast %cst_262 : f32 to vector<8x128xf32>
    %767 = arith.mulf %766, %765 : vector<8x128xf32>
    %cst_263 = arith.constant 5.000000e-01 : f32
    %768 = vector.broadcast %cst_263 : f32 to vector<8x128xf32>
    %769 = arith.addf %767, %768 : vector<8x128xf32>
    %770 = vector.extract_strided_slice %745 {offsets = [0, 384], sizes = [8, 128], strides = [1, 1]} : vector<8x512xf32> to vector<8x128xf32>
    %771 = math.tanh %770 : vector<8x128xf32>
    %772 = arith.mulf %761, %713 : vector<8x128xf32>
    %773 = arith.mulf %753, %771 : vector<8x128xf32>
    %774 = arith.addf %772, %773 : vector<8x128xf32>
    %775 = math.tanh %774 : vector<8x128xf32>
    %776 = arith.mulf %769, %775 : vector<8x128xf32>
    %777 = vector.extract_strided_slice %743 {offsets = [0, 512], sizes = [8, 512], strides = [1, 1]} : vector<8x1024xf32> to vector<8x512xf32>
    %778 = arith.addf %739, %777 : vector<8x512xf32>
    %779 = vector.extract_strided_slice %778 {offsets = [0, 0], sizes = [8, 128], strides = [1, 1]} : vector<8x512xf32> to vector<8x128xf32>
    %cst_264 = arith.constant 5.000000e-01 : f32
    %780 = vector.broadcast %cst_264 : f32 to vector<8x128xf32>
    %781 = arith.mulf %780, %779 : vector<8x128xf32>
    %782 = math.tanh %781 : vector<8x128xf32>
    %cst_265 = arith.constant 5.000000e-01 : f32
    %783 = vector.broadcast %cst_265 : f32 to vector<8x128xf32>
    %784 = arith.mulf %783, %782 : vector<8x128xf32>
    %cst_266 = arith.constant 5.000000e-01 : f32
    %785 = vector.broadcast %cst_266 : f32 to vector<8x128xf32>
    %786 = arith.addf %784, %785 : vector<8x128xf32>
    %787 = vector.extract_strided_slice %778 {offsets = [0, 128], sizes = [8, 128], strides = [1, 1]} : vector<8x512xf32> to vector<8x128xf32>
    %cst_267 = arith.constant 5.000000e-01 : f32
    %788 = vector.broadcast %cst_267 : f32 to vector<8x128xf32>
    %789 = arith.mulf %788, %787 : vector<8x128xf32>
    %790 = math.tanh %789 : vector<8x128xf32>
    %cst_268 = arith.constant 5.000000e-01 : f32
    %791 = vector.broadcast %cst_268 : f32 to vector<8x128xf32>
    %792 = arith.mulf %791, %790 : vector<8x128xf32>
    %cst_269 = arith.constant 5.000000e-01 : f32
    %793 = vector.broadcast %cst_269 : f32 to vector<8x128xf32>
    %794 = arith.addf %792, %793 : vector<8x128xf32>
    %795 = vector.extract_strided_slice %778 {offsets = [0, 256], sizes = [8, 128], strides = [1, 1]} : vector<8x512xf32> to vector<8x128xf32>
    %cst_270 = arith.constant 5.000000e-01 : f32
    %796 = vector.broadcast %cst_270 : f32 to vector<8x128xf32>
    %797 = arith.mulf %796, %795 : vector<8x128xf32>
    %798 = math.tanh %797 : vector<8x128xf32>
    %cst_271 = arith.constant 5.000000e-01 : f32
    %799 = vector.broadcast %cst_271 : f32 to vector<8x128xf32>
    %800 = arith.mulf %799, %798 : vector<8x128xf32>
    %cst_272 = arith.constant 5.000000e-01 : f32
    %801 = vector.broadcast %cst_272 : f32 to vector<8x128xf32>
    %802 = arith.addf %800, %801 : vector<8x128xf32>
    %803 = vector.extract_strided_slice %778 {offsets = [0, 384], sizes = [8, 128], strides = [1, 1]} : vector<8x512xf32> to vector<8x128xf32>
    %804 = math.tanh %803 : vector<8x128xf32>
    %805 = arith.mulf %794, %715 : vector<8x128xf32>
    %806 = arith.mulf %786, %804 : vector<8x128xf32>
    %807 = arith.addf %805, %806 : vector<8x128xf32>
    %808 = math.tanh %807 : vector<8x128xf32>
    %809 = arith.mulf %802, %808 : vector<8x128xf32>
    %810 = vector.broadcast %c7_i32_246 : i32 to vector<8x128xi32>
    %811 = arith.cmpi sgt, %15, %810 : vector<8x128xi32>
    %812 = vector.broadcast %731 : i32 to vector<8x128xi32>
    %813 = arith.cmpi sgt, %15, %812 : vector<8x128xi32>
    %814 = arith.select %811, %776, %712 : vector<8x128xi1>, vector<8x128xf32>
    %815 = arith.select %811, %774, %713 : vector<8x128xi1>, vector<8x128xf32>
    %816 = arith.select %813, %809, %714 : vector<8x128xi1>, vector<8x128xf32>
    %817 = arith.select %813, %807, %715 : vector<8x128xi1>, vector<8x128xf32>
    %cst_273 = arith.constant 0.000000e+00 : f32
    %818 = vector.broadcast %cst_273 : f32 to vector<8x128xf32>
    %819 = arith.select %811, %776, %818 : vector<8x128xi1>, vector<8x128xf32>
    %820 = arith.truncf %819 : vector<8x128xf32> to vector<8x128xbf16>
    %821 = arith.index_cast %c7_i32_246 : i32 to index
    %c0_274 = arith.constant 0 : index
    %c0_275 = arith.constant 0 : index
    %822 = vector.load %arg9[%821, %c0_274, %c0_275] : memref<16x8x128xbf16, #tpu.memory_space<vmem>>, vector<1x8x128xbf16>
    %823 = vector.shape_cast %822 : vector<1x8x128xbf16> to vector<8x128xbf16>
    %824 = vector.shape_cast %820 : vector<8x128xbf16> to vector<1x8x128xbf16>
    tpu.vector_store %arg9[%821, %c0_274, %c0_275], %824 {strides = array<i32>} : memref<16x8x128xbf16, #tpu.memory_space<vmem>>, vector<1x8x128xbf16>,
    %cst_276 = arith.constant 0.000000e+00 : f32
    %825 = vector.broadcast %cst_276 : f32 to vector<8x128xf32>
    %826 = arith.select %813, %809, %825 : vector<8x128xi1>, vector<8x128xf32>
    %827 = arith.truncf %826 : vector<8x128xf32> to vector<8x128xbf16>
    %c8_i32_277 = arith.constant 8 : i32
    %828 = arith.addi %c8_i32_277, %731 : i32
    %829 = arith.index_cast %828 : i32 to index
    %c0_278 = arith.constant 0 : index
    %c0_279 = arith.constant 0 : index
    %830 = vector.load %arg9[%829, %c0_278, %c0_279] : memref<16x8x128xbf16, #tpu.memory_space<vmem>>, vector<1x8x128xbf16>
    %831 = vector.shape_cast %830 : vector<1x8x128xbf16> to vector<8x128xbf16>
    %832 = vector.shape_cast %827 : vector<8x128xbf16> to vector<1x8x128xbf16>
    tpu.vector_store %arg9[%829, %c0_278, %c0_279], %832 {strides = array<i32>} : memref<16x8x128xbf16, #tpu.memory_space<vmem>>, vector<1x8x128xbf16>,
    %c8_i32_280 = arith.constant 8 : i32
    %833 = tpu.concatenate %814, %816 in 1 : vector<8x128xf32>, vector<8x128xf32> -> vector<8x256xf32>
    %834 = arith.truncf %833 : vector<8x256xf32> to vector<8x256xbf16>
    %c0_281 = arith.constant 0 : index
    %c0_282 = arith.constant 0 : index
    %835 = vector.load %arg7[%c0_281, %c0_282] : memref<256x128xbf16, #tpu.memory_space<vmem>>, vector<256x128xbf16>
    %cst_283 = arith.constant dense<0.000000e+00> : vector<8x128xf32>
    %836 = tpu.matmul %834, %835, %cst_283 {dimension_numbers = #tpu.dot_dimension_numbers<[1], [0], [0], [1], [0, 0, 1, 1], [], []>} : vector<8x256xbf16>, vector<256x128xbf16>, vector<8x128xf32> -> vector<8x128xf32>
    %c0_284 = arith.constant 0 : index
    %c0_285 = arith.constant 0 : index
    %837 = vector.load %arg8[%c0_284, %c0_285] : memref<1x128xf32, #tpu.memory_space<vmem>>, vector<1x128xf32>
    %838 = vector.broadcast %837 : vector<1x128xf32> to vector<8x128xf32>
    %839 = arith.addf %836, %838 : vector<8x128xf32>
    %840 = math.tanh %839 : vector<8x128xf32>
    %c0_286 = arith.constant 0 : index
    %c0_287 = arith.constant 0 : index
    %841 = vector.load %arg10[%c0_286, %c0_287] : memref<8x128xf32, #tpu.memory_space<vmem>>, vector<8x128xf32>
    tpu.vector_store %arg10[%c0_286, %c0_287], %840 {strides = array<i32>} : memref<8x128xf32, #tpu.memory_space<vmem>>, vector<8x128xf32>,
    return
  }
}

</mosaic_0001>

<bundles_post_ra>
// kernel: caption_encoder_forward.1
= control target key start
LH: loop header
LB: loop body
LE: loop exit
PB: predicated region body
PF: predicated region fallthrough
CT: control target
= control target key end

     0   :  { %v10186_v2 = vmov 0   ;;  %vm134_vm0 = vcmask 261120   ;;  %v10187_v60 = vmov 0.0|0.0   ;;  %s14552_s0 = inlined_call_operand.vmem [shape: bf16[64,32], index: 0, kind: input, shape index: {}]   ;;  %s14553_s1 = inlined_call_operand.vmem [shape: s32[8,1], index: 1, kind: input, shape index: {}]   ;;  %s14554_s2 = inlined_call_operand.vmem [shape: bf16[32,512], index: 2, kind: input, shape index: {}]   ;;  %s14555_s3 = inlined_call_operand.vmem [shape: bf16[32,512], index: 3, kind: input, shape index: {}]   ;;  %s14556_s4 = inlined_call_operand.vmem [shape: f32[1,512], index: 4, kind: input, shape index: {}]   ;;  %s14557_s5 = inlined_call_operand.vmem [shape: f32[1,512], index: 5, kind: input, shape index: {}]   ;;  %s14558_s6 = inlined_call_operand.vmem [shape: bf16[256,1024], index: 6, kind: input, shape index: {}]   ;;  %s14559_s7 = inlined_call_operand.vmem [shape: bf16[256,128], index: 7, kind: input, shape index: {}]   ;;  %s14560_s8 = inlined_call_operand.vmem [shape: f32[1,128], index: 8, kind: input, shape index: {}]   ;;  %s14561_s9 = inlined_call_operand.vmem [shape: bf16[16,8,128], index: 9, kind: output, shape index: {0}]   ;;  %s14562_s10 = inlined_call_operand.hbm [shape: f32[8,128], index: 10, kind: output, shape index: {1}]  }
   0x1   :  { %v9958_v0 = vld [vmem:[%s14554_s2 + $0x24] ss:$16 sps:$4 sm:$0xff]   ;;  %v9960_v1 = vld [vmem:[%s14554_s2 + $0x20] ss:$16 sps:$4 sm:$0xff]   ;;  %179 = vmatprep.mubr.bf16.mxu0 %v10186_v2  ;;  %199 = vmatprep.mubr.bf16.mxu1 %v10186_v2  ;;  %v9968_v7 = vld [vmem:[%s14554_s2 + $0x2c] ss:$16 sps:$4 sm:$0xff]  }
   0x2   :  { %159 = vmatprep.subr.bf16.mxu0 %v9958_v0  ;;  %9950 = vmatprep.subr.bf16.mxu1 %v9958_v0  ;;  %v9961_v3 = vld [vmem:[%s14554_s2 + $0x4] ss:$16 sps:$4 sm:$0xff]   ;;  %v9963_v4 = vld [vmem:[%s14554_s2] ss:$16 sps:$4 sm:$0xff]   ;;  %v9966_v8 = vld [vmem:[%s14554_s2 + $0x28] ss:$16 sps:$4 sm:$0xff]  }
   0x3   :  { %160 = vmatpush1.bf16.msra.mxu0 %v9960_v1  ;;  %9952 = vmatpush1.bf16.msra.mxu1 %v9960_v1  ;;  %v10261_v5 = vld [vmem:[%s14552_s0] sm:$0xff]   ;;  %v10266_v6 = vld [vmem:[%s14552_s0 + $0x10] sm:$0xff]   ;;  %v9976_v11 = vld [vmem:[%s14554_s2 + $0xc] ss:$16 sps:$4 sm:$0xff]  }
   0x4   :  { %161 = vmatprep.subr.bf16.mxu0 %v9961_v3  ;;  %9951 = vmatprep.subr.bf16.mxu1 %v9961_v3  ;;  %v9971_v9 = vld [vmem:[%s14555_s3 + $0x24] ss:$16 sps:$4 sm:$0xff]   ;;  %v9969_v10 = vld [vmem:[%s14555_s3 + $0x20] ss:$16 sps:$4 sm:$0xff]   ;;  %v9974_v12 = vld [vmem:[%s14554_s2 + $0x8] ss:$16 sps:$4 sm:$0xff]  }
   0x5   :  { %9957 = vset.pattern.permute.xlu0 %v10186_v2  ;;  %v9979_v13 = vld [vmem:[%s14555_s3 + $0x4] ss:$16 sps:$4 sm:$0xff]   ;;  %v9977_v14 = vld [vmem:[%s14555_s3] ss:$16 sps:$4 sm:$0xff]   ;;  %v9982_v17 = vld [vmem:[%s14555_s3 + $0x2c] ss:$16 sps:$4 sm:$0xff]  }
   0x6   :  { %v648_v15 = vld [vmem:[%s14558_s6 + $0x1c0] sm:$0xff]  ;;  %v10311_v18 = vld [vmem:[%s14552_s0 + $0x8] sm:$0xff]   ;;  %v10316_v19 = vld [vmem:[%s14552_s0 + $0x18] sm:$0xff]  }
   0x7   :  { %162 = vmatpush1.bf16.msra.mxu0 %v9963_v4  ;;  %9953 = vmatpush1.bf16.msra.mxu1 %v9963_v4  ;;  %v652_v16 = vld [vmem:[%s14558_s6 + $0x1e0] sm:$0xff]  ;;  %v9980_v24 = vld [vmem:[%s14555_s3 + $0x28] ss:$16 sps:$4 sm:$0xff]   ;;  %v9985_v28 = vld [vmem:[%s14555_s3 + $0xc] ss:$16 sps:$4 sm:$0xff]  }
   0x8   :  { %232 = vmatprep.subr.bf16.mxu1 %v9968_v7  ;;  %407 = vmatprep.subr.bf16.mxu0 %v9971_v9  ;;  %v8905_v20 = vcombine.high %v648_v15, %v652_v16  ;;  %v640_v21 = vld [vmem:[%s14558_s6 + $0x180] sm:$0xff]  ;;  %v8904_v23 = vcombine.low %v648_v15, %v652_v16  ;;  %v10345_v29 = vld [vmem:[%s14558_s6 + $0x1c8] sm:$0xff] }
   0x9   :  { %v644_v22 = vld [vmem:[%s14558_s6 + $0x1a0] sm:$0xff]  ;;  %v10350_v30 = vld [vmem:[%s14558_s6 + $0x1e8] sm:$0xff] }
   0xa   :  { %8824 = vmatmul.mubr.msk.bf16.vlgmr.msra.gmra.mxu0 %vm134_vm0, %v10261_v5  ;;  %8826 = vmatmul.mubr.msk.bf16.vlgmr.msra.gmra.mxu1 %vm134_vm0, %v10266_v6  ;;  %v8897_v25 = vcombine.high %v640_v21, %v644_v22  ;;  %v632_v26 = vld [vmem:[%s14558_s6 + $0x140] sm:$0xff]  ;;  %v8896_v31 = vcombine.low %v640_v21, %v644_v22  ;;  %v9983_v32 = vld [vmem:[%s14555_s3 + $0x8] ss:$16 sps:$4 sm:$0xff]   ;;  %v8907_v34 = vcombine.high %v10345_v29, %v10350_v30 }
   0xb   :  { %233 = vmatpush1.bf16.msra.mxu1 %v9966_v8  ;;  %189 = vmatprep.mubr.bf16.mxu0 %v10186_v2  ;;  %v636_v27 = vld [vmem:[%s14558_s6 + $0x160] sm:$0xff]  ;;  %v641_v62 = vld [vmem:[%s14558_s6 + $0x188] sm:$0xff]  ;;  %v8906_v1 = vcombine.low %v10345_v29, %v10350_v30 }
   0xc   :  { %209 = vmatprep.mubr.bf16.mxu1 %v10186_v2  ;;  %234 = vmatprep.subr.bf16.mxu1 %v9976_v11  ;;  %v8889_v33 = vcombine.high %v632_v26, %v636_v27  ;;  %v624_v35 = vld [vmem:[%s14558_s6 + $0x100] sm:$0xff]  ;;  %v8888_v37 = vcombine.low %v632_v26, %v636_v27  ;;  %v645_v63 = vld [vmem:[%s14558_s6 + $0x1a8] sm:$0xff] }
   0xd   :  { %408 = vmatpush1.bf16.msra.mxu0 %v9969_v10  ;;  %v628_v36 = vld [vmem:[%s14558_s6 + $0x120] sm:$0xff]  ;;  %v8899_v4 = vcombine.high %v641_v62, %v645_v63  ;;  %v633_v9 = vld [vmem:[%s14558_s6 + $0x148] sm:$0xff] }
   0xe   :  { %409 = vmatprep.subr.bf16.mxu0 %v9979_v13  ;;  %v8881_v38 = vcombine.high %v624_v35, %v628_v36  ;;  %v616_v39 = vld [vmem:[%s14558_s6 + $0xc0] sm:$0xff]  ;;  %v8880_v41 = vcombine.low %v624_v35, %v628_v36  ;;  %v637_v10 = vld [vmem:[%s14558_s6 + $0x168] sm:$0xff] }
   0xf   :  { %235 = vmatpush1.bf16.msra.mxu1 %v9974_v12  ;;  %v620_v40 = vld [vmem:[%s14558_s6 + $0xe0] sm:$0xff]  ;;  %v8898_v12 = vcombine.low %v641_v62, %v645_v63  ;;  %v625_v15 = vld [vmem:[%s14558_s6 + $0x108] sm:$0xff]  ;;  %v8890_v21 = vcombine.low %v633_v9, %v637_v10 }
  0x10   :  { %480 = vmatprep.subr.bf16.mxu1 %v9982_v17  ;;  %v8873_v42 = vcombine.high %v616_v39, %v620_v40  ;;  %v608_v43 = vld [vmem:[%s14558_s6 + $0x80] sm:$0xff]  ;;  %v8872_v45 = vcombine.low %v616_v39, %v620_v40  ;;  %v629_v17 = vld [vmem:[%s14558_s6 + $0x128] sm:$0xff] }
  0x11   :  { %410 = vmatpush1.bf16.msra.mxu0 %v9977_v14  ;;  %v612_v44 = vld [vmem:[%s14558_s6 + $0xa0] sm:$0xff]  ;;  %v8883_v27 = vcombine.high %v625_v15, %v629_v17  ;;  %v8882_v29 = vcombine.low %v625_v15, %v629_v17 }
  0x12   :  { %8825 = vmatmul.mubr.msk.bf16.gmra.mxu0 %vm134_vm0, %v10311_v18  ;;  %8827 = vmatmul.mubr.msk.bf16.gmra.mxu1 %vm134_vm0, %v10316_v19  ;;  %v8865_v46 = vcombine.high %v608_v43, %v612_v44  ;;  %v600_v47 = vld [vmem:[%s14558_s6 + $0x40] sm:$0xff]  ;;  %v8864_v49 = vcombine.low %v608_v43, %v612_v44 }
  0x13   :  { %252 = vmatprep.mubr.bf16.mxu1 %v10186_v2  ;;  %427 = vmatprep.mubr.bf16.mxu0 %v10186_v2  ;;  %v604_v48 = vld [vmem:[%s14558_s6 + $0x60] sm:$0xff] }
  0x14   :  { %1360 = vmatprep.subr.bf16.mxu0 %v8905_v20  ;;  %v8857_v50 = vcombine.high %v600_v47, %v604_v48  ;;  %v592_v51 = vld [vmem:[%s14558_s6] sm:$0xff]  ;;  %v8856_v53 = vcombine.low %v600_v47, %v604_v48 }
  0x15   :  { %v596_v52 = vld [vmem:[%s14558_s6 + $0x20] sm:$0xff] }
  0x16   :  { %v8849_v54 = vcombine.high %v592_v51, %v596_v52  ;;  %v712_v55 = vld [vmem:[%s14558_s6 + $0x3c0] sm:$0xff]  ;;  %v8848_v57 = vcombine.low %v592_v51, %v596_v52 }
  0x17   :  { %v716_v56 = vld [vmem:[%s14558_s6 + $0x3e0] sm:$0xff] }
  0x18   :  { %v8969_v58 = vcombine.high %v712_v55, %v716_v56  ;;  %v704_v59 = vld [vmem:[%s14558_s6 + $0x380] sm:$0xff]  ;;  %v8968_v0 = vcombine.low %v712_v55, %v716_v56 }
  0x19   :  { %v708_v61 = vld [vmem:[%s14558_s6 + $0x3a0] sm:$0xff] }
  0x1a   :  { %8828 = vmatmul.mubr.msk.bf16.vlgmr.msra.gmra.mxu1 %vm134_vm0, %v10261_v5  ;;  %8840 = vmatmul.mubr.msk.bf16.vlgmr.msra.gmra.mxu0 %vm134_vm0, %v10261_v5  ;;  %v8961_v3 = vcombine.high %v704_v59, %v708_v61  ;;  %v696_v7 = vld [vmem:[%s14558_s6 + $0x340] sm:$0xff]  ;;  %v8960_v11 = vcombine.low %v704_v59, %v708_v61 }
  0x1b   :  { %1361 = vmatpush1.bf16.msra.mxu0 %v8904_v23  ;;  %481 = vmatpush1.bf16.msra.mxu1 %v9980_v24  ;;  %v700_v8 = vld [vmem:[%s14558_s6 + $0x360] sm:$0xff]  ;;  %v617_v24 = vld [vmem:[%s14558_s6 + $0xc8] sm:$0xff] }
  0x1c   :  { %1362 = vmatprep.subr.bf16.mxu0 %v8897_v25  ;;  %262 = vmatprep.mubr.bf16.mxu1 %v10186_v2  ;;  %v688_v13 = vld [vmem:[%s14558_s6 + $0x300] sm:$0xff]  ;;  %v8953_v16 = vcombine.high %v696_v7, %v700_v8  ;;  %v8952_v20 = vcombine.low %v696_v7, %v700_v8  ;;  %v621_v25 = vld [vmem:[%s14558_s6 + $0xe8] sm:$0xff] }
  0x1d   :  { %482 = vmatprep.subr.bf16.mxu1 %v9985_v28  ;;  %437 = vmatprep.mubr.bf16.mxu0 %v10186_v2  ;;  %v692_v14 = vld [vmem:[%s14558_s6 + $0x320] sm:$0xff] }
  0x1e   :  { %v680_v22 = vld [vmem:[%s14558_s6 + $0x2c0] sm:$0xff]  ;;  %v8945_v26 = vcombine.high %v688_v13, %v692_v14  ;;  %v8944_v28 = vcombine.low %v688_v13, %v692_v14 }
  0x1f   :  { %1363 = vmatpush1.bf16.msra.mxu0 %v8896_v31  ;;  %483 = vmatpush1.bf16.msra.mxu1 %v9983_v32  ;;  %v684_v23 = vld [vmem:[%s14558_s6 + $0x2e0] sm:$0xff] }
  0x20   :  { %1364 = vmatprep.subr.bf16.mxu0 %v8889_v33  ;;  %1401 = vmatprep.subr.bf16.mxu1 %v8907_v34  ;;  %v672_v30 = vld [vmem:[%s14558_s6 + $0x280] sm:$0xff]  ;;  %v8937_v32 = vcombine.high %v680_v22, %v684_v23  ;;  %v8875_v33 = vcombine.high %v617_v24, %v621_v25  ;;  %v613_v34 = vld [vmem:[%s14558_s6 + $0xa8] sm:$0xff] }
  0x21   :  { %v676_v31 = vld [vmem:[%s14558_s6 + $0x2a0] sm:$0xff] }
  0x22   :  { %8829 = vmatmul.mubr.msk.bf16.gmra.mxu1 %vm134_vm0, %v10311_v18  ;;  %8841 = vmatmul.mubr.msk.bf16.gmra.mxu0 %vm134_vm0, %v10311_v18 }
  0x23   :  { %1365 = vmatpush1.bf16.msra.mxu0 %v8888_v37  ;;  %272 = vmatprep.mubr.bf16.mxu1 %v10186_v2 }
  0x24   :  { %1366 = vmatprep.subr.bf16.mxu0 %v8881_v38  ;;  %447 = vmatprep.mubr.bf16.mxu0 %v10186_v2 }
  0x27   :  { %1367 = vmatpush1.bf16.msra.mxu0 %v8880_v41 }
  0x28   :  { %1368 = vmatprep.subr.bf16.mxu0 %v8873_v42 }
  0x2a   :  { %8830 = vmatmul.mubr.msk.bf16.gmra.mxu1 %vm134_vm0, %v10266_v6  ;;  %8842 = vmatmul.mubr.msk.bf16.gmra.mxu0 %vm134_vm0, %v10266_v6 }
  0x2b   :  { %1369 = vmatpush1.bf16.msra.mxu0 %v8872_v45  ;;  %282 = vmatprep.mubr.bf16.mxu1 %v10186_v2 }
  0x2c   :  { %1370 = vmatprep.subr.bf16.mxu0 %v8865_v46  ;;  %457 = vmatprep.mubr.bf16.mxu0 %v10186_v2 }
  0x2f   :  { %1371 = vmatpush1.bf16.msra.mxu0 %v8864_v49 }
  0x30   :  { %1372 = vmatprep.subr.bf16.mxu0 %v8857_v50 }
  0x32   :  { %8831 = vmatmul.mubr.msk.bf16.gmra.mxu1 %vm134_vm0, %v10316_v19  ;;  %8843 = vmatmul.mubr.msk.bf16.gmra.mxu0 %vm134_vm0, %v10316_v19 }
  0x33   :  { %1373 = vmatpush1.bf16.msra.mxu0 %v8856_v53  ;;  %500 = vmatprep.mubr.bf16.mxu1 %v10186_v2 }
  0x34   :  { %1374 = vmatprep.subr.bf16.mxu0 %v8849_v54  ;;  %1392 = vmatprep.mubr.bf16.mxu0 %v10187_v60 }
  0x37   :  { %1375 = vmatpush1.bf16.msra.mxu0 %v8848_v57 }
  0x38   :  { %1376 = vmatprep.subr.bf16.mxu0 %v8969_v58 }
  0x3a   :  { %8844 = vmatmul.mubr.msk.bf16.vlgmr.msra.gmra.mxu1 %vm134_vm0, %v10261_v5  ;;  %v8891_v5 = vcombine.high %v633_v9, %v637_v10 }
  0x3b   :  { %1377 = vmatpush2.bf16.msra.mxu0 %v8968_v0  ;;  %1402 = vmatpush1.bf16.msra.mxu1 %v8906_v1 }
  0x3c   :  { %1378 = vmatprep.subr.bf16.mxu0 %v8961_v3  ;;  %1403 = vmatprep.subr.bf16.mxu1 %v8899_v4 }
  0x3d   :  { %510 = vmatprep.mubr.bf16.mxu1 %v10186_v2 }
  0x3f   :  { %1379 = vmatpush2.bf16.msra.mxu0 %v8960_v11  ;;  %1404 = vmatpush1.bf16.msra.mxu1 %v8898_v12 }
  0x40   :  { %1380 = vmatprep.subr.bf16.mxu0 %v8953_v16  ;;  %1405 = vmatprep.subr.bf16.mxu1 %v8891_v5 }
  0x42   :  { %8845 = vmatmul.mubr.msk.bf16.gmra.mxu1 %vm134_vm0, %v10311_v18  ;;  %v609_v18 = vld [vmem:[%s14558_s6 + $0x88] sm:$0xff] }
  0x43   :  { %1381 = vmatpush2.bf16.msra.mxu0 %v8952_v20  ;;  %1406 = vmatpush1.bf16.msra.mxu1 %v8890_v21 }
  0x44   :  { %1382 = vmatprep.subr.bf16.mxu0 %v8945_v26  ;;  %1407 = vmatprep.subr.bf16.mxu1 %v8883_v27 }
  0x45   :  { %520 = vmatprep.mubr.bf16.mxu1 %v10186_v2 }
  0x46   :  { %16 = vsyncpa [#allocation5], 0  ;;  %v8936_v35 = vcombine.low %v680_v22, %v684_v23  ;;  %v8874_v36 = vcombine.low %v617_v24, %v621_v25  ;;  %v8929_v37 = vcombine.high %v672_v30, %v676_v31  ;;  %v8867_v38 = vcombine.high %v609_v18, %v613_v34  ;;  %v664_v39 = vld [vmem:[%s14558_s6 + $0x240] sm:$0xff]  ;;  %v601_v41 = vld [vmem:[%s14558_s6 + $0x48] sm:$0xff]  ;;  %s10188_s30 = smov [#allocation4]  }
  0x47   :  { %1383 = vmatpush2.bf16.msra.mxu0 %v8944_v28  ;;  %1408 = vmatpush1.bf16.msra.mxu1 %v8882_v29  ;;  %v668_v40 = vld [vmem:[%s14558_s6 + $0x260] sm:$0xff]  ;;  %v605_v42 = vld [vmem:[%s14558_s6 + $0x68] sm:$0xff]  ;;  %v8928_v43 = vcombine.low %v672_v30, %v676_v31  ;;  %v8866_v44 = vcombine.low %v609_v18, %v613_v34  ;;  %v654_v56 = vld [vmem:[%s14558_s6 + $0x1f0] sm:$0xff] }
  0x48   :  { %1384 = vmatprep.subr.bf16.mxu0 %v8937_v32  ;;  %1409 = vmatprep.subr.bf16.mxu1 %v8875_v33  ;;  %v8921_v45 = vcombine.high %v664_v39, %v668_v40  ;;  %v8859_v46 = vcombine.high %v601_v41, %v605_v42  ;;  %v656_v47 = vld [vmem:[%s14558_s6 + $0x200] sm:$0xff]  ;;  %v597_v49 = vld [vmem:[%s14558_s6 + $0x28] sm:$0xff]  ;;  %v8920_v50 = vcombine.low %v664_v39, %v668_v40  ;;  %v642_v0 = vld [vmem:[%s14558_s6 + $0x190] sm:$0xff] }
  0x49   :  { %v660_v48 = vld [vmem:[%s14558_s6 + $0x220] sm:$0xff]  ;;  %v8858_v51 = vcombine.low %v601_v41, %v605_v42  ;;  %v713_v54 = vld [vmem:[%s14558_s6 + $0x3c8] sm:$0xff]  ;;  %v646_v1 = vld [vmem:[%s14558_s6 + $0x1b0] sm:$0xff] }
  0x4a   :  { %8846 = vmatmul.mubr.msk.bf16.gmra.mxu1 %vm134_vm0, %v10266_v6  ;;  %v593_v6 = vld [vmem:[%s14558_s6 + $0x8] sm:$0xff]  ;;  %v8913_v52 = vcombine.high %v656_v47, %v660_v48  ;;  %v8912_v57 = vcombine.low %v656_v47, %v660_v48  ;;  %v573_v59 = vld [vmem:[%s14553_s1] sm:$0xff]  ;;  %v8901_v8 = vcombine.high %v642_v0, %v646_v1  ;;  %v634_v11 = vld [vmem:[%s14558_s6 + $0x150] sm:$0xff]  ;;  %v8900_v14 = vcombine.low %v642_v0, %v646_v1  ;;  %s8788_s1 = sshll.u32 %s10188_s30, 4  ;;  %s8789_s1 = int_to_ptr.vmem [resolvable:$true] %s8788_s1 }
  0x4b   :  { %1385 = vmatpush2.bf16.msra.mxu0 %v8936_v35  ;;  %1410 = vmatpush1.bf16.msra.mxu1 %v8874_v36  ;;  %v8851_v53 = vcombine.high %v593_v6, %v597_v49  ;;  %v717_v55 = vld [vmem:[%s14558_s6 + $0x3e8] sm:$0xff]  ;;  %v8850_v58 = vcombine.low %v593_v6, %v597_v49  ;;  %v638_v12 = vld [vmem:[%s14558_s6 + $0x170] sm:$0xff]  ;;  %v643_v1 = vld [vmem:[%s14558_s6 + $0x198] sm:$0xff]  ;;  %s10164_s11 = scalar_lea.vmem %s8789_s1, 128  ;;  %p10169_p1 = scmp.lt.s32.totalorder %s8789_s1, %s8789_s1 }
  0x4c   :  { %1386 = vmatprep.subr.bf16.mxu0 %v8929_v37  ;;  %1411 = vmatprep.subr.bf16.mxu1 %v8867_v38  ;;  %v8971_v61 = vcombine.high %v713_v54, %v717_v55  ;;  %v705_v63 = vld [vmem:[%s14558_s6 + $0x388] sm:$0xff]  ;;  %v8970_v3 = vcombine.low %v713_v54, %v717_v55  ;;  %v8893_v16 = vcombine.high %v634_v11, %v638_v12  ;;  %v626_v20 = vld [vmem:[%s14558_s6 + $0x110] sm:$0xff]  ;;  %p10165_p0 = scmp.ne.s32.totalorder %s8789_s1, %s10164_s11  ;;  %p10170_p2 = scmp.lt.s32.totalorder %s10164_s11, %s10164_s11 }
  0x4d   :  { %530 = vmatprep.mubr.bf16.mxu1 %v10186_v2  ;;  %v650_v2 = vld [vmem:[%s14558_s6 + $0x1d0] sm:$0xff]  ;;  %575 = vperm.xlu0 %9957, %v573_v59   ;;  %v697_v9 = vld [vmem:[%s14558_s6 + $0x348] sm:$0xff]  ;;  %v8892_v23 = vcombine.low %v634_v11, %v638_v12  ;;  %v635_v12 = vld [vmem:[%s14558_s6 + $0x158] sm:$0xff] }
  0x4e   :  { %v8909_v62 = vcombine.high %v650_v2, %v654_v56  ;;  %v8908_v4 = vcombine.low %v650_v2, %v654_v56  ;;  %v701_v10 = vld [vmem:[%s14558_s6 + $0x368] sm:$0xff]  ;;  %v630_v21 = vld [vmem:[%s14558_s6 + $0x130] sm:$0xff]  ;;  %p10171_p3 = por %p10170_p2, %p10169_p1 }
  0x4f   :  { %1387 = vmatpush2.bf16.msra.mxu0 %v8928_v43  ;;  %1412 = vmatpush1.bf16.msra.mxu1 %v8866_v44  ;;  %v8955_v15 = vcombine.high %v697_v9, %v701_v10  ;;  %v689_v5 = vld [vmem:[%s14558_s6 + $0x308] sm:$0xff]  ;;  %v8954_v22 = vcombine.low %v697_v9, %v701_v10  ;;  %v8885_v25 = vcombine.high %v626_v20, %v630_v21  ;;  %v618_v28 = vld [vmem:[%s14558_s6 + $0xd0] sm:$0xff] }
  0x50   :  { %1388 = vmatprep.subr.bf16.mxu0 %v8921_v45  ;;  %1413 = vmatprep.subr.bf16.mxu1 %v8859_v46  ;;  %v693_v17 = vld [vmem:[%s14558_s6 + $0x328] sm:$0xff]  ;;  %v622_v29 = vld [vmem:[%s14558_s6 + $0xf0] sm:$0xff]  ;;  %v8884_v31 = vcombine.low %v626_v20, %v630_v21  ;;  %v627_v21 = vld [vmem:[%s14558_s6 + $0x118] sm:$0xff]  ;;  %p10172_p4 = pnand %p10171_p3, %p10165_p0 }
  0x51   :  { %v8947_v24 = vcombine.high %v689_v5, %v693_v17  ;;  %v681_v26 = vld [vmem:[%s14558_s6 + $0x2c8] sm:$0xff]  ;;  %v8946_v30 = vcombine.low %v689_v5, %v693_v17  ;;  %v8877_v33 = vcombine.high %v618_v28, %v622_v29  ;;  %v610_v35 = vld [vmem:[%s14558_s6 + $0x90] sm:$0xff]  ;;  %v8876_v38 = vcombine.low %v618_v28, %v622_v29  ;;  %v619_v29 = vld [vmem:[%s14558_s6 + $0xd8] sm:$0xff] }
  0x52   :  { %8847 = vmatmul.mubr.msk.bf16.gmra.mxu1 %vm134_vm0, %v10316_v19  ;;  %v709_v19 = vld [vmem:[%s14558_s6 + $0x3a8] sm:$0xff]  ;;  %v614_v36 = vld [vmem:[%s14558_s6 + $0xb0] sm:$0xff] }
  0x53   :  { %1389 = vmatpush2.bf16.msra.mxu0 %v8920_v50  ;;  %1414 = vmatpush1.bf16.msra.mxu1 %v8858_v51  ;;  %v8963_v7 = vcombine.high %v705_v63, %v709_v19  ;;  %v8962_v13 = vcombine.low %v705_v63, %v709_v19  ;;  %v685_v27 = vld [vmem:[%s14558_s6 + $0x2e8] sm:$0xff]  ;;  %v8869_v40 = vcombine.high %v610_v35, %v614_v36  ;;  %v602_v43 = vld [vmem:[%s14558_s6 + $0x50] sm:$0xff] }
  0x54   :  { %1390 = vmatprep.subr.bf16.mxu0 %v8913_v52  ;;  %1415 = vmatprep.subr.bf16.mxu1 %v8851_v53  ;;  %v8939_v32 = vcombine.high %v681_v26, %v685_v27  ;;  %v673_v18 = vld [vmem:[%s14558_s6 + $0x288] sm:$0xff]  ;;  %v8938_v37 = vcombine.low %v681_v26, %v685_v27  ;;  %v606_v44 = vld [vmem:[%s14558_s6 + $0x70] sm:$0xff]  ;;  %v8868_v46 = vcombine.low %v610_v35, %v614_v36  ;;  %v611_v36 = vld [vmem:[%s14558_s6 + $0x98] sm:$0xff] }
  0x55   :  { %1433 = vmatprep.mubr.bf16.mxu1 %v10187_v60  ;;  %v677_v34 = vld [vmem:[%s14558_s6 + $0x2a8] sm:$0xff]  ;;  %v8861_v48 = vcombine.high %v602_v43, %v606_v44  ;;  %v594_v50 = vld [vmem:[%s14558_s6 + $0x10] sm:$0xff]  ;;  %v8860_v53 = vcombine.low %v602_v43, %v606_v44  ;;  %v603_v44 = vld [vmem:[%s14558_s6 + $0x58] sm:$0xff] }
  0x56   :  { %v8931_v39 = vcombine.high %v673_v18, %v677_v34  ;;  %v665_v41 = vld [vmem:[%s14558_s6 + $0x248] sm:$0xff]  ;;  %v8930_v45 = vcombine.low %v673_v18, %v677_v34  ;;  %v598_v51 = vld [vmem:[%s14558_s6 + $0x30] sm:$0xff] }
  0x57   :  { %1391 = vmatpush2.bf16.msra.mxu0 %v8912_v57  ;;  %1416 = vmatpush1.bf16.msra.mxu1 %v8850_v58  ;;  %v669_v42 = vld [vmem:[%s14558_s6 + $0x268] sm:$0xff]  ;;  %v8853_v55 = vcombine.high %v594_v50, %v598_v51  ;;  %v714_v2 = vld [vmem:[%s14558_s6 + $0x3d0] sm:$0xff]  ;;  %v651_v57 = vld [vmem:[%s14558_s6 + $0x1d8] sm:$0xff] }
  0x58   :  { %1417 = vmatprep.subr.bf16.mxu1 %v8971_v61  ;;  %1442 = vmatprep.subr.bf16.mxu0 %v8909_v62  ;;  %v8923_v47 = vcombine.high %v665_v41, %v669_v42  ;;  %v657_v6 = vld [vmem:[%s14558_s6 + $0x208] sm:$0xff]  ;;  %v8922_v52 = vcombine.low %v665_v41, %v669_v42  ;;  %v718_v56 = vld [vmem:[%s14558_s6 + $0x3f0] sm:$0xff]  ;;  %v655_v58 = vld [vmem:[%s14558_s6 + $0x1f8] sm:$0xff]  ;;  %v8852_v61 = vcombine.low %v594_v50, %v598_v51 }
  0x59   :  { %v661_v49 = vld [vmem:[%s14558_s6 + $0x228] sm:$0xff]  ;;  %v8973_v62 = vcombine.high %v714_v2, %v718_v56  ;;  %v8911_v63 = vcombine.high %v651_v57, %v655_v58  ;;  %v706_v19 = vld [vmem:[%s14558_s6 + $0x390] sm:$0xff]  ;;  %v595_v51 = vld [vmem:[%s14558_s6 + $0x18] sm:$0xff] }
  0x5a   :  { %1393 = vmatmul.mubr.bf16.vlgmr.msra.gmra.mxu0 %v10187_v60  ;;  %v8915_v54 = vcombine.high %v657_v6, %v661_v49  ;;  %v8914_v59 = vcombine.low %v657_v6, %v661_v49  ;;  %v710_v0 = vld [vmem:[%s14558_s6 + $0x3b0] sm:$0xff] }
  0x5b   :  { %1418 = vmatpush2.bf16.msra.mxu1 %v8970_v3  ;;  %1443 = vmatpush1.bf16.msra.mxu0 %v8908_v4  ;;  %v647_v3 = vld [vmem:[%s14558_s6 + $0x1b8] sm:$0xff]  ;;  %v8972_v4 = vcombine.low %v714_v2, %v718_v56  ;;  %v698_v10 = vld [vmem:[%s14558_s6 + $0x350] sm:$0xff] }
  0x5c   :  { %1419 = vmatprep.subr.bf16.mxu1 %v8963_v7  ;;  %1444 = vmatprep.subr.bf16.mxu0 %v8901_v8  ;;  %v8910_v7 = vcombine.low %v651_v57, %v655_v58  ;;  %v8965_v8 = vcombine.high %v706_v19, %v710_v0  ;;  %v8903_v9 = vcombine.high %v643_v1, %v647_v3  ;;  %v702_v11 = vld [vmem:[%s14558_s6 + $0x370] sm:$0xff]  ;;  %v715_v56 = vld [vmem:[%s14558_s6 + $0x3d8] sm:$0xff] }
  0x5d   :  { %1474 = vmatprep.mubr.bf16.mxu0 %v10187_v60  ;;  %v690_v17 = vld [vmem:[%s14558_s6 + $0x310] sm:$0xff]  ;;  %v719_v57 = vld [vmem:[%s14558_s6 + $0x3f8] sm:$0xff] }
  0x5e   :  { %v694_v20 = vld [vmem:[%s14558_s6 + $0x330] sm:$0xff] }
  0x5f   :  { %1420 = vmatpush2.bf16.msra.mxu1 %v8962_v13  ;;  %1445 = vmatpush1.bf16.msra.mxu0 %v8900_v14  ;;  %v639_v13 = vld [vmem:[%s14558_s6 + $0x178] sm:$0xff]  ;;  %v8964_v14 = vcombine.low %v706_v19, %v710_v0  ;;  %v682_v27 = vld [vmem:[%s14558_s6 + $0x2d0] sm:$0xff]  ;;  %v8974_v19 = vcombine.low %v715_v56, %v719_v57 }
  0x60   :  { %1421 = vmatprep.subr.bf16.mxu1 %v8955_v15  ;;  %1446 = vmatprep.subr.bf16.mxu0 %v8893_v16  ;;  %v8902_v15 = vcombine.low %v643_v1, %v647_v3  ;;  %v8957_v16 = vcombine.high %v698_v10, %v702_v11  ;;  %v8895_v5 = vcombine.high %v635_v12, %v639_v13  ;;  %v686_v28 = vld [vmem:[%s14558_s6 + $0x2f0] sm:$0xff]  ;;  %v699_v1 = vld [vmem:[%s14558_s6 + $0x358] sm:$0xff] }
  0x61   :  { %v674_v34 = vld [vmem:[%s14558_s6 + $0x290] sm:$0xff]  ;;  %v703_v3 = vld [vmem:[%s14558_s6 + $0x378] sm:$0xff] }
  0x62   :  { %v678_v35 = vld [vmem:[%s14558_s6 + $0x2b0] sm:$0xff] }
  0x63   :  { %1422 = vmatpush2.bf16.msra.mxu1 %v8954_v22  ;;  %1447 = vmatpush1.bf16.msra.mxu0 %v8892_v23  ;;  %v631_v22 = vld [vmem:[%s14558_s6 + $0x138] sm:$0xff]  ;;  %v8956_v23 = vcombine.low %v698_v10, %v702_v11  ;;  %v666_v42 = vld [vmem:[%s14558_s6 + $0x250] sm:$0xff]  ;;  %v8958_v10 = vcombine.low %v699_v1, %v703_v3 }
  0x64   :  { %1423 = vmatprep.subr.bf16.mxu1 %v8947_v24  ;;  %1448 = vmatprep.subr.bf16.mxu0 %v8885_v25  ;;  %v8894_v24 = vcombine.low %v635_v12, %v639_v13  ;;  %v8949_v25 = vcombine.high %v690_v17, %v694_v20  ;;  %v8887_v26 = vcombine.high %v627_v21, %v631_v22  ;;  %v670_v43 = vld [vmem:[%s14558_s6 + $0x270] sm:$0xff]  ;;  %v683_v12 = vld [vmem:[%s14558_s6 + $0x2d8] sm:$0xff] }
  0x65   :  { %v658_v49 = vld [vmem:[%s14558_s6 + $0x210] sm:$0xff]  ;;  %v687_v13 = vld [vmem:[%s14558_s6 + $0x2f8] sm:$0xff] }
  0x66   :  { %v662_v50 = vld [vmem:[%s14558_s6 + $0x230] sm:$0xff] }
  0x67   :  { %1424 = vmatpush2.bf16.msra.mxu1 %v8946_v30  ;;  %1449 = vmatpush1.bf16.msra.mxu0 %v8884_v31  ;;  %v623_v30 = vld [vmem:[%s14558_s6 + $0xf8] sm:$0xff]  ;;  %v8948_v31 = vcombine.low %v690_v17, %v694_v20  ;;  %v8916_v58 = vcombine.low %v658_v49, %v662_v50  ;;  %v8942_v17 = vcombine.low %v683_v12, %v687_v13 }
  0x68   :  { %1425 = vmatprep.subr.bf16.mxu1 %v8939_v32  ;;  %1450 = vmatprep.subr.bf16.mxu0 %v8877_v33  ;;  %v8886_v32 = vcombine.low %v627_v21, %v631_v22  ;;  %v8941_v33 = vcombine.high %v682_v27, %v686_v28  ;;  %v8879_v18 = vcombine.high %v619_v29, %v623_v30  ;;  %v667_v21 = vld [vmem:[%s14558_s6 + $0x258] sm:$0xff] }
  0x69   :  { %v671_v22 = vld [vmem:[%s14558_s6 + $0x278] sm:$0xff] }
  0x6b   :  { %1426 = vmatpush2.bf16.msra.mxu1 %v8938_v37  ;;  %1451 = vmatpush1.bf16.msra.mxu0 %v8876_v38  ;;  %v615_v37 = vld [vmem:[%s14558_s6 + $0xb8] sm:$0xff]  ;;  %v8940_v38 = vcombine.low %v682_v27, %v686_v28  ;;  %v8926_v27 = vcombine.low %v667_v21, %v671_v22 }
  0x6c   :  { %1427 = vmatprep.subr.bf16.mxu1 %v8931_v39  ;;  %1452 = vmatprep.subr.bf16.mxu0 %v8869_v40  ;;  %v8878_v39 = vcombine.low %v619_v29, %v623_v30  ;;  %v8933_v40 = vcombine.high %v674_v34, %v678_v35  ;;  %v8871_v41 = vcombine.high %v611_v36, %v615_v37  ;;  %v54_v30 = vlaneseq }
  0x6f   :  { %1428 = vmatpush2.bf16.msra.mxu1 %v8930_v45  ;;  %1453 = vmatpush1.bf16.msra.mxu0 %v8868_v46  ;;  %v607_v45 = vld [vmem:[%s14558_s6 + $0x78] sm:$0xff]  ;;  %v8932_v46 = vcombine.low %v674_v34, %v678_v35 }
  0x70   :  { %1429 = vmatprep.subr.bf16.mxu1 %v8923_v47  ;;  %1454 = vmatprep.subr.bf16.mxu0 %v8861_v48  ;;  %v8870_v47 = vcombine.low %v611_v36, %v615_v37  ;;  %v8925_v48 = vcombine.high %v666_v42, %v670_v43  ;;  %v8863_v6 = vcombine.high %v603_v44, %v607_v45 }
  0x73   :  { %1430 = vmatpush2.bf16.msra.mxu1 %v8922_v52  ;;  %1455 = vmatpush1.bf16.msra.mxu0 %v8860_v53  ;;  %v599_v52 = vld [vmem:[%s14558_s6 + $0x38] sm:$0xff]  ;;  %v8924_v53 = vcombine.low %v666_v42, %v670_v43 }
  0x74   :  { %1431 = vmatprep.subr.bf16.mxu1 %v8915_v54  ;;  %1456 = vmatprep.subr.bf16.mxu0 %v8853_v55  ;;  %v8862_v54 = vcombine.low %v603_v44, %v607_v45  ;;  %v8917_v55 = vcombine.high %v658_v49, %v662_v50  ;;  %v8855_v2 = vcombine.high %v595_v51, %v599_v52 }
  0x77   :  { %1432 = vmatpush2.bf16.msra.mxu1 %v8914_v59  ;;  %1457 = vmatpush1.bf16.msra.mxu0 %v8852_v61  ;;  %v8854_v59 = vcombine.low %v595_v51, %v599_v52  ;;  %v8975_v61 = vcombine.high %v715_v56, %v719_v57 }
  0x78   :  { %1458 = vmatprep.subr.bf16.mxu0 %v8973_v62  ;;  %1483 = vmatprep.subr.bf16.mxu1 %v8911_v63  ;;  %v707_v62 = vld [vmem:[%s14558_s6 + $0x398] sm:$0xff] }
  0x79   :  { %v711_v63 = vld [vmem:[%s14558_s6 + $0x3b8] sm:$0xff] }
  0x7a   :  { %1434 = vmatmul.mubr.bf16.vlgmr.msra.gmra.mxu1 %v10187_v60  ;;  %v8967_v0 = vcombine.high %v707_v62, %v711_v63 }
  0x7b   :  { %1459 = vmatpush2.bf16.msra.mxu0 %v8972_v4  ;;  %1484 = vmatpush1.bf16.msra.mxu1 %v8910_v7  ;;  %v8966_v4 = vcombine.low %v707_v62, %v711_v63  ;;  %v8959_v7 = vcombine.high %v699_v1, %v703_v3 }
  0x7c   :  { %1460 = vmatprep.subr.bf16.mxu0 %v8965_v8  ;;  %1485 = vmatprep.subr.bf16.mxu1 %v8903_v9  ;;  %v691_v8 = vld [vmem:[%s14558_s6 + $0x318] sm:$0xff] }
  0x7d   :  { %1515 = vmatprep.mubr.bf16.mxu1 %v10187_v60  ;;  %v695_v9 = vld [vmem:[%s14558_s6 + $0x338] sm:$0xff] }
  0x7e   :  { %v8951_v11 = vcombine.high %v691_v8, %v695_v9 }
  0x7f   :  { %1461 = vmatpush2.bf16.msra.mxu0 %v8964_v14  ;;  %1486 = vmatpush1.bf16.msra.mxu1 %v8902_v15  ;;  %v8950_v14 = vcombine.low %v691_v8, %v695_v9  ;;  %v8943_v15 = vcombine.high %v683_v12, %v687_v13 }
  0x80   :  { %1462 = vmatprep.subr.bf16.mxu0 %v8957_v16  ;;  %1487 = vmatprep.subr.bf16.mxu1 %v8895_v5  ;;  %v675_v16 = vld [vmem:[%s14558_s6 + $0x298] sm:$0xff] }
  0x81   :  { %v679_v5 = vld [vmem:[%s14558_s6 + $0x2b8] sm:$0xff] }
  0x82   :  { %v8935_v20 = vcombine.high %v675_v16, %v679_v5 }
  0x83   :  { %1463 = vmatpush2.bf16.msra.mxu0 %v8956_v23  ;;  %1488 = vmatpush1.bf16.msra.mxu1 %v8894_v24  ;;  %v8934_v23 = vcombine.low %v675_v16, %v679_v5  ;;  %v8927_v24 = vcombine.high %v667_v21, %v671_v22 }
  0x84   :  { %1464 = vmatprep.subr.bf16.mxu0 %v8949_v25  ;;  %1489 = vmatprep.subr.bf16.mxu1 %v8887_v26  ;;  %v659_v25 = vld [vmem:[%s14558_s6 + $0x218] sm:$0xff] }
  0x85   :  { %v663_v26 = vld [vmem:[%s14558_s6 + $0x238] sm:$0xff] }
  0x86   :  { %v8919_v28 = vcombine.high %v659_v25, %v663_v26  ;;  %v8918_v29 = vcombine.low %v659_v25, %v663_v26  ;;  %v1653_v25 = vld [vmem:[%s14558_s6 + $0x1e0] sm:$0xff]  ;;  %v1650_v26 = vld [vmem:[%s14558_s6 + $0x1c8] sm:$0xff] }
  0x87   :  { %1465 = vmatpush2.bf16.msra.mxu0 %v8948_v31  ;;  %1490 = vmatpush1.bf16.msra.mxu1 %v8886_v32  ;;  %v10764_v31 = vshrl.u32 %v54_v30, 7  ;;  %v1654_v30 = vld [vmem:[%s14558_s6 + $0x1e8] sm:$0xff] }
  0x88   :  { %1466 = vmatprep.subr.bf16.mxu0 %v8941_v33  ;;  %1491 = vmatprep.subr.bf16.mxu1 %v8879_v18  ;;  %v52_v33 = vld [vmem:[%s14556_s4] sm:$0xf] }
  0x89   :  { %v56_v32 = vsub.s32 0, %v10764_v31  ;;  %v60_v18 = vsub.s32 1, %v10764_v31  ;;  %v14563_v8 = vsub.s32 3, %v10764_v31 }
  0x8b   :  { %1467 = vmatpush2.bf16.msra.mxu0 %v8940_v38  ;;  %1492 = vmatpush1.bf16.msra.mxu1 %v8878_v39  ;;  %v10771_v34 = vrot.slane %v52_v33, %v56_v32  ;;  %v10773_v35 = vrot.slane %v52_v33, %v60_v18  ;;  %v10850_v16 = vrot.slane %v52_v33, %v14563_v8 }
  0x8c   :  { %1468 = vmatprep.subr.bf16.mxu0 %v8933_v40  ;;  %1493 = vmatprep.subr.bf16.mxu1 %v8871_v41 }
  0x8f   :  { %1469 = vmatpush2.bf16.msra.mxu0 %v8932_v46  ;;  %1494 = vmatpush1.bf16.msra.mxu1 %v8870_v47 }
  0x90   :  { %1470 = vmatprep.subr.bf16.mxu0 %v8925_v48  ;;  %1495 = vmatprep.subr.bf16.mxu1 %v8863_v6 }
  0x93   :  { %1471 = vmatpush2.bf16.msra.mxu0 %v8924_v53  ;;  %1496 = vmatpush1.bf16.msra.mxu1 %v8862_v54  ;;  %v10806_v54 = vld [vmem:[%s14557_s5] sm:$0xf] }
  0x94   :  { %1472 = vmatprep.subr.bf16.mxu0 %v8917_v55  ;;  %1497 = vmatprep.subr.bf16.mxu1 %v8855_v2  ;;  %v10831_v3 = vrot.slane %v10806_v54, %v60_v18 }
  0x97   :  { %1473 = vmatpush2.bf16.msra.mxu0 %v8916_v58  ;;  %1498 = vmatpush1.bf16.msra.mxu1 %v8854_v59 }
  0x98   :  { %1499 = vmatprep.subr.bf16.mxu1 %v8975_v61  ;;  %v10821_v61 = vrot.slane %v10806_v54, %v56_v32 }
  0x9a   :  { %1475 = vmatmul.mubr.bf16.vlgmr.msra.gmra.mxu0 %v10187_v60 }
  0x9b   :  { %1500 = vmatpush2.bf16.msra.mxu1 %v8974_v19 }
  0x9c   :  { %1501 = vmatprep.subr.bf16.mxu1 %v8967_v0  ;;  %v14564_v0 = vsub.s32 2, %v10764_v31 }
  0x9e   :  { %v10843_v12 = vrot.slane %v52_v33, %v14564_v0 }
  0x9f   :  { %1502 = vmatpush2.bf16.msra.mxu1 %v8966_v4 }
  0xa0   :  { %1503 = vmatprep.subr.bf16.mxu1 %v8959_v7 }
  0xa3   :  { %1504 = vmatpush2.bf16.msra.mxu1 %v8958_v10 }
  0xa4   :  { %1505 = vmatprep.subr.bf16.mxu1 %v8951_v11 }
  0xa7   :  { %1506 = vmatpush2.bf16.msra.mxu1 %v8950_v14 }
  0xa8   :  { %1507 = vmatprep.subr.bf16.mxu1 %v8943_v15 }
  0xab   :  { %1508 = vmatpush2.bf16.msra.mxu1 %v8942_v17 }
  0xac   :  { %1509 = vmatprep.subr.bf16.mxu1 %v8935_v20 }
  0xaf   :  { %1510 = vmatpush2.bf16.msra.mxu1 %v8934_v23 }
  0xb0   :  { %1511 = vmatprep.subr.bf16.mxu1 %v8927_v24  ;;  %v1649_v24 = vld [vmem:[%s14558_s6 + $0x1c0] sm:$0xff] }
  0xb1   :  { %v10884_v18 = vcombine.low %v1649_v24, %v1653_v25 }
  0xb3   :  { %1512 = vmatpush2.bf16.msra.mxu1 %v8926_v27 }
  0xb4   :  { %1513 = vmatprep.subr.bf16.mxu1 %v8919_v28 }
  0xb7   :  { %1514 = vmatpush2.bf16.msra.mxu1 %v8918_v29  ;;  %v10873_v29 = vcombine.high %v1649_v24, %v1653_v25 }
  0xb9   :  { %2361 = vmatprep.subr.bf16.mxu0 %v10873_v29 }
  0xba   :  { %1516 = vmatmul.mubr.bf16.vlgmr.msra.gmra.mxu1 %v10187_v60  ;;  %2362 = vmatpush1.bf16.msra.mxu0 %v10884_v18 }
  0xca   :  { %v201_v36 = vpop.f32.mrf.mxu1  ;;  %v10775_v37 = vpop.f32.mrf.mxu0 }
  0xcb   :  { %v10778_v60 = vadd.f32 %v201_v36, %v10771_v34  ;;  %v10886_v36 = vcombine.low %v1650_v26, %v1654_v30 }
  0xcc   :  { %v203_v38 = vpop.f32.mrf.mxu1  ;;  %v10780_v39 = vpop.f32.mrf.mxu0 }
  0xcd   :  { %14800 = vst [vmem:[#allocation7_spill] sm:$0xff] %v10778_v60  ;;  %v10783_v40 = vadd.f32 %v203_v38, %v10773_v35 }
  0xce   :  { %v205_v41 = vpop.f32.mrf.mxu1  ;;  %v185_v42 = vpop.f32.mrf.mxu0 }
  0xcf   :  { %14801 = vst [vmem:[#allocation8_spill] sm:$0xff] %v10783_v40  ;;  %v10786_v43 = vadd.f32 %v205_v41, %v10771_v34  ;;  %v10789_v44 = vadd.f32 %v185_v42, %v10771_v34  ;;  %v10889_v42 = vcombine.high %v1650_v26, %v1654_v30  ;;  %v1633_v26 = vld [vmem:[%s14558_s6 + $0x140] sm:$0xff] }
  0xd0   :  { %v207_v45 = vpop.f32.mrf.mxu1  ;;  %v187_v46 = vpop.f32.mrf.mxu0 }
  0xd1   :  { %14802 = vst [vmem:[#allocation9_spill] sm:$0xff] %v10786_v43  ;;  %14803 = vst [vmem:[#allocation10_spill] sm:$0xff] %v10789_v44  ;;  %v10792_v47 = vadd.f32 %v207_v45, %v10773_v35  ;;  %v10795_v48 = vadd.f32 %v187_v46, %v10773_v35  ;;  %2402 = vmatprep.subr.bf16.mxu1 %v10889_v42  ;;  %v1614_v43 = vld [vmem:[%s14558_s6 + $0xa8] sm:$0xff] }
  0xd2   :  { %v211_v6 = vpop.f32.mrf.mxu1  ;;  %v191_v49 = vpop.f32.mrf.mxu0  ;;  %2403 = vmatpush1.bf16.msra.mxu1 %v10886_v36 }
  0xd3   :  { %14804 = vst [vmem:[#allocation11_spill] sm:$0xff] %v10792_v47  ;;  %14805 = vst [vmem:[#allocation12_spill] sm:$0xff] %v10795_v48  ;;  %v10798_v50 = vadd.f32 %v211_v6, %v10771_v34  ;;  %v10801_v51 = vadd.f32 %v191_v49, %v10771_v34  ;;  %v1641_v6 = vld [vmem:[%s14558_s6 + $0x180] sm:$0xff] }
  0xd4   :  { %v213_v52 = vpop.f32.mrf.mxu1  ;;  %v193_v53 = vpop.f32.mrf.mxu0  ;;  %v1645_v49 = vld [vmem:[%s14558_s6 + $0x1a0] sm:$0xff] }
  0xd5   :  { %14806 = vst [vmem:[#allocation13_spill] sm:$0xff] %v10798_v50  ;;  %14807 = vst [vmem:[#allocation14_spill] sm:$0xff] %v10801_v51  ;;  %v10809_v55 = vadd.f32 %v213_v52, %v10773_v35  ;;  %v10812_v2 = vadd.f32 %v193_v53, %v10773_v35  ;;  %v1642_v52 = vld [vmem:[%s14558_s6 + $0x188] sm:$0xff]  ;;  %v1613_v47 = vld [vmem:[%s14558_s6 + $0xa0] sm:$0xff] }
  0xd6   :  { %v215_v56 = vpop.f32.mrf.mxu1  ;;  %v195_v57 = vpop.f32.mrf.mxu0 }
  0xd7   :  { %14808 = vst [vmem:[#allocation15_spill] sm:$0xff] %v10809_v55  ;;  %14809 = vst [vmem:[#allocation16_spill] sm:$0xff] %v10812_v2  ;;  %v10815_v58 = vadd.f32 %v215_v56, %v10771_v34  ;;  %v10818_v59 = vadd.f32 %v195_v57, %v10771_v34  ;;  %v10908_v57 = vcombine.high %v1641_v6, %v1645_v49 }
  0xd8   :  { %v217_v62 = vpop.f32.mrf.mxu1  ;;  %v197_v63 = vpop.f32.mrf.mxu0 }
  0xd9   :  { %14810 = vst [vmem:[#allocation17_spill] sm:$0xff] %v10815_v58  ;;  %14811 = vst [vmem:[#allocation18_spill] sm:$0xff] %v10818_v59  ;;  %v10824_v19 = vadd.f32 %v217_v62, %v10773_v35  ;;  %v10828_v1 = vadd.f32 %v197_v63, %v10773_v35  ;;  %v1646_v62 = vld [vmem:[%s14558_s6 + $0x1a8] sm:$0xff]  ;;  %2363 = vmatprep.subr.bf16.mxu0 %v10908_v57 }
  0xda   :  { %v10833_v4 = vpop.f32.mrf.mxu1  ;;  %v429_v7 = vpop.f32.mrf.mxu0 }
  0xdb   :  { %14812 = vst [vmem:[#allocation19_spill] sm:$0xff] %v10824_v19  ;;  %14813 = vst [vmem:[#allocation20_spill] sm:$0xff] %v10828_v1  ;;  %v10837_v9 = vadd.f32 %v429_v7, %v10821_v61 }
  0xdc   :  { %v10839_v10 = vpop.f32.mrf.mxu1  ;;  %v431_v11 = vpop.f32.mrf.mxu0 }
  0xdd   :  { %14814 = vst [vmem:[#allocation21_spill] sm:$0xff] %v10837_v9  ;;  %v10846_v13 = vadd.f32 %v431_v11, %v10831_v3  ;;  %v10920_v11 = vcombine.low %v1641_v6, %v1645_v49  ;;  %v1638_v6 = vld [vmem:[%s14558_s6 + $0x168] sm:$0xff] }
  0xde   :  { %v258_v14 = vpop.f32.mrf.mxu1  ;;  %v433_v15 = vpop.f32.mrf.mxu0 }
  0xdf   :  { %14815 = vst [vmem:[#allocation22_spill] sm:$0xff] %v10846_v13  ;;  %v10853_v5 = vadd.f32 %v258_v14, %v10843_v12  ;;  %v10856_v17 = vadd.f32 %v433_v15, %v10821_v61  ;;  %v10922_v14 = vcombine.low %v1642_v52, %v1646_v62  ;;  %2364 = vmatpush1.bf16.msra.mxu0 %v10920_v11 }
  0xe0   :  { %v260_v20 = vpop.f32.mrf.mxu1  ;;  %v435_v21 = vpop.f32.mrf.mxu0 }
  0xe1   :  { %14816 = vst [vmem:[#allocation23_spill] sm:$0xff] %v10853_v5  ;;  %14817 = vst [vmem:[#allocation24_spill] sm:$0xff] %v10856_v17  ;;  %v10859_v22 = vadd.f32 %v260_v20, %v10850_v16  ;;  %v10862_v23 = vadd.f32 %v435_v21, %v10831_v3  ;;  %v10925_v21 = vcombine.high %v1642_v52, %v1646_v62 }
  0xe2   :  { %v264_v27 = vpop.f32.mrf.mxu1  ;;  %v439_v28 = vpop.f32.mrf.mxu0 }
  0xe3   :  { %14818 = vst [vmem:[#allocation25_spill] sm:$0xff] %v10859_v22  ;;  %14819 = vst [vmem:[#allocation26_spill] sm:$0xff] %v10862_v23  ;;  %v10879_v32 = vadd.f32 %v264_v27, %v10843_v12  ;;  %v10882_v33 = vadd.f32 %v439_v28, %v10821_v61  ;;  %v1637_v27 = vld [vmem:[%s14558_s6 + $0x160] sm:$0xff]  ;;  %v1634_v28 = vld [vmem:[%s14558_s6 + $0x148] sm:$0xff]  ;;  %2404 = vmatprep.subr.bf16.mxu1 %v10925_v21 }
  0xe4   :  { %v266_v38 = vpop.f32.mrf.mxu1  ;;  %v441_v41 = vpop.f32.mrf.mxu0  ;;  %2405 = vmatpush1.bf16.msra.mxu1 %v10922_v14 }
  0xe5   :  { %14820 = vst [vmem:[#allocation27_spill] sm:$0xff] %v10879_v32  ;;  %14821 = vst [vmem:[#allocation28_spill] sm:$0xff] %v10882_v33  ;;  %v10892_v45 = vadd.f32 %v266_v38, %v10850_v16  ;;  %v10895_v46 = vadd.f32 %v441_v41, %v10831_v3  ;;  %v10944_v41 = vcombine.high %v1633_v26, %v1637_v27 }
  0xe6   :  { %v268_v53 = vpop.f32.mrf.mxu1  ;;  %v443_v56 = vpop.f32.mrf.mxu0 }
  0xe7   :  { %14822 = vst [vmem:[#allocation29_spill] sm:$0xff] %v10892_v45  ;;  %14823 = vst [vmem:[#allocation30_spill] sm:$0xff] %v10895_v46  ;;  %v10914_v63 = vadd.f32 %v268_v53, %v10843_v12  ;;  %v10917_v7 = vadd.f32 %v443_v56, %v10821_v61  ;;  %v10956_v53 = vcombine.low %v1633_v26, %v1637_v27  ;;  %2365 = vmatprep.subr.bf16.mxu0 %v10944_v41  ;;  %v1625_v26 = vld [vmem:[%s14558_s6 + $0x100] sm:$0xff] }
  0xe8   :  { %v270_v15 = vpop.f32.mrf.mxu1  ;;  %v445_v20 = vpop.f32.mrf.mxu0  ;;  %v10958_v56 = vcombine.low %v1634_v28, %v1638_v6  ;;  %v1629_v27 = vld [vmem:[%s14558_s6 + $0x120] sm:$0xff] }
  0xe9   :  { %14824 = vst [vmem:[#allocation31_spill] sm:$0xff] %v10914_v63  ;;  %14825 = vst [vmem:[#allocation32_spill] sm:$0xff] %v10917_v7  ;;  %v10928_v24 = vadd.f32 %v270_v15, %v10850_v16  ;;  %v10931_v25 = vadd.f32 %v445_v20, %v10831_v3  ;;  %v10961_v20 = vcombine.high %v1634_v28, %v1638_v6  ;;  %2366 = vmatpush1.bf16.msra.mxu0 %v10956_v53  ;;  %v1626_v28 = vld [vmem:[%s14558_s6 + $0x108] sm:$0xff] }
  0xea   :  { %v274_v30 = vpop.f32.mrf.mxu1  ;;  %v449_v38 = vpop.f32.mrf.mxu0  ;;  %v10992_v9 = vcombine.low %v1625_v26, %v1629_v27 }
  0xeb   :  { %14826 = vst [vmem:[#allocation33_spill] sm:$0xff] %v10928_v24  ;;  %14827 = vst [vmem:[#allocation34_spill] sm:$0xff] %v10931_v25  ;;  %v10950_v49 = vadd.f32 %v274_v30, %v10843_v12  ;;  %v10953_v52 = vadd.f32 %v449_v38, %v10821_v61  ;;  %2406 = vmatprep.subr.bf16.mxu1 %v10961_v20 }
  0xec   :  { %v276_v62 = vpop.f32.mrf.mxu1  ;;  %v451_v15 = vpop.f32.mrf.mxu0  ;;  %2407 = vmatpush1.bf16.msra.mxu1 %v10958_v56 }
  0xed   :  { %14828 = vst [vmem:[#allocation35_spill] sm:$0xff] %v10950_v49  ;;  %14829 = vst [vmem:[#allocation36_spill] sm:$0xff] %v10953_v52  ;;  %v10964_v8 = vadd.f32 %v276_v62, %v10850_v16  ;;  %v10967_v30 = vadd.f32 %v451_v15, %v10831_v3  ;;  %v10980_v62 = vcombine.high %v1625_v26, %v1629_v27  ;;  %v1630_v15 = vld [vmem:[%s14558_s6 + $0x128] sm:$0xff]  ;;  %v1617_v26 = vld [vmem:[%s14558_s6 + $0xc0] sm:$0xff] }
  0xee   :  { %v278_v38 = vpop.f32.mrf.mxu1  ;;  %v453_v6 = vpop.f32.mrf.mxu0  ;;  %v10994_v19 = vcombine.low %v1626_v28, %v1630_v15  ;;  %v10997_v17 = vcombine.high %v1626_v28, %v1630_v15  ;;  %v1621_v27 = vld [vmem:[%s14558_s6 + $0xe0] sm:$0xff]  ;;  %v1618_v28 = vld [vmem:[%s14558_s6 + $0xc8] sm:$0xff] }
  0xef   :  { %14830 = vst [vmem:[#allocation37_spill] sm:$0xff] %v10964_v8  ;;  %14831 = vst [vmem:[#allocation38_spill] sm:$0xff] %v10967_v30  ;;  %v10986_v0 = vadd.f32 %v278_v38, %v10843_v12  ;;  %v10989_v13 = vadd.f32 %v453_v6, %v10821_v61  ;;  %2367 = vmatprep.subr.bf16.mxu0 %v10980_v62  ;;  %v1622_v15 = vld [vmem:[%s14558_s6 + $0xe8] sm:$0xff]  ;;  %v11028_v33 = vcombine.low %v1617_v26, %v1621_v27 }
  0xf0   :  { %v280_v58 = vpop.f32.mrf.mxu1  ;;  %v455_v23 = vpop.f32.mrf.mxu0  ;;  %2368 = vmatpush1.bf16.msra.mxu0 %v10992_v9  ;;  %2408 = vmatprep.subr.bf16.mxu1 %v10997_v17 }
  0xf1   :  { %14832 = vst [vmem:[#allocation39_spill] sm:$0xff] %v10986_v0  ;;  %14833 = vst [vmem:[#allocation40_spill] sm:$0xff] %v10989_v13  ;;  %v11000_v55 = vadd.f32 %v280_v58, %v10850_v16  ;;  %v11003_v38 = vadd.f32 %v455_v23, %v10831_v3  ;;  %v11016_v23 = vcombine.high %v1617_v26, %v1621_v27  ;;  %2409 = vmatpush1.bf16.msra.mxu1 %v10994_v19 }
  0xf2   :  { %v284_v6 = vpop.f32.mrf.mxu1  ;;  %v459_v58 = vpop.f32.mrf.mxu0  ;;  %v11030_v0 = vcombine.low %v1618_v28, %v1622_v15  ;;  %v11042_v26 = vcombine.high %v1618_v28, %v1622_v15 }
  0xf3   :  { %14834 = vst [vmem:[#allocation41_spill] sm:$0xff] %v11000_v55  ;;  %14835 = vst [vmem:[#allocation42_spill] sm:$0xff] %v11003_v38  ;;  %v11022_v50 = vadd.f32 %v284_v6, %v10843_v12  ;;  %v11025_v46 = vadd.f32 %v459_v58, %v10821_v61  ;;  %v1609_v55 = vld [vmem:[%s14558_s6 + $0x80] sm:$0xff]  ;;  %v1610_v6 = vld [vmem:[%s14558_s6 + $0x88] sm:$0xff]  ;;  %2369 = vmatprep.subr.bf16.mxu0 %v11016_v23 }
  0xf4   :  { %v286_v58 = vpop.f32.mrf.mxu1  ;;  %v11044_v27 = vcombine.high %v1609_v55, %v1613_v47  ;;  %2370 = vmatpush1.bf16.msra.mxu0 %v11028_v33  ;;  %v11056_v49 = vcombine.low %v1609_v55, %v1613_v47  ;;  %v11058_v8 = vcombine.high %v1610_v6, %v1614_v43  ;;  %2410 = vmatprep.subr.bf16.mxu1 %v11042_v26 }
  0xf5   :  { %14836 = vst [vmem:[#allocation43_spill] sm:$0xff] %v11022_v50  ;;  %14837 = vst [vmem:[#allocation44_spill] sm:$0xff] %v11025_v46  ;;  %v461_v50 = vpop.f32.mrf.mxu0  ;;  %v11050_v25 = vadd.f32 %v286_v58, %v10850_v16  ;;  %v14841_v58 = vsub.s32 2, %v10764_v31  ;;  %2411 = vmatpush1.bf16.msra.mxu1 %v11030_v0  ;;  %v11074_v47 = vcombine.low %v1610_v6, %v1614_v43  ;;  %v1601_v43 = vld [vmem:[%s14558_s6 + $0x40] sm:$0xff] }
  0xf6   :  { %v11053_v7 = vadd.f32 %v461_v50, %v10831_v3  ;;  %v288_v28 = vpop.f32.mrf.mxu1  ;;  %2371 = vmatprep.subr.bf16.mxu0 %v11044_v27  ;;  %2412 = vmatprep.subr.bf16.mxu1 %v11058_v8 }
  0xf7   :  { %14838 = vst [vmem:[#allocation45_spill] sm:$0xff] %v11050_v25  ;;  %v463_v15 = vpop.f32.mrf.mxu0  ;;  %v11063_v40 = vadd.f32 %v288_v28, %v10843_v12  ;;  %v11068_v50 = vrot.slane %v10806_v54, %v14841_v58  ;;  %v14843_v28 = vsub.s32 3, %v10764_v31  ;;  %v1602_v31 = vld [vmem:[%s14558_s6 + $0x48] sm:$0xff] }
  0xf8   :  { %14839 = vst [vmem:[#allocation46_spill] sm:$0xff] %v11053_v7  ;;  %v11071_v25 = vadd.f32 %v463_v15, %v10821_v61  ;;  %v290_v55 = vpop.f32.mrf.mxu1  ;;  %2372 = vmatpush1.bf16.msra.mxu0 %v11056_v49  ;;  %v1605_v61 = vld [vmem:[%s14558_s6 + $0x60] sm:$0xff] }
  0xf9   :  { %14840 = vst [vmem:[#allocation47_spill] sm:$0xff] %v11063_v40  ;;  %v465_v60 = vpop.f32.mrf.mxu0  ;;  %v11078_v30 = vadd.f32 %v290_v55, %v10850_v16  ;;  %v11083_v40 = vrot.slane %v10806_v54, %v14843_v28  ;;  %v11098_v54 = vcombine.high %v1601_v43, %v1605_v61  ;;  %2413 = vmatpush1.bf16.msra.mxu1 %v11074_v47 }
  0xfa   :  { %v11086_v58 = vadd.f32 %v465_v60, %v10831_v3  ;;  %v502_v6 = vpop.f32.mrf.mxu1  ;;  %v1606_v60 = vld [vmem:[%s14558_s6 + $0x68] sm:$0xff]  ;;  %v11107_v15 = vcombine.low %v1601_v43, %v1605_v61  ;;  %v1597_v43 = vld [vmem:[%s14558_s6 + $0x20] sm:$0xff] }
  0xfb   :  { %14842 = vst [vmem:[#allocation48_spill] sm:$0xff] %v11078_v30  ;;  %v11104_v3 = vadd.f32 %v502_v6, %v11068_v50  ;;  %v11109_v55 = vcombine.low %v1602_v31, %v1606_v60  ;;  %v11111_v28 = vcombine.high %v1602_v31, %v1606_v60  ;;  %2373 = vmatprep.subr.bf16.mxu0 %v11098_v54  ;;  %v1593_v6 = vld [vmem:[%s14558_s6] sm:$0xff]  ;;  %v1594_v61 = vld [vmem:[%s14558_s6 + $0x8] sm:$0xff] }
  0xfc   :  { %v504_v30 = vpop.f32.mrf.mxu1  ;;  %2374 = vmatpush1.bf16.msra.mxu0 %v11107_v15  ;;  %v11128_v60 = vcombine.high %v1593_v6, %v1597_v43 }
  0xfd   :  { %14844 = vst [vmem:[#allocation49_spill] sm:$0xff] %v11104_v3  ;;  %v11115_v52 = vadd.f32 %v504_v30, %v11083_v40  ;;  %2414 = vmatprep.subr.bf16.mxu1 %v11111_v28  ;;  %v1598_v30 = vld [vmem:[%s14558_s6 + $0x28] sm:$0xff] }
  0xfe   :  { %v506_v31 = vpop.f32.mrf.mxu1  ;;  %2415 = vmatpush1.bf16.msra.mxu1 %v11109_v55  ;;  %v11139_v63 = vcombine.low %v1594_v61, %v1598_v30  ;;  %v11141_v24 = vcombine.high %v1594_v61, %v1598_v30  ;;  %2375 = vmatprep.subr.bf16.mxu0 %v11128_v60 }
  0xff   :  { %14845 = vst [vmem:[#allocation50_spill] sm:$0xff] %v11115_v52  ;;  %v11134_v3 = vadd.f32 %v506_v31, %v11068_v50  ;;  %v11137_v52 = vcombine.low %v1593_v6, %v1597_v43  ;;  %v1713_v31 = vld [vmem:[%s14558_s6 + $0x3c0] sm:$0xff]  ;;  %v1714_v43 = vld [vmem:[%s14558_s6 + $0x3c8] sm:$0xff] }
 0x100   :  { %v508_v1 = vpop.f32.mrf.mxu1  ;;  %2416 = vmatprep.subr.bf16.mxu1 %v11141_v24  ;;  %v1717_v6 = vld [vmem:[%s14558_s6 + $0x3e0] sm:$0xff] }
 0x101   :  { %14846 = vst [vmem:[#allocation51_spill] sm:$0xff] %v11134_v3  ;;  %v11145_v59 = vadd.f32 %v508_v1, %v11083_v40  ;;  %2376 = vmatpush1.bf16.msra.mxu0 %v11137_v52  ;;  %v11158_v30 = vcombine.high %v1713_v31, %v1717_v6  ;;  %v1718_v1 = vld [vmem:[%s14558_s6 + $0x3e8] sm:$0xff] }
 0x102   :  { %v512_v61 = vpop.f32.mrf.mxu1  ;;  %2417 = vmatpush1.bf16.msra.mxu1 %v11139_v63  ;;  %v11169_v38 = vcombine.low %v1714_v43, %v1718_v1  ;;  %v11171_v13 = vcombine.high %v1714_v43, %v1718_v1 }
 0x103   :  { %14847 = vst [vmem:[#allocation52_spill] sm:$0xff] %v11145_v59  ;;  %v11164_v3 = vadd.f32 %v512_v61, %v11068_v50  ;;  %v11167_v59 = vcombine.low %v1713_v31, %v1717_v6  ;;  %2377 = vmatprep.subr.bf16.mxu0 %v11158_v30  ;;  %v1705_v61 = vld [vmem:[%s14558_s6 + $0x380] sm:$0xff]  ;;  %v1706_v6 = vld [vmem:[%s14558_s6 + $0x388] sm:$0xff] }
 0x104   :  { %14850 = vst [vmem:[#allocation55_spill] sm:$0xff] %v11169_v38  ;;  %v514_v32 = vpop.f32.mrf.mxu1  ;;  %2418 = vmatprep.subr.bf16.mxu1 %v11171_v13  ;;  %v1709_v31 = vld [vmem:[%s14558_s6 + $0x3a0] sm:$0xff] }
 0x105   :  { %14848 = vst [vmem:[#allocation53_spill] sm:$0xff] %v11164_v3  ;;  %14849 = vst [vmem:[#allocation54_spill] sm:$0xff] %v11167_v59  ;;  %v11175_v45 = vadd.f32 %v514_v32, %v11083_v40  ;;  %2378 = vmatpush2.bf16.msra.mxu0 %v11167_v59  ;;  %v11188_v1 = vcombine.high %v1705_v61, %v1709_v31  ;;  %v1710_v32 = vld [vmem:[%s14558_s6 + $0x3a8] sm:$0xff] }
 0x106   :  { %v516_v43 = vpop.f32.mrf.mxu1  ;;  %2419 = vmatpush2.bf16.msra.mxu1 %v11169_v38  ;;  %v11199_v2 = vcombine.low %v1706_v6, %v1710_v32  ;;  %v11201_v51 = vcombine.high %v1706_v6, %v1710_v32 }
 0x107   :  { %14851 = vst [vmem:[#allocation56_spill] sm:$0xff] %v11175_v45  ;;  %14852 = vst [vmem:[#allocation57_spill] sm:$0xff] %v11188_v1  ;;  %v11194_v3 = vadd.f32 %v516_v43, %v11068_v50  ;;  %v11197_v45 = vcombine.low %v1705_v61, %v1709_v31  ;;  %2379 = vmatprep.subr.bf16.mxu0 %v11188_v1  ;;  %v1697_v43 = vld [vmem:[%s14558_s6 + $0x340] sm:$0xff]  ;;  %v1698_v31 = vld [vmem:[%s14558_s6 + $0x348] sm:$0xff] }
 0x108   :  { %14855 = vst [vmem:[#allocation60_spill] sm:$0xff] %v11199_v2  ;;  %14856 = vst [vmem:[#allocation61_spill] sm:$0xff] %v11201_v51  ;;  %v518_v7 = vpop.f32.mrf.mxu1  ;;  %2420 = vmatprep.subr.bf16.mxu1 %v11201_v51  ;;  %v1701_v61 = vld [vmem:[%s14558_s6 + $0x360] sm:$0xff]  ;;  %v1670_v1 = vld [vmem:[%s14558_s6 + $0x268] sm:$0xff] }
 0x109   :  { %14853 = vst [vmem:[#allocation58_spill] sm:$0xff] %v11194_v3  ;;  %14854 = vst [vmem:[#allocation59_spill] sm:$0xff] %v11197_v45  ;;  %v11205_v46 = vadd.f32 %v518_v7, %v11083_v40  ;;  %2380 = vmatpush2.bf16.msra.mxu0 %v11197_v45  ;;  %v11218_v32 = vcombine.high %v1697_v43, %v1701_v61  ;;  %v1702_v7 = vld [vmem:[%s14558_s6 + $0x368] sm:$0xff]  ;;  %v1665_v45 = vld [vmem:[%s14558_s6 + $0x240] sm:$0xff] }
 0x10a   :  { %v522_v6 = vpop.f32.mrf.mxu1  ;;  %2421 = vmatpush2.bf16.msra.mxu1 %v11199_v2  ;;  %v11229_v5 = vcombine.low %v1698_v31, %v1702_v7  ;;  %v11231_v22 = vcombine.high %v1698_v31, %v1702_v7 }
 0x10b   :  { %14857 = vst [vmem:[#allocation62_spill] sm:$0xff] %v11205_v46  ;;  %14858 = vst [vmem:[#allocation63_spill] sm:$0xff] %v11218_v32  ;;  %v11224_v3 = vadd.f32 %v522_v6, %v11068_v50  ;;  %v11227_v46 = vcombine.low %v1697_v43, %v1701_v61  ;;  %2381 = vmatprep.subr.bf16.mxu0 %v11218_v32  ;;  %v1689_v6 = vld [vmem:[%s14558_s6 + $0x300] sm:$0xff]  ;;  %v1690_v61 = vld [vmem:[%s14558_s6 + $0x308] sm:$0xff] }
 0x10c   :  { %14861 = vst [vmem:[#allocation66_spill] sm:$0xff] %v11229_v5  ;;  %14862 = vst [vmem:[#allocation67_spill] sm:$0xff] %v11231_v22  ;;  %v524_v48 = vpop.f32.mrf.mxu1  ;;  %2422 = vmatprep.subr.bf16.mxu1 %v11231_v22  ;;  %v1693_v43 = vld [vmem:[%s14558_s6 + $0x320] sm:$0xff] }
 0x10d   :  { %14859 = vst [vmem:[#allocation64_spill] sm:$0xff] %v11224_v3  ;;  %14860 = vst [vmem:[#allocation65_spill] sm:$0xff] %v11227_v46  ;;  %v11235_v44 = vadd.f32 %v524_v48, %v11083_v40  ;;  %2382 = vmatpush2.bf16.msra.mxu0 %v11227_v46  ;;  %v11248_v7 = vcombine.high %v1689_v6, %v1693_v43  ;;  %v1694_v48 = vld [vmem:[%s14558_s6 + $0x328] sm:$0xff] }
 0x10e   :  { %v526_v31 = vpop.f32.mrf.mxu1  ;;  %2423 = vmatpush2.bf16.msra.mxu1 %v11229_v5  ;;  %v11259_v46 = vcombine.low %v1690_v61, %v1694_v48  ;;  %v11261_v22 = vcombine.high %v1690_v61, %v1694_v48  ;;  %v1678_v5 = vld [vmem:[%s14558_s6 + $0x2a8] sm:$0xff] }
 0x10f   :  { %14863 = vst [vmem:[#allocation68_spill] sm:$0xff] %v11235_v44  ;;  %14864 = vst [vmem:[#allocation69_spill] sm:$0xff] %v11248_v7  ;;  %v11254_v3 = vadd.f32 %v526_v31, %v11068_v50  ;;  %v11257_v44 = vcombine.low %v1689_v6, %v1693_v43  ;;  %2383 = vmatprep.subr.bf16.mxu0 %v11248_v7  ;;  %v1681_v31 = vld [vmem:[%s14558_s6 + $0x2c0] sm:$0xff]  ;;  %v1682_v43 = vld [vmem:[%s14558_s6 + $0x2c8] sm:$0xff] }
 0x110   :  { %14867 = vst [vmem:[#allocation72_spill] sm:$0xff] %v11259_v46  ;;  %14868 = vst [vmem:[#allocation73_spill] sm:$0xff] %v11261_v22  ;;  %v528_v32 = vpop.f32.mrf.mxu1  ;;  %2424 = vmatprep.subr.bf16.mxu1 %v11261_v22  ;;  %v1685_v6 = vld [vmem:[%s14558_s6 + $0x2e0] sm:$0xff] }
 0x111   :  { %14865 = vst [vmem:[#allocation70_spill] sm:$0xff] %v11254_v3  ;;  %14866 = vst [vmem:[#allocation71_spill] sm:$0xff] %v11257_v44  ;;  %v11265_v2 = vadd.f32 %v528_v32, %v11083_v40  ;;  %2384 = vmatpush2.bf16.msra.mxu0 %v11257_v44  ;;  %v11278_v48 = vcombine.low %v1681_v31, %v1685_v6  ;;  %v11280_v32 = vcombine.high %v1681_v31, %v1685_v6  ;;  %v1686_v3 = vld [vmem:[%s14558_s6 + $0x2e8] sm:$0xff]  ;;  %v1677_v44 = vld [vmem:[%s14558_s6 + $0x2a0] sm:$0xff] }
 0x112   :  { %v532_v61 = vpop.f32.mrf.mxu1  ;;  %2425 = vmatpush2.bf16.msra.mxu1 %v11259_v46  ;;  %v11295_v7 = vcombine.low %v1682_v43, %v1686_v3  ;;  %v11297_v31 = vcombine.high %v1682_v43, %v1686_v3  ;;  %v1674_v6 = vld [vmem:[%s14558_s6 + $0x288] sm:$0xff]  ;;  %v1669_v3 = vld [vmem:[%s14558_s6 + $0x260] sm:$0xff] }
 0x113   :  { %14869 = vst [vmem:[#allocation74_spill] sm:$0xff] %v11265_v2  ;;  %14870 = vst [vmem:[#allocation75_spill] sm:$0xff] %v11278_v48  ;;  %v1673_v2 = vld [vmem:[%s14558_s6 + $0x280] sm:$0xff]  ;;  %v11292_v22 = vadd.f32 %v532_v61, %v11068_v50  ;;  %2385 = vmatprep.subr.bf16.mxu0 %v11280_v32  ;;  %v11311_v46 = vcombine.high %v1674_v6, %v1678_v5  ;;  %v11330_v59 = vcombine.high %v1665_v45, %v1669_v3 }
 0x114   :  { %14871 = vst [vmem:[#allocation76_spill] sm:$0xff] %v11280_v32  ;;  %14873 = vst [vmem:[#allocation78_spill] sm:$0xff] %v11295_v7  ;;  %v534_v61 = vpop.f32.mrf.mxu1  ;;  %2426 = vmatprep.subr.bf16.mxu1 %v11297_v31  ;;  %v11321_v51 = vcombine.low %v1673_v2, %v1677_v44  ;;  %v1666_v32 = vld [vmem:[%s14558_s6 + $0x248] sm:$0xff] }
 0x115   :  { %14872 = vst [vmem:[#allocation77_spill] sm:$0xff] %v11292_v22  ;;  %14874 = vst [vmem:[#allocation79_spill] sm:$0xff] %v11297_v31  ;;  %v11309_v22 = vcombine.high %v1673_v2, %v1677_v44  ;;  %v11317_v43 = vadd.f32 %v534_v61, %v11083_v40  ;;  %2386 = vmatpush2.bf16.msra.mxu0 %v11278_v48  ;;  %v11336_v44 = vcombine.low %v1674_v6, %v1678_v5  ;;  %v1657_v2 = vld [vmem:[%s14558_s6 + $0x200] sm:$0xff]  ;;  %v1662_v6 = vld [vmem:[%s14558_s6 + $0x228] sm:$0xff] }
 0x116   :  { %14876 = vst [vmem:[#allocation81_spill] sm:$0xff] %v11311_v46  ;;  %14878 = vst [vmem:[#allocation83_spill] sm:$0xff] %v11321_v51  ;;  %v536_v38 = vpop.f32.mrf.mxu1  ;;  %2427 = vmatpush2.bf16.msra.mxu1 %v11295_v7  ;;  %v11351_v5 = vcombine.low %v1665_v45, %v1669_v3 }
 0x117   :  { %14875 = vst [vmem:[#allocation80_spill] sm:$0xff] %v11309_v22  ;;  %14877 = vst [vmem:[#allocation82_spill] sm:$0xff] %v11317_v43  ;;  %2387 = vmatprep.subr.bf16.mxu0 %v11309_v22  ;;  %v11333_v61 = vadd.f32 %v536_v38, %v11068_v50  ;;  %v1661_v43 = vld [vmem:[%s14558_s6 + $0x220] sm:$0xff]  ;;  %2428 = vmatprep.subr.bf16.mxu1 %v11311_v46  ;;  %v11345_v22 = vcombine.high %v1666_v32, %v1670_v1  ;;  %v1658_v50 = vld [vmem:[%s14558_s6 + $0x208] sm:$0xff] }
 0x118   :  { %14879 = vst [vmem:[#allocation84_spill] sm:$0xff] %v11330_v59  ;;  %v538_v48 = vpop.f32.mrf.mxu1  ;;  %14880 = vst [vmem:[#allocation85_spill] sm:$0xff] %v11351_v5  ;;  %v11360_v46 = vcombine.high %v1657_v2, %v1661_v43  ;;  %v11366_v45 = vcombine.high %v1658_v50, %v1662_v6  ;;  %v11369_v3 = vcombine.low %v1657_v2, %v1661_v43 }
 0x119   :  { %v11348_v38 = vadd.f32 %v538_v48, %v11083_v40  ;;  %2388 = vmatpush2.bf16.msra.mxu0 %v11321_v51  ;;  %v11363_v40 = vcombine.low %v1666_v32, %v1670_v1  ;;  %v1651_v1 = vld [vmem:[%s14558_s6 + $0x1d0] sm:$0xff] }
 0x11a   :  { %v1394_v7 = vpop.f32.mrf.mxu0  ;;  %2389 = vmatprep.subr.bf16.mxu0 %v11330_v59  ;;  %14881 = vst [vmem:[#allocation86_spill] sm:$0xff] %v11360_v46  ;;  %2429 = vmatpush2.bf16.msra.mxu1 %v11336_v44  ;;  %14883 = vst [vmem:[#allocation88_spill] sm:$0xff] %v11366_v45  ;;  %v11373_v59 = vcombine.low %v1658_v50, %v1662_v6  ;;  %v1655_v32 = vld [vmem:[%s14558_s6 + $0x1f0] sm:$0xff] }
 0x11b   :  { %14882 = vst [vmem:[#allocation87_spill] sm:$0xff] %v11363_v40  ;;  %2430 = vmatprep.subr.bf16.mxu1 %v11345_v22  ;;  %14884 = vst [vmem:[#allocation89_spill] sm:$0xff] %v11369_v3  ;;  %v11386_v43 = vcombine.high %v1651_v1, %v1655_v32  ;;  %v11392_v2 = vcombine.low %v1651_v1, %v1655_v32  ;;  %v257_v32 = vadd.f32 %v10839_v10, %v10850_v16 }
 0x11c   :  { %v1396_v48 = vpop.f32.mrf.mxu0  ;;  %14885 = vst [vmem:[#allocation90_spill] sm:$0xff] %v11373_v59 }
 0x11d   :  { %2390 = vmatpush2.bf16.msra.mxu0 %v11351_v5  ;;  %14886 = vst [vmem:[#allocation91_spill] sm:$0xff] %v11386_v43 }
 0x11e   :  { %v1398_v51 = vpop.f32.mrf.mxu0  ;;  %2391 = vmatprep.subr.bf16.mxu0 %v11360_v46  ;;  %2431 = vmatpush2.bf16.msra.mxu1 %v11363_v40 }
 0x11f   :  { %2432 = vmatprep.subr.bf16.mxu1 %v11366_v45  ;;  %v1652_v51 = vld [vmem:[%s14558_s6 + $0x1d8] sm:$0xff]  ;;  %v182_v45 = vadd.f32 %v10775_v37, %v10771_v34 }
 0x120   :  { %v1399_v31 = vpop.f32.mrf.mxu0 }
 0x121   :  { %2392 = vmatpush2.bf16.msra.mxu0 %v11369_v3  ;;  %v1656_v31 = vld [vmem:[%s14558_s6 + $0x1f8] sm:$0xff]  ;;  %v184_v3 = vadd.f32 %v10780_v39, %v10773_v35  ;;  %v1524_v40 = vadd.f32 %v1394_v7, %v182_v45 }
 0x122   :  { %2433 = vmatpush2.bf16.msra.mxu1 %v11373_v59  ;;  %v11394_v50 = vcombine.low %v1652_v51, %v1656_v31  ;;  %v11396_v6 = vcombine.high %v1652_v51, %v1656_v31  ;;  %2443 = vmatprep.subr.bf16.mxu0 %v11386_v43 }
 0x123   :  { %v1525_v46 = vadd.f32 %v1396_v48, %v184_v3  ;;  %v1528_v59 = vmul.f32 0.5, %v1524_v40 }
 0x124   :  { %14887 = vst [vmem:[#allocation92_spill] sm:$0xff] %v11396_v6  ;;  %2484 = vmatprep.subr.bf16.mxu1 %v11396_v6  ;;  %v255_v6 = vadd.f32 %v10833_v4, %v10843_v12 }
 0x125   :  { %v1532_v5 = vmul.f32 0.5, %v1525_v46 }
 0x127   :  { %10002 = vtanh.f32 %v1532_v5 }
 0x128   :  { %10004 = vtanh.f32 %v1528_v59 }
 0x134   :  { %v10003_v34 = vpop.eup %10002 }
 0x135   :  { %v10005_v37 = vpop.eup %10004  ;;  %v1534_v7 = vmul.f32 0.5, %v10003_v34 }
 0x136   :  { %v1530_v40 = vmul.f32 0.5, %v10005_v37 }
 0x137   :  { %v1535_v5 = vadd.f32 0.5, %v1534_v7 }
 0x138   :  { %v1531_v59 = vadd.f32 0.5, %v1530_v40 }
 0x139   :  { %v1541_v45 = vmul.f32 0.0, %v1535_v5 }
 0x13a   :  { %v1435_v1 = vpop.f32.mrf.mxu1 }
 0x13b   :  { %v1526_v39 = vadd.f32 %v1435_v1, %v255_v6  ;;  %v11411_v1 = vpop.permute.xlu0 %575 }
 0x13c   :  { %v1437_v51 = vpop.f32.mrf.mxu1  ;;  %vm1568_vm1 = vcmp.gt.s32.totalorder %v11411_v1, 0  ;;  %vm1569_vm2 = vcmp.gt.s32.totalorder %v11411_v1, 7  ;;  %vm2569_vm5 = vcmp.gt.s32.totalorder %v11411_v1, 1  ;;  %vm2570_vm6 = vcmp.gt.s32.totalorder %v11411_v1, 6 }
 0x13d   :  { %v1527_v31 = vadd.f32 %v1437_v51, %v257_v32  ;;  %v1536_v46 = vmul.f32 0.5, %v1526_v39  ;;  %vm11434_vm3 = vmpackc.low %vm1569_vm2, %vm1569_vm2  ;;  %vm3575_vm7 = vcmp.gt.s32.totalorder %v11411_v1, 2  ;;  %vm3576_vm8 = vcmp.gt.s32.totalorder %v11411_v1, 5 }
 0x13e   :  { %v1439_v43 = vpop.f32.mrf.mxu1  ;;  %vm11453_vm4 = vmpackc.low %vm1568_vm1, %vm1568_vm1  ;;  %vm4581_vm9 = vcmp.gt.s32.totalorder %v11411_v1, 3  ;;  %vm4582_vm10 = vcmp.gt.s32.totalorder %v11411_v1, 4 }
 0x13f   :  { %10006 = vtanh.f32 %v1527_v31 }
 0x140   :  { %v1440_v35 = vpop.f32.mrf.mxu1  ;;  %10008 = vtanh.f32 %v1536_v46 }
 0x14c   :  { %v10007_v48 = vpop.eup %10006 }
 0x14d   :  { %v1542_v10 = vmul.f32 %v10007_v48, %v1531_v59  ;;  %v10009_v3 = vpop.eup %10008 }
 0x14e   :  { %v1538_v4 = vmul.f32 0.5, %v10009_v3 }
 0x14f   :  { %v11408_v16 = vadd.f32 %v1542_v10, %v1541_v45 }
 0x150   :  { %v1539_v6 = vadd.f32 0.5, %v1538_v4 }
 0x151   :  { %10010 = vtanh.f32 %v11408_v16 }
 0x15a   :  { %v1476_v12 = vpop.f32.mrf.mxu0 }
 0x15b   :  { %v1546_v7 = vadd.f32 %v1476_v12, %v11071_v25 }
 0x15c   :  { %v1478_v43 = vpop.f32.mrf.mxu0 }
 0x15d   :  { %v1547_v37 = vadd.f32 %v1478_v43, %v11086_v58  ;;  %v1550_v40 = vmul.f32 0.5, %v1546_v7 }
 0x15e   :  { %v1480_v32 = vpop.f32.mrf.mxu0  ;;  %v10011_v51 = vpop.eup %10010 }
 0x15f   :  { %v1545_v35 = vmul.f32 %v10011_v51, %v1539_v6  ;;  %v1554_v46 = vmul.f32 0.5, %v1547_v37 }
 0x160   :  { %v1481_v31 = vpop.f32.mrf.mxu0 }
 0x161   :  { %v11416_v39 = vsel %vm1568_vm1, %v1545_v35, 0.0  ;;  %10012 = vtanh.f32 %v1554_v46 }
 0x162   :  { %v1574_v34 = vpack.c.bf16 %v11416_v39, %v11416_v39  ;;  %10014 = vtanh.f32 %v1550_v40 }
 0x164   :  { %1575 = vst [vmem:[%s14561_s9] sm:$0xf] %v1574_v34 }
 0x16e   :  { %v10013_v4 = vpop.eup %10012 }
 0x16f   :  { %v10015_v6 = vpop.eup %10014  ;;  %v1556_v32 = vmul.f32 0.5, %v10013_v4 }
 0x170   :  { %v1552_v58 = vmul.f32 0.5, %v10015_v6 }
 0x171   :  { %v1557_v43 = vadd.f32 0.5, %v1556_v32  ;;  %v11461_v32 = vpack.c.bf16 %v1545_v35, %v1545_v35  ;;  %v1639_v35 = vld [vmem:[%s14558_s6 + $0x170] sm:$0xff] }
 0x172   :  { %v1553_v25 = vadd.f32 0.5, %v1552_v58 }
 0x173   :  { %v1563_v31 = vmul.f32 0.0, %v1557_v43 }
 0x17a   :  { %v1517_v5 = vpop.f32.mrf.mxu1 }
 0x17b   :  { %v1548_v3 = vadd.f32 %v1517_v5, %v11333_v61  ;;  %v1628_v5 = vld [vmem:[%s14558_s6 + $0x118] sm:$0xff] }
 0x17c   :  { %v1519_v59 = vpop.f32.mrf.mxu1 }
 0x17d   :  { %v1549_v48 = vadd.f32 %v1519_v59, %v11348_v38  ;;  %v1558_v51 = vmul.f32 0.5, %v1548_v3  ;;  %v1643_v59 = vld [vmem:[%s14558_s6 + $0x190] sm:$0xff] }
 0x17e   :  { %v1521_v45 = vpop.f32.mrf.mxu1 }
 0x17f   :  { %10016 = vtanh.f32 %v1549_v48  ;;  %v1647_v48 = vld [vmem:[%s14558_s6 + $0x1b0] sm:$0xff]  ;;  %v1644_v45 = vld [vmem:[%s14558_s6 + $0x198] sm:$0xff] }
 0x180   :  { %v1522_v10 = vpop.f32.mrf.mxu1  ;;  %10018 = vtanh.f32 %v1558_v51  ;;  %v1635_v51 = vld [vmem:[%s14558_s6 + $0x150] sm:$0xff]  ;;  %v11472_v43 = vcombine.high %v1643_v59, %v1647_v48 }
 0x181   :  { %v1648_v10 = vld [vmem:[%s14558_s6 + $0x1b8] sm:$0xff] }
 0x18c   :  { %v10017_v12 = vpop.eup %10016 }
 0x18d   :  { %v1564_v34 = vmul.f32 %v10017_v12, %v1553_v25  ;;  %v10019_v38 = vpop.eup %10018  ;;  %v11474_v25 = vcombine.high %v1644_v45, %v1648_v10  ;;  %v1636_v12 = vld [vmem:[%s14558_s6 + $0x158] sm:$0xff] }
 0x18e   :  { %v1560_v7 = vmul.f32 0.5, %v10019_v38  ;;  %v11498_v38 = vcombine.low %v1644_v45, %v1648_v10 }
 0x18f   :  { %v11427_v37 = vadd.f32 %v1564_v34, %v1563_v31  ;;  %v1640_v31 = vld [vmem:[%s14558_s6 + $0x178] sm:$0xff]  ;;  %v11496_v34 = vcombine.low %v1643_v59, %v1647_v48  ;;  %v11524_v48 = vcombine.low %v1635_v51, %v1639_v35 }
 0x190   :  { %v1561_v46 = vadd.f32 0.5, %v1560_v7  ;;  %14893 = vst [vmem:[#allocation94_spill] sm:$0xff] %v11498_v38  ;;  %v11504_v7 = vcombine.high %v1635_v51, %v1639_v35  ;;  %v1632_v59 = vld [vmem:[%s14558_s6 + $0x138] sm:$0xff]  ;;  %v11526_v45 = vcombine.low %v1636_v12, %v1640_v31 }
 0x191   :  { %10020 = vtanh.f32 %v11427_v37  ;;  %14892 = vst [vmem:[#allocation93_spill] sm:$0xff] %v11496_v34  ;;  %14896 = vst [vmem:[#allocation97_spill] sm:$0xff] %v11524_v48  ;;  %v1620_v51 = vld [vmem:[%s14558_s6 + $0xd8] sm:$0xff] }
 0x192   :  { %14894 = vst [vmem:[#allocation95_spill] sm:$0xff] %v11504_v7  ;;  %14897 = vst [vmem:[#allocation98_spill] sm:$0xff] %v11526_v45  ;;  %v1624_v35 = vld [vmem:[%s14558_s6 + $0xf8] sm:$0xff] }
 0x19e   :  { %v10021_v40 = vpop.eup %10020 }
 0x19f   :  { %v1567_v61 = vmul.f32 %v10021_v40, %v1561_v46  ;;  %v11506_v46 = vcombine.high %v1636_v12, %v1640_v31  ;;  %v1627_v40 = vld [vmem:[%s14558_s6 + $0x110] sm:$0xff]  ;;  %v11550_v31 = vcombine.low %v1628_v5, %v1632_v59 }
 0x1a1   :  { %v9106_v3 = vpack.c.bf16 %v1567_v61, %v1567_v61  ;;  %v11459_v6 = vsel %vm1569_vm2, %v1567_v61, 0.0  ;;  %14895 = vst [vmem:[#allocation96_spill] sm:$0xff] %v11506_v46  ;;  %v1631_v61 = vld [vmem:[%s14558_s6 + $0x130] sm:$0xff]  ;;  %14901 = vst [vmem:[#allocation102_spill] sm:$0xff] %v11550_v31 }
 0x1a2   :  { %v1576_v58 = vpack.c.bf16 %v11459_v6, %v11459_v6  ;;  %v11530_v10 = vcombine.high %v1627_v40, %v1631_v61  ;;  %v11548_v12 = vcombine.low %v1627_v40, %v1631_v61  ;;  %v1612_v40 = vld [vmem:[%s14558_s6 + $0x98] sm:$0xff] }
 0x1a3   :  { %9107 = vmatprep.mubr.msk.bf16.mxu0 %vm11434_vm3, %v9106_v3  ;;  %9113 = vmatprep.mubr.msk.bf16.mxu1 %vm11434_vm3, %v9106_v3  ;;  %v1616_v61 = vld [vmem:[%s14558_s6 + $0xb8] sm:$0xff] }
 0x1a4   :  { %9110 = vmatmul.mubr.msk.bf16.vlgmr.msra.gmra.mxu0 %vm11453_vm4, %v11461_v32  ;;  %9116 = vmatmul.mubr.msk.bf16.vlgmr.msra.gmra.mxu1 %vm11453_vm4, %v11461_v32  ;;  %8976 = vst [vmem:[%s14561_s9 + $0x3c] sm:$0xf] %v1576_v58  ;;  %14898 = vst [vmem:[#allocation99_spill] sm:$0xff] %v11530_v10  ;;  %v1619_v58 = vld [vmem:[%s14558_s6 + $0xd0] sm:$0xff] }
 0x1a5   :  { %2444 = vmatpush1.bf16.msra.mxu0 %v11392_v2  ;;  %2485 = vmatpush1.bf16.msra.mxu1 %v11394_v50  ;;  %14900 = vst [vmem:[#allocation101_spill] sm:$0xff] %v11548_v12 }
 0x1a6   :  { %9119 = vmatprep.mubr.msk.bf16.mxu0 %vm11434_vm3, %v9106_v3  ;;  %9125 = vmatprep.mubr.msk.bf16.mxu1 %vm11434_vm3, %v9106_v3  ;;  %v11532_v3 = vcombine.high %v1628_v5, %v1632_v59  ;;  %v11574_v59 = vcombine.low %v1620_v51, %v1624_v35 }
 0x1a7   :  { %2445 = vmatprep.subr.bf16.mxu0 %v11472_v43  ;;  %2486 = vmatprep.subr.bf16.mxu1 %v11474_v25 }
 0x1a8   :  { %14899 = vst [vmem:[#allocation100_spill] sm:$0xff] %v11532_v3  ;;  %14905 = vst [vmem:[#allocation106_spill] sm:$0xff] %v11574_v59 }
 0x1a9   :  { %2446 = vmatpush1.bf16.msra.mxu0 %v11496_v34  ;;  %2487 = vmatpush1.bf16.msra.mxu1 %v11498_v38  ;;  %v1623_v38 = vld [vmem:[%s14558_s6 + $0xf0] sm:$0xff] }
 0x1aa   :  { %2447 = vmatprep.subr.bf16.mxu0 %v11504_v7  ;;  %2488 = vmatprep.subr.bf16.mxu1 %v11506_v46  ;;  %v11554_v46 = vcombine.high %v1619_v58, %v1623_v38  ;;  %v11556_v7 = vcombine.high %v1620_v51, %v1624_v35  ;;  %v1611_v34 = vld [vmem:[%s14558_s6 + $0x90] sm:$0xff]  ;;  %v11572_v5 = vcombine.low %v1619_v58, %v1623_v38  ;;  %v1604_v38 = vld [vmem:[%s14558_s6 + $0x58] sm:$0xff] }
 0x1ab   :  { %v1608_v58 = vld [vmem:[%s14558_s6 + $0x78] sm:$0xff]  ;;  %v11598_v35 = vcombine.low %v1612_v40, %v1616_v61 }
 0x1ac   :  { %14902 = vst [vmem:[#allocation103_spill] sm:$0xff] %v11554_v46  ;;  %14903 = vst [vmem:[#allocation104_spill] sm:$0xff] %v11556_v7 }
 0x1ad   :  { %2448 = vmatpush1.bf16.msra.mxu0 %v11524_v48  ;;  %2489 = vmatpush1.bf16.msra.mxu1 %v11526_v45  ;;  %v1615_v45 = vld [vmem:[%s14558_s6 + $0xb0] sm:$0xff]  ;;  %14904 = vst [vmem:[#allocation105_spill] sm:$0xff] %v11572_v5  ;;  %14909 = vst [vmem:[#allocation110_spill] sm:$0xff] %v11598_v35 }
 0x1ae   :  { %2449 = vmatprep.subr.bf16.mxu0 %v11530_v10  ;;  %2490 = vmatprep.subr.bf16.mxu1 %v11532_v3  ;;  %v11578_v3 = vcombine.high %v1611_v34, %v1615_v45  ;;  %v11580_v10 = vcombine.high %v1612_v40, %v1616_v61  ;;  %v1603_v48 = vld [vmem:[%s14558_s6 + $0x50] sm:$0xff]  ;;  %v11596_v51 = vcombine.low %v1611_v34, %v1615_v45  ;;  %v1596_v34 = vld [vmem:[%s14558_s6 + $0x18] sm:$0xff] }
 0x1af   :  { %v1600_v45 = vld [vmem:[%s14558_s6 + $0x38] sm:$0xff]  ;;  %v11622_v61 = vcombine.low %v1604_v38, %v1608_v58 }
 0x1b0   :  { %14906 = vst [vmem:[#allocation107_spill] sm:$0xff] %v11578_v3  ;;  %14907 = vst [vmem:[#allocation108_spill] sm:$0xff] %v11580_v10 }
 0x1b1   :  { %2450 = vmatpush1.bf16.msra.mxu0 %v11548_v12  ;;  %2491 = vmatpush1.bf16.msra.mxu1 %v11550_v31  ;;  %v1607_v31 = vld [vmem:[%s14558_s6 + $0x70] sm:$0xff]  ;;  %14908 = vst [vmem:[#allocation109_spill] sm:$0xff] %v11596_v51  ;;  %14913 = vst [vmem:[#allocation114_spill] sm:$0xff] %v11622_v61 }
 0x1b2   :  { %2451 = vmatprep.subr.bf16.mxu0 %v11554_v46  ;;  %2492 = vmatprep.subr.bf16.mxu1 %v11556_v7  ;;  %v11602_v7 = vcombine.high %v1603_v48, %v1607_v31  ;;  %v11604_v46 = vcombine.high %v1604_v38, %v1608_v58  ;;  %v1595_v12 = vld [vmem:[%s14558_s6 + $0x10] sm:$0xff]  ;;  %v11620_v40 = vcombine.low %v1603_v48, %v1607_v31  ;;  %v1716_v48 = vld [vmem:[%s14558_s6 + $0x3d8] sm:$0xff] }
 0x1b3   :  { %v1720_v31 = vld [vmem:[%s14558_s6 + $0x3f8] sm:$0xff]  ;;  %v11646_v58 = vcombine.low %v1596_v34, %v1600_v45 }
 0x1b4   :  { %14910 = vst [vmem:[#allocation111_spill] sm:$0xff] %v11602_v7  ;;  %14911 = vst [vmem:[#allocation112_spill] sm:$0xff] %v11604_v46 }
 0x1b5   :  { %2452 = vmatpush1.bf16.msra.mxu0 %v11572_v5  ;;  %2493 = vmatpush1.bf16.msra.mxu1 %v11574_v59  ;;  %v1599_v59 = vld [vmem:[%s14558_s6 + $0x30] sm:$0xff]  ;;  %14912 = vst [vmem:[#allocation113_spill] sm:$0xff] %v11620_v40  ;;  %14917 = vst [vmem:[#allocation118_spill] sm:$0xff] %v11646_v58 }
 0x1b6   :  { %2453 = vmatprep.subr.bf16.mxu0 %v11578_v3  ;;  %2494 = vmatprep.subr.bf16.mxu1 %v11580_v10  ;;  %v11626_v10 = vcombine.high %v1595_v12, %v1599_v59  ;;  %v11628_v3 = vcombine.high %v1596_v34, %v1600_v45  ;;  %v1715_v5 = vld [vmem:[%s14558_s6 + $0x3d0] sm:$0xff]  ;;  %v11644_v38 = vcombine.low %v1595_v12, %v1599_v59  ;;  %v1708_v12 = vld [vmem:[%s14558_s6 + $0x398] sm:$0xff] }
 0x1b7   :  { %v1712_v59 = vld [vmem:[%s14558_s6 + $0x3b8] sm:$0xff]  ;;  %v11670_v45 = vcombine.low %v1716_v48, %v1720_v31 }
 0x1b8   :  { %14914 = vst [vmem:[#allocation115_spill] sm:$0xff] %v11626_v10  ;;  %14915 = vst [vmem:[#allocation116_spill] sm:$0xff] %v11628_v3 }
 0x1b9   :  { %2454 = vmatpush1.bf16.msra.mxu0 %v11596_v51  ;;  %2495 = vmatpush1.bf16.msra.mxu1 %v11598_v35  ;;  %v1719_v35 = vld [vmem:[%s14558_s6 + $0x3f0] sm:$0xff]  ;;  %14916 = vst [vmem:[#allocation117_spill] sm:$0xff] %v11644_v38  ;;  %14921 = vst [vmem:[#allocation122_spill] sm:$0xff] %v11670_v45 }
 0x1ba   :  { %2455 = vmatprep.subr.bf16.mxu0 %v11602_v7  ;;  %2496 = vmatprep.subr.bf16.mxu1 %v11604_v46  ;;  %v11650_v46 = vcombine.high %v1715_v5, %v1719_v35  ;;  %v11652_v7 = vcombine.high %v1716_v48, %v1720_v31  ;;  %v1707_v51 = vld [vmem:[%s14558_s6 + $0x390] sm:$0xff]  ;;  %v11668_v34 = vcombine.low %v1715_v5, %v1719_v35  ;;  %v1700_v5 = vld [vmem:[%s14558_s6 + $0x358] sm:$0xff] }
 0x1bb   :  { %v1704_v35 = vld [vmem:[%s14558_s6 + $0x378] sm:$0xff]  ;;  %v11694_v31 = vcombine.low %v1708_v12, %v1712_v59 }
 0x1bc   :  { %14918 = vst [vmem:[#allocation119_spill] sm:$0xff] %v11650_v46  ;;  %14919 = vst [vmem:[#allocation120_spill] sm:$0xff] %v11652_v7 }
 0x1bd   :  { %2456 = vmatpush1.bf16.msra.mxu0 %v11620_v40  ;;  %2497 = vmatpush1.bf16.msra.mxu1 %v11622_v61  ;;  %v1711_v61 = vld [vmem:[%s14558_s6 + $0x3b0] sm:$0xff]  ;;  %14920 = vst [vmem:[#allocation121_spill] sm:$0xff] %v11668_v34  ;;  %14925 = vst [vmem:[#allocation126_spill] sm:$0xff] %v11694_v31 }
 0x1be   :  { %2457 = vmatprep.subr.bf16.mxu0 %v11626_v10  ;;  %2498 = vmatprep.subr.bf16.mxu1 %v11628_v3  ;;  %v11674_v3 = vcombine.high %v1707_v51, %v1711_v61  ;;  %v11676_v10 = vcombine.high %v1708_v12, %v1712_v59  ;;  %v1699_v40 = vld [vmem:[%s14558_s6 + $0x350] sm:$0xff]  ;;  %v11692_v48 = vcombine.low %v1707_v51, %v1711_v61  ;;  %v1692_v51 = vld [vmem:[%s14558_s6 + $0x318] sm:$0xff] }
 0x1bf   :  { %v1696_v61 = vld [vmem:[%s14558_s6 + $0x338] sm:$0xff]  ;;  %v11718_v59 = vcombine.low %v1700_v5, %v1704_v35 }
 0x1c0   :  { %14922 = vst [vmem:[#allocation123_spill] sm:$0xff] %v11674_v3  ;;  %14923 = vst [vmem:[#allocation124_spill] sm:$0xff] %v11676_v10 }
 0x1c1   :  { %2458 = vmatpush1.bf16.msra.mxu0 %v11644_v38  ;;  %2499 = vmatpush1.bf16.msra.mxu1 %v11646_v58  ;;  %v1703_v58 = vld [vmem:[%s14558_s6 + $0x370] sm:$0xff]  ;;  %14924 = vst [vmem:[#allocation125_spill] sm:$0xff] %v11692_v48  ;;  %14929 = vst [vmem:[#allocation130_spill] sm:$0xff] %v11718_v59 }
 0x1c2   :  { %2459 = vmatprep.subr.bf16.mxu0 %v11650_v46  ;;  %2500 = vmatprep.subr.bf16.mxu1 %v11652_v7  ;;  %v11698_v7 = vcombine.high %v1699_v40, %v1703_v58  ;;  %v11700_v46 = vcombine.high %v1700_v5, %v1704_v35  ;;  %v1691_v38 = vld [vmem:[%s14558_s6 + $0x310] sm:$0xff]  ;;  %v11716_v12 = vcombine.low %v1699_v40, %v1703_v58  ;;  %v1684_v40 = vld [vmem:[%s14558_s6 + $0x2d8] sm:$0xff] }
 0x1c3   :  { %v1688_v58 = vld [vmem:[%s14558_s6 + $0x2f8] sm:$0xff]  ;;  %v11742_v35 = vcombine.low %v1692_v51, %v1696_v61 }
 0x1c4   :  { %14926 = vst [vmem:[#allocation127_spill] sm:$0xff] %v11698_v7  ;;  %14927 = vst [vmem:[#allocation128_spill] sm:$0xff] %v11700_v46 }
 0x1c5   :  { %2460 = vmatpush2.bf16.msra.mxu0 %v11668_v34  ;;  %2501 = vmatpush2.bf16.msra.mxu1 %v11670_v45  ;;  %v1695_v45 = vld [vmem:[%s14558_s6 + $0x330] sm:$0xff]  ;;  %14928 = vst [vmem:[#allocation129_spill] sm:$0xff] %v11716_v12  ;;  %14933 = vst [vmem:[#allocation134_spill] sm:$0xff] %v11742_v35 }
 0x1c6   :  { %2461 = vmatprep.subr.bf16.mxu0 %v11674_v3  ;;  %2502 = vmatprep.subr.bf16.mxu1 %v11676_v10  ;;  %v11722_v10 = vcombine.high %v1691_v38, %v1695_v45  ;;  %v11724_v3 = vcombine.high %v1692_v51, %v1696_v61  ;;  %v1683_v34 = vld [vmem:[%s14558_s6 + $0x2d0] sm:$0xff]  ;;  %v11740_v5 = vcombine.low %v1691_v38, %v1695_v45  ;;  %v1676_v38 = vld [vmem:[%s14558_s6 + $0x298] sm:$0xff] }
 0x1c7   :  { %v1680_v45 = vld [vmem:[%s14558_s6 + $0x2b8] sm:$0xff]  ;;  %v11766_v61 = vcombine.low %v1684_v40, %v1688_v58 }
 0x1c8   :  { %14930 = vst [vmem:[#allocation131_spill] sm:$0xff] %v11722_v10  ;;  %14931 = vst [vmem:[#allocation132_spill] sm:$0xff] %v11724_v3 }
 0x1c9   :  { %2462 = vmatpush2.bf16.msra.mxu0 %v11692_v48  ;;  %2503 = vmatpush2.bf16.msra.mxu1 %v11694_v31  ;;  %v1687_v31 = vld [vmem:[%s14558_s6 + $0x2f0] sm:$0xff]  ;;  %14932 = vst [vmem:[#allocation133_spill] sm:$0xff] %v11740_v5  ;;  %14937 = vst [vmem:[#allocation138_spill] sm:$0xff] %v11766_v61 }
 0x1ca   :  { %2463 = vmatprep.subr.bf16.mxu0 %v11698_v7  ;;  %2504 = vmatprep.subr.bf16.mxu1 %v11700_v46  ;;  %v11746_v46 = vcombine.high %v1683_v34, %v1687_v31  ;;  %v11748_v7 = vcombine.high %v1684_v40, %v1688_v58  ;;  %v1675_v48 = vld [vmem:[%s14558_s6 + $0x290] sm:$0xff]  ;;  %v11764_v51 = vcombine.low %v1683_v34, %v1687_v31  ;;  %v1668_v34 = vld [vmem:[%s14558_s6 + $0x258] sm:$0xff] }
 0x1cb   :  { %v1672_v31 = vld [vmem:[%s14558_s6 + $0x278] sm:$0xff]  ;;  %v11790_v58 = vcombine.low %v1676_v38, %v1680_v45 }
 0x1cc   :  { %14934 = vst [vmem:[#allocation135_spill] sm:$0xff] %v11746_v46  ;;  %14935 = vst [vmem:[#allocation136_spill] sm:$0xff] %v11748_v7 }
 0x1cd   :  { %2464 = vmatpush2.bf16.msra.mxu0 %v11716_v12  ;;  %2505 = vmatpush2.bf16.msra.mxu1 %v11718_v59  ;;  %v1679_v59 = vld [vmem:[%s14558_s6 + $0x2b0] sm:$0xff]  ;;  %14936 = vst [vmem:[#allocation137_spill] sm:$0xff] %v11764_v51 }
 0x1ce   :  { %2465 = vmatprep.subr.bf16.mxu0 %v11722_v10  ;;  %2506 = vmatprep.subr.bf16.mxu1 %v11724_v3  ;;  %v11770_v3 = vcombine.high %v1675_v48, %v1679_v59  ;;  %v11772_v10 = vcombine.high %v1676_v38, %v1680_v45  ;;  %v1667_v12 = vld [vmem:[%s14558_s6 + $0x250] sm:$0xff]  ;;  %v11788_v40 = vcombine.low %v1675_v48, %v1679_v59  ;;  %v1660_v48 = vld [vmem:[%s14558_s6 + $0x218] sm:$0xff] }
 0x1cf   :  { %v1664_v59 = vld [vmem:[%s14558_s6 + $0x238] sm:$0xff]  ;;  %v11814_v45 = vcombine.low %v1668_v34, %v1672_v31 }
 0x1d0   :  { %14938 = vst [vmem:[#allocation139_spill] sm:$0xff] %v11770_v3  ;;  %14939 = vst [vmem:[#allocation140_spill] sm:$0xff] %v11772_v10 }
 0x1d1   :  { %2466 = vmatpush2.bf16.msra.mxu0 %v11740_v5  ;;  %2507 = vmatpush2.bf16.msra.mxu1 %v11742_v35  ;;  %v1671_v35 = vld [vmem:[%s14558_s6 + $0x270] sm:$0xff]  ;;  %14940 = vst [vmem:[#allocation141_spill] sm:$0xff] %v11788_v40 }
 0x1d2   :  { %2467 = vmatprep.subr.bf16.mxu0 %v11746_v46  ;;  %2508 = vmatprep.subr.bf16.mxu1 %v11748_v7  ;;  %v11794_v7 = vcombine.high %v1667_v12, %v1671_v35  ;;  %v11796_v46 = vcombine.high %v1668_v34, %v1672_v31  ;;  %v1659_v5 = vld [vmem:[%s14558_s6 + $0x210] sm:$0xff]  ;;  %v11812_v38 = vcombine.low %v1667_v12, %v1671_v35  ;;  %v14973_v34 = vld [vmem:[#allocation25_spill] sm:$0xff] }
 0x1d5   :  { %2468 = vmatpush2.bf16.msra.mxu0 %v11764_v51  ;;  %2509 = vmatpush2.bf16.msra.mxu1 %v11766_v61  ;;  %v1663_v61 = vld [vmem:[%s14558_s6 + $0x230] sm:$0xff] }
 0x1d6   :  { %2469 = vmatprep.subr.bf16.mxu0 %v11770_v3  ;;  %2510 = vmatprep.subr.bf16.mxu1 %v11772_v10  ;;  %v11818_v10 = vcombine.high %v1659_v5, %v1663_v61  ;;  %v11820_v3 = vcombine.high %v1660_v48, %v1664_v59  ;;  %v11824_v51 = vcombine.low %v1659_v5, %v1663_v61 }
 0x1d9   :  { %2470 = vmatpush2.bf16.msra.mxu0 %v11788_v40  ;;  %2511 = vmatpush2.bf16.msra.mxu1 %v11790_v58  ;;  %v11826_v40 = vcombine.low %v1660_v48, %v1664_v59 }
 0x1da   :  { %2471 = vmatprep.subr.bf16.mxu0 %v11794_v7  ;;  %2512 = vmatprep.subr.bf16.mxu1 %v11796_v46 }
 0x1dd   :  { %2472 = vmatpush2.bf16.msra.mxu0 %v11812_v38  ;;  %2513 = vmatpush2.bf16.msra.mxu1 %v11814_v45 }
 0x1de   :  { %2473 = vmatprep.subr.bf16.mxu0 %v11818_v10  ;;  %2514 = vmatprep.subr.bf16.mxu1 %v11820_v3 }
 0x1e1   :  { %2474 = vmatpush2.bf16.msra.mxu0 %v11824_v51  ;;  %2515 = vmatpush2.bf16.msra.mxu1 %v11826_v40 }
 0x1e2   :  { %3367 = vmatprep.subr.bf16.mxu0 %v10873_v29  ;;  %3408 = vmatprep.subr.bf16.mxu1 %v10889_v42  ;;  %v14946_v29 = vld [vmem:[#allocation60_spill] sm:$0xff]  ;;  %v14950_v42 = vld [vmem:[#allocation66_spill] sm:$0xff] }
 0x1e4   :  { %9122 = vmatmul.mubr.msk.bf16.vlgmr.msra.gmra.mxu0 %vm11453_vm4, %v11461_v32  ;;  %9128 = vmatmul.mubr.msk.bf16.vlgmr.msra.gmra.mxu1 %vm11453_vm4, %v11461_v32  ;;  %v14972_v32 = vld [vmem:[#allocation12_spill] sm:$0xff] }
 0x1e5   :  { %3368 = vmatpush1.bf16.msra.mxu0 %v10884_v18  ;;  %3409 = vmatpush1.bf16.msra.mxu1 %v10886_v36  ;;  %v14948_v18 = vld [vmem:[#allocation67_spill] sm:$0xff]  ;;  %v14949_v36 = vld [vmem:[#allocation65_spill] sm:$0xff] }
 0x1e6   :  { %3369 = vmatprep.subr.bf16.mxu0 %v10908_v57  ;;  %3410 = vmatprep.subr.bf16.mxu1 %v10925_v21  ;;  %v14952_v57 = vld [vmem:[#allocation73_spill] sm:$0xff]  ;;  %v14956_v21 = vld [vmem:[#allocation79_spill] sm:$0xff] }
 0x1e9   :  { %3370 = vmatpush1.bf16.msra.mxu0 %v10920_v11  ;;  %3411 = vmatpush1.bf16.msra.mxu1 %v10922_v14  ;;  %v14954_v11 = vld [vmem:[#allocation72_spill] sm:$0xff] }
 0x1ea   :  { %3371 = vmatprep.subr.bf16.mxu0 %v10944_v41  ;;  %3412 = vmatprep.subr.bf16.mxu1 %v10961_v20  ;;  %v14955_v14 = vld [vmem:[#allocation76_spill] sm:$0xff]  ;;  %v14958_v41 = vld [vmem:[#allocation78_spill] sm:$0xff]  ;;  %v14963_v20 = vld [vmem:[#allocation85_spill] sm:$0xff] }
 0x1ed   :  { %3372 = vmatpush1.bf16.msra.mxu0 %v10956_v53  ;;  %3413 = vmatpush1.bf16.msra.mxu1 %v10958_v56  ;;  %v14961_v53 = vld [vmem:[#allocation83_spill] sm:$0xff]  ;;  %v14962_v56 = vld [vmem:[#allocation84_spill] sm:$0xff] }
 0x1ee   :  { %3373 = vmatprep.subr.bf16.mxu0 %v10980_v62  ;;  %3414 = vmatprep.subr.bf16.mxu1 %v10997_v17  ;;  %v14945_v17 = vld [vmem:[#allocation59_spill] sm:$0xff] }
 0x1ef   :  { %v14964_v62 = vld [vmem:[#allocation87_spill] sm:$0xff] }
 0x1f1   :  { %3374 = vmatpush1.bf16.msra.mxu0 %v10992_v9  ;;  %3415 = vmatpush1.bf16.msra.mxu1 %v10994_v19  ;;  %v14941_v19 = vld [vmem:[#allocation54_spill] sm:$0xff]  ;;  %v14944_v9 = vld [vmem:[#allocation61_spill] sm:$0xff] }
 0x1f2   :  { %3375 = vmatprep.subr.bf16.mxu0 %v11016_v23  ;;  %3416 = vmatprep.subr.bf16.mxu1 %v11042_v26  ;;  %v14965_v23 = vld [vmem:[#allocation86_spill] sm:$0xff]  ;;  %v14966_v26 = vld [vmem:[#allocation88_spill] sm:$0xff] }
 0x1f5   :  { %3376 = vmatpush1.bf16.msra.mxu0 %v11028_v33  ;;  %3417 = vmatpush1.bf16.msra.mxu1 %v11030_v0  ;;  %v14942_v0 = vld [vmem:[#allocation55_spill] sm:$0xff] }
 0x1f6   :  { %3377 = vmatprep.subr.bf16.mxu0 %v11044_v27  ;;  %3418 = vmatprep.subr.bf16.mxu1 %v11058_v8  ;;  %v14943_v8 = vld [vmem:[#allocation57_spill] sm:$0xff]  ;;  %v14947_v33 = vld [vmem:[#allocation63_spill] sm:$0xff] }
 0x1f7   :  { %v14967_v27 = vld [vmem:[#allocation89_spill] sm:$0xff] }
 0x1f9   :  { %3378 = vmatpush1.bf16.msra.mxu0 %v11056_v49  ;;  %3419 = vmatpush1.bf16.msra.mxu1 %v11074_v47  ;;  %v14959_v49 = vld [vmem:[#allocation80_spill] sm:$0xff]  ;;  %v14968_v47 = vld [vmem:[#allocation90_spill] sm:$0xff] }
 0x1fa   :  { %3379 = vmatprep.subr.bf16.mxu0 %v11098_v54  ;;  %3420 = vmatprep.subr.bf16.mxu1 %v11111_v28  ;;  %v14969_v54 = vld [vmem:[#allocation91_spill] sm:$0xff] }
 0x1fd   :  { %3380 = vmatpush1.bf16.msra.mxu0 %v11107_v15  ;;  %3421 = vmatpush1.bf16.msra.mxu1 %v11109_v55  ;;  %v14970_v15 = vld [vmem:[#allocation92_spill] sm:$0xff] }
 0x1fe   :  { %3381 = vmatprep.subr.bf16.mxu0 %v11128_v60  ;;  %3422 = vmatprep.subr.bf16.mxu1 %v11141_v24  ;;  %v14957_v24 = vld [vmem:[#allocation75_spill] sm:$0xff]  ;;  %v14971_v60 = vld [vmem:[#allocation10_spill] sm:$0xff] }
 0x201   :  { %3382 = vmatpush1.bf16.msra.mxu0 %v11137_v52  ;;  %3423 = vmatpush1.bf16.msra.mxu1 %v11139_v63  ;;  %v14953_v63 = vld [vmem:[#allocation71_spill] sm:$0xff]  ;;  %v14960_v52 = vld [vmem:[#allocation81_spill] sm:$0xff] }
 0x202   :  { %3383 = vmatprep.subr.bf16.mxu0 %v11158_v30  ;;  %3424 = vmatprep.subr.bf16.mxu1 %v11171_v13  ;;  %v14951_v13 = vld [vmem:[#allocation69_spill] sm:$0xff] }
 0x205   :  { %3384 = vmatpush2.bf16.msra.mxu0 %v14941_v19  ;;  %3425 = vmatpush2.bf16.msra.mxu1 %v14942_v0  ;;  %v14974_v19 = vld [vmem:[#allocation23_spill] sm:$0xff] }
 0x206   :  { %3385 = vmatprep.subr.bf16.mxu0 %v14943_v8  ;;  %3426 = vmatprep.subr.bf16.mxu1 %v14944_v9 }
 0x209   :  { %3386 = vmatpush2.bf16.msra.mxu0 %v14945_v17  ;;  %3427 = vmatpush2.bf16.msra.mxu1 %v14946_v29 }
 0x20a   :  { %3387 = vmatprep.subr.bf16.mxu0 %v14947_v33  ;;  %3428 = vmatprep.subr.bf16.mxu1 %v14948_v18 }
 0x20d   :  { %3388 = vmatpush2.bf16.msra.mxu0 %v14949_v36  ;;  %3429 = vmatpush2.bf16.msra.mxu1 %v14950_v42 }
 0x20e   :  { %3389 = vmatprep.subr.bf16.mxu0 %v14951_v13  ;;  %3430 = vmatprep.subr.bf16.mxu1 %v14952_v57  ;;  %v1571_v57 = vsel %vm1568_vm1, %v11408_v16, 0.0 }
 0x211   :  { %3390 = vmatpush2.bf16.msra.mxu0 %v14953_v63  ;;  %3431 = vmatpush2.bf16.msra.mxu1 %v14954_v11 }
 0x212   :  { %3391 = vmatprep.subr.bf16.mxu0 %v14955_v14  ;;  %3432 = vmatprep.subr.bf16.mxu1 %v14956_v21 }
 0x215   :  { %3392 = vmatpush2.bf16.msra.mxu0 %v14957_v24  ;;  %3433 = vmatpush2.bf16.msra.mxu1 %v14958_v41 }
 0x216   :  { %3393 = vmatprep.subr.bf16.mxu0 %v14959_v49  ;;  %3434 = vmatprep.subr.bf16.mxu1 %v14960_v52 }
 0x219   :  { %3394 = vmatpush2.bf16.msra.mxu0 %v14961_v53  ;;  %3435 = vmatpush2.bf16.msra.mxu1 %v11336_v44 }
 0x21a   :  { %3395 = vmatprep.subr.bf16.mxu0 %v14962_v56  ;;  %3436 = vmatprep.subr.bf16.mxu1 %v11345_v22 }
 0x21d   :  { %3396 = vmatpush2.bf16.msra.mxu0 %v14963_v20  ;;  %3437 = vmatpush2.bf16.msra.mxu1 %v14964_v62  ;;  %v14975_v62 = vld [vmem:[#allocation44_spill] sm:$0xff] }
 0x21e   :  { %3397 = vmatprep.subr.bf16.mxu0 %v14965_v23  ;;  %3438 = vmatprep.subr.bf16.mxu1 %v14966_v26 }
 0x221   :  { %3398 = vmatpush2.bf16.msra.mxu0 %v14967_v27  ;;  %3439 = vmatpush2.bf16.msra.mxu1 %v14968_v47 }
 0x222   :  { %3449 = vmatprep.subr.bf16.mxu0 %v14969_v54  ;;  %3490 = vmatprep.subr.bf16.mxu1 %v14970_v15  ;;  %v14976_v54 = vld [vmem:[#allocation46_spill] sm:$0xff] }
 0x264   :  { %v2395_v55 = vpop.f32.mrf.mxu0  ;;  %v2436_v28 = vpop.f32.mrf.mxu1 }
 0x265   :  { %v2525_v22 = vadd.f32 %v2395_v55, %v14971_v60  ;;  %v2527_v0 = vadd.f32 %v2436_v28, %v14974_v19 }
 0x266   :  { %v2397_v30 = vpop.f32.mrf.mxu0  ;;  %v2438_v44 = vpop.f32.mrf.mxu1 }
 0x267   :  { %v2529_v4 = vmul.f32 0.5, %v2525_v22  ;;  %v2526_v12 = vadd.f32 %v2397_v30, %v14972_v32  ;;  %v2528_v31 = vadd.f32 %v2438_v44, %v14973_v34  ;;  %v2537_v8 = vmul.f32 0.5, %v2527_v0  ;;  %v14977_v22 = vld [vmem:[#allocation82_spill] sm:$0xff]  ;;  %v14978_v32 = vld [vmem:[#allocation77_spill] sm:$0xff] }
 0x268   :  { %v2399_v5 = vpop.f32.mrf.mxu0  ;;  %v2440_v35 = vpop.f32.mrf.mxu1 }
 0x269   :  { %10022 = vtanh.f32 %v2529_v4  ;;  %v2533_v61 = vmul.f32 0.5, %v2526_v12 }
 0x26a   :  { %v2400_v48 = vpop.f32.mrf.mxu0  ;;  %v2441_v59 = vpop.f32.mrf.mxu1 }
 0x26b   :  { %10024 = vtanh.f32 %v2533_v61 }
 0x26c   :  { %10026 = vtanh.f32 %v2528_v31 }
 0x26d   :  { %10028 = vtanh.f32 %v2537_v8  ;;  %v1573_v8 = vsel %vm1569_vm2, %v11427_v37, 0.0 }
 0x276   :  { %v10023_v9 = vpop.eup %10022 }
 0x277   :  { %v2531_v17 = vmul.f32 0.5, %v10023_v9 }
 0x278   :  { %v10025_v29 = vpop.eup %10024 }
 0x279   :  { %v2532_v33 = vadd.f32 0.5, %v2531_v17  ;;  %v2535_v18 = vmul.f32 0.5, %v10025_v29  ;;  %v10027_v36 = vpop.eup %10026 }
 0x27a   :  { %v10029_v21 = vpop.eup %10028 }
 0x27b   :  { %v2536_v42 = vadd.f32 0.5, %v2535_v18  ;;  %v2543_v13 = vmul.f32 %v10027_v36, %v2532_v33  ;;  %v2539_v24 = vmul.f32 0.5, %v10029_v21 }
 0x27d   :  { %v2542_v63 = vmul.f32 %v2536_v42, %v1571_v57  ;;  %v2540_v41 = vadd.f32 0.5, %v2539_v24 }
 0x27f   :  { %v2544_v11 = vadd.f32 %v2543_v13, %v2542_v63 }
 0x281   :  { %10030 = vtanh.f32 %v2544_v11  ;;  %v11914_v14 = vsel %vm2569_vm5, %v2544_v11, %v1571_v57 }
 0x28e   :  { %v10031_v49 = vpop.eup %10030 }
 0x28f   :  { %v2546_v52 = vmul.f32 %v10031_v49, %v2540_v41  ;;  %v14981_v41 = vld [vmem:[#allocation95_spill] sm:$0xff]  ;;  %v14982_v49 = vld [vmem:[#allocation96_spill] sm:$0xff] }
 0x291   :  { %v2575_v53 = vsel %vm2569_vm5, %v2546_v52, 0.0  ;;  %v11936_v57 = vsel %vm2569_vm5, %v2546_v52, %v11416_v39  ;;  %v14979_v39 = vld [vmem:[#allocation93_spill] sm:$0xff] }
 0x292   :  { %v2576_v56 = vpack.c.bf16 %v2575_v53, %v2575_v53  ;;  %v11949_v24 = vpack.c.bf16 %v11936_v57, %v11936_v57  ;;  %v14983_v52 = vld [vmem:[#allocation97_spill] sm:$0xff]  ;;  %v14984_v53 = vld [vmem:[#allocation98_spill] sm:$0xff] }
 0x294   :  { %9129 = vst [vmem:[%s14561_s9 + $0x4] sm:$0xf] %v2576_v56  ;;  %v14987_v56 = vld [vmem:[#allocation101_spill] sm:$0xff] }
 0x2a4   :  { %v2477_v16 = vpop.f32.mrf.mxu0  ;;  %v2518_v20 = vpop.f32.mrf.mxu1 }
 0x2a5   :  { %v2547_v23 = vadd.f32 %v2477_v16, %v14975_v62  ;;  %v2549_v12 = vadd.f32 %v2518_v20, %v14978_v32  ;;  %v14990_v16 = vld [vmem:[#allocation104_spill] sm:$0xff]  ;;  %v14991_v20 = vld [vmem:[#allocation105_spill] sm:$0xff]  ;;  %v14992_v62 = vld [vmem:[#allocation106_spill] sm:$0xff] }
 0x2a6   :  { %v2479_v26 = vpop.f32.mrf.mxu0  ;;  %v2520_v27 = vpop.f32.mrf.mxu1  ;;  %v15006_v32 = vld [vmem:[#allocation120_spill] sm:$0xff] }
 0x2a7   :  { %v2551_v47 = vmul.f32 0.5, %v2547_v23  ;;  %v2548_v15 = vadd.f32 %v2479_v26, %v14976_v54  ;;  %v2550_v30 = vadd.f32 %v2520_v27, %v14977_v22  ;;  %v2559_v5 = vmul.f32 0.5, %v2549_v12  ;;  %v14993_v23 = vld [vmem:[#allocation107_spill] sm:$0xff]  ;;  %v14994_v26 = vld [vmem:[#allocation108_spill] sm:$0xff]  ;;  %v14995_v27 = vld [vmem:[#allocation109_spill] sm:$0xff] }
 0x2a8   :  { %v2481_v55 = vpop.f32.mrf.mxu0  ;;  %v2522_v28 = vpop.f32.mrf.mxu1  ;;  %v14997_v54 = vld [vmem:[#allocation111_spill] sm:$0xff]  ;;  %v15002_v22 = vld [vmem:[#allocation116_spill] sm:$0xff]  ;;  %v15007_v12 = vld [vmem:[#allocation121_spill] sm:$0xff] }
 0x2a9   :  { %10032 = vtanh.f32 %v2551_v47  ;;  %v2555_v60 = vmul.f32 0.5, %v2548_v15  ;;  %v14996_v47 = vld [vmem:[#allocation110_spill] sm:$0xff]  ;;  %v14998_v15 = vld [vmem:[#allocation112_spill] sm:$0xff]  ;;  %v14999_v55 = vld [vmem:[#allocation113_spill] sm:$0xff] }
 0x2aa   :  { %v2482_v44 = vpop.f32.mrf.mxu0  ;;  %v2523_v4 = vpop.f32.mrf.mxu1  ;;  %v15000_v28 = vld [vmem:[#allocation114_spill] sm:$0xff] }
 0x2ab   :  { %10034 = vtanh.f32 %v2555_v60  ;;  %v15001_v60 = vld [vmem:[#allocation115_spill] sm:$0xff]  ;;  %v15004_v44 = vld [vmem:[#allocation118_spill] sm:$0xff] }
 0x2ac   :  { %10036 = vtanh.f32 %v2550_v30  ;;  %v15003_v30 = vld [vmem:[#allocation117_spill] sm:$0xff]  ;;  %v15005_v4 = vld [vmem:[#allocation119_spill] sm:$0xff] }
 0x2ad   :  { %10038 = vtanh.f32 %v2559_v5  ;;  %v15008_v5 = vld [vmem:[#allocation122_spill] sm:$0xff] }
 0x2b6   :  { %v10033_v35 = vpop.eup %10032 }
 0x2b7   :  { %v2553_v61 = vmul.f32 0.5, %v10033_v35  ;;  %v15009_v35 = vld [vmem:[#allocation123_spill] sm:$0xff] }
 0x2b8   :  { %v10035_v34 = vpop.eup %10034 }
 0x2b9   :  { %v2554_v31 = vadd.f32 0.5, %v2553_v61  ;;  %v2557_v48 = vmul.f32 0.5, %v10035_v34  ;;  %v10037_v59 = vpop.eup %10036  ;;  %v15010_v61 = vld [vmem:[#allocation124_spill] sm:$0xff]  ;;  %v15011_v34 = vld [vmem:[#allocation125_spill] sm:$0xff] }
 0x2ba   :  { %v10039_v33 = vpop.eup %10038 }
 0x2bb   :  { %v2558_v19 = vadd.f32 0.5, %v2557_v48  ;;  %v2565_v0 = vmul.f32 %v10037_v59, %v2554_v31  ;;  %v2561_v18 = vmul.f32 0.5, %v10039_v33  ;;  %v15012_v31 = vld [vmem:[#allocation126_spill] sm:$0xff]  ;;  %v15013_v48 = vld [vmem:[#allocation127_spill] sm:$0xff]  ;;  %v15014_v59 = vld [vmem:[#allocation128_spill] sm:$0xff] }
 0x2bc   :  { %v15020_v33 = vld [vmem:[#allocation134_spill] sm:$0xff] }
 0x2bd   :  { %v2564_v9 = vmul.f32 %v2558_v19, %v1573_v8  ;;  %v2562_v36 = vadd.f32 0.5, %v2561_v18  ;;  %v15015_v19 = vld [vmem:[#allocation129_spill] sm:$0xff]  ;;  %v15021_v18 = vld [vmem:[#allocation135_spill] sm:$0xff] }
 0x2bf   :  { %v2566_v17 = vadd.f32 %v2565_v0, %v2564_v9  ;;  %v15016_v0 = vld [vmem:[#allocation130_spill] sm:$0xff]  ;;  %v15018_v9 = vld [vmem:[#allocation132_spill] sm:$0xff] }
 0x2c1   :  { %10040 = vtanh.f32 %v2566_v17  ;;  %v11931_v29 = vsel %vm2570_vm6, %v2566_v17, %v1573_v8  ;;  %v15017_v8 = vld [vmem:[#allocation131_spill] sm:$0xff]  ;;  %v15019_v17 = vld [vmem:[#allocation133_spill] sm:$0xff] }
 0x2ce   :  { %v10041_v42 = vpop.eup %10040 }
 0x2cf   :  { %v2568_v13 = vmul.f32 %v10041_v42, %v2562_v36  ;;  %v15022_v36 = vld [vmem:[#allocation136_spill] sm:$0xff]  ;;  %v15023_v42 = vld [vmem:[#allocation137_spill] sm:$0xff] }
 0x2d1   :  { %v11941_v37 = vsel %vm2570_vm6, %v2568_v13, %v11459_v6  ;;  %v2579_v63 = vsel %vm2570_vm6, %v2568_v13, 0.0  ;;  %v14980_v6 = vld [vmem:[#allocation94_spill] sm:$0xff] }
 0x2d2   :  { %v2580_v11 = vpack.c.bf16 %v2579_v63, %v2579_v63  ;;  %v2598_v21 = vpack.c.bf16 %v11941_v37, %v11941_v37  ;;  %v15024_v13 = vld [vmem:[#allocation138_spill] sm:$0xff]  ;;  %v15025_v63 = vld [vmem:[#allocation139_spill] sm:$0xff] }
 0x2d4   :  { %9130 = vst [vmem:[%s14561_s9 + $0x38] sm:$0xf] %v2580_v11  ;;  %3399 = vmatprep.mubr.bf16.mxu0 %v2598_v21  ;;  %3440 = vmatprep.mubr.bf16.mxu1 %v2598_v21  ;;  %v15026_v11 = vld [vmem:[#allocation140_spill] sm:$0xff] }
 0x2d5   :  { %3400 = vmatmul.mubr.bf16.vlgmr.msra.gmra.mxu0 %v11949_v24  ;;  %3441 = vmatmul.mubr.bf16.vlgmr.msra.gmra.mxu1 %v11949_v24 }
 0x2d6   :  { %3450 = vmatpush1.bf16.msra.mxu0 %v11392_v2  ;;  %3491 = vmatpush1.bf16.msra.mxu1 %v11394_v50  ;;  %v14985_v2 = vld [vmem:[#allocation99_spill] sm:$0xff]  ;;  %v14986_v50 = vld [vmem:[#allocation100_spill] sm:$0xff] }
 0x2d7   :  { %3481 = vmatprep.mubr.bf16.mxu0 %v2598_v21  ;;  %3522 = vmatprep.mubr.bf16.mxu1 %v2598_v21  ;;  %v15027_v21 = vld [vmem:[#allocation141_spill] sm:$0xff] }
 0x2d8   :  { %3451 = vmatprep.subr.bf16.mxu0 %v11472_v43  ;;  %3492 = vmatprep.subr.bf16.mxu1 %v11474_v25  ;;  %v14988_v43 = vld [vmem:[#allocation102_spill] sm:$0xff]  ;;  %v14989_v25 = vld [vmem:[#allocation103_spill] sm:$0xff] }
 0x2da   :  { %3452 = vmatpush1.bf16.msra.mxu0 %v14979_v39  ;;  %3493 = vmatpush1.bf16.msra.mxu1 %v14980_v6  ;;  %v3654_v6 = vld [vmem:[%s14558_s6 + $0x188] sm:$0xff] }
 0x2db   :  { %3453 = vmatprep.subr.bf16.mxu0 %v14981_v41  ;;  %3494 = vmatprep.subr.bf16.mxu1 %v14982_v49  ;;  %v3658_v41 = vld [vmem:[%s14558_s6 + $0x1a8] sm:$0xff]  ;;  %v3645_v49 = vld [vmem:[%s14558_s6 + $0x140] sm:$0xff] }
 0x2de   :  { %3454 = vmatpush1.bf16.msra.mxu0 %v14983_v52  ;;  %3495 = vmatpush1.bf16.msra.mxu1 %v14984_v53  ;;  %v12058_v52 = vcombine.high %v3654_v6, %v3658_v41  ;;  %v3649_v53 = vld [vmem:[%s14558_s6 + $0x160] sm:$0xff] }
 0x2df   :  { %3455 = vmatprep.subr.bf16.mxu0 %v14985_v2  ;;  %3496 = vmatprep.subr.bf16.mxu1 %v14986_v50  ;;  %v3646_v2 = vld [vmem:[%s14558_s6 + $0x148] sm:$0xff] }
 0x2e0   :  { %v3650_v50 = vld [vmem:[%s14558_s6 + $0x168] sm:$0xff] }
 0x2e2   :  { %3456 = vmatpush1.bf16.msra.mxu0 %v14987_v56  ;;  %3497 = vmatpush1.bf16.msra.mxu1 %v14988_v43  ;;  %v12075_v43 = vcombine.low %v3654_v6, %v3658_v41  ;;  %v3729_v6 = vld [vmem:[%s14558_s6 + $0x3e0] sm:$0xff]  ;;  %v3726_v41 = vld [vmem:[%s14558_s6 + $0x3c8] sm:$0xff] }
 0x2e3   :  { %3457 = vmatprep.subr.bf16.mxu0 %v14989_v25  ;;  %3498 = vmatprep.subr.bf16.mxu1 %v14990_v16  ;;  %v12077_v25 = vcombine.high %v3645_v49, %v3649_v53  ;;  %v12080_v16 = vcombine.high %v3646_v2, %v3650_v50 }
 0x2e6   :  { %3458 = vmatpush1.bf16.msra.mxu0 %v14991_v20  ;;  %3499 = vmatpush1.bf16.msra.mxu1 %v14992_v62  ;;  %v3637_v20 = vld [vmem:[%s14558_s6 + $0x100] sm:$0xff] }
 0x2e7   :  { %3459 = vmatprep.subr.bf16.mxu0 %v14993_v23  ;;  %3500 = vmatprep.subr.bf16.mxu1 %v14994_v26  ;;  %v3641_v62 = vld [vmem:[%s14558_s6 + $0x120] sm:$0xff]  ;;  %v3638_v23 = vld [vmem:[%s14558_s6 + $0x108] sm:$0xff] }
 0x2e8   :  { %v3642_v26 = vld [vmem:[%s14558_s6 + $0x128] sm:$0xff] }
 0x2ea   :  { %3460 = vmatpush1.bf16.msra.mxu0 %v14995_v27  ;;  %3501 = vmatpush1.bf16.msra.mxu1 %v14996_v47  ;;  %v12095_v27 = vcombine.low %v3645_v49, %v3649_v53  ;;  %v12099_v47 = vcombine.low %v3646_v2, %v3650_v50  ;;  %v3730_v53 = vld [vmem:[%s14558_s6 + $0x3e8] sm:$0xff] }
 0x2eb   :  { %3461 = vmatprep.subr.bf16.mxu0 %v14997_v54  ;;  %3502 = vmatprep.subr.bf16.mxu1 %v14998_v15  ;;  %v12101_v54 = vcombine.high %v3637_v20, %v3641_v62  ;;  %v12104_v15 = vcombine.high %v3638_v23, %v3642_v26  ;;  %v12228_v50 = vcombine.low %v3726_v41, %v3730_v53 }
 0x2ee   :  { %3462 = vmatpush1.bf16.msra.mxu0 %v14999_v55  ;;  %3503 = vmatpush1.bf16.msra.mxu1 %v15000_v28  ;;  %v12107_v55 = vcombine.low %v3637_v20, %v3641_v62  ;;  %v12111_v28 = vcombine.low %v3638_v23, %v3642_v26  ;;  %v12230_v20 = vcombine.high %v3726_v41, %v3730_v53  ;;  %v3717_v62 = vld [vmem:[%s14558_s6 + $0x380] sm:$0xff]  ;;  %v3718_v26 = vld [vmem:[%s14558_s6 + $0x388] sm:$0xff] }
 0x2ef   :  { %3463 = vmatprep.subr.bf16.mxu0 %v15001_v60  ;;  %3504 = vmatprep.subr.bf16.mxu1 %v15002_v22  ;;  %v3629_v60 = vld [vmem:[%s14558_s6 + $0xc0] sm:$0xff]  ;;  %v3706_v41 = vld [vmem:[%s14558_s6 + $0x328] sm:$0xff] }
 0x2f0   :  { %v3633_v22 = vld [vmem:[%s14558_s6 + $0xe0] sm:$0xff] }
 0x2f1   :  { %v3721_v23 = vld [vmem:[%s14558_s6 + $0x3a0] sm:$0xff] }
 0x2f2   :  { %3464 = vmatpush1.bf16.msra.mxu0 %v15003_v30  ;;  %3505 = vmatpush1.bf16.msra.mxu1 %v15004_v44  ;;  %v3630_v30 = vld [vmem:[%s14558_s6 + $0xc8] sm:$0xff]  ;;  %v12125_v44 = vcombine.high %v3629_v60, %v3633_v22  ;;  %v3693_v53 = vld [vmem:[%s14558_s6 + $0x2c0] sm:$0xff] }
 0x2f3   :  { %3465 = vmatprep.subr.bf16.mxu0 %v15005_v4  ;;  %3506 = vmatprep.subr.bf16.mxu1 %v15006_v32  ;;  %v3634_v4 = vld [vmem:[%s14558_s6 + $0xe8] sm:$0xff]  ;;  %v12130_v32 = vcombine.low %v3629_v60, %v3633_v22  ;;  %v12245_v60 = vcombine.high %v3717_v62, %v3721_v23 }
 0x2f4   :  { %v3722_v22 = vld [vmem:[%s14558_s6 + $0x3a8] sm:$0xff] }
 0x2f5   :  { %15028 = vst [vmem:[#allocation54_spill] sm:$0xff] %v12245_v60 }
 0x2f6   :  { %3466 = vmatpush2.bf16.msra.mxu0 %v15007_v12  ;;  %3507 = vmatpush2.bf16.msra.mxu1 %v15008_v5  ;;  %v12132_v12 = vcombine.low %v3630_v30, %v3634_v4  ;;  %v12134_v5 = vcombine.high %v3630_v30, %v3634_v4  ;;  %v12250_v30 = vcombine.low %v3717_v62, %v3721_v23  ;;  %v3697_v62 = vld [vmem:[%s14558_s6 + $0x2e0] sm:$0xff] }
 0x2f7   :  { %3467 = vmatprep.subr.bf16.mxu0 %v15009_v35  ;;  %3508 = vmatprep.subr.bf16.mxu1 %v15010_v61  ;;  %v3621_v35 = vld [vmem:[%s14558_s6 + $0x80] sm:$0xff]  ;;  %v12252_v4 = vcombine.low %v3718_v26, %v3722_v22 }
 0x2f8   :  { %v3625_v61 = vld [vmem:[%s14558_s6 + $0xa0] sm:$0xff]  ;;  %15029 = vst [vmem:[#allocation55_spill] sm:$0xff] %v12250_v30 }
 0x2f9   :  { %15030 = vst [vmem:[#allocation57_spill] sm:$0xff] %v12252_v4 }
 0x2fa   :  { %3468 = vmatpush2.bf16.msra.mxu0 %v15011_v34  ;;  %3509 = vmatpush2.bf16.msra.mxu1 %v15012_v31  ;;  %v3622_v34 = vld [vmem:[%s14558_s6 + $0x88] sm:$0xff]  ;;  %v12149_v31 = vcombine.high %v3621_v35, %v3625_v61 }
 0x2fb   :  { %3469 = vmatprep.subr.bf16.mxu0 %v15013_v48  ;;  %3510 = vmatprep.subr.bf16.mxu1 %v15014_v59  ;;  %v3626_v48 = vld [vmem:[%s14558_s6 + $0xa8] sm:$0xff]  ;;  %v12154_v59 = vcombine.low %v3621_v35, %v3625_v61  ;;  %v12254_v35 = vcombine.high %v3718_v26, %v3722_v22  ;;  %v3709_v61 = vld [vmem:[%s14558_s6 + $0x340] sm:$0xff]  ;;  %v12310_v22 = vcombine.high %v3693_v53, %v3697_v62 }
 0x2fd   :  { %15031 = vst [vmem:[#allocation61_spill] sm:$0xff] %v12254_v35  ;;  %15040 = vst [vmem:[#allocation71_spill] sm:$0xff] %v12310_v22 }
 0x2fe   :  { %3470 = vmatpush2.bf16.msra.mxu0 %v15015_v19  ;;  %3511 = vmatpush2.bf16.msra.mxu1 %v15016_v0  ;;  %v12156_v19 = vcombine.low %v3622_v34, %v3626_v48  ;;  %v12158_v0 = vcombine.high %v3622_v34, %v3626_v48  ;;  %v3713_v34 = vld [vmem:[%s14558_s6 + $0x360] sm:$0xff]  ;;  %v3710_v48 = vld [vmem:[%s14558_s6 + $0x348] sm:$0xff] }
 0x2ff   :  { %3471 = vmatprep.subr.bf16.mxu0 %v15017_v8  ;;  %3512 = vmatprep.subr.bf16.mxu1 %v15018_v9  ;;  %v3613_v8 = vld [vmem:[%s14558_s6 + $0x40] sm:$0xff] }
 0x300   :  { %v3617_v9 = vld [vmem:[%s14558_s6 + $0x60] sm:$0xff] }
 0x302   :  { %3472 = vmatpush2.bf16.msra.mxu0 %v15019_v17  ;;  %3513 = vmatpush2.bf16.msra.mxu1 %v15020_v33  ;;  %v3614_v17 = vld [vmem:[%s14558_s6 + $0x48] sm:$0xff]  ;;  %v12173_v33 = vcombine.high %v3613_v8, %v3617_v9 }
 0x303   :  { %3473 = vmatprep.subr.bf16.mxu0 %v15021_v18  ;;  %3514 = vmatprep.subr.bf16.mxu1 %v15022_v36  ;;  %v3618_v18 = vld [vmem:[%s14558_s6 + $0x68] sm:$0xff]  ;;  %v12178_v36 = vcombine.low %v3613_v8, %v3617_v9  ;;  %v12269_v8 = vcombine.high %v3709_v61, %v3713_v34 }
 0x304   :  { %v3714_v9 = vld [vmem:[%s14558_s6 + $0x368] sm:$0xff] }
 0x305   :  { %15032 = vst [vmem:[#allocation59_spill] sm:$0xff] %v12269_v8 }
 0x306   :  { %3474 = vmatpush2.bf16.msra.mxu0 %v15023_v42  ;;  %3515 = vmatpush2.bf16.msra.mxu1 %v15024_v13  ;;  %v12180_v42 = vcombine.low %v3614_v17, %v3618_v18  ;;  %v12182_v13 = vcombine.high %v3614_v17, %v3618_v18  ;;  %v12274_v17 = vcombine.low %v3709_v61, %v3713_v34  ;;  %v3694_v61 = vld [vmem:[%s14558_s6 + $0x2c8] sm:$0xff] }
 0x307   :  { %3475 = vmatprep.subr.bf16.mxu0 %v15025_v63  ;;  %3516 = vmatprep.subr.bf16.mxu1 %v15026_v11  ;;  %v3605_v63 = vld [vmem:[%s14558_s6] sm:$0xff]  ;;  %v12276_v18 = vcombine.low %v3710_v48, %v3714_v9  ;;  %v3698_v34 = vld [vmem:[%s14558_s6 + $0x2e8] sm:$0xff] }
 0x308   :  { %v3609_v11 = vld [vmem:[%s14558_s6 + $0x20] sm:$0xff]  ;;  %15033 = vst [vmem:[#allocation60_spill] sm:$0xff] %v12274_v17 }
 0x309   :  { %15034 = vst [vmem:[#allocation63_spill] sm:$0xff] %v12276_v18 }
 0x30a   :  { %3476 = vmatpush2.bf16.msra.mxu0 %v15027_v21  ;;  %3517 = vmatpush2.bf16.msra.mxu1 %v11790_v58  ;;  %v3653_v58 = vld [vmem:[%s14558_s6 + $0x180] sm:$0xff]  ;;  %v3606_v21 = vld [vmem:[%s14558_s6 + $0x8] sm:$0xff] }
 0x30b   :  { %3477 = vmatprep.subr.bf16.mxu0 %v11794_v7  ;;  %3518 = vmatprep.subr.bf16.mxu1 %v11796_v46  ;;  %v3661_v7 = vld [vmem:[%s14558_s6 + $0x1c0] sm:$0xff] }
 0x30c   :  { %v3665_v46 = vld [vmem:[%s14558_s6 + $0x1e0] sm:$0xff] }
 0x30e   :  { %3478 = vmatpush2.bf16.msra.mxu0 %v11812_v38  ;;  %3519 = vmatpush2.bf16.msra.mxu1 %v11814_v45  ;;  %v3657_v38 = vld [vmem:[%s14558_s6 + $0x1a0] sm:$0xff] }
 0x30f   :  { %3479 = vmatprep.subr.bf16.mxu0 %v11818_v10  ;;  %3520 = vmatprep.subr.bf16.mxu1 %v11820_v3  ;;  %v3662_v10 = vld [vmem:[%s14558_s6 + $0x1c8] sm:$0xff]  ;;  %v12029_v3 = vcombine.low %v3661_v7, %v3665_v46  ;;  %v12046_v39 = vcombine.high %v3653_v58, %v3657_v38  ;;  %v12071_v56 = vcombine.low %v3653_v58, %v3657_v38  ;;  %v3725_v38 = vld [vmem:[%s14558_s6 + $0x3c0] sm:$0xff] }
 0x310   :  { %v12221_v49 = vcombine.high %v3725_v38, %v3729_v6  ;;  %v12226_v2 = vcombine.low %v3725_v38, %v3729_v6 }
 0x312   :  { %3480 = vmatpush2.bf16.msra.mxu0 %v11824_v51  ;;  %3521 = vmatpush2.bf16.msra.mxu1 %v11826_v40  ;;  %v12031_v51 = vcombine.high %v3661_v7, %v3665_v46  ;;  %v3666_v40 = vld [vmem:[%s14558_s6 + $0x1e8] sm:$0xff]  ;;  %v12197_v7 = vcombine.high %v3605_v63, %v3609_v11 }
 0x313   :  { %v12042_v45 = vcombine.low %v3662_v10, %v3666_v40  ;;  %v3610_v46 = vld [vmem:[%s14558_s6 + $0x28] sm:$0xff] }
 0x314   :  { %4373 = vmatprep.subr.bf16.mxu0 %v12031_v51  ;;  %v12206_v58 = vcombine.high %v3606_v21, %v3610_v46 }
 0x315   :  { %3482 = vmatmul.mubr.bf16.vlgmr.msra.gmra.mxu0 %v11949_v24  ;;  %3523 = vmatmul.mubr.bf16.vlgmr.msra.gmra.mxu1 %v11949_v24  ;;  %v12044_v24 = vcombine.high %v3662_v10, %v3666_v40  ;;  %v12202_v10 = vcombine.low %v3605_v63, %v3609_v11  ;;  %v12204_v40 = vcombine.low %v3606_v21, %v3610_v46  ;;  %v3701_v11 = vld [vmem:[%s14558_s6 + $0x300] sm:$0xff]  ;;  %v3702_v46 = vld [vmem:[%s14558_s6 + $0x308] sm:$0xff] }
 0x316   :  { %4374 = vmatpush1.bf16.msra.mxu0 %v12029_v3  ;;  %v12278_v63 = vcombine.high %v3710_v48, %v3714_v9  ;;  %v3705_v21 = vld [vmem:[%s14558_s6 + $0x320] sm:$0xff]  ;;  %v12306_v23 = vcombine.low %v3702_v46, %v3706_v41  ;;  %v12308_v26 = vcombine.high %v3702_v46, %v3706_v41  ;;  %v12322_v9 = vcombine.high %v3694_v61, %v3698_v34  ;;  %v3690_v46 = vld [vmem:[%s14558_s6 + $0x2a8] sm:$0xff] }
 0x317   :  { %4414 = vmatprep.subr.bf16.mxu1 %v12044_v24  ;;  %4375 = vmatprep.subr.bf16.mxu0 %v12046_v39  ;;  %v12293_v38 = vcombine.low %v3701_v11, %v3705_v21  ;;  %v12295_v6 = vcombine.high %v3701_v11, %v3705_v21  ;;  %v3685_v48 = vld [vmem:[%s14558_s6 + $0x280] sm:$0xff]  ;;  %v3686_v21 = vld [vmem:[%s14558_s6 + $0x288] sm:$0xff]  ;;  %v12335_v41 = vcombine.low %v3693_v53, %v3697_v62 }
 0x318   :  { %4415 = vmatpush1.bf16.msra.mxu1 %v12042_v45  ;;  %15035 = vst [vmem:[#allocation67_spill] sm:$0xff] %v12278_v63  ;;  %15038 = vst [vmem:[#allocation69_spill] sm:$0xff] %v12306_v23  ;;  %v3689_v11 = vld [vmem:[%s14558_s6 + $0x2a0] sm:$0xff]  ;;  %v3678_v62 = vld [vmem:[%s14558_s6 + $0x248] sm:$0xff] }
 0x319   :  { %4416 = vmatprep.subr.bf16.mxu1 %v12058_v52  ;;  %15036 = vst [vmem:[#allocation65_spill] sm:$0xff] %v12293_v38  ;;  %15037 = vst [vmem:[#allocation66_spill] sm:$0xff] %v12295_v6  ;;  %v3681_v53 = vld [vmem:[%s14558_s6 + $0x260] sm:$0xff] }
 0x31a   :  { %4376 = vmatpush1.bf16.msra.mxu0 %v12071_v56  ;;  %15039 = vst [vmem:[#allocation73_spill] sm:$0xff] %v12308_v26  ;;  %15041 = vst [vmem:[#allocation72_spill] sm:$0xff] %v12322_v9 }
 0x31b   :  { %4377 = vmatprep.subr.bf16.mxu0 %v12077_v25  ;;  %15042 = vst [vmem:[#allocation76_spill] sm:$0xff] %v12335_v41 }
 0x31c   :  { %4417 = vmatpush1.bf16.msra.mxu1 %v12075_v43 }
 0x31d   :  { %4418 = vmatprep.subr.bf16.mxu1 %v12080_v16 }
 0x31e   :  { %4378 = vmatpush1.bf16.msra.mxu0 %v12095_v27 }
 0x31f   :  { %4379 = vmatprep.subr.bf16.mxu0 %v12101_v54 }
 0x320   :  { %4419 = vmatpush1.bf16.msra.mxu1 %v12099_v47 }
 0x321   :  { %4420 = vmatprep.subr.bf16.mxu1 %v12104_v15 }
 0x322   :  { %4380 = vmatpush1.bf16.msra.mxu0 %v12107_v55 }
 0x323   :  { %4381 = vmatprep.subr.bf16.mxu0 %v12125_v44 }
 0x324   :  { %4421 = vmatpush1.bf16.msra.mxu1 %v12111_v28 }
 0x325   :  { %4422 = vmatprep.subr.bf16.mxu1 %v12134_v5 }
 0x326   :  { %4382 = vmatpush1.bf16.msra.mxu0 %v12130_v32 }
 0x327   :  { %4383 = vmatprep.subr.bf16.mxu0 %v12149_v31 }
 0x328   :  { %4423 = vmatpush1.bf16.msra.mxu1 %v12132_v12 }
 0x329   :  { %4424 = vmatprep.subr.bf16.mxu1 %v12158_v0 }
 0x32a   :  { %4384 = vmatpush1.bf16.msra.mxu0 %v12154_v59 }
 0x32b   :  { %4385 = vmatprep.subr.bf16.mxu0 %v12173_v33 }
 0x32c   :  { %4425 = vmatpush1.bf16.msra.mxu1 %v12156_v19 }
 0x32d   :  { %4426 = vmatprep.subr.bf16.mxu1 %v12182_v13 }
 0x32e   :  { %4386 = vmatpush1.bf16.msra.mxu0 %v12178_v36 }
 0x32f   :  { %4387 = vmatprep.subr.bf16.mxu0 %v12197_v7 }
 0x330   :  { %4427 = vmatpush1.bf16.msra.mxu1 %v12180_v42 }
 0x331   :  { %4428 = vmatprep.subr.bf16.mxu1 %v12206_v58 }
 0x332   :  { %4388 = vmatpush1.bf16.msra.mxu0 %v12202_v10 }
 0x333   :  { %4389 = vmatprep.subr.bf16.mxu0 %v12221_v49 }
 0x334   :  { %4429 = vmatpush1.bf16.msra.mxu1 %v12204_v40 }
 0x335   :  { %4430 = vmatprep.subr.bf16.mxu1 %v12230_v20 }
 0x336   :  { %4390 = vmatpush2.bf16.msra.mxu0 %v12226_v2 }
 0x337   :  { %4391 = vmatprep.subr.bf16.mxu0 %v12245_v60 }
 0x338   :  { %4431 = vmatpush2.bf16.msra.mxu1 %v12228_v50 }
 0x339   :  { %4432 = vmatprep.subr.bf16.mxu1 %v12254_v35 }
 0x33a   :  { %4392 = vmatpush2.bf16.msra.mxu0 %v12250_v30 }
 0x33b   :  { %4393 = vmatprep.subr.bf16.mxu0 %v12269_v8  ;;  %v15060_v8 = vld [vmem:[#allocation29_spill] sm:$0xff] }
 0x33c   :  { %4433 = vmatpush2.bf16.msra.mxu1 %v12252_v4 }
 0x33d   :  { %4434 = vmatprep.subr.bf16.mxu1 %v12278_v63 }
 0x33e   :  { %4394 = vmatpush2.bf16.msra.mxu0 %v12274_v17  ;;  %v12344_v17 = vcombine.high %v3686_v21, %v3690_v46 }
 0x33f   :  { %4395 = vmatprep.subr.bf16.mxu0 %v12295_v6  ;;  %v12339_v6 = vcombine.low %v3694_v61, %v3698_v34  ;;  %v3682_v61 = vld [vmem:[%s14558_s6 + $0x268] sm:$0xff]  ;;  %v12359_v34 = vcombine.low %v3685_v48, %v3689_v11 }
 0x340   :  { %4435 = vmatpush2.bf16.msra.mxu1 %v12276_v18  ;;  %v12341_v18 = vcombine.high %v3685_v48, %v3689_v11  ;;  %15045 = vst [vmem:[#allocation78_spill] sm:$0xff] %v12344_v17  ;;  %v3673_v48 = vld [vmem:[%s14558_s6 + $0x220] sm:$0xff]  ;;  %v3670_v11 = vld [vmem:[%s14558_s6 + $0x208] sm:$0xff] }
 0x341   :  { %4436 = vmatprep.subr.bf16.mxu1 %v12308_v26  ;;  %15043 = vst [vmem:[#allocation79_spill] sm:$0xff] %v12339_v6  ;;  %v3677_v26 = vld [vmem:[%s14558_s6 + $0x240] sm:$0xff]  ;;  %15046 = vst [vmem:[#allocation80_spill] sm:$0xff] %v12359_v34 }
 0x342   :  { %4396 = vmatpush2.bf16.msra.mxu0 %v12293_v38  ;;  %15044 = vst [vmem:[#allocation75_spill] sm:$0xff] %v12341_v18  ;;  %v3669_v38 = vld [vmem:[%s14558_s6 + $0x200] sm:$0xff] }
 0x343   :  { %4397 = vmatprep.subr.bf16.mxu0 %v12310_v22  ;;  %v12365_v22 = vcombine.high %v3677_v26, %v3681_v53 }
 0x344   :  { %4437 = vmatpush2.bf16.msra.mxu1 %v12306_v23  ;;  %v12368_v23 = vcombine.high %v3678_v62, %v3682_v61 }
 0x345   :  { %4438 = vmatprep.subr.bf16.mxu1 %v12322_v9  ;;  %v12363_v9 = vcombine.low %v3686_v21, %v3690_v46  ;;  %15048 = vst [vmem:[#allocation83_spill] sm:$0xff] %v12365_v22  ;;  %v3674_v21 = vld [vmem:[%s14558_s6 + $0x228] sm:$0xff]  ;;  %v12383_v46 = vcombine.low %v3677_v26, %v3681_v53  ;;  %v3663_v53 = vld [vmem:[%s14558_s6 + $0x1d0] sm:$0xff] }
 0x346   :  { %4398 = vmatpush2.bf16.msra.mxu0 %v12335_v41  ;;  %15049 = vst [vmem:[#allocation84_spill] sm:$0xff] %v12368_v23  ;;  %v12395_v41 = vcombine.low %v3669_v38, %v3673_v48  ;;  %v12399_v26 = vcombine.low %v3670_v11, %v3674_v21 }
 0x347   :  { %4399 = vmatprep.subr.bf16.mxu0 %v12341_v18  ;;  %15047 = vst [vmem:[#allocation81_spill] sm:$0xff] %v12363_v9  ;;  %15050 = vst [vmem:[#allocation85_spill] sm:$0xff] %v12383_v46  ;;  %v12389_v18 = vcombine.high %v3669_v38, %v3673_v48  ;;  %v3664_v38 = vld [vmem:[%s14558_s6 + $0x1d8] sm:$0xff] }
 0x348   :  { %4439 = vmatpush2.bf16.msra.mxu1 %v12339_v6  ;;  %v12392_v6 = vcombine.high %v3670_v11, %v3674_v21  ;;  %15054 = vst [vmem:[#allocation89_spill] sm:$0xff] %v12395_v41  ;;  %15055 = vst [vmem:[#allocation90_spill] sm:$0xff] %v12399_v26  ;;  %v3668_v11 = vld [vmem:[%s14558_s6 + $0x1f8] sm:$0xff] }
 0x349   :  { %4440 = vmatprep.subr.bf16.mxu1 %v12344_v17  ;;  %v12387_v17 = vcombine.low %v3678_v62, %v3682_v61  ;;  %15052 = vst [vmem:[#allocation86_spill] sm:$0xff] %v12389_v18  ;;  %v3667_v62 = vld [vmem:[%s14558_s6 + $0x1f0] sm:$0xff]  ;;  %v12420_v21 = vcombine.low %v3664_v38, %v3668_v11 }
 0x34a   :  { %4400 = vmatpush2.bf16.msra.mxu0 %v12359_v34  ;;  %15053 = vst [vmem:[#allocation88_spill] sm:$0xff] %v12392_v6  ;;  %v12413_v61 = vcombine.low %v3663_v53, %v3667_v62  ;;  %v12415_v48 = vcombine.high %v3663_v53, %v3667_v62  ;;  %v15059_v62 = vld [vmem:[#allocation16_spill] sm:$0xff] }
 0x34b   :  { %4401 = vmatprep.subr.bf16.mxu0 %v12365_v22  ;;  %15051 = vst [vmem:[#allocation87_spill] sm:$0xff] %v12387_v17 }
 0x34c   :  { %4441 = vmatpush2.bf16.msra.mxu1 %v12363_v9  ;;  %15056 = vst [vmem:[#allocation91_spill] sm:$0xff] %v12415_v48 }
 0x34d   :  { %4442 = vmatprep.subr.bf16.mxu1 %v12368_v23 }
 0x34e   :  { %4402 = vmatpush2.bf16.msra.mxu0 %v12383_v46 }
 0x34f   :  { %4403 = vmatprep.subr.bf16.mxu0 %v12389_v18 }
 0x350   :  { %4443 = vmatpush2.bf16.msra.mxu1 %v12387_v17  ;;  %v15058_v17 = vld [vmem:[#allocation14_spill] sm:$0xff] }
 0x351   :  { %4444 = vmatprep.subr.bf16.mxu1 %v12392_v6 }
 0x352   :  { %4404 = vmatpush2.bf16.msra.mxu0 %v12395_v41  ;;  %v12422_v41 = vcombine.high %v3664_v38, %v3668_v11 }
 0x353   :  { %4455 = vmatprep.subr.bf16.mxu0 %v12415_v48 }
 0x354   :  { %4445 = vmatpush2.bf16.msra.mxu1 %v12399_v26  ;;  %15057 = vst [vmem:[#allocation92_spill] sm:$0xff] %v12422_v41 }
 0x355   :  { %4496 = vmatprep.subr.bf16.mxu1 %v12422_v41  ;;  %v15061_v41 = vld [vmem:[#allocation27_spill] sm:$0xff] }
 0x395   :  { %v3401_v6 = vpop.f32.mrf.mxu0  ;;  %v3442_v18 = vpop.f32.mrf.mxu1 }
 0x396   :  { %v3531_v26 = vadd.f32 %v3401_v6, %v15058_v17  ;;  %v3533_v48 = vadd.f32 %v3442_v18, %v15061_v41 }
 0x397   :  { %v3403_v46 = vpop.f32.mrf.mxu0  ;;  %v3444_v23 = vpop.f32.mrf.mxu1 }
 0x398   :  { %v3535_v53 = vmul.f32 0.5, %v3531_v26  ;;  %v3532_v22 = vadd.f32 %v3403_v46, %v15059_v62  ;;  %v3534_v38 = vadd.f32 %v3444_v23, %v15060_v8  ;;  %v3543_v30 = vmul.f32 0.5, %v3533_v48  ;;  %v15063_v62 = vld [vmem:[#allocation40_spill] sm:$0xff] }
 0x399   :  { %v3405_v9 = vpop.f32.mrf.mxu0  ;;  %v3446_v34 = vpop.f32.mrf.mxu1 }
 0x39a   :  { %10042 = vtanh.f32 %v3535_v53  ;;  %v3539_v63 = vmul.f32 0.5, %v3532_v22 }
 0x39b   :  { %v3406_v11 = vpop.f32.mrf.mxu0  ;;  %v3447_v4 = vpop.f32.mrf.mxu1 }
 0x39c   :  { %10044 = vtanh.f32 %v3539_v63 }
 0x39d   :  { %10046 = vtanh.f32 %v3534_v38 }
 0x39e   :  { %10048 = vtanh.f32 %v3543_v30 }
 0x3a7   :  { %v10043_v35 = vpop.eup %10042 }
 0x3a8   :  { %v3537_v17 = vmul.f32 0.5, %v10043_v35 }
 0x3a9   :  { %v10045_v6 = vpop.eup %10044 }
 0x3aa   :  { %v3538_v60 = vadd.f32 0.5, %v3537_v17  ;;  %v3541_v26 = vmul.f32 0.5, %v10045_v6  ;;  %v10047_v46 = vpop.eup %10046  ;;  %v15064_v6 = vld [vmem:[#allocation42_spill] sm:$0xff] }
 0x3ab   :  { %v10049_v8 = vpop.eup %10048 }
 0x3ac   :  { %v3542_v9 = vadd.f32 0.5, %v3541_v26  ;;  %v3549_v34 = vmul.f32 %v10047_v46, %v3538_v60  ;;  %v3545_v35 = vmul.f32 0.5, %v10049_v8 }
 0x3ae   :  { %v3548_v22 = vmul.f32 %v3542_v9, %v11914_v14  ;;  %v3546_v18 = vadd.f32 0.5, %v3545_v35 }
 0x3b0   :  { %v3550_v53 = vadd.f32 %v3549_v34, %v3548_v22  ;;  %v15065_v22 = vld [vmem:[#allocation74_spill] sm:$0xff] }
 0x3b2   :  { %10050 = vtanh.f32 %v3550_v53  ;;  %v12435_v4 = vsel %vm3575_vm7, %v3550_v53, %v11914_v14 }
 0x3b3   :  { %15062 = vst [vmem:[#allocation10_spill] sm:$0xff] %v12435_v4 }
 0x3bf   :  { %v10051_v63 = vpop.eup %10050 }
 0x3c0   :  { %v3552_v30 = vmul.f32 %v10051_v63, %v3546_v18  ;;  %v15066_v18 = vld [vmem:[#allocation70_spill] sm:$0xff] }
 0x3c2   :  { %v3581_v23 = vsel %vm3575_vm7, %v3552_v30, 0.0 }
 0x3c3   :  { %v3582_v60 = vpack.c.bf16 %v3581_v23, %v3581_v23 }
 0x3c5   :  { %9259 = vst [vmem:[%s14561_s9 + $0x8] sm:$0xf] %v3582_v60 }
 0x3d5   :  { %v3483_v41 = vpop.f32.mrf.mxu0  ;;  %v3524_v48 = vpop.f32.mrf.mxu1 }
 0x3d6   :  { %v3553_v38 = vadd.f32 %v3483_v41, %v15063_v62  ;;  %v3555_v63 = vadd.f32 %v3524_v48, %v15066_v18  ;;  %v3659_v18 = vld [vmem:[%s14558_s6 + $0x1b0] sm:$0xff] }
 0x3d7   :  { %v3485_v11 = vpop.f32.mrf.mxu0  ;;  %v3526_v14 = vpop.f32.mrf.mxu1 }
 0x3d8   :  { %v3557_v17 = vmul.f32 0.5, %v3553_v38  ;;  %v3554_v26 = vadd.f32 %v3485_v11, %v15064_v6  ;;  %v3556_v53 = vadd.f32 %v3526_v14, %v15065_v22  ;;  %v3565_v23 = vmul.f32 0.5, %v3555_v63 }
 0x3d9   :  { %v3487_v46 = vpop.f32.mrf.mxu0  ;;  %v3528_v9 = vpop.f32.mrf.mxu1 }
 0x3da   :  { %10052 = vtanh.f32 %v3557_v17  ;;  %v3561_v34 = vmul.f32 0.5, %v3554_v26 }
 0x3db   :  { %v3488_v8 = vpop.f32.mrf.mxu0  ;;  %v3529_v35 = vpop.f32.mrf.mxu1 }
 0x3dc   :  { %10054 = vtanh.f32 %v3561_v34  ;;  %v3655_v8 = vld [vmem:[%s14558_s6 + $0x190] sm:$0xff] }
 0x3dd   :  { %10056 = vtanh.f32 %v3556_v53 }
 0x3de   :  { %10058 = vtanh.f32 %v3565_v23 }
 0x3e7   :  { %v10053_v60 = vpop.eup %10052 }
 0x3e8   :  { %v3559_v41 = vmul.f32 0.5, %v10053_v60  ;;  %v3647_v60 = vld [vmem:[%s14558_s6 + $0x150] sm:$0xff] }
 0x3e9   :  { %v10055_v62 = vpop.eup %10054 }
 0x3ea   :  { %v3560_v4 = vadd.f32 0.5, %v3559_v41  ;;  %v3563_v38 = vmul.f32 0.5, %v10055_v62  ;;  %v10057_v11 = vpop.eup %10056  ;;  %v12489_v41 = vcombine.high %v3655_v8, %v3659_v18 }
 0x3eb   :  { %v10059_v14 = vpop.eup %10058 }
 0x3ec   :  { %v3564_v6 = vadd.f32 0.5, %v3563_v38  ;;  %v3571_v46 = vmul.f32 %v10057_v11, %v3560_v4  ;;  %v3567_v9 = vmul.f32 0.5, %v10059_v14  ;;  %v12456_v4 = vsel %vm3575_vm7, %v3552_v30, %v11936_v57  ;;  %v3656_v57 = vld [vmem:[%s14558_s6 + $0x198] sm:$0xff]  ;;  %v3651_v38 = vld [vmem:[%s14558_s6 + $0x170] sm:$0xff] }
 0x3ed   :  { %v3660_v30 = vld [vmem:[%s14558_s6 + $0x1b8] sm:$0xff]  ;;  %v12481_v23 = vpack.c.bf16 %v12456_v4, %v12456_v4 }
 0x3ee   :  { %v3570_v17 = vmul.f32 %v3564_v6, %v11931_v29  ;;  %v3568_v34 = vadd.f32 0.5, %v3567_v9  ;;  %v12491_v62 = vcombine.high %v3656_v57, %v3660_v30  ;;  %v3648_v11 = vld [vmem:[%s14558_s6 + $0x158] sm:$0xff]  ;;  %v3639_v9 = vld [vmem:[%s14558_s6 + $0x110] sm:$0xff] }
 0x3ef   :  { %v3652_v6 = vld [vmem:[%s14558_s6 + $0x178] sm:$0xff] }
 0x3f0   :  { %v3572_v26 = vadd.f32 %v3571_v46, %v3570_v17  ;;  %v12506_v46 = vcombine.low %v3655_v8, %v3659_v18  ;;  %v12508_v17 = vcombine.low %v3656_v57, %v3660_v30  ;;  %v12512_v14 = vcombine.high %v3648_v11, %v3652_v6  ;;  %v3631_v30 = vld [vmem:[%s14558_s6 + $0xd0] sm:$0xff] }
 0x3f1   :  { %v12530_v8 = vcombine.low %v3647_v60, %v3651_v38 }
 0x3f2   :  { %10060 = vtanh.f32 %v3572_v26  ;;  %v12451_v48 = vsel %vm3576_vm8, %v3572_v26, %v11931_v29  ;;  %v12510_v26 = vcombine.high %v3647_v60, %v3651_v38  ;;  %15068 = vst [vmem:[#allocation25_spill] sm:$0xff] %v12512_v14  ;;  %v3636_v60 = vld [vmem:[%s14558_s6 + $0xf8] sm:$0xff] }
 0x3f3   :  { %15069 = vst [vmem:[#allocation23_spill] sm:$0xff] %v12530_v8 }
 0x3f4   :  { %15067 = vst [vmem:[#allocation12_spill] sm:$0xff] %v12510_v26 }
 0x3ff   :  { %v10061_v22 = vpop.eup %10060 }
 0x400   :  { %v3574_v53 = vmul.f32 %v10061_v22, %v3568_v34  ;;  %v3643_v34 = vld [vmem:[%s14558_s6 + $0x130] sm:$0xff]  ;;  %v3640_v22 = vld [vmem:[%s14558_s6 + $0x118] sm:$0xff] }
 0x401   :  { %v12536_v18 = vcombine.high %v3639_v9, %v3643_v34  ;;  %v12554_v38 = vcombine.low %v3639_v9, %v3643_v34  ;;  %v3624_v9 = vld [vmem:[%s14558_s6 + $0x98] sm:$0xff] }
 0x402   :  { %v12464_v35 = vsel %vm3576_vm8, %v3574_v53, %v11941_v37  ;;  %v3585_v29 = vsel %vm3576_vm8, %v3574_v53, 0.0  ;;  %v3644_v53 = vld [vmem:[%s14558_s6 + $0x138] sm:$0xff] }
 0x403   :  { %v3586_v63 = vpack.c.bf16 %v3585_v29, %v3585_v29  ;;  %v3604_v37 = vpack.c.bf16 %v12464_v35, %v12464_v35  ;;  %v12532_v29 = vcombine.low %v3648_v11, %v3652_v6  ;;  %15071 = vst [vmem:[#allocation46_spill] sm:$0xff] %v12536_v18  ;;  %v12538_v57 = vcombine.high %v3640_v22, %v3644_v53  ;;  %v3628_v34 = vld [vmem:[%s14558_s6 + $0xb8] sm:$0xff] }
 0x404   :  { %15073 = vst [vmem:[#allocation77_spill] sm:$0xff] %v12554_v38  ;;  %v12556_v11 = vcombine.low %v3640_v22, %v3644_v53 }
 0x405   :  { %9260 = vst [vmem:[%s14561_s9 + $0x34] sm:$0xf] %v3586_v63  ;;  %4405 = vmatprep.mubr.bf16.mxu0 %v3604_v37  ;;  %4446 = vmatprep.mubr.bf16.mxu1 %v3604_v37  ;;  %15070 = vst [vmem:[#allocation44_spill] sm:$0xff] %v12532_v29  ;;  %v3635_v63 = vld [vmem:[%s14558_s6 + $0xf0] sm:$0xff] }
 0x406   :  { %4406 = vmatmul.mubr.bf16.vlgmr.msra.gmra.mxu0 %v12481_v23  ;;  %4447 = vmatmul.mubr.bf16.vlgmr.msra.gmra.mxu1 %v12481_v23  ;;  %15072 = vst [vmem:[#allocation82_spill] sm:$0xff] %v12538_v57  ;;  %15074 = vst [vmem:[#allocation93_spill] sm:$0xff] %v12556_v11  ;;  %v12560_v6 = vcombine.high %v3631_v30, %v3635_v63  ;;  %v12578_v22 = vcombine.low %v3631_v30, %v3635_v63  ;;  %v3616_v30 = vld [vmem:[%s14558_s6 + $0x58] sm:$0xff] }
 0x407   :  { %4456 = vmatpush1.bf16.msra.mxu0 %v12413_v61  ;;  %4497 = vmatpush1.bf16.msra.mxu1 %v12420_v21  ;;  %v3620_v63 = vld [vmem:[%s14558_s6 + $0x78] sm:$0xff] }
 0x408   :  { %4487 = vmatprep.mubr.bf16.mxu0 %v3604_v37  ;;  %4528 = vmatprep.mubr.bf16.mxu1 %v3604_v37  ;;  %v3632_v37 = vld [vmem:[%s14558_s6 + $0xd8] sm:$0xff]  ;;  %15075 = vst [vmem:[#allocation94_spill] sm:$0xff] %v12560_v6  ;;  %15077 = vst [vmem:[#allocation96_spill] sm:$0xff] %v12578_v22 }
 0x409   :  { %4457 = vmatprep.subr.bf16.mxu0 %v12489_v41  ;;  %4498 = vmatprep.subr.bf16.mxu1 %v12491_v62  ;;  %v12580_v53 = vcombine.low %v3632_v37, %v3636_v60 }
 0x40b   :  { %4458 = vmatpush1.bf16.msra.mxu0 %v12506_v46  ;;  %4499 = vmatpush1.bf16.msra.mxu1 %v12508_v17  ;;  %15078 = vst [vmem:[#allocation97_spill] sm:$0xff] %v12580_v53 }
 0x40c   :  { %4459 = vmatprep.subr.bf16.mxu0 %v12510_v26  ;;  %4500 = vmatprep.subr.bf16.mxu1 %v12512_v14  ;;  %v12562_v14 = vcombine.high %v3632_v37, %v3636_v60  ;;  %v3623_v26 = vld [vmem:[%s14558_s6 + $0x90] sm:$0xff]  ;;  %v12604_v60 = vcombine.low %v3624_v9, %v3628_v34 }
 0x40e   :  { %15076 = vst [vmem:[#allocation95_spill] sm:$0xff] %v12562_v14  ;;  %15082 = vst [vmem:[#allocation101_spill] sm:$0xff] %v12604_v60 }
 0x40f   :  { %4460 = vmatpush1.bf16.msra.mxu0 %v12530_v8  ;;  %4501 = vmatpush1.bf16.msra.mxu1 %v12532_v29  ;;  %v3627_v29 = vld [vmem:[%s14558_s6 + $0xb0] sm:$0xff] }
 0x410   :  { %4461 = vmatprep.subr.bf16.mxu0 %v12536_v18  ;;  %4502 = vmatprep.subr.bf16.mxu1 %v12538_v57  ;;  %v12584_v57 = vcombine.high %v3623_v26, %v3627_v29  ;;  %v12586_v18 = vcombine.high %v3624_v9, %v3628_v34  ;;  %v3615_v8 = vld [vmem:[%s14558_s6 + $0x50] sm:$0xff]  ;;  %v12602_v37 = vcombine.low %v3623_v26, %v3627_v29  ;;  %v3608_v26 = vld [vmem:[%s14558_s6 + $0x18] sm:$0xff] }
 0x411   :  { %v3612_v29 = vld [vmem:[%s14558_s6 + $0x38] sm:$0xff]  ;;  %v12628_v34 = vcombine.low %v3616_v30, %v3620_v63 }
 0x412   :  { %15079 = vst [vmem:[#allocation98_spill] sm:$0xff] %v12584_v57  ;;  %15080 = vst [vmem:[#allocation99_spill] sm:$0xff] %v12586_v18 }
 0x413   :  { %4462 = vmatpush1.bf16.msra.mxu0 %v12554_v38  ;;  %4503 = vmatpush1.bf16.msra.mxu1 %v12556_v11  ;;  %v3619_v11 = vld [vmem:[%s14558_s6 + $0x70] sm:$0xff]  ;;  %15081 = vst [vmem:[#allocation100_spill] sm:$0xff] %v12602_v37  ;;  %15086 = vst [vmem:[#allocation105_spill] sm:$0xff] %v12628_v34 }
 0x414   :  { %4463 = vmatprep.subr.bf16.mxu0 %v12560_v6  ;;  %4504 = vmatprep.subr.bf16.mxu1 %v12562_v14  ;;  %v12608_v14 = vcombine.high %v3615_v8, %v3619_v11  ;;  %v12610_v6 = vcombine.high %v3616_v30, %v3620_v63  ;;  %v3607_v38 = vld [vmem:[%s14558_s6 + $0x10] sm:$0xff]  ;;  %v12626_v9 = vcombine.low %v3615_v8, %v3619_v11  ;;  %v3728_v8 = vld [vmem:[%s14558_s6 + $0x3d8] sm:$0xff] }
 0x415   :  { %v3732_v11 = vld [vmem:[%s14558_s6 + $0x3f8] sm:$0xff]  ;;  %v12652_v63 = vcombine.low %v3608_v26, %v3612_v29 }
 0x416   :  { %15083 = vst [vmem:[#allocation102_spill] sm:$0xff] %v12608_v14  ;;  %15084 = vst [vmem:[#allocation103_spill] sm:$0xff] %v12610_v6 }
 0x417   :  { %4464 = vmatpush1.bf16.msra.mxu0 %v12578_v22  ;;  %4505 = vmatpush1.bf16.msra.mxu1 %v12580_v53  ;;  %v3611_v53 = vld [vmem:[%s14558_s6 + $0x30] sm:$0xff]  ;;  %15085 = vst [vmem:[#allocation104_spill] sm:$0xff] %v12626_v9  ;;  %15090 = vst [vmem:[#allocation109_spill] sm:$0xff] %v12652_v63 }
 0x418   :  { %4465 = vmatprep.subr.bf16.mxu0 %v12584_v57  ;;  %4506 = vmatprep.subr.bf16.mxu1 %v12586_v18  ;;  %v12632_v18 = vcombine.high %v3607_v38, %v3611_v53  ;;  %v12634_v57 = vcombine.high %v3608_v26, %v3612_v29  ;;  %v3727_v22 = vld [vmem:[%s14558_s6 + $0x3d0] sm:$0xff]  ;;  %v12650_v30 = vcombine.low %v3607_v38, %v3611_v53  ;;  %v3720_v38 = vld [vmem:[%s14558_s6 + $0x398] sm:$0xff] }
 0x419   :  { %v3724_v53 = vld [vmem:[%s14558_s6 + $0x3b8] sm:$0xff]  ;;  %v12676_v29 = vcombine.low %v3728_v8, %v3732_v11 }
 0x41a   :  { %15087 = vst [vmem:[#allocation106_spill] sm:$0xff] %v12632_v18  ;;  %15088 = vst [vmem:[#allocation107_spill] sm:$0xff] %v12634_v57 }
 0x41b   :  { %4466 = vmatpush1.bf16.msra.mxu0 %v12602_v37  ;;  %4507 = vmatpush1.bf16.msra.mxu1 %v12604_v60  ;;  %v3731_v60 = vld [vmem:[%s14558_s6 + $0x3f0] sm:$0xff]  ;;  %15089 = vst [vmem:[#allocation108_spill] sm:$0xff] %v12650_v30  ;;  %15094 = vst [vmem:[#allocation113_spill] sm:$0xff] %v12676_v29 }
 0x41c   :  { %4467 = vmatprep.subr.bf16.mxu0 %v12608_v14  ;;  %4508 = vmatprep.subr.bf16.mxu1 %v12610_v6  ;;  %v12656_v6 = vcombine.high %v3727_v22, %v3731_v60  ;;  %v12658_v14 = vcombine.high %v3728_v8, %v3732_v11  ;;  %v3719_v37 = vld [vmem:[%s14558_s6 + $0x390] sm:$0xff]  ;;  %v12674_v26 = vcombine.low %v3727_v22, %v3731_v60  ;;  %v3712_v22 = vld [vmem:[%s14558_s6 + $0x358] sm:$0xff] }
 0x41d   :  { %v3716_v60 = vld [vmem:[%s14558_s6 + $0x378] sm:$0xff]  ;;  %v12700_v11 = vcombine.low %v3720_v38, %v3724_v53 }
 0x41e   :  { %15091 = vst [vmem:[#allocation110_spill] sm:$0xff] %v12656_v6  ;;  %15092 = vst [vmem:[#allocation111_spill] sm:$0xff] %v12658_v14 }
 0x41f   :  { %4468 = vmatpush1.bf16.msra.mxu0 %v12626_v9  ;;  %4509 = vmatpush1.bf16.msra.mxu1 %v12628_v34  ;;  %v3723_v34 = vld [vmem:[%s14558_s6 + $0x3b0] sm:$0xff]  ;;  %15093 = vst [vmem:[#allocation112_spill] sm:$0xff] %v12674_v26  ;;  %15098 = vst [vmem:[#allocation117_spill] sm:$0xff] %v12700_v11 }
 0x420   :  { %4469 = vmatprep.subr.bf16.mxu0 %v12632_v18  ;;  %4510 = vmatprep.subr.bf16.mxu1 %v12634_v57  ;;  %v12680_v57 = vcombine.high %v3719_v37, %v3723_v34  ;;  %v12682_v18 = vcombine.high %v3720_v38, %v3724_v53  ;;  %v3711_v9 = vld [vmem:[%s14558_s6 + $0x350] sm:$0xff]  ;;  %v12698_v8 = vcombine.low %v3719_v37, %v3723_v34  ;;  %v3704_v37 = vld [vmem:[%s14558_s6 + $0x318] sm:$0xff] }
 0x421   :  { %v3708_v34 = vld [vmem:[%s14558_s6 + $0x338] sm:$0xff]  ;;  %v12724_v53 = vcombine.low %v3712_v22, %v3716_v60 }
 0x422   :  { %15095 = vst [vmem:[#allocation114_spill] sm:$0xff] %v12680_v57  ;;  %15096 = vst [vmem:[#allocation115_spill] sm:$0xff] %v12682_v18 }
 0x423   :  { %4470 = vmatpush1.bf16.msra.mxu0 %v12650_v30  ;;  %4511 = vmatpush1.bf16.msra.mxu1 %v12652_v63  ;;  %v3715_v63 = vld [vmem:[%s14558_s6 + $0x370] sm:$0xff]  ;;  %15097 = vst [vmem:[#allocation116_spill] sm:$0xff] %v12698_v8  ;;  %15102 = vst [vmem:[#allocation121_spill] sm:$0xff] %v12724_v53 }
 0x424   :  { %4471 = vmatprep.subr.bf16.mxu0 %v12656_v6  ;;  %4512 = vmatprep.subr.bf16.mxu1 %v12658_v14  ;;  %v12704_v14 = vcombine.high %v3711_v9, %v3715_v63  ;;  %v12706_v6 = vcombine.high %v3712_v22, %v3716_v60  ;;  %v3703_v30 = vld [vmem:[%s14558_s6 + $0x310] sm:$0xff]  ;;  %v12722_v38 = vcombine.low %v3711_v9, %v3715_v63  ;;  %v3696_v9 = vld [vmem:[%s14558_s6 + $0x2d8] sm:$0xff] }
 0x425   :  { %v3700_v63 = vld [vmem:[%s14558_s6 + $0x2f8] sm:$0xff]  ;;  %v12748_v60 = vcombine.low %v3704_v37, %v3708_v34 }
 0x426   :  { %15099 = vst [vmem:[#allocation118_spill] sm:$0xff] %v12704_v14  ;;  %15100 = vst [vmem:[#allocation119_spill] sm:$0xff] %v12706_v6 }
 0x427   :  { %4472 = vmatpush2.bf16.msra.mxu0 %v12674_v26  ;;  %4513 = vmatpush2.bf16.msra.mxu1 %v12676_v29  ;;  %v3707_v29 = vld [vmem:[%s14558_s6 + $0x330] sm:$0xff]  ;;  %15101 = vst [vmem:[#allocation120_spill] sm:$0xff] %v12722_v38  ;;  %15106 = vst [vmem:[#allocation125_spill] sm:$0xff] %v12748_v60 }
 0x428   :  { %4473 = vmatprep.subr.bf16.mxu0 %v12680_v57  ;;  %4514 = vmatprep.subr.bf16.mxu1 %v12682_v18  ;;  %v12728_v18 = vcombine.high %v3703_v30, %v3707_v29  ;;  %v12730_v57 = vcombine.high %v3704_v37, %v3708_v34  ;;  %v3695_v26 = vld [vmem:[%s14558_s6 + $0x2d0] sm:$0xff]  ;;  %v12746_v22 = vcombine.low %v3703_v30, %v3707_v29  ;;  %v3688_v30 = vld [vmem:[%s14558_s6 + $0x298] sm:$0xff] }
 0x429   :  { %v3692_v29 = vld [vmem:[%s14558_s6 + $0x2b8] sm:$0xff]  ;;  %v12772_v34 = vcombine.low %v3696_v9, %v3700_v63 }
 0x42a   :  { %15103 = vst [vmem:[#allocation122_spill] sm:$0xff] %v12728_v18  ;;  %15104 = vst [vmem:[#allocation123_spill] sm:$0xff] %v12730_v57 }
 0x42b   :  { %4474 = vmatpush2.bf16.msra.mxu0 %v12698_v8  ;;  %4515 = vmatpush2.bf16.msra.mxu1 %v12700_v11  ;;  %v3699_v11 = vld [vmem:[%s14558_s6 + $0x2f0] sm:$0xff]  ;;  %15105 = vst [vmem:[#allocation124_spill] sm:$0xff] %v12746_v22  ;;  %15110 = vst [vmem:[#allocation129_spill] sm:$0xff] %v12772_v34 }
 0x42c   :  { %4475 = vmatprep.subr.bf16.mxu0 %v12704_v14  ;;  %4516 = vmatprep.subr.bf16.mxu1 %v12706_v6  ;;  %v12752_v6 = vcombine.high %v3695_v26, %v3699_v11  ;;  %v12754_v14 = vcombine.high %v3696_v9, %v3700_v63  ;;  %v3687_v8 = vld [vmem:[%s14558_s6 + $0x290] sm:$0xff]  ;;  %v12770_v37 = vcombine.low %v3695_v26, %v3699_v11  ;;  %v3680_v26 = vld [vmem:[%s14558_s6 + $0x258] sm:$0xff] }
 0x42d   :  { %v3684_v11 = vld [vmem:[%s14558_s6 + $0x278] sm:$0xff]  ;;  %v12796_v63 = vcombine.low %v3688_v30, %v3692_v29 }
 0x42e   :  { %15107 = vst [vmem:[#allocation126_spill] sm:$0xff] %v12752_v6  ;;  %15108 = vst [vmem:[#allocation127_spill] sm:$0xff] %v12754_v14 }
 0x42f   :  { %4476 = vmatpush2.bf16.msra.mxu0 %v12722_v38  ;;  %4517 = vmatpush2.bf16.msra.mxu1 %v12724_v53  ;;  %v3691_v53 = vld [vmem:[%s14558_s6 + $0x2b0] sm:$0xff]  ;;  %15109 = vst [vmem:[#allocation128_spill] sm:$0xff] %v12770_v37 }
 0x430   :  { %4477 = vmatprep.subr.bf16.mxu0 %v12728_v18  ;;  %4518 = vmatprep.subr.bf16.mxu1 %v12730_v57  ;;  %v12776_v57 = vcombine.high %v3687_v8, %v3691_v53  ;;  %v12778_v18 = vcombine.high %v3688_v30, %v3692_v29  ;;  %v3679_v38 = vld [vmem:[%s14558_s6 + $0x250] sm:$0xff]  ;;  %v12794_v9 = vcombine.low %v3687_v8, %v3691_v53  ;;  %v3672_v8 = vld [vmem:[%s14558_s6 + $0x218] sm:$0xff] }
 0x431   :  { %v3676_v53 = vld [vmem:[%s14558_s6 + $0x238] sm:$0xff]  ;;  %v12820_v29 = vcombine.low %v3680_v26, %v3684_v11 }
 0x432   :  { %15111 = vst [vmem:[#allocation130_spill] sm:$0xff] %v12776_v57  ;;  %15112 = vst [vmem:[#allocation131_spill] sm:$0xff] %v12778_v18 }
 0x433   :  { %4478 = vmatpush2.bf16.msra.mxu0 %v12746_v22  ;;  %4519 = vmatpush2.bf16.msra.mxu1 %v12748_v60  ;;  %v3683_v60 = vld [vmem:[%s14558_s6 + $0x270] sm:$0xff]  ;;  %15113 = vst [vmem:[#allocation132_spill] sm:$0xff] %v12794_v9 }
 0x434   :  { %4479 = vmatprep.subr.bf16.mxu0 %v12752_v6  ;;  %4520 = vmatprep.subr.bf16.mxu1 %v12754_v14  ;;  %v12800_v14 = vcombine.high %v3679_v38, %v3683_v60  ;;  %v12802_v6 = vcombine.high %v3680_v26, %v3684_v11  ;;  %v3671_v22 = vld [vmem:[%s14558_s6 + $0x210] sm:$0xff]  ;;  %v12818_v30 = vcombine.low %v3679_v38, %v3683_v60  ;;  %v15146_v11 = vld [vmem:[#allocation33_spill] sm:$0xff] }
 0x435   :  { %v15145_v38 = vld [vmem:[#allocation20_spill] sm:$0xff] }
 0x437   :  { %4480 = vmatpush2.bf16.msra.mxu0 %v12770_v37  ;;  %4521 = vmatpush2.bf16.msra.mxu1 %v12772_v34  ;;  %v3675_v34 = vld [vmem:[%s14558_s6 + $0x230] sm:$0xff] }
 0x438   :  { %4481 = vmatprep.subr.bf16.mxu0 %v12776_v57  ;;  %4522 = vmatprep.subr.bf16.mxu1 %v12778_v18  ;;  %v12824_v18 = vcombine.high %v3671_v22, %v3675_v34  ;;  %v12826_v57 = vcombine.high %v3672_v8, %v3676_v53  ;;  %v12830_v37 = vcombine.low %v3671_v22, %v3675_v34 }
 0x43b   :  { %4482 = vmatpush2.bf16.msra.mxu0 %v12794_v9  ;;  %4523 = vmatpush2.bf16.msra.mxu1 %v12796_v63  ;;  %v12832_v9 = vcombine.low %v3672_v8, %v3676_v53 }
 0x43c   :  { %4483 = vmatprep.subr.bf16.mxu0 %v12800_v14  ;;  %4524 = vmatprep.subr.bf16.mxu1 %v12802_v6 }
 0x43f   :  { %4484 = vmatpush2.bf16.msra.mxu0 %v12818_v30  ;;  %4525 = vmatpush2.bf16.msra.mxu1 %v12820_v29 }
 0x440   :  { %4485 = vmatprep.subr.bf16.mxu0 %v12824_v18  ;;  %4526 = vmatprep.subr.bf16.mxu1 %v12826_v57 }
 0x443   :  { %4486 = vmatpush2.bf16.msra.mxu0 %v12830_v37  ;;  %4527 = vmatpush2.bf16.msra.mxu1 %v12832_v9 }
 0x444   :  { %5377 = vmatprep.subr.bf16.mxu0 %v12031_v51  ;;  %5418 = vmatprep.subr.bf16.mxu1 %v12044_v24  ;;  %v15115_v51 = vld [vmem:[#allocation61_spill] sm:$0xff] }
 0x445   :  { %v15117_v24 = vld [vmem:[#allocation57_spill] sm:$0xff] }
 0x446   :  { %4488 = vmatmul.mubr.bf16.vlgmr.msra.gmra.mxu0 %v12481_v23  ;;  %4529 = vmatmul.mubr.bf16.vlgmr.msra.gmra.mxu1 %v12481_v23 }
 0x447   :  { %5378 = vmatpush1.bf16.msra.mxu0 %v12029_v3  ;;  %5419 = vmatpush1.bf16.msra.mxu1 %v12042_v45  ;;  %v15114_v3 = vld [vmem:[#allocation54_spill] sm:$0xff]  ;;  %v15116_v45 = vld [vmem:[#allocation55_spill] sm:$0xff] }
 0x448   :  { %5379 = vmatprep.subr.bf16.mxu0 %v12046_v39  ;;  %5420 = vmatprep.subr.bf16.mxu1 %v12058_v52  ;;  %v15118_v39 = vld [vmem:[#allocation59_spill] sm:$0xff] }
 0x449   :  { %v15119_v52 = vld [vmem:[#allocation67_spill] sm:$0xff] }
 0x44b   :  { %5380 = vmatpush1.bf16.msra.mxu0 %v12071_v56  ;;  %5421 = vmatpush1.bf16.msra.mxu1 %v12075_v43  ;;  %v15120_v56 = vld [vmem:[#allocation60_spill] sm:$0xff]  ;;  %v15121_v43 = vld [vmem:[#allocation63_spill] sm:$0xff] }
 0x44c   :  { %5381 = vmatprep.subr.bf16.mxu0 %v12077_v25  ;;  %5422 = vmatprep.subr.bf16.mxu1 %v12080_v16  ;;  %v15122_v25 = vld [vmem:[#allocation66_spill] sm:$0xff]  ;;  %v15123_v16 = vld [vmem:[#allocation73_spill] sm:$0xff] }
 0x44f   :  { %5382 = vmatpush1.bf16.msra.mxu0 %v12095_v27  ;;  %5423 = vmatpush1.bf16.msra.mxu1 %v12099_v47  ;;  %v15124_v27 = vld [vmem:[#allocation65_spill] sm:$0xff] }
 0x450   :  { %5383 = vmatprep.subr.bf16.mxu0 %v12101_v54  ;;  %5424 = vmatprep.subr.bf16.mxu1 %v12104_v15  ;;  %v15125_v47 = vld [vmem:[#allocation69_spill] sm:$0xff]  ;;  %v15126_v54 = vld [vmem:[#allocation71_spill] sm:$0xff]  ;;  %v15127_v15 = vld [vmem:[#allocation72_spill] sm:$0xff] }
 0x453   :  { %5384 = vmatpush1.bf16.msra.mxu0 %v12107_v55  ;;  %5425 = vmatpush1.bf16.msra.mxu1 %v12111_v28  ;;  %v15128_v55 = vld [vmem:[#allocation76_spill] sm:$0xff]  ;;  %v15129_v28 = vld [vmem:[#allocation79_spill] sm:$0xff] }
 0x454   :  { %5385 = vmatprep.subr.bf16.mxu0 %v12125_v44  ;;  %5426 = vmatprep.subr.bf16.mxu1 %v12134_v5  ;;  %v15130_v44 = vld [vmem:[#allocation75_spill] sm:$0xff]  ;;  %v15133_v5 = vld [vmem:[#allocation81_spill] sm:$0xff] }
 0x457   :  { %5386 = vmatpush1.bf16.msra.mxu0 %v12130_v32  ;;  %5427 = vmatpush1.bf16.msra.mxu1 %v12132_v12  ;;  %v15131_v32 = vld [vmem:[#allocation78_spill] sm:$0xff]  ;;  %v15132_v12 = vld [vmem:[#allocation80_spill] sm:$0xff] }
 0x458   :  { %5387 = vmatprep.subr.bf16.mxu0 %v12149_v31  ;;  %5428 = vmatprep.subr.bf16.mxu1 %v12158_v0  ;;  %v15134_v31 = vld [vmem:[#allocation83_spill] sm:$0xff] }
 0x459   :  { %v15137_v0 = vld [vmem:[#allocation87_spill] sm:$0xff] }
 0x45b   :  { %5388 = vmatpush1.bf16.msra.mxu0 %v12154_v59  ;;  %5429 = vmatpush1.bf16.msra.mxu1 %v12156_v19  ;;  %v15135_v59 = vld [vmem:[#allocation84_spill] sm:$0xff]  ;;  %v15136_v19 = vld [vmem:[#allocation85_spill] sm:$0xff] }
 0x45c   :  { %5389 = vmatprep.subr.bf16.mxu0 %v12173_v33  ;;  %5430 = vmatprep.subr.bf16.mxu1 %v12182_v13  ;;  %v15138_v33 = vld [vmem:[#allocation86_spill] sm:$0xff] }
 0x45d   :  { %v15141_v13 = vld [vmem:[#allocation90_spill] sm:$0xff] }
 0x45f   :  { %5390 = vmatpush1.bf16.msra.mxu0 %v12178_v36  ;;  %5431 = vmatpush1.bf16.msra.mxu1 %v12180_v42  ;;  %v15139_v36 = vld [vmem:[#allocation88_spill] sm:$0xff]  ;;  %v15140_v42 = vld [vmem:[#allocation89_spill] sm:$0xff] }
 0x460   :  { %5391 = vmatprep.subr.bf16.mxu0 %v12197_v7  ;;  %5432 = vmatprep.subr.bf16.mxu1 %v12206_v58  ;;  %v15142_v7 = vld [vmem:[#allocation91_spill] sm:$0xff] }
 0x463   :  { %5392 = vmatpush1.bf16.msra.mxu0 %v12202_v10  ;;  %5433 = vmatpush1.bf16.msra.mxu1 %v12204_v40  ;;  %v15143_v10 = vld [vmem:[#allocation92_spill] sm:$0xff] }
 0x464   :  { %5393 = vmatprep.subr.bf16.mxu0 %v12221_v49  ;;  %5434 = vmatprep.subr.bf16.mxu1 %v12230_v20  ;;  %v15144_v49 = vld [vmem:[#allocation18_spill] sm:$0xff] }
 0x467   :  { %5394 = vmatpush2.bf16.msra.mxu0 %v12226_v2  ;;  %5435 = vmatpush2.bf16.msra.mxu1 %v12228_v50 }
 0x468   :  { %5395 = vmatprep.subr.bf16.mxu0 %v15114_v3  ;;  %5436 = vmatprep.subr.bf16.mxu1 %v15115_v51  ;;  %v15147_v51 = vld [vmem:[#allocation31_spill] sm:$0xff] }
 0x46b   :  { %5396 = vmatpush2.bf16.msra.mxu0 %v15116_v45  ;;  %5437 = vmatpush2.bf16.msra.mxu1 %v15117_v24 }
 0x46c   :  { %5397 = vmatprep.subr.bf16.mxu0 %v15118_v39  ;;  %5438 = vmatprep.subr.bf16.mxu1 %v15119_v52 }
 0x46f   :  { %5398 = vmatpush2.bf16.msra.mxu0 %v15120_v56  ;;  %5439 = vmatpush2.bf16.msra.mxu1 %v15121_v43 }
 0x470   :  { %5399 = vmatprep.subr.bf16.mxu0 %v15122_v25  ;;  %5440 = vmatprep.subr.bf16.mxu1 %v15123_v16 }
 0x473   :  { %5400 = vmatpush2.bf16.msra.mxu0 %v15124_v27  ;;  %5441 = vmatpush2.bf16.msra.mxu1 %v15125_v47 }
 0x474   :  { %5401 = vmatprep.subr.bf16.mxu0 %v15126_v54  ;;  %5442 = vmatprep.subr.bf16.mxu1 %v15127_v15  ;;  %v15148_v54 = vld [vmem:[#allocation10_spill] sm:$0xff] }
 0x477   :  { %5402 = vmatpush2.bf16.msra.mxu0 %v15128_v55  ;;  %5443 = vmatpush2.bf16.msra.mxu1 %v15129_v28 }
 0x478   :  { %5403 = vmatprep.subr.bf16.mxu0 %v15130_v44  ;;  %5444 = vmatprep.subr.bf16.mxu1 %v15131_v32 }
 0x47b   :  { %5404 = vmatpush2.bf16.msra.mxu0 %v15132_v12  ;;  %5445 = vmatpush2.bf16.msra.mxu1 %v15133_v5 }
 0x47c   :  { %5405 = vmatprep.subr.bf16.mxu0 %v15134_v31  ;;  %5446 = vmatprep.subr.bf16.mxu1 %v15135_v59 }
 0x47f   :  { %5406 = vmatpush2.bf16.msra.mxu0 %v15136_v19  ;;  %5447 = vmatpush2.bf16.msra.mxu1 %v15137_v0 }
 0x480   :  { %5407 = vmatprep.subr.bf16.mxu0 %v15138_v33  ;;  %5448 = vmatprep.subr.bf16.mxu1 %v15139_v36  ;;  %v15149_v36 = vld [vmem:[#allocation36_spill] sm:$0xff] }
 0x483   :  { %5408 = vmatpush2.bf16.msra.mxu0 %v15140_v42  ;;  %5449 = vmatpush2.bf16.msra.mxu1 %v15141_v13 }
 0x484   :  { %5459 = vmatprep.subr.bf16.mxu0 %v15142_v7  ;;  %5500 = vmatprep.subr.bf16.mxu1 %v15143_v10 }
 0x4c6   :  { %v4407_v40 = vpop.f32.mrf.mxu0  ;;  %v4448_v58 = vpop.f32.mrf.mxu1 }
 0x4c7   :  { %v4537_v2 = vadd.f32 %v4407_v40, %v15144_v49  ;;  %v4539_v45 = vadd.f32 %v4448_v58, %v15147_v51  ;;  %v15150_v40 = vld [vmem:[#allocation38_spill] sm:$0xff] }
 0x4c8   :  { %v4409_v50 = vpop.f32.mrf.mxu0  ;;  %v4450_v20 = vpop.f32.mrf.mxu1 }
 0x4c9   :  { %v4541_v23 = vmul.f32 0.5, %v4537_v2  ;;  %v4538_v22 = vadd.f32 %v4409_v50, %v15145_v38  ;;  %v4540_v8 = vadd.f32 %v4450_v20, %v15146_v11  ;;  %v4549_v24 = vmul.f32 0.5, %v4539_v45  ;;  %v15151_v20 = vld [vmem:[#allocation68_spill] sm:$0xff] }
 0x4ca   :  { %v4411_v60 = vpop.f32.mrf.mxu0  ;;  %v4452_v34 = vpop.f32.mrf.mxu1 }
 0x4cb   :  { %10062 = vtanh.f32 %v4541_v23  ;;  %v4545_v26 = vmul.f32 0.5, %v4538_v22  ;;  %v15152_v60 = vld [vmem:[#allocation64_spill] sm:$0xff] }
 0x4cc   :  { %v4412_v53 = vpop.f32.mrf.mxu0  ;;  %v4453_v3 = vpop.f32.mrf.mxu1 }
 0x4cd   :  { %10064 = vtanh.f32 %v4545_v26 }
 0x4ce   :  { %10066 = vtanh.f32 %v4540_v8 }
 0x4cf   :  { %10068 = vtanh.f32 %v4549_v24 }
 0x4d8   :  { %v10063_v39 = vpop.eup %10062 }
 0x4d9   :  { %v4543_v52 = vmul.f32 0.5, %v10063_v39 }
 0x4da   :  { %v10065_v56 = vpop.eup %10064 }
 0x4db   :  { %v4544_v43 = vadd.f32 0.5, %v4543_v52  ;;  %v4547_v25 = vmul.f32 0.5, %v10065_v56  ;;  %v10067_v16 = vpop.eup %10066 }
 0x4dc   :  { %v10069_v44 = vpop.eup %10068 }
 0x4dd   :  { %v4548_v27 = vadd.f32 0.5, %v4547_v25  ;;  %v4555_v47 = vmul.f32 %v10067_v16, %v4544_v43  ;;  %v4551_v32 = vmul.f32 0.5, %v10069_v44 }
 0x4df   :  { %v4554_v15 = vmul.f32 %v4548_v27, %v15148_v54  ;;  %v4552_v12 = vadd.f32 0.5, %v4551_v32 }
 0x4e1   :  { %v4556_v55 = vadd.f32 %v4555_v47, %v4554_v15 }
 0x4e3   :  { %10070 = vtanh.f32 %v4556_v55  ;;  %v12915_v28 = vsel %vm4581_vm9, %v4556_v55, %v15148_v54 }
 0x4f0   :  { %v10071_v5 = vpop.eup %10070 }
 0x4f1   :  { %v4558_v31 = vmul.f32 %v10071_v5, %v4552_v12  ;;  %v15155_v5 = vld [vmem:[#allocation23_spill] sm:$0xff] }
 0x4f3   :  { %v4587_v59 = vsel %vm4581_vm9, %v4558_v31, 0.0  ;;  %v12936_v15 = vsel %vm4581_vm9, %v4558_v31, %v12456_v4  ;;  %v15153_v4 = vld [vmem:[#allocation12_spill] sm:$0xff] }
 0x4f4   :  { %v4588_v19 = vpack.c.bf16 %v4587_v59, %v4587_v59  ;;  %v12949_v12 = vpack.c.bf16 %v12936_v15, %v12936_v15  ;;  %v15156_v31 = vld [vmem:[#allocation44_spill] sm:$0xff]  ;;  %v15159_v59 = vld [vmem:[#allocation77_spill] sm:$0xff] }
 0x4f6   :  { %9389 = vst [vmem:[%s14561_s9 + $0xc] sm:$0xf] %v4588_v19  ;;  %v15164_v19 = vld [vmem:[#allocation97_spill] sm:$0xff] }
 0x506   :  { %v4489_v0 = vpop.f32.mrf.mxu0  ;;  %v4530_v33 = vpop.f32.mrf.mxu1 }
 0x507   :  { %v4559_v42 = vadd.f32 %v4489_v0, %v15149_v36  ;;  %v4561_v34 = vadd.f32 %v4530_v33, %v15152_v60  ;;  %v15165_v0 = vld [vmem:[#allocation98_spill] sm:$0xff]  ;;  %v15166_v33 = vld [vmem:[#allocation99_spill] sm:$0xff]  ;;  %v15167_v36 = vld [vmem:[#allocation100_spill] sm:$0xff] }
 0x508   :  { %v4491_v13 = vpop.f32.mrf.mxu0  ;;  %v4532_v7 = vpop.f32.mrf.mxu1  ;;  %v15181_v60 = vld [vmem:[#allocation114_spill] sm:$0xff] }
 0x509   :  { %v4563_v10 = vmul.f32 0.5, %v4559_v42  ;;  %v4560_v58 = vadd.f32 %v4491_v13, %v15150_v40  ;;  %v4562_v23 = vadd.f32 %v4532_v7, %v15151_v20  ;;  %v4571_v26 = vmul.f32 0.5, %v4561_v34  ;;  %v15168_v42 = vld [vmem:[#allocation101_spill] sm:$0xff]  ;;  %v15169_v13 = vld [vmem:[#allocation102_spill] sm:$0xff]  ;;  %v15170_v7 = vld [vmem:[#allocation103_spill] sm:$0xff] }
 0x50a   :  { %v4493_v49 = vpop.f32.mrf.mxu0  ;;  %v4534_v2 = vpop.f32.mrf.mxu1  ;;  %v15172_v40 = vld [vmem:[#allocation105_spill] sm:$0xff]  ;;  %v15177_v20 = vld [vmem:[#allocation110_spill] sm:$0xff]  ;;  %v15182_v34 = vld [vmem:[#allocation115_spill] sm:$0xff] }
 0x50b   :  { %10072 = vtanh.f32 %v4563_v10  ;;  %v4567_v50 = vmul.f32 0.5, %v4560_v58  ;;  %v15171_v10 = vld [vmem:[#allocation104_spill] sm:$0xff]  ;;  %v15173_v58 = vld [vmem:[#allocation106_spill] sm:$0xff]  ;;  %v15174_v49 = vld [vmem:[#allocation107_spill] sm:$0xff] }
 0x50c   :  { %v4494_v38 = vpop.f32.mrf.mxu0  ;;  %v4535_v22 = vpop.f32.mrf.mxu1  ;;  %v15175_v2 = vld [vmem:[#allocation108_spill] sm:$0xff] }
 0x50d   :  { %10074 = vtanh.f32 %v4567_v50  ;;  %v15176_v50 = vld [vmem:[#allocation109_spill] sm:$0xff]  ;;  %v15179_v38 = vld [vmem:[#allocation112_spill] sm:$0xff] }
 0x50e   :  { %10076 = vtanh.f32 %v4562_v23  ;;  %v15178_v23 = vld [vmem:[#allocation111_spill] sm:$0xff]  ;;  %v15180_v22 = vld [vmem:[#allocation113_spill] sm:$0xff] }
 0x50f   :  { %10078 = vtanh.f32 %v4571_v26  ;;  %v15183_v26 = vld [vmem:[#allocation116_spill] sm:$0xff] }
 0x518   :  { %v10073_v11 = vpop.eup %10072 }
 0x519   :  { %v4565_v8 = vmul.f32 0.5, %v10073_v11  ;;  %v15184_v11 = vld [vmem:[#allocation117_spill] sm:$0xff] }
 0x51a   :  { %v10075_v53 = vpop.eup %10074 }
 0x51b   :  { %v4566_v3 = vadd.f32 0.5, %v4565_v8  ;;  %v4569_v51 = vmul.f32 0.5, %v10075_v53  ;;  %v10077_v45 = vpop.eup %10076  ;;  %v15185_v8 = vld [vmem:[#allocation118_spill] sm:$0xff]  ;;  %v15186_v53 = vld [vmem:[#allocation119_spill] sm:$0xff] }
 0x51c   :  { %v10079_v25 = vpop.eup %10078 }
 0x51d   :  { %v4570_v24 = vadd.f32 0.5, %v4569_v51  ;;  %v4577_v39 = vmul.f32 %v10077_v45, %v4566_v3  ;;  %v4573_v16 = vmul.f32 0.5, %v10079_v25  ;;  %v15187_v3 = vld [vmem:[#allocation120_spill] sm:$0xff]  ;;  %v15188_v51 = vld [vmem:[#allocation121_spill] sm:$0xff]  ;;  %v15189_v45 = vld [vmem:[#allocation122_spill] sm:$0xff] }
 0x51e   :  { %v15194_v25 = vld [vmem:[#allocation127_spill] sm:$0xff] }
 0x51f   :  { %v4576_v52 = vmul.f32 %v4570_v24, %v12451_v48  ;;  %v4574_v27 = vadd.f32 0.5, %v4573_v16  ;;  %v15190_v24 = vld [vmem:[#allocation123_spill] sm:$0xff]  ;;  %v15195_v16 = vld [vmem:[#allocation128_spill] sm:$0xff] }
 0x521   :  { %v4578_v56 = vadd.f32 %v4577_v39, %v4576_v52  ;;  %v15191_v39 = vld [vmem:[#allocation124_spill] sm:$0xff]  ;;  %v15192_v52 = vld [vmem:[#allocation125_spill] sm:$0xff] }
 0x523   :  { %10080 = vtanh.f32 %v4578_v56  ;;  %v12931_v43 = vsel %vm4582_vm10, %v4578_v56, %v12451_v48  ;;  %v15193_v56 = vld [vmem:[#allocation126_spill] sm:$0xff] }
 0x530   :  { %v10081_v47 = vpop.eup %10080 }
 0x531   :  { %v4580_v54 = vmul.f32 %v10081_v47, %v4574_v27  ;;  %v15196_v27 = vld [vmem:[#allocation129_spill] sm:$0xff]  ;;  %v15197_v47 = vld [vmem:[#allocation130_spill] sm:$0xff] }
 0x533   :  { %v12941_v55 = vsel %vm4582_vm10, %v4580_v54, %v12464_v35  ;;  %v4591_v44 = vsel %vm4582_vm10, %v4580_v54, 0.0  ;;  %v15154_v35 = vld [vmem:[#allocation25_spill] sm:$0xff]  ;;  %v15198_v54 = vld [vmem:[#allocation131_spill] sm:$0xff] }
 0x534   :  { %v4592_v48 = vpack.c.bf16 %v4591_v44, %v4591_v44  ;;  %v4608_v32 = vpack.c.bf16 %v12941_v55, %v12941_v55  ;;  %v15199_v44 = vld [vmem:[#allocation132_spill] sm:$0xff] }
 0x536   :  { %9390 = vst [vmem:[%s14561_s9 + $0x30] sm:$0xf] %v4592_v48  ;;  %5409 = vmatprep.mubr.bf16.mxu0 %v4608_v32  ;;  %5450 = vmatprep.mubr.bf16.mxu1 %v4608_v32 }
 0x537   :  { %5410 = vmatmul.mubr.bf16.vlgmr.msra.gmra.mxu0 %v12949_v12  ;;  %5451 = vmatmul.mubr.bf16.vlgmr.msra.gmra.mxu1 %v12949_v12 }
 0x538   :  { %5460 = vmatpush1.bf16.msra.mxu0 %v12413_v61  ;;  %5501 = vmatpush1.bf16.msra.mxu1 %v12420_v21  ;;  %v15157_v61 = vld [vmem:[#allocation46_spill] sm:$0xff] }
 0x539   :  { %5491 = vmatprep.mubr.bf16.mxu0 %v4608_v32  ;;  %5532 = vmatprep.mubr.bf16.mxu1 %v4608_v32  ;;  %v15158_v21 = vld [vmem:[#allocation82_spill] sm:$0xff] }
 0x53a   :  { %5461 = vmatprep.subr.bf16.mxu0 %v12489_v41  ;;  %5502 = vmatprep.subr.bf16.mxu1 %v12491_v62  ;;  %v15160_v41 = vld [vmem:[#allocation93_spill] sm:$0xff]  ;;  %v15161_v62 = vld [vmem:[#allocation94_spill] sm:$0xff] }
 0x53c   :  { %5462 = vmatpush1.bf16.msra.mxu0 %v12506_v46  ;;  %5503 = vmatpush1.bf16.msra.mxu1 %v12508_v17  ;;  %v15162_v46 = vld [vmem:[#allocation95_spill] sm:$0xff]  ;;  %v15163_v17 = vld [vmem:[#allocation96_spill] sm:$0xff] }
 0x53d   :  { %5463 = vmatprep.subr.bf16.mxu0 %v15153_v4  ;;  %5504 = vmatprep.subr.bf16.mxu1 %v15154_v35  ;;  %v5664_v4 = vld [vmem:[%s14558_s6 + $0x1a8] sm:$0xff]  ;;  %v5651_v35 = vld [vmem:[%s14558_s6 + $0x140] sm:$0xff] }
 0x540   :  { %5464 = vmatpush1.bf16.msra.mxu0 %v15155_v5  ;;  %5505 = vmatpush1.bf16.msra.mxu1 %v15156_v31  ;;  %v5655_v31 = vld [vmem:[%s14558_s6 + $0x160] sm:$0xff] }
 0x541   :  { %5465 = vmatprep.subr.bf16.mxu0 %v15157_v61  ;;  %5506 = vmatprep.subr.bf16.mxu1 %v15158_v21  ;;  %v5652_v61 = vld [vmem:[%s14558_s6 + $0x148] sm:$0xff] }
 0x542   :  { %v5656_v21 = vld [vmem:[%s14558_s6 + $0x168] sm:$0xff] }
 0x544   :  { %5466 = vmatpush1.bf16.msra.mxu0 %v15159_v59  ;;  %5507 = vmatpush1.bf16.msra.mxu1 %v15160_v41 }
 0x545   :  { %5467 = vmatprep.subr.bf16.mxu0 %v15161_v62  ;;  %5508 = vmatprep.subr.bf16.mxu1 %v15162_v46  ;;  %v13077_v62 = vcombine.high %v5651_v35, %v5655_v31  ;;  %v13080_v46 = vcombine.high %v5652_v61, %v5656_v21 }
 0x548   :  { %5468 = vmatpush1.bf16.msra.mxu0 %v15163_v17  ;;  %5509 = vmatpush1.bf16.msra.mxu1 %v15164_v19  ;;  %v5643_v17 = vld [vmem:[%s14558_s6 + $0x100] sm:$0xff] }
 0x549   :  { %5469 = vmatprep.subr.bf16.mxu0 %v15165_v0  ;;  %5510 = vmatprep.subr.bf16.mxu1 %v15166_v33  ;;  %v5647_v19 = vld [vmem:[%s14558_s6 + $0x120] sm:$0xff]  ;;  %v5644_v0 = vld [vmem:[%s14558_s6 + $0x108] sm:$0xff] }
 0x54a   :  { %v5648_v33 = vld [vmem:[%s14558_s6 + $0x128] sm:$0xff] }
 0x54c   :  { %5470 = vmatpush1.bf16.msra.mxu0 %v15167_v36  ;;  %5511 = vmatpush1.bf16.msra.mxu1 %v15168_v42  ;;  %v13095_v36 = vcombine.low %v5651_v35, %v5655_v31  ;;  %v13099_v42 = vcombine.low %v5652_v61, %v5656_v21  ;;  %v5736_v31 = vld [vmem:[%s14558_s6 + $0x3e8] sm:$0xff] }
 0x54d   :  { %5471 = vmatprep.subr.bf16.mxu0 %v15169_v13  ;;  %5512 = vmatprep.subr.bf16.mxu1 %v15170_v7  ;;  %v13101_v13 = vcombine.high %v5643_v17, %v5647_v19  ;;  %v13104_v7 = vcombine.high %v5644_v0, %v5648_v33 }
 0x550   :  { %5472 = vmatpush1.bf16.msra.mxu0 %v15171_v10  ;;  %5513 = vmatpush1.bf16.msra.mxu1 %v15172_v40  ;;  %v13107_v10 = vcombine.low %v5643_v17, %v5647_v19  ;;  %v13111_v40 = vcombine.low %v5644_v0, %v5648_v33  ;;  %v5723_v19 = vld [vmem:[%s14558_s6 + $0x380] sm:$0xff]  ;;  %v5724_v33 = vld [vmem:[%s14558_s6 + $0x388] sm:$0xff] }
 0x551   :  { %5473 = vmatprep.subr.bf16.mxu0 %v15173_v58  ;;  %5514 = vmatprep.subr.bf16.mxu1 %v15174_v49  ;;  %v5635_v58 = vld [vmem:[%s14558_s6 + $0xc0] sm:$0xff] }
 0x552   :  { %v5639_v49 = vld [vmem:[%s14558_s6 + $0xe0] sm:$0xff] }
 0x553   :  { %v5727_v0 = vld [vmem:[%s14558_s6 + $0x3a0] sm:$0xff] }
 0x554   :  { %5474 = vmatpush1.bf16.msra.mxu0 %v15175_v2  ;;  %5515 = vmatpush1.bf16.msra.mxu1 %v15176_v50  ;;  %v5636_v2 = vld [vmem:[%s14558_s6 + $0xc8] sm:$0xff]  ;;  %v13125_v50 = vcombine.high %v5635_v58, %v5639_v49 }
 0x555   :  { %5475 = vmatprep.subr.bf16.mxu0 %v15177_v20  ;;  %5516 = vmatprep.subr.bf16.mxu1 %v15178_v23  ;;  %v5640_v20 = vld [vmem:[%s14558_s6 + $0xe8] sm:$0xff]  ;;  %v13130_v23 = vcombine.low %v5635_v58, %v5639_v49  ;;  %v13245_v58 = vcombine.high %v5723_v19, %v5727_v0 }
 0x556   :  { %v5728_v49 = vld [vmem:[%s14558_s6 + $0x3a8] sm:$0xff] }
 0x557   :  { %15200 = vst [vmem:[#allocation133_spill] sm:$0xff] %v13245_v58 }
 0x558   :  { %5476 = vmatpush2.bf16.msra.mxu0 %v15179_v38  ;;  %5517 = vmatpush2.bf16.msra.mxu1 %v15180_v22  ;;  %v13132_v38 = vcombine.low %v5636_v2, %v5640_v20  ;;  %v13134_v22 = vcombine.high %v5636_v2, %v5640_v20  ;;  %v13250_v2 = vcombine.low %v5723_v19, %v5727_v0  ;;  %v5703_v19 = vld [vmem:[%s14558_s6 + $0x2e0] sm:$0xff] }
 0x559   :  { %5477 = vmatprep.subr.bf16.mxu0 %v15181_v60  ;;  %5518 = vmatprep.subr.bf16.mxu1 %v15182_v34  ;;  %v5627_v60 = vld [vmem:[%s14558_s6 + $0x80] sm:$0xff]  ;;  %v13252_v20 = vcombine.low %v5724_v33, %v5728_v49 }
 0x55a   :  { %v5631_v34 = vld [vmem:[%s14558_s6 + $0xa0] sm:$0xff]  ;;  %15201 = vst [vmem:[#allocation134_spill] sm:$0xff] %v13250_v2 }
 0x55b   :  { %15202 = vst [vmem:[#allocation135_spill] sm:$0xff] %v13252_v20 }
 0x55c   :  { %5478 = vmatpush2.bf16.msra.mxu0 %v15183_v26  ;;  %5519 = vmatpush2.bf16.msra.mxu1 %v15184_v11  ;;  %v5628_v26 = vld [vmem:[%s14558_s6 + $0x88] sm:$0xff]  ;;  %v13149_v11 = vcombine.high %v5627_v60, %v5631_v34 }
 0x55d   :  { %5479 = vmatprep.subr.bf16.mxu0 %v15185_v8  ;;  %5520 = vmatprep.subr.bf16.mxu1 %v15186_v53  ;;  %v5632_v8 = vld [vmem:[%s14558_s6 + $0xa8] sm:$0xff]  ;;  %v13154_v53 = vcombine.low %v5627_v60, %v5631_v34  ;;  %v13254_v60 = vcombine.high %v5724_v33, %v5728_v49  ;;  %v5715_v34 = vld [vmem:[%s14558_s6 + $0x340] sm:$0xff] }
 0x55f   :  { %15203 = vst [vmem:[#allocation136_spill] sm:$0xff] %v13254_v60 }
 0x560   :  { %5480 = vmatpush2.bf16.msra.mxu0 %v15187_v3  ;;  %5521 = vmatpush2.bf16.msra.mxu1 %v15188_v51  ;;  %v13156_v3 = vcombine.low %v5628_v26, %v5632_v8  ;;  %v13158_v51 = vcombine.high %v5628_v26, %v5632_v8  ;;  %v5719_v26 = vld [vmem:[%s14558_s6 + $0x360] sm:$0xff]  ;;  %v5716_v8 = vld [vmem:[%s14558_s6 + $0x348] sm:$0xff] }
 0x561   :  { %5481 = vmatprep.subr.bf16.mxu0 %v15189_v45  ;;  %5522 = vmatprep.subr.bf16.mxu1 %v15190_v24  ;;  %v5619_v45 = vld [vmem:[%s14558_s6 + $0x40] sm:$0xff] }
 0x562   :  { %v5623_v24 = vld [vmem:[%s14558_s6 + $0x60] sm:$0xff] }
 0x564   :  { %5482 = vmatpush2.bf16.msra.mxu0 %v15191_v39  ;;  %5523 = vmatpush2.bf16.msra.mxu1 %v15192_v52  ;;  %v5620_v39 = vld [vmem:[%s14558_s6 + $0x48] sm:$0xff]  ;;  %v13173_v52 = vcombine.high %v5619_v45, %v5623_v24 }
 0x565   :  { %5483 = vmatprep.subr.bf16.mxu0 %v15193_v56  ;;  %5524 = vmatprep.subr.bf16.mxu1 %v15194_v25  ;;  %v5624_v56 = vld [vmem:[%s14558_s6 + $0x68] sm:$0xff]  ;;  %v13178_v25 = vcombine.low %v5619_v45, %v5623_v24  ;;  %v13269_v45 = vcombine.high %v5715_v34, %v5719_v26 }
 0x566   :  { %v5720_v24 = vld [vmem:[%s14558_s6 + $0x368] sm:$0xff] }
 0x567   :  { %15204 = vst [vmem:[#allocation137_spill] sm:$0xff] %v13269_v45 }
 0x568   :  { %5484 = vmatpush2.bf16.msra.mxu0 %v15195_v16  ;;  %5525 = vmatpush2.bf16.msra.mxu1 %v15196_v27  ;;  %v13180_v16 = vcombine.low %v5620_v39, %v5624_v56  ;;  %v13182_v27 = vcombine.high %v5620_v39, %v5624_v56  ;;  %v13274_v39 = vcombine.low %v5715_v34, %v5719_v26  ;;  %v5700_v34 = vld [vmem:[%s14558_s6 + $0x2c8] sm:$0xff] }
 0x569   :  { %5485 = vmatprep.subr.bf16.mxu0 %v15197_v47  ;;  %5526 = vmatprep.subr.bf16.mxu1 %v15198_v54  ;;  %v5611_v47 = vld [vmem:[%s14558_s6] sm:$0xff]  ;;  %v13276_v56 = vcombine.low %v5716_v8, %v5720_v24  ;;  %v5704_v26 = vld [vmem:[%s14558_s6 + $0x2e8] sm:$0xff] }
 0x56a   :  { %v5615_v54 = vld [vmem:[%s14558_s6 + $0x20] sm:$0xff]  ;;  %15205 = vst [vmem:[#allocation138_spill] sm:$0xff] %v13274_v39 }
 0x56b   :  { %15206 = vst [vmem:[#allocation139_spill] sm:$0xff] %v13276_v56 }
 0x56c   :  { %5486 = vmatpush2.bf16.msra.mxu0 %v15199_v44  ;;  %5527 = vmatpush2.bf16.msra.mxu1 %v12796_v63  ;;  %v5659_v63 = vld [vmem:[%s14558_s6 + $0x180] sm:$0xff]  ;;  %v5612_v44 = vld [vmem:[%s14558_s6 + $0x8] sm:$0xff] }
 0x56d   :  { %5487 = vmatprep.subr.bf16.mxu0 %v12800_v14  ;;  %5528 = vmatprep.subr.bf16.mxu1 %v12802_v6  ;;  %v5667_v14 = vld [vmem:[%s14558_s6 + $0x1c0] sm:$0xff] }
 0x56e   :  { %v5671_v6 = vld [vmem:[%s14558_s6 + $0x1e0] sm:$0xff] }
 0x570   :  { %5488 = vmatpush2.bf16.msra.mxu0 %v12818_v30  ;;  %5529 = vmatpush2.bf16.msra.mxu1 %v12820_v29  ;;  %v5663_v30 = vld [vmem:[%s14558_s6 + $0x1a0] sm:$0xff] }
 0x571   :  { %5489 = vmatprep.subr.bf16.mxu0 %v12824_v18  ;;  %5530 = vmatprep.subr.bf16.mxu1 %v12826_v57  ;;  %v5668_v18 = vld [vmem:[%s14558_s6 + $0x1c8] sm:$0xff]  ;;  %v13029_v57 = vcombine.low %v5667_v14, %v5671_v6  ;;  %v13046_v32 = vcombine.high %v5659_v63, %v5663_v30  ;;  %v13071_v59 = vcombine.low %v5659_v63, %v5663_v30  ;;  %v5731_v30 = vld [vmem:[%s14558_s6 + $0x3c0] sm:$0xff] }
 0x574   :  { %5490 = vmatpush2.bf16.msra.mxu0 %v12830_v37  ;;  %5531 = vmatpush2.bf16.msra.mxu1 %v12832_v9  ;;  %v13031_v37 = vcombine.high %v5667_v14, %v5671_v6  ;;  %v5672_v9 = vld [vmem:[%s14558_s6 + $0x1e8] sm:$0xff]  ;;  %v13197_v14 = vcombine.high %v5611_v47, %v5615_v54 }
 0x575   :  { %v13042_v29 = vcombine.low %v5668_v18, %v5672_v9  ;;  %v13044_v48 = vcombine.high %v5668_v18, %v5672_v9  ;;  %v5616_v6 = vld [vmem:[%s14558_s6 + $0x28] sm:$0xff]  ;;  %v13202_v18 = vcombine.low %v5611_v47, %v5615_v54  ;;  %v13278_v47 = vcombine.high %v5716_v8, %v5720_v24  ;;  %v5707_v54 = vld [vmem:[%s14558_s6 + $0x300] sm:$0xff] }
 0x576   :  { %6379 = vmatprep.subr.bf16.mxu0 %v13031_v37  ;;  %v13204_v9 = vcombine.low %v5612_v44, %v5616_v6  ;;  %v13206_v63 = vcombine.high %v5612_v44, %v5616_v6  ;;  %v5711_v44 = vld [vmem:[%s14558_s6 + $0x320] sm:$0xff]  ;;  %v5708_v6 = vld [vmem:[%s14558_s6 + $0x308] sm:$0xff]  ;;  %v13322_v24 = vcombine.high %v5700_v34, %v5704_v26 }
 0x577   :  { %5492 = vmatmul.mubr.bf16.vlgmr.msra.gmra.mxu0 %v12949_v12  ;;  %5533 = vmatmul.mubr.bf16.vlgmr.msra.gmra.mxu1 %v12949_v12  ;;  %v5660_v12 = vld [vmem:[%s14558_s6 + $0x188] sm:$0xff]  ;;  %15207 = vst [vmem:[#allocation140_spill] sm:$0xff] %v13278_v47  ;;  %v5691_v8 = vld [vmem:[%s14558_s6 + $0x280] sm:$0xff] }
 0x578   :  { %v13058_v5 = vcombine.high %v5660_v12, %v5664_v4  ;;  %6420 = vmatprep.subr.bf16.mxu1 %v13044_v48  ;;  %6380 = vmatpush1.bf16.msra.mxu0 %v13029_v57  ;;  %v13075_v41 = vcombine.low %v5660_v12, %v5664_v4  ;;  %v5735_v12 = vld [vmem:[%s14558_s6 + $0x3e0] sm:$0xff]  ;;  %v5732_v4 = vld [vmem:[%s14558_s6 + $0x3c8] sm:$0xff]  ;;  %15213 = vst [vmem:[#allocation40_spill] sm:$0xff] %v13322_v24 }
 0x579   :  { %6421 = vmatpush1.bf16.msra.mxu1 %v13042_v29  ;;  %6381 = vmatprep.subr.bf16.mxu0 %v13046_v32  ;;  %v13221_v35 = vcombine.high %v5731_v30, %v5735_v12  ;;  %v13226_v61 = vcombine.low %v5731_v30, %v5735_v12  ;;  %v13228_v21 = vcombine.low %v5732_v4, %v5736_v31 }
 0x57a   :  { %6422 = vmatprep.subr.bf16.mxu1 %v13058_v5  ;;  %v13230_v17 = vcombine.high %v5732_v4, %v5736_v31  ;;  %v13293_v30 = vcombine.low %v5707_v54, %v5711_v44  ;;  %v13295_v12 = vcombine.high %v5707_v54, %v5711_v44  ;;  %v5712_v4 = vld [vmem:[%s14558_s6 + $0x328] sm:$0xff]  ;;  %v5699_v31 = vld [vmem:[%s14558_s6 + $0x2c0] sm:$0xff] }
 0x57b   :  { %v13306_v0 = vcombine.low %v5708_v6, %v5712_v4  ;;  %v13308_v33 = vcombine.high %v5708_v6, %v5712_v4  ;;  %v13310_v49 = vcombine.high %v5699_v31, %v5703_v19  ;;  %v5695_v54 = vld [vmem:[%s14558_s6 + $0x2a0] sm:$0xff]  ;;  %v5692_v44 = vld [vmem:[%s14558_s6 + $0x288] sm:$0xff]  ;;  %v13335_v4 = vcombine.low %v5699_v31, %v5703_v19 }
 0x57c   :  { %6382 = vmatpush1.bf16.msra.mxu0 %v13071_v59  ;;  %15208 = vst [vmem:[#allocation141_spill] sm:$0xff] %v13293_v30  ;;  %15209 = vst [vmem:[#allocation14_spill] sm:$0xff] %v13295_v12  ;;  %v5696_v6 = vld [vmem:[%s14558_s6 + $0x2a8] sm:$0xff]  ;;  %v5687_v31 = vld [vmem:[%s14558_s6 + $0x260] sm:$0xff] }
 0x57d   :  { %6423 = vmatpush1.bf16.msra.mxu1 %v13075_v41  ;;  %6383 = vmatprep.subr.bf16.mxu0 %v13077_v62  ;;  %15210 = vst [vmem:[#allocation16_spill] sm:$0xff] %v13306_v0  ;;  %15211 = vst [vmem:[#allocation29_spill] sm:$0xff] %v13308_v33  ;;  %v5684_v19 = vld [vmem:[%s14558_s6 + $0x248] sm:$0xff] }
 0x57e   :  { %6424 = vmatprep.subr.bf16.mxu1 %v13080_v46  ;;  %15212 = vst [vmem:[#allocation27_spill] sm:$0xff] %v13310_v49  ;;  %15214 = vst [vmem:[#allocation42_spill] sm:$0xff] %v13335_v4 }
 0x580   :  { %6384 = vmatpush1.bf16.msra.mxu0 %v13095_v36 }
 0x581   :  { %6425 = vmatpush1.bf16.msra.mxu1 %v13099_v42  ;;  %6385 = vmatprep.subr.bf16.mxu0 %v13101_v13 }
 0x582   :  { %6426 = vmatprep.subr.bf16.mxu1 %v13104_v7 }
 0x584   :  { %6386 = vmatpush1.bf16.msra.mxu0 %v13107_v10 }
 0x585   :  { %6427 = vmatpush1.bf16.msra.mxu1 %v13111_v40  ;;  %6387 = vmatprep.subr.bf16.mxu0 %v13125_v50 }
 0x586   :  { %6428 = vmatprep.subr.bf16.mxu1 %v13134_v22 }
 0x588   :  { %6388 = vmatpush1.bf16.msra.mxu0 %v13130_v23 }
 0x589   :  { %6429 = vmatpush1.bf16.msra.mxu1 %v13132_v38  ;;  %6389 = vmatprep.subr.bf16.mxu0 %v13149_v11 }
 0x58a   :  { %6430 = vmatprep.subr.bf16.mxu1 %v13158_v51 }
 0x58c   :  { %6390 = vmatpush1.bf16.msra.mxu0 %v13154_v53 }
 0x58d   :  { %6431 = vmatpush1.bf16.msra.mxu1 %v13156_v3  ;;  %6391 = vmatprep.subr.bf16.mxu0 %v13173_v52 }
 0x58e   :  { %6432 = vmatprep.subr.bf16.mxu1 %v13182_v27 }
 0x590   :  { %6392 = vmatpush1.bf16.msra.mxu0 %v13178_v25 }
 0x591   :  { %6433 = vmatpush1.bf16.msra.mxu1 %v13180_v16  ;;  %6393 = vmatprep.subr.bf16.mxu0 %v13197_v14 }
 0x592   :  { %6434 = vmatprep.subr.bf16.mxu1 %v13206_v63 }
 0x594   :  { %6394 = vmatpush1.bf16.msra.mxu0 %v13202_v18 }
 0x595   :  { %6435 = vmatpush1.bf16.msra.mxu1 %v13204_v9  ;;  %6395 = vmatprep.subr.bf16.mxu0 %v13221_v35 }
 0x596   :  { %6436 = vmatprep.subr.bf16.mxu1 %v13230_v17 }
 0x598   :  { %6396 = vmatpush2.bf16.msra.mxu0 %v13226_v61 }
 0x599   :  { %6437 = vmatpush2.bf16.msra.mxu1 %v13228_v21  ;;  %6397 = vmatprep.subr.bf16.mxu0 %v13245_v58 }
 0x59a   :  { %6438 = vmatprep.subr.bf16.mxu1 %v13254_v60 }
 0x59c   :  { %6398 = vmatpush2.bf16.msra.mxu0 %v13250_v2 }
 0x59d   :  { %6439 = vmatpush2.bf16.msra.mxu1 %v13252_v20  ;;  %6399 = vmatprep.subr.bf16.mxu0 %v13269_v45  ;;  %v15232_v45 = vld [vmem:[#allocation37_spill] sm:$0xff] }
 0x59e   :  { %6440 = vmatprep.subr.bf16.mxu1 %v13278_v47 }
 0x5a0   :  { %6400 = vmatpush2.bf16.msra.mxu0 %v13274_v39  ;;  %v13344_v39 = vcombine.high %v5692_v44, %v5696_v6 }
 0x5a1   :  { %6441 = vmatpush2.bf16.msra.mxu1 %v13276_v56  ;;  %6401 = vmatprep.subr.bf16.mxu0 %v13295_v12  ;;  %v13339_v12 = vcombine.low %v5700_v34, %v5704_v26  ;;  %v13341_v56 = vcombine.high %v5691_v8, %v5695_v54  ;;  %v5688_v34 = vld [vmem:[%s14558_s6 + $0x268] sm:$0xff]  ;;  %v13359_v26 = vcombine.low %v5691_v8, %v5695_v54  ;;  %v5679_v8 = vld [vmem:[%s14558_s6 + $0x220] sm:$0xff] }
 0x5a2   :  { %6442 = vmatprep.subr.bf16.mxu1 %v13308_v33  ;;  %15217 = vst [vmem:[#allocation54_spill] sm:$0xff] %v13344_v39  ;;  %v5683_v33 = vld [vmem:[%s14558_s6 + $0x240] sm:$0xff]  ;;  %v5676_v54 = vld [vmem:[%s14558_s6 + $0x208] sm:$0xff] }
 0x5a3   :  { %15215 = vst [vmem:[#allocation74_spill] sm:$0xff] %v13339_v12  ;;  %15216 = vst [vmem:[#allocation70_spill] sm:$0xff] %v13341_v56 }
 0x5a4   :  { %6402 = vmatpush2.bf16.msra.mxu0 %v13293_v30  ;;  %15218 = vst [vmem:[#allocation61_spill] sm:$0xff] %v13359_v26  ;;  %v5675_v30 = vld [vmem:[%s14558_s6 + $0x200] sm:$0xff] }
 0x5a5   :  { %6443 = vmatpush2.bf16.msra.mxu1 %v13306_v0  ;;  %6403 = vmatprep.subr.bf16.mxu0 %v13310_v49  ;;  %v13365_v49 = vcombine.high %v5683_v33, %v5687_v31  ;;  %v13368_v0 = vcombine.high %v5684_v19, %v5688_v34 }
 0x5a6   :  { %6444 = vmatprep.subr.bf16.mxu1 %v13322_v24  ;;  %v13363_v24 = vcombine.low %v5692_v44, %v5696_v6  ;;  %v5680_v44 = vld [vmem:[%s14558_s6 + $0x228] sm:$0xff]  ;;  %v13383_v6 = vcombine.low %v5683_v33, %v5687_v31  ;;  %v5669_v31 = vld [vmem:[%s14558_s6 + $0x1d0] sm:$0xff] }
 0x5a7   :  { %15220 = vst [vmem:[#allocation57_spill] sm:$0xff] %v13365_v49  ;;  %15221 = vst [vmem:[#allocation59_spill] sm:$0xff] %v13368_v0  ;;  %v13399_v33 = vcombine.low %v5676_v54, %v5680_v44 }
 0x5a8   :  { %6404 = vmatpush2.bf16.msra.mxu0 %v13335_v4  ;;  %15219 = vst [vmem:[#allocation55_spill] sm:$0xff] %v13363_v24  ;;  %15222 = vst [vmem:[#allocation67_spill] sm:$0xff] %v13383_v6  ;;  %v13395_v4 = vcombine.low %v5675_v30, %v5679_v8 }
 0x5a9   :  { %6445 = vmatpush2.bf16.msra.mxu1 %v13339_v12  ;;  %6405 = vmatprep.subr.bf16.mxu0 %v13341_v56  ;;  %v13389_v56 = vcombine.high %v5675_v30, %v5679_v8  ;;  %v13392_v12 = vcombine.high %v5676_v54, %v5680_v44  ;;  %15227 = vst [vmem:[#allocation65_spill] sm:$0xff] %v13399_v33  ;;  %v5670_v30 = vld [vmem:[%s14558_s6 + $0x1d8] sm:$0xff] }
 0x5aa   :  { %6446 = vmatprep.subr.bf16.mxu1 %v13344_v39  ;;  %v13387_v39 = vcombine.low %v5684_v19, %v5688_v34  ;;  %15226 = vst [vmem:[#allocation73_spill] sm:$0xff] %v13395_v4  ;;  %v5673_v19 = vld [vmem:[%s14558_s6 + $0x1f0] sm:$0xff]  ;;  %v5674_v54 = vld [vmem:[%s14558_s6 + $0x1f8] sm:$0xff] }
 0x5ab   :  { %15224 = vst [vmem:[#allocation63_spill] sm:$0xff] %v13389_v56  ;;  %15225 = vst [vmem:[#allocation66_spill] sm:$0xff] %v13392_v12  ;;  %v13413_v34 = vcombine.low %v5669_v31, %v5673_v19  ;;  %v13415_v8 = vcombine.high %v5669_v31, %v5673_v19  ;;  %v13420_v44 = vcombine.low %v5670_v30, %v5674_v54  ;;  %v15231_v19 = vld [vmem:[#allocation8_spill] sm:$0xff] }
 0x5ac   :  { %6406 = vmatpush2.bf16.msra.mxu0 %v13359_v26  ;;  %15223 = vst [vmem:[#allocation60_spill] sm:$0xff] %v13387_v39 }
 0x5ad   :  { %6447 = vmatpush2.bf16.msra.mxu1 %v13363_v24  ;;  %6407 = vmatprep.subr.bf16.mxu0 %v13365_v49  ;;  %15228 = vst [vmem:[#allocation69_spill] sm:$0xff] %v13415_v8 }
 0x5ae   :  { %6448 = vmatprep.subr.bf16.mxu1 %v13368_v0 }
 0x5b0   :  { %6408 = vmatpush2.bf16.msra.mxu0 %v13383_v6 }
 0x5b1   :  { %6449 = vmatpush2.bf16.msra.mxu1 %v13387_v39  ;;  %6409 = vmatprep.subr.bf16.mxu0 %v13389_v56  ;;  %v15230_v39 = vld [vmem:[#allocation7_spill] sm:$0xff] }
 0x5b2   :  { %6450 = vmatprep.subr.bf16.mxu1 %v13392_v12 }
 0x5b4   :  { %6410 = vmatpush2.bf16.msra.mxu0 %v13395_v4  ;;  %v13422_v4 = vcombine.high %v5670_v30, %v5674_v54 }
 0x5b5   :  { %6451 = vmatpush2.bf16.msra.mxu1 %v13399_v33  ;;  %6461 = vmatprep.subr.bf16.mxu0 %v13415_v8 }
 0x5b6   :  { %15229 = vst [vmem:[#allocation71_spill] sm:$0xff] %v13422_v4  ;;  %6502 = vmatprep.subr.bf16.mxu1 %v13422_v4  ;;  %v15233_v4 = vld [vmem:[#allocation35_spill] sm:$0xff] }
 0x5f7   :  { %v5411_v12 = vpop.f32.mrf.mxu0  ;;  %v5452_v56 = vpop.f32.mrf.mxu1 }
 0x5f8   :  { %v5541_v33 = vadd.f32 %v5411_v12, %v15230_v39  ;;  %v5543_v8 = vadd.f32 %v5452_v56, %v15233_v4 }
 0x5f9   :  { %v5413_v6 = vpop.f32.mrf.mxu0  ;;  %v5454_v0 = vpop.f32.mrf.mxu1 }
 0x5fa   :  { %v5545_v31 = vmul.f32 0.5, %v5541_v33  ;;  %v5542_v49 = vadd.f32 %v5413_v6, %v15231_v19  ;;  %v5544_v30 = vadd.f32 %v5454_v0, %v15232_v45  ;;  %v5553_v2 = vmul.f32 0.5, %v5543_v8  ;;  %v15235_v19 = vld [vmem:[#allocation32_spill] sm:$0xff] }
 0x5fb   :  { %v5415_v24 = vpop.f32.mrf.mxu0  ;;  %v5456_v26 = vpop.f32.mrf.mxu1 }
 0x5fc   :  { %10082 = vtanh.f32 %v5545_v31  ;;  %v5549_v47 = vmul.f32 0.5, %v5542_v49 }
 0x5fd   :  { %v5416_v54 = vpop.f32.mrf.mxu0  ;;  %v5457_v20 = vpop.f32.mrf.mxu1 }
 0x5fe   :  { %10084 = vtanh.f32 %v5549_v47 }
 0x5ff   :  { %10086 = vtanh.f32 %v5544_v30 }
 0x600   :  { %10088 = vtanh.f32 %v5553_v2 }
 0x609   :  { %v10083_v60 = vpop.eup %10082 }
 0x60a   :  { %v5547_v39 = vmul.f32 0.5, %v10083_v60 }
 0x60b   :  { %v10085_v12 = vpop.eup %10084 }
 0x60c   :  { %v5548_v58 = vadd.f32 0.5, %v5547_v39  ;;  %v5551_v33 = vmul.f32 0.5, %v10085_v12  ;;  %v10087_v6 = vpop.eup %10086  ;;  %v15236_v12 = vld [vmem:[#allocation34_spill] sm:$0xff] }
 0x60d   :  { %v10089_v45 = vpop.eup %10088 }
 0x60e   :  { %v5552_v24 = vadd.f32 0.5, %v5551_v33  ;;  %v5559_v26 = vmul.f32 %v10087_v6, %v5548_v58  ;;  %v5555_v56 = vmul.f32 0.5, %v10089_v45 }
 0x610   :  { %v5558_v49 = vmul.f32 %v5552_v24, %v12915_v28  ;;  %v5556_v47 = vadd.f32 0.5, %v5555_v56 }
 0x612   :  { %v5560_v31 = vadd.f32 %v5559_v26, %v5558_v49  ;;  %v15237_v49 = vld [vmem:[#allocation62_spill] sm:$0xff] }
 0x614   :  { %10090 = vtanh.f32 %v5560_v31  ;;  %v13434_v20 = vsel %vm4582_vm10, %v5560_v31, %v12915_v28 }
 0x615   :  { %15234 = vst [vmem:[#allocation72_spill] sm:$0xff] %v13434_v20 }
 0x621   :  { %v10091_v60 = vpop.eup %10090 }
 0x622   :  { %v5562_v0 = vmul.f32 %v10091_v60, %v5556_v47  ;;  %v15238_v47 = vld [vmem:[#allocation58_spill] sm:$0xff] }
 0x624   :  { %v5589_v2 = vsel %vm4582_vm10, %v5562_v0, 0.0 }
 0x625   :  { %v5590_v4 = vpack.c.bf16 %v5589_v2, %v5589_v2 }
 0x627   :  { %9519 = vst [vmem:[%s14561_s9 + $0x10] sm:$0xf] %v5590_v4 }
 0x637   :  { %v5493_v58 = vpop.f32.mrf.mxu0  ;;  %v5534_v8 = vpop.f32.mrf.mxu1 }
 0x638   :  { %v5563_v30 = vadd.f32 %v5493_v58, %v15235_v19  ;;  %v5565_v60 = vadd.f32 %v5534_v8, %v15238_v47  ;;  %v5665_v47 = vld [vmem:[%s14558_s6 + $0x1b0] sm:$0xff] }
 0x639   :  { %v5495_v54 = vpop.f32.mrf.mxu0  ;;  %v5536_v28 = vpop.f32.mrf.mxu1 }
 0x63a   :  { %v5567_v39 = vmul.f32 0.5, %v5563_v30  ;;  %v5564_v33 = vadd.f32 %v5495_v54, %v15236_v12  ;;  %v5566_v31 = vadd.f32 %v5536_v28, %v15237_v49  ;;  %v5575_v2 = vmul.f32 0.5, %v5565_v60 }
 0x63b   :  { %v5497_v6 = vpop.f32.mrf.mxu0  ;;  %v5538_v24 = vpop.f32.mrf.mxu1 }
 0x63c   :  { %10092 = vtanh.f32 %v5567_v39  ;;  %v5571_v26 = vmul.f32 0.5, %v5564_v33 }
 0x63d   :  { %v5498_v45 = vpop.f32.mrf.mxu0  ;;  %v5539_v56 = vpop.f32.mrf.mxu1 }
 0x63e   :  { %10094 = vtanh.f32 %v5571_v26  ;;  %v13454_v45 = vsel %vm4582_vm10, %v5562_v0, %v12936_v15  ;;  %v5662_v15 = vld [vmem:[%s14558_s6 + $0x198] sm:$0xff] }
 0x63f   :  { %10096 = vtanh.f32 %v5566_v31  ;;  %v5666_v0 = vld [vmem:[%s14558_s6 + $0x1b8] sm:$0xff] }
 0x640   :  { %10098 = vtanh.f32 %v5575_v2  ;;  %v13479_v2 = vpack.c.bf16 %v13454_v45, %v13454_v45 }
 0x649   :  { %v10093_v4 = vpop.eup %10092 }
 0x64a   :  { %v5569_v58 = vmul.f32 0.5, %v10093_v4  ;;  %v5653_v4 = vld [vmem:[%s14558_s6 + $0x150] sm:$0xff] }
 0x64b   :  { %v10095_v19 = vpop.eup %10094 }
 0x64c   :  { %v5570_v20 = vadd.f32 0.5, %v5569_v58  ;;  %v5573_v30 = vmul.f32 0.5, %v10095_v19  ;;  %v10097_v54 = vpop.eup %10096  ;;  %v13489_v19 = vcombine.high %v5662_v15, %v5666_v0 }
 0x64d   :  { %v10099_v8 = vpop.eup %10098 }
 0x64e   :  { %v5574_v12 = vadd.f32 0.5, %v5573_v30  ;;  %v5581_v6 = vmul.f32 %v10097_v54, %v5570_v20  ;;  %v5577_v24 = vmul.f32 0.5, %v10099_v8  ;;  %v5661_v20 = vld [vmem:[%s14558_s6 + $0x190] sm:$0xff]  ;;  %v5654_v54 = vld [vmem:[%s14558_s6 + $0x158] sm:$0xff] }
 0x64f   :  { %v13487_v58 = vcombine.high %v5661_v20, %v5665_v47  ;;  %v5657_v30 = vld [vmem:[%s14558_s6 + $0x170] sm:$0xff] }
 0x650   :  { %v5580_v39 = vmul.f32 %v5574_v12, %v12931_v43  ;;  %v5578_v26 = vadd.f32 0.5, %v5577_v24  ;;  %v5658_v12 = vld [vmem:[%s14558_s6 + $0x178] sm:$0xff]  ;;  %v5645_v24 = vld [vmem:[%s14558_s6 + $0x110] sm:$0xff] }
 0x651   :  { %v13510_v8 = vcombine.high %v5654_v54, %v5658_v12 }
 0x652   :  { %v5582_v33 = vadd.f32 %v5581_v6, %v5580_v39  ;;  %v13504_v6 = vcombine.low %v5661_v20, %v5665_v47  ;;  %v13506_v39 = vcombine.low %v5662_v15, %v5666_v0  ;;  %v13528_v20 = vcombine.low %v5653_v4, %v5657_v30  ;;  %v5637_v0 = vld [vmem:[%s14558_s6 + $0xd0] sm:$0xff] }
 0x653   :  { %15240 = vst [vmem:[#allocation79_spill] sm:$0xff] %v13510_v8 }
 0x654   :  { %10100 = vtanh.f32 %v5582_v33  ;;  %v13449_v28 = vsel %vm4581_vm9, %v5582_v33, %v12931_v43  ;;  %v13508_v33 = vcombine.high %v5653_v4, %v5657_v30  ;;  %15241 = vst [vmem:[#allocation75_spill] sm:$0xff] %v13528_v20  ;;  %v5642_v4 = vld [vmem:[%s14558_s6 + $0xf8] sm:$0xff] }
 0x656   :  { %15239 = vst [vmem:[#allocation76_spill] sm:$0xff] %v13508_v33 }
 0x661   :  { %v10101_v49 = vpop.eup %10100 }
 0x662   :  { %v5584_v31 = vmul.f32 %v10101_v49, %v5578_v26  ;;  %v5649_v26 = vld [vmem:[%s14558_s6 + $0x130] sm:$0xff]  ;;  %v5646_v49 = vld [vmem:[%s14558_s6 + $0x118] sm:$0xff] }
 0x663   :  { %v13534_v47 = vcombine.high %v5645_v24, %v5649_v26  ;;  %v13552_v30 = vcombine.low %v5645_v24, %v5649_v26  ;;  %v5630_v24 = vld [vmem:[%s14558_s6 + $0x98] sm:$0xff] }
 0x664   :  { %v13462_v56 = vsel %vm4581_vm9, %v5584_v31, %v12941_v55  ;;  %v5593_v43 = vsel %vm4581_vm9, %v5584_v31, 0.0  ;;  %v5650_v31 = vld [vmem:[%s14558_s6 + $0x138] sm:$0xff] }
 0x665   :  { %v5594_v60 = vpack.c.bf16 %v5593_v43, %v5593_v43  ;;  %v5610_v55 = vpack.c.bf16 %v13462_v56, %v13462_v56  ;;  %v13530_v43 = vcombine.low %v5654_v54, %v5658_v12  ;;  %15243 = vst [vmem:[#allocation80_spill] sm:$0xff] %v13534_v47  ;;  %v13536_v15 = vcombine.high %v5646_v49, %v5650_v31  ;;  %v5634_v26 = vld [vmem:[%s14558_s6 + $0xb8] sm:$0xff] }
 0x666   :  { %15245 = vst [vmem:[#allocation83_spill] sm:$0xff] %v13552_v30  ;;  %v13554_v54 = vcombine.low %v5646_v49, %v5650_v31 }
 0x667   :  { %9520 = vst [vmem:[%s14561_s9 + $0x2c] sm:$0xf] %v5594_v60  ;;  %6411 = vmatprep.mubr.bf16.mxu0 %v5610_v55  ;;  %6452 = vmatprep.mubr.bf16.mxu1 %v5610_v55  ;;  %15242 = vst [vmem:[#allocation78_spill] sm:$0xff] %v13530_v43  ;;  %v5641_v60 = vld [vmem:[%s14558_s6 + $0xf0] sm:$0xff] }
 0x668   :  { %6412 = vmatmul.mubr.bf16.vlgmr.msra.gmra.mxu0 %v13479_v2  ;;  %6453 = vmatmul.mubr.bf16.vlgmr.msra.gmra.mxu1 %v13479_v2  ;;  %15244 = vst [vmem:[#allocation81_spill] sm:$0xff] %v13536_v15  ;;  %15246 = vst [vmem:[#allocation84_spill] sm:$0xff] %v13554_v54  ;;  %v13558_v12 = vcombine.high %v5637_v0, %v5641_v60  ;;  %v13576_v49 = vcombine.low %v5637_v0, %v5641_v60  ;;  %v5622_v0 = vld [vmem:[%s14558_s6 + $0x58] sm:$0xff] }
 0x669   :  { %6462 = vmatpush1.bf16.msra.mxu0 %v13413_v34  ;;  %6503 = vmatpush1.bf16.msra.mxu1 %v13420_v44  ;;  %v5626_v60 = vld [vmem:[%s14558_s6 + $0x78] sm:$0xff] }
 0x66a   :  { %6493 = vmatprep.mubr.bf16.mxu0 %v5610_v55  ;;  %6534 = vmatprep.mubr.bf16.mxu1 %v5610_v55  ;;  %v5638_v55 = vld [vmem:[%s14558_s6 + $0xd8] sm:$0xff]  ;;  %15247 = vst [vmem:[#allocation85_spill] sm:$0xff] %v13558_v12  ;;  %15249 = vst [vmem:[#allocation86_spill] sm:$0xff] %v13576_v49 }
 0x66b   :  { %6463 = vmatprep.subr.bf16.mxu0 %v13487_v58  ;;  %6504 = vmatprep.subr.bf16.mxu1 %v13489_v19  ;;  %v13578_v31 = vcombine.low %v5638_v55, %v5642_v4 }
 0x66d   :  { %6464 = vmatpush1.bf16.msra.mxu0 %v13504_v6  ;;  %6505 = vmatpush1.bf16.msra.mxu1 %v13506_v39  ;;  %15250 = vst [vmem:[#allocation88_spill] sm:$0xff] %v13578_v31 }
 0x66e   :  { %6465 = vmatprep.subr.bf16.mxu0 %v13508_v33  ;;  %6506 = vmatprep.subr.bf16.mxu1 %v13510_v8  ;;  %v13560_v8 = vcombine.high %v5638_v55, %v5642_v4  ;;  %v5629_v33 = vld [vmem:[%s14558_s6 + $0x90] sm:$0xff]  ;;  %v13602_v4 = vcombine.low %v5630_v24, %v5634_v26 }
 0x670   :  { %15248 = vst [vmem:[#allocation87_spill] sm:$0xff] %v13560_v8  ;;  %15254 = vst [vmem:[#allocation92_spill] sm:$0xff] %v13602_v4 }
 0x671   :  { %6466 = vmatpush1.bf16.msra.mxu0 %v13528_v20  ;;  %6507 = vmatpush1.bf16.msra.mxu1 %v13530_v43  ;;  %v5633_v43 = vld [vmem:[%s14558_s6 + $0xb0] sm:$0xff] }
 0x672   :  { %6467 = vmatprep.subr.bf16.mxu0 %v13534_v47  ;;  %6508 = vmatprep.subr.bf16.mxu1 %v13536_v15  ;;  %v13582_v15 = vcombine.high %v5629_v33, %v5633_v43  ;;  %v13584_v47 = vcombine.high %v5630_v24, %v5634_v26  ;;  %v5621_v20 = vld [vmem:[%s14558_s6 + $0x50] sm:$0xff]  ;;  %v13600_v55 = vcombine.low %v5629_v33, %v5633_v43  ;;  %v5614_v33 = vld [vmem:[%s14558_s6 + $0x18] sm:$0xff] }
 0x673   :  { %v5618_v43 = vld [vmem:[%s14558_s6 + $0x38] sm:$0xff]  ;;  %v13626_v26 = vcombine.low %v5622_v0, %v5626_v60 }
 0x674   :  { %15251 = vst [vmem:[#allocation89_spill] sm:$0xff] %v13582_v15  ;;  %15252 = vst [vmem:[#allocation90_spill] sm:$0xff] %v13584_v47 }
 0x675   :  { %6468 = vmatpush1.bf16.msra.mxu0 %v13552_v30  ;;  %6509 = vmatpush1.bf16.msra.mxu1 %v13554_v54  ;;  %v5625_v54 = vld [vmem:[%s14558_s6 + $0x70] sm:$0xff]  ;;  %15253 = vst [vmem:[#allocation91_spill] sm:$0xff] %v13600_v55  ;;  %15258 = vst [vmem:[#allocation31_spill] sm:$0xff] %v13626_v26 }
 0x676   :  { %6469 = vmatprep.subr.bf16.mxu0 %v13558_v12  ;;  %6510 = vmatprep.subr.bf16.mxu1 %v13560_v8  ;;  %v13606_v8 = vcombine.high %v5621_v20, %v5625_v54  ;;  %v13608_v12 = vcombine.high %v5622_v0, %v5626_v60  ;;  %v5613_v30 = vld [vmem:[%s14558_s6 + $0x10] sm:$0xff]  ;;  %v13624_v24 = vcombine.low %v5621_v20, %v5625_v54  ;;  %v5734_v20 = vld [vmem:[%s14558_s6 + $0x3d8] sm:$0xff] }
 0x677   :  { %v5738_v54 = vld [vmem:[%s14558_s6 + $0x3f8] sm:$0xff]  ;;  %v13650_v60 = vcombine.low %v5614_v33, %v5618_v43 }
 0x678   :  { %15255 = vst [vmem:[#allocation18_spill] sm:$0xff] %v13606_v8  ;;  %15256 = vst [vmem:[#allocation20_spill] sm:$0xff] %v13608_v12 }
 0x679   :  { %6470 = vmatpush1.bf16.msra.mxu0 %v13576_v49  ;;  %6511 = vmatpush1.bf16.msra.mxu1 %v13578_v31  ;;  %v5617_v31 = vld [vmem:[%s14558_s6 + $0x30] sm:$0xff]  ;;  %15257 = vst [vmem:[#allocation33_spill] sm:$0xff] %v13624_v24  ;;  %15262 = vst [vmem:[#allocation68_spill] sm:$0xff] %v13650_v60 }
 0x67a   :  { %6471 = vmatprep.subr.bf16.mxu0 %v13582_v15  ;;  %6512 = vmatprep.subr.bf16.mxu1 %v13584_v47  ;;  %v13630_v47 = vcombine.high %v5613_v30, %v5617_v31  ;;  %v13632_v15 = vcombine.high %v5614_v33, %v5618_v43  ;;  %v5733_v49 = vld [vmem:[%s14558_s6 + $0x3d0] sm:$0xff]  ;;  %v13648_v0 = vcombine.low %v5613_v30, %v5617_v31  ;;  %v5726_v30 = vld [vmem:[%s14558_s6 + $0x398] sm:$0xff] }
 0x67b   :  { %v5730_v31 = vld [vmem:[%s14558_s6 + $0x3b8] sm:$0xff]  ;;  %v13674_v43 = vcombine.low %v5734_v20, %v5738_v54 }
 0x67c   :  { %15259 = vst [vmem:[#allocation10_spill] sm:$0xff] %v13630_v47  ;;  %15260 = vst [vmem:[#allocation36_spill] sm:$0xff] %v13632_v15 }
 0x67d   :  { %6472 = vmatpush1.bf16.msra.mxu0 %v13600_v55  ;;  %6513 = vmatpush1.bf16.msra.mxu1 %v13602_v4  ;;  %v5737_v4 = vld [vmem:[%s14558_s6 + $0x3f0] sm:$0xff]  ;;  %15261 = vst [vmem:[#allocation38_spill] sm:$0xff] %v13648_v0  ;;  %15266 = vst [vmem:[#allocation23_spill] sm:$0xff] %v13674_v43 }
 0x67e   :  { %6473 = vmatprep.subr.bf16.mxu0 %v13606_v8  ;;  %6514 = vmatprep.subr.bf16.mxu1 %v13608_v12  ;;  %v13654_v12 = vcombine.high %v5733_v49, %v5737_v4  ;;  %v13656_v8 = vcombine.high %v5734_v20, %v5738_v54  ;;  %v5725_v55 = vld [vmem:[%s14558_s6 + $0x390] sm:$0xff]  ;;  %v13672_v33 = vcombine.low %v5733_v49, %v5737_v4  ;;  %v5718_v49 = vld [vmem:[%s14558_s6 + $0x358] sm:$0xff] }
 0x67f   :  { %v5722_v4 = vld [vmem:[%s14558_s6 + $0x378] sm:$0xff]  ;;  %v13698_v54 = vcombine.low %v5726_v30, %v5730_v31 }
 0x680   :  { %15263 = vst [vmem:[#allocation64_spill] sm:$0xff] %v13654_v12  ;;  %15264 = vst [vmem:[#allocation12_spill] sm:$0xff] %v13656_v8 }
 0x681   :  { %6474 = vmatpush1.bf16.msra.mxu0 %v13624_v24  ;;  %6515 = vmatpush1.bf16.msra.mxu1 %v13626_v26  ;;  %v5729_v26 = vld [vmem:[%s14558_s6 + $0x3b0] sm:$0xff]  ;;  %15265 = vst [vmem:[#allocation25_spill] sm:$0xff] %v13672_v33  ;;  %15270 = vst [vmem:[#allocation77_spill] sm:$0xff] %v13698_v54 }
 0x682   :  { %6475 = vmatprep.subr.bf16.mxu0 %v13630_v47  ;;  %6516 = vmatprep.subr.bf16.mxu1 %v13632_v15  ;;  %v13678_v15 = vcombine.high %v5725_v55, %v5729_v26  ;;  %v13680_v47 = vcombine.high %v5726_v30, %v5730_v31  ;;  %v5717_v24 = vld [vmem:[%s14558_s6 + $0x350] sm:$0xff]  ;;  %v13696_v20 = vcombine.low %v5725_v55, %v5729_v26  ;;  %v5710_v55 = vld [vmem:[%s14558_s6 + $0x318] sm:$0xff] }
 0x683   :  { %v5714_v26 = vld [vmem:[%s14558_s6 + $0x338] sm:$0xff]  ;;  %v13722_v31 = vcombine.low %v5718_v49, %v5722_v4 }
 0x684   :  { %15267 = vst [vmem:[#allocation44_spill] sm:$0xff] %v13678_v15  ;;  %15268 = vst [vmem:[#allocation46_spill] sm:$0xff] %v13680_v47 }
 0x685   :  { %6476 = vmatpush1.bf16.msra.mxu0 %v13648_v0  ;;  %6517 = vmatpush1.bf16.msra.mxu1 %v13650_v60  ;;  %v5721_v60 = vld [vmem:[%s14558_s6 + $0x370] sm:$0xff]  ;;  %15269 = vst [vmem:[#allocation82_spill] sm:$0xff] %v13696_v20  ;;  %15274 = vst [vmem:[#allocation96_spill] sm:$0xff] %v13722_v31 }
 0x686   :  { %6477 = vmatprep.subr.bf16.mxu0 %v13654_v12  ;;  %6518 = vmatprep.subr.bf16.mxu1 %v13656_v8  ;;  %v13702_v8 = vcombine.high %v5717_v24, %v5721_v60  ;;  %v13704_v12 = vcombine.high %v5718_v49, %v5722_v4  ;;  %v5709_v0 = vld [vmem:[%s14558_s6 + $0x310] sm:$0xff]  ;;  %v13720_v30 = vcombine.low %v5717_v24, %v5721_v60  ;;  %v5702_v24 = vld [vmem:[%s14558_s6 + $0x2d8] sm:$0xff] }
 0x687   :  { %v5706_v60 = vld [vmem:[%s14558_s6 + $0x2f8] sm:$0xff]  ;;  %v13746_v4 = vcombine.low %v5710_v55, %v5714_v26 }
 0x688   :  { %15271 = vst [vmem:[#allocation93_spill] sm:$0xff] %v13702_v8  ;;  %15272 = vst [vmem:[#allocation94_spill] sm:$0xff] %v13704_v12 }
 0x689   :  { %6478 = vmatpush2.bf16.msra.mxu0 %v13672_v33  ;;  %6519 = vmatpush2.bf16.msra.mxu1 %v13674_v43  ;;  %v5713_v43 = vld [vmem:[%s14558_s6 + $0x330] sm:$0xff]  ;;  %15273 = vst [vmem:[#allocation95_spill] sm:$0xff] %v13720_v30  ;;  %15278 = vst [vmem:[#allocation100_spill] sm:$0xff] %v13746_v4 }
 0x68a   :  { %6479 = vmatprep.subr.bf16.mxu0 %v13678_v15  ;;  %6520 = vmatprep.subr.bf16.mxu1 %v13680_v47  ;;  %v13726_v47 = vcombine.high %v5709_v0, %v5713_v43  ;;  %v13728_v15 = vcombine.high %v5710_v55, %v5714_v26  ;;  %v5701_v33 = vld [vmem:[%s14558_s6 + $0x2d0] sm:$0xff]  ;;  %v13744_v49 = vcombine.low %v5709_v0, %v5713_v43  ;;  %v5694_v0 = vld [vmem:[%s14558_s6 + $0x298] sm:$0xff] }
 0x68b   :  { %v5698_v43 = vld [vmem:[%s14558_s6 + $0x2b8] sm:$0xff]  ;;  %v13770_v26 = vcombine.low %v5702_v24, %v5706_v60 }
 0x68c   :  { %15275 = vst [vmem:[#allocation97_spill] sm:$0xff] %v13726_v47  ;;  %15276 = vst [vmem:[#allocation98_spill] sm:$0xff] %v13728_v15 }
 0x68d   :  { %6480 = vmatpush2.bf16.msra.mxu0 %v13696_v20  ;;  %6521 = vmatpush2.bf16.msra.mxu1 %v13698_v54  ;;  %v5705_v54 = vld [vmem:[%s14558_s6 + $0x2f0] sm:$0xff]  ;;  %15277 = vst [vmem:[#allocation99_spill] sm:$0xff] %v13744_v49  ;;  %15282 = vst [vmem:[#allocation104_spill] sm:$0xff] %v13770_v26 }
 0x68e   :  { %6481 = vmatprep.subr.bf16.mxu0 %v13702_v8  ;;  %6522 = vmatprep.subr.bf16.mxu1 %v13704_v12  ;;  %v13750_v12 = vcombine.high %v5701_v33, %v5705_v54  ;;  %v13752_v8 = vcombine.high %v5702_v24, %v5706_v60  ;;  %v5693_v20 = vld [vmem:[%s14558_s6 + $0x290] sm:$0xff]  ;;  %v13768_v55 = vcombine.low %v5701_v33, %v5705_v54  ;;  %v5686_v33 = vld [vmem:[%s14558_s6 + $0x258] sm:$0xff] }
 0x68f   :  { %v5690_v54 = vld [vmem:[%s14558_s6 + $0x278] sm:$0xff]  ;;  %v13794_v60 = vcombine.low %v5694_v0, %v5698_v43 }
 0x690   :  { %15279 = vst [vmem:[#allocation101_spill] sm:$0xff] %v13750_v12  ;;  %15280 = vst [vmem:[#allocation102_spill] sm:$0xff] %v13752_v8 }
 0x691   :  { %6482 = vmatpush2.bf16.msra.mxu0 %v13720_v30  ;;  %6523 = vmatpush2.bf16.msra.mxu1 %v13722_v31  ;;  %v5697_v31 = vld [vmem:[%s14558_s6 + $0x2b0] sm:$0xff]  ;;  %15281 = vst [vmem:[#allocation103_spill] sm:$0xff] %v13768_v55 }
 0x692   :  { %6483 = vmatprep.subr.bf16.mxu0 %v13726_v47  ;;  %6524 = vmatprep.subr.bf16.mxu1 %v13728_v15  ;;  %v13774_v15 = vcombine.high %v5693_v20, %v5697_v31  ;;  %v13776_v47 = vcombine.high %v5694_v0, %v5698_v43  ;;  %v5685_v30 = vld [vmem:[%s14558_s6 + $0x250] sm:$0xff]  ;;  %v13792_v24 = vcombine.low %v5693_v20, %v5697_v31  ;;  %v5678_v20 = vld [vmem:[%s14558_s6 + $0x218] sm:$0xff] }
 0x693   :  { %v5682_v31 = vld [vmem:[%s14558_s6 + $0x238] sm:$0xff]  ;;  %v13818_v43 = vcombine.low %v5686_v33, %v5690_v54 }
 0x694   :  { %15283 = vst [vmem:[#allocation105_spill] sm:$0xff] %v13774_v15  ;;  %15284 = vst [vmem:[#allocation106_spill] sm:$0xff] %v13776_v47 }
 0x695   :  { %6484 = vmatpush2.bf16.msra.mxu0 %v13744_v49  ;;  %6525 = vmatpush2.bf16.msra.mxu1 %v13746_v4  ;;  %v5689_v4 = vld [vmem:[%s14558_s6 + $0x270] sm:$0xff]  ;;  %15285 = vst [vmem:[#allocation107_spill] sm:$0xff] %v13792_v24 }
 0x696   :  { %6485 = vmatprep.subr.bf16.mxu0 %v13750_v12  ;;  %6526 = vmatprep.subr.bf16.mxu1 %v13752_v8  ;;  %v13798_v8 = vcombine.high %v5685_v30, %v5689_v4  ;;  %v13800_v12 = vcombine.high %v5686_v33, %v5690_v54  ;;  %v5677_v49 = vld [vmem:[%s14558_s6 + $0x210] sm:$0xff]  ;;  %v13816_v0 = vcombine.low %v5685_v30, %v5689_v4  ;;  %v15317_v30 = vld [vmem:[#allocation11_spill] sm:$0xff]  ;;  %v15318_v54 = vld [vmem:[#allocation41_spill] sm:$0xff] }
 0x699   :  { %6486 = vmatpush2.bf16.msra.mxu0 %v13768_v55  ;;  %6527 = vmatpush2.bf16.msra.mxu1 %v13770_v26  ;;  %v5681_v26 = vld [vmem:[%s14558_s6 + $0x230] sm:$0xff] }
 0x69a   :  { %6487 = vmatprep.subr.bf16.mxu0 %v13774_v15  ;;  %6528 = vmatprep.subr.bf16.mxu1 %v13776_v47  ;;  %v13822_v47 = vcombine.high %v5677_v49, %v5681_v26  ;;  %v13824_v15 = vcombine.high %v5678_v20, %v5682_v31  ;;  %v13828_v55 = vcombine.low %v5677_v49, %v5681_v26 }
 0x69d   :  { %6488 = vmatpush2.bf16.msra.mxu0 %v13792_v24  ;;  %6529 = vmatpush2.bf16.msra.mxu1 %v13794_v60  ;;  %v13830_v24 = vcombine.low %v5678_v20, %v5682_v31 }
 0x69e   :  { %6489 = vmatprep.subr.bf16.mxu0 %v13798_v8  ;;  %6530 = vmatprep.subr.bf16.mxu1 %v13800_v12 }
 0x6a1   :  { %6490 = vmatpush2.bf16.msra.mxu0 %v13816_v0  ;;  %6531 = vmatpush2.bf16.msra.mxu1 %v13818_v43 }
 0x6a2   :  { %6491 = vmatprep.subr.bf16.mxu0 %v13822_v47  ;;  %6532 = vmatprep.subr.bf16.mxu1 %v13824_v15 }
 0x6a5   :  { %6492 = vmatpush2.bf16.msra.mxu0 %v13828_v55  ;;  %6533 = vmatpush2.bf16.msra.mxu1 %v13830_v24 }
 0x6a6   :  { %7381 = vmatprep.subr.bf16.mxu0 %v13031_v37  ;;  %7422 = vmatprep.subr.bf16.mxu1 %v13044_v48  ;;  %v15287_v37 = vld [vmem:[#allocation136_spill] sm:$0xff]  ;;  %v15289_v48 = vld [vmem:[#allocation135_spill] sm:$0xff] }
 0x6a8   :  { %6494 = vmatmul.mubr.bf16.vlgmr.msra.gmra.mxu0 %v13479_v2  ;;  %6535 = vmatmul.mubr.bf16.vlgmr.msra.gmra.mxu1 %v13479_v2 }
 0x6a9   :  { %7382 = vmatpush1.bf16.msra.mxu0 %v13029_v57  ;;  %7423 = vmatpush1.bf16.msra.mxu1 %v13042_v29  ;;  %v15286_v57 = vld [vmem:[#allocation133_spill] sm:$0xff]  ;;  %v15288_v29 = vld [vmem:[#allocation134_spill] sm:$0xff] }
 0x6aa   :  { %7383 = vmatprep.subr.bf16.mxu0 %v13046_v32  ;;  %7424 = vmatprep.subr.bf16.mxu1 %v13058_v5  ;;  %v15290_v32 = vld [vmem:[#allocation137_spill] sm:$0xff]  ;;  %v15291_v5 = vld [vmem:[#allocation140_spill] sm:$0xff] }
 0x6ad   :  { %7384 = vmatpush1.bf16.msra.mxu0 %v13071_v59  ;;  %7425 = vmatpush1.bf16.msra.mxu1 %v13075_v41  ;;  %v15292_v59 = vld [vmem:[#allocation138_spill] sm:$0xff]  ;;  %v15293_v41 = vld [vmem:[#allocation139_spill] sm:$0xff] }
 0x6ae   :  { %7385 = vmatprep.subr.bf16.mxu0 %v13077_v62  ;;  %7426 = vmatprep.subr.bf16.mxu1 %v13080_v46  ;;  %v15294_v62 = vld [vmem:[#allocation14_spill] sm:$0xff]  ;;  %v15295_v46 = vld [vmem:[#allocation29_spill] sm:$0xff] }
 0x6b1   :  { %7386 = vmatpush1.bf16.msra.mxu0 %v13095_v36  ;;  %7427 = vmatpush1.bf16.msra.mxu1 %v13099_v42  ;;  %v15296_v36 = vld [vmem:[#allocation141_spill] sm:$0xff]  ;;  %v15297_v42 = vld [vmem:[#allocation16_spill] sm:$0xff] }
 0x6b2   :  { %7387 = vmatprep.subr.bf16.mxu0 %v13101_v13  ;;  %7428 = vmatprep.subr.bf16.mxu1 %v13104_v7  ;;  %v15298_v13 = vld [vmem:[#allocation27_spill] sm:$0xff]  ;;  %v15299_v7 = vld [vmem:[#allocation40_spill] sm:$0xff] }
 0x6b5   :  { %7388 = vmatpush1.bf16.msra.mxu0 %v13107_v10  ;;  %7429 = vmatpush1.bf16.msra.mxu1 %v13111_v40  ;;  %v15300_v10 = vld [vmem:[#allocation42_spill] sm:$0xff] }
 0x6b6   :  { %7389 = vmatprep.subr.bf16.mxu0 %v13125_v50  ;;  %7430 = vmatprep.subr.bf16.mxu1 %v13134_v22  ;;  %v15301_v40 = vld [vmem:[#allocation74_spill] sm:$0xff]  ;;  %v15305_v22 = vld [vmem:[#allocation55_spill] sm:$0xff] }
 0x6b7   :  { %v15302_v50 = vld [vmem:[#allocation70_spill] sm:$0xff] }
 0x6b9   :  { %7390 = vmatpush1.bf16.msra.mxu0 %v13130_v23  ;;  %7431 = vmatpush1.bf16.msra.mxu1 %v13132_v38  ;;  %v15303_v23 = vld [vmem:[#allocation54_spill] sm:$0xff]  ;;  %v15304_v38 = vld [vmem:[#allocation61_spill] sm:$0xff] }
 0x6ba   :  { %7391 = vmatprep.subr.bf16.mxu0 %v13149_v11  ;;  %7432 = vmatprep.subr.bf16.mxu1 %v13158_v51  ;;  %v15306_v11 = vld [vmem:[#allocation57_spill] sm:$0xff]  ;;  %v15309_v51 = vld [vmem:[#allocation60_spill] sm:$0xff] }
 0x6bd   :  { %7392 = vmatpush1.bf16.msra.mxu0 %v13154_v53  ;;  %7433 = vmatpush1.bf16.msra.mxu1 %v13156_v3  ;;  %v15307_v53 = vld [vmem:[#allocation59_spill] sm:$0xff] }
 0x6be   :  { %7393 = vmatprep.subr.bf16.mxu0 %v13173_v52  ;;  %7434 = vmatprep.subr.bf16.mxu1 %v13182_v27  ;;  %v15308_v3 = vld [vmem:[#allocation67_spill] sm:$0xff]  ;;  %v15313_v27 = vld [vmem:[#allocation65_spill] sm:$0xff] }
 0x6bf   :  { %v15310_v52 = vld [vmem:[#allocation63_spill] sm:$0xff] }
 0x6c1   :  { %7394 = vmatpush1.bf16.msra.mxu0 %v13178_v25  ;;  %7435 = vmatpush1.bf16.msra.mxu1 %v13180_v16  ;;  %v15311_v25 = vld [vmem:[#allocation66_spill] sm:$0xff]  ;;  %v15312_v16 = vld [vmem:[#allocation73_spill] sm:$0xff] }
 0x6c2   :  { %7395 = vmatprep.subr.bf16.mxu0 %v13197_v14  ;;  %7436 = vmatprep.subr.bf16.mxu1 %v13206_v63  ;;  %v15314_v14 = vld [vmem:[#allocation69_spill] sm:$0xff] }
 0x6c5   :  { %7396 = vmatpush1.bf16.msra.mxu0 %v13202_v18  ;;  %7437 = vmatpush1.bf16.msra.mxu1 %v13204_v9  ;;  %v15315_v18 = vld [vmem:[#allocation71_spill] sm:$0xff] }
 0x6c6   :  { %7397 = vmatprep.subr.bf16.mxu0 %v13221_v35  ;;  %7438 = vmatprep.subr.bf16.mxu1 %v13230_v17  ;;  %v15316_v35 = vld [vmem:[#allocation9_spill] sm:$0xff] }
 0x6c9   :  { %7398 = vmatpush2.bf16.msra.mxu0 %v13226_v61  ;;  %7439 = vmatpush2.bf16.msra.mxu1 %v13228_v21 }
 0x6ca   :  { %7399 = vmatprep.subr.bf16.mxu0 %v15286_v57  ;;  %7440 = vmatprep.subr.bf16.mxu1 %v15287_v37  ;;  %v15319_v37 = vld [vmem:[#allocation39_spill] sm:$0xff] }
 0x6cd   :  { %7400 = vmatpush2.bf16.msra.mxu0 %v15288_v29  ;;  %7441 = vmatpush2.bf16.msra.mxu1 %v15289_v48 }
 0x6ce   :  { %7401 = vmatprep.subr.bf16.mxu0 %v15290_v32  ;;  %7442 = vmatprep.subr.bf16.mxu1 %v15291_v5 }
 0x6d1   :  { %7402 = vmatpush2.bf16.msra.mxu0 %v15292_v59  ;;  %7443 = vmatpush2.bf16.msra.mxu1 %v15293_v41 }
 0x6d2   :  { %7403 = vmatprep.subr.bf16.mxu0 %v15294_v62  ;;  %7444 = vmatprep.subr.bf16.mxu1 %v15295_v46 }
 0x6d5   :  { %7404 = vmatpush2.bf16.msra.mxu0 %v15296_v36  ;;  %7445 = vmatpush2.bf16.msra.mxu1 %v15297_v42 }
 0x6d6   :  { %7405 = vmatprep.subr.bf16.mxu0 %v15298_v13  ;;  %7446 = vmatprep.subr.bf16.mxu1 %v15299_v7  ;;  %v15320_v13 = vld [vmem:[#allocation72_spill] sm:$0xff] }
 0x6d9   :  { %7406 = vmatpush2.bf16.msra.mxu0 %v15300_v10  ;;  %7447 = vmatpush2.bf16.msra.mxu1 %v15301_v40 }
 0x6da   :  { %7407 = vmatprep.subr.bf16.mxu0 %v15302_v50  ;;  %7448 = vmatprep.subr.bf16.mxu1 %v15303_v23 }
 0x6dd   :  { %7408 = vmatpush2.bf16.msra.mxu0 %v15304_v38  ;;  %7449 = vmatpush2.bf16.msra.mxu1 %v15305_v22 }
 0x6de   :  { %7409 = vmatprep.subr.bf16.mxu0 %v15306_v11  ;;  %7450 = vmatprep.subr.bf16.mxu1 %v15307_v53 }
 0x6e1   :  { %7410 = vmatpush2.bf16.msra.mxu0 %v15308_v3  ;;  %7451 = vmatpush2.bf16.msra.mxu1 %v15309_v51 }
 0x6e2   :  { %7411 = vmatprep.subr.bf16.mxu0 %v15310_v52  ;;  %7452 = vmatprep.subr.bf16.mxu1 %v15311_v25  ;;  %v15321_v25 = vld [vmem:[#allocation28_spill] sm:$0xff] }
 0x6e5   :  { %7412 = vmatpush2.bf16.msra.mxu0 %v15312_v16  ;;  %7453 = vmatpush2.bf16.msra.mxu1 %v15313_v27 }
 0x6e6   :  { %7463 = vmatprep.subr.bf16.mxu0 %v15314_v14  ;;  %7504 = vmatprep.subr.bf16.mxu1 %v15315_v18 }
 0x728   :  { %v6413_v9 = vpop.f32.mrf.mxu0  ;;  %v6454_v63 = vpop.f32.mrf.mxu1 }
 0x729   :  { %v6543_v61 = vadd.f32 %v6413_v9, %v15316_v35  ;;  %v6545_v29 = vadd.f32 %v6454_v63, %v15319_v37  ;;  %v15322_v9 = vld [vmem:[#allocation30_spill] sm:$0xff] }
 0x72a   :  { %v6415_v21 = vpop.f32.mrf.mxu0  ;;  %v6456_v17 = vpop.f32.mrf.mxu1 }
 0x72b   :  { %v6547_v2 = vmul.f32 0.5, %v6543_v61  ;;  %v6544_v49 = vadd.f32 %v6415_v21, %v15317_v30  ;;  %v6546_v20 = vadd.f32 %v6456_v17, %v15318_v54  ;;  %v6555_v48 = vmul.f32 0.5, %v6545_v29  ;;  %v15323_v17 = vld [vmem:[#allocation56_spill] sm:$0xff] }
 0x72c   :  { %v6417_v4 = vpop.f32.mrf.mxu0  ;;  %v6458_v26 = vpop.f32.mrf.mxu1 }
 0x72d   :  { %10102 = vtanh.f32 %v6547_v2  ;;  %v6551_v33 = vmul.f32 0.5, %v6544_v49  ;;  %v15324_v4 = vld [vmem:[#allocation53_spill] sm:$0xff] }
 0x72e   :  { %v6418_v31 = vpop.f32.mrf.mxu0  ;;  %v6459_v57 = vpop.f32.mrf.mxu1 }
 0x72f   :  { %10104 = vtanh.f32 %v6551_v33 }
 0x730   :  { %10106 = vtanh.f32 %v6546_v20 }
 0x731   :  { %10108 = vtanh.f32 %v6555_v48 }
 0x73a   :  { %v10103_v32 = vpop.eup %10102 }
 0x73b   :  { %v6549_v5 = vmul.f32 0.5, %v10103_v32 }
 0x73c   :  { %v10105_v59 = vpop.eup %10104 }
 0x73d   :  { %v6550_v41 = vadd.f32 0.5, %v6549_v5  ;;  %v6553_v62 = vmul.f32 0.5, %v10105_v59  ;;  %v10107_v46 = vpop.eup %10106 }
 0x73e   :  { %v10109_v50 = vpop.eup %10108 }
 0x73f   :  { %v6554_v36 = vadd.f32 0.5, %v6553_v62  ;;  %v6561_v42 = vmul.f32 %v10107_v46, %v6550_v41  ;;  %v6557_v23 = vmul.f32 0.5, %v10109_v50 }
 0x741   :  { %v6560_v7 = vmul.f32 %v6554_v36, %v15320_v13  ;;  %v6558_v38 = vadd.f32 0.5, %v6557_v23 }
 0x743   :  { %v6562_v10 = vadd.f32 %v6561_v42, %v6560_v7 }
 0x745   :  { %10110 = vtanh.f32 %v6562_v10  ;;  %v13912_v40 = vsel %vm3576_vm8, %v6562_v10, %v15320_v13 }
 0x752   :  { %v10111_v22 = vpop.eup %10110 }
 0x753   :  { %v6564_v11 = vmul.f32 %v10111_v22, %v6558_v38  ;;  %v15327_v22 = vld [vmem:[#allocation75_spill] sm:$0xff] }
 0x755   :  { %v6591_v53 = vsel %vm3576_vm8, %v6564_v11, 0.0  ;;  %v13932_v7 = vsel %vm3576_vm8, %v6564_v11, %v13454_v45  ;;  %v15325_v45 = vld [vmem:[#allocation76_spill] sm:$0xff]  ;;  %v15328_v11 = vld [vmem:[#allocation78_spill] sm:$0xff] }
 0x756   :  { %v6592_v3 = vpack.c.bf16 %v6591_v53, %v6591_v53  ;;  %v13945_v38 = vpack.c.bf16 %v13932_v7, %v13932_v7  ;;  %v15331_v53 = vld [vmem:[#allocation83_spill] sm:$0xff] }
 0x758   :  { %9649 = vst [vmem:[%s14561_s9 + $0x14] sm:$0xf] %v6592_v3  ;;  %v15336_v3 = vld [vmem:[#allocation88_spill] sm:$0xff] }
 0x768   :  { %v6495_v51 = vpop.f32.mrf.mxu0  ;;  %v6536_v52 = vpop.f32.mrf.mxu1 }
 0x769   :  { %v6565_v16 = vadd.f32 %v6495_v51, %v15321_v25  ;;  %v6567_v26 = vadd.f32 %v6536_v52, %v15324_v4  ;;  %v15337_v51 = vld [vmem:[#allocation89_spill] sm:$0xff]  ;;  %v15338_v52 = vld [vmem:[#allocation90_spill] sm:$0xff]  ;;  %v15339_v25 = vld [vmem:[#allocation91_spill] sm:$0xff] }
 0x76a   :  { %v6497_v27 = vpop.f32.mrf.mxu0  ;;  %v6538_v14 = vpop.f32.mrf.mxu1  ;;  %v15353_v4 = vld [vmem:[#allocation44_spill] sm:$0xff] }
 0x76b   :  { %v6569_v18 = vmul.f32 0.5, %v6565_v16  ;;  %v6566_v63 = vadd.f32 %v6497_v27, %v15322_v9  ;;  %v6568_v2 = vadd.f32 %v6538_v14, %v15323_v17  ;;  %v6577_v33 = vmul.f32 0.5, %v6567_v26  ;;  %v15340_v16 = vld [vmem:[#allocation92_spill] sm:$0xff]  ;;  %v15341_v27 = vld [vmem:[#allocation18_spill] sm:$0xff]  ;;  %v15344_v9 = vld [vmem:[#allocation31_spill] sm:$0xff] }
 0x76c   :  { %v6499_v35 = vpop.f32.mrf.mxu0  ;;  %v6540_v61 = vpop.f32.mrf.mxu1  ;;  %v15342_v14 = vld [vmem:[#allocation20_spill] sm:$0xff]  ;;  %v15354_v26 = vld [vmem:[#allocation46_spill] sm:$0xff] }
 0x76d   :  { %10112 = vtanh.f32 %v6569_v18  ;;  %v6573_v21 = vmul.f32 0.5, %v6566_v63  ;;  %v15343_v18 = vld [vmem:[#allocation33_spill] sm:$0xff]  ;;  %v15345_v63 = vld [vmem:[#allocation10_spill] sm:$0xff]  ;;  %v15346_v35 = vld [vmem:[#allocation36_spill] sm:$0xff] }
 0x76e   :  { %v6500_v30 = vpop.f32.mrf.mxu0  ;;  %v6541_v49 = vpop.f32.mrf.mxu1  ;;  %v15347_v61 = vld [vmem:[#allocation38_spill] sm:$0xff]  ;;  %v15349_v17 = vld [vmem:[#allocation64_spill] sm:$0xff] }
 0x76f   :  { %10114 = vtanh.f32 %v6573_v21  ;;  %v15348_v21 = vld [vmem:[#allocation68_spill] sm:$0xff]  ;;  %v15351_v30 = vld [vmem:[#allocation25_spill] sm:$0xff]  ;;  %v15352_v49 = vld [vmem:[#allocation23_spill] sm:$0xff] }
 0x770   :  { %10116 = vtanh.f32 %v6568_v2  ;;  %v15350_v2 = vld [vmem:[#allocation12_spill] sm:$0xff] }
 0x771   :  { %10118 = vtanh.f32 %v6577_v33  ;;  %v15355_v33 = vld [vmem:[#allocation82_spill] sm:$0xff] }
 0x77a   :  { %v10113_v54 = vpop.eup %10112 }
 0x77b   :  { %v6571_v20 = vmul.f32 0.5, %v10113_v54  ;;  %v15356_v54 = vld [vmem:[#allocation77_spill] sm:$0xff] }
 0x77c   :  { %v10115_v31 = vpop.eup %10114 }
 0x77d   :  { %v6572_v57 = vadd.f32 0.5, %v6571_v20  ;;  %v6575_v37 = vmul.f32 0.5, %v10115_v31  ;;  %v10117_v29 = vpop.eup %10116  ;;  %v15357_v20 = vld [vmem:[#allocation93_spill] sm:$0xff]  ;;  %v15358_v31 = vld [vmem:[#allocation94_spill] sm:$0xff] }
 0x77e   :  { %v10119_v62 = vpop.eup %10118 }
 0x77f   :  { %v6576_v48 = vadd.f32 0.5, %v6575_v37  ;;  %v6583_v32 = vmul.f32 %v10117_v29, %v6572_v57  ;;  %v6579_v46 = vmul.f32 0.5, %v10119_v62  ;;  %v15359_v57 = vld [vmem:[#allocation95_spill] sm:$0xff]  ;;  %v15360_v37 = vld [vmem:[#allocation96_spill] sm:$0xff]  ;;  %v15361_v29 = vld [vmem:[#allocation97_spill] sm:$0xff] }
 0x780   :  { %v15366_v62 = vld [vmem:[#allocation102_spill] sm:$0xff] }
 0x781   :  { %v6582_v5 = vmul.f32 %v6576_v48, %v13449_v28  ;;  %v6580_v36 = vadd.f32 0.5, %v6579_v46  ;;  %v15362_v48 = vld [vmem:[#allocation98_spill] sm:$0xff]  ;;  %v15367_v46 = vld [vmem:[#allocation103_spill] sm:$0xff] }
 0x783   :  { %v6584_v59 = vadd.f32 %v6583_v32, %v6582_v5  ;;  %v15363_v32 = vld [vmem:[#allocation99_spill] sm:$0xff]  ;;  %v15364_v5 = vld [vmem:[#allocation100_spill] sm:$0xff] }
 0x785   :  { %10120 = vtanh.f32 %v6584_v59  ;;  %v13927_v41 = vsel %vm3575_vm7, %v6584_v59, %v13449_v28  ;;  %v15365_v59 = vld [vmem:[#allocation101_spill] sm:$0xff] }
 0x792   :  { %v10121_v42 = vpop.eup %10120 }
 0x793   :  { %v6586_v13 = vmul.f32 %v10121_v42, %v6580_v36  ;;  %v15368_v36 = vld [vmem:[#allocation104_spill] sm:$0xff]  ;;  %v15369_v42 = vld [vmem:[#allocation105_spill] sm:$0xff] }
 0x795   :  { %v13937_v10 = vsel %vm3575_vm7, %v6586_v13, %v13462_v56  ;;  %v6595_v50 = vsel %vm3575_vm7, %v6586_v13, 0.0  ;;  %v15326_v56 = vld [vmem:[#allocation79_spill] sm:$0xff]  ;;  %v15370_v13 = vld [vmem:[#allocation106_spill] sm:$0xff] }
 0x796   :  { %v6596_v28 = vpack.c.bf16 %v6595_v50, %v6595_v50  ;;  %v6612_v23 = vpack.c.bf16 %v13937_v10, %v13937_v10  ;;  %v15371_v50 = vld [vmem:[#allocation107_spill] sm:$0xff] }
 0x798   :  { %9650 = vst [vmem:[%s14561_s9 + $0x28] sm:$0xf] %v6596_v28  ;;  %7413 = vmatprep.mubr.bf16.mxu0 %v6612_v23  ;;  %7454 = vmatprep.mubr.bf16.mxu1 %v6612_v23 }
 0x799   :  { %7414 = vmatmul.mubr.bf16.vlgmr.msra.gmra.mxu0 %v13945_v38  ;;  %7455 = vmatmul.mubr.bf16.vlgmr.msra.gmra.mxu1 %v13945_v38 }
 0x79a   :  { %7464 = vmatpush1.bf16.msra.mxu0 %v13413_v34  ;;  %7505 = vmatpush1.bf16.msra.mxu1 %v13420_v44  ;;  %v15329_v34 = vld [vmem:[#allocation80_spill] sm:$0xff]  ;;  %v15330_v44 = vld [vmem:[#allocation81_spill] sm:$0xff] }
 0x79b   :  { %7495 = vmatprep.mubr.bf16.mxu0 %v6612_v23  ;;  %7536 = vmatprep.mubr.bf16.mxu1 %v6612_v23 }
 0x79c   :  { %7465 = vmatprep.subr.bf16.mxu0 %v13487_v58  ;;  %7506 = vmatprep.subr.bf16.mxu1 %v13489_v19  ;;  %v15332_v58 = vld [vmem:[#allocation84_spill] sm:$0xff]  ;;  %v15333_v19 = vld [vmem:[#allocation85_spill] sm:$0xff] }
 0x79e   :  { %7466 = vmatpush1.bf16.msra.mxu0 %v13504_v6  ;;  %7507 = vmatpush1.bf16.msra.mxu1 %v13506_v39  ;;  %v15334_v6 = vld [vmem:[#allocation87_spill] sm:$0xff]  ;;  %v15335_v39 = vld [vmem:[#allocation86_spill] sm:$0xff] }
 0x79f   :  { %7467 = vmatprep.subr.bf16.mxu0 %v15325_v45  ;;  %7508 = vmatprep.subr.bf16.mxu1 %v15326_v56  ;;  %v7668_v45 = vld [vmem:[%s14558_s6 + $0x1a8] sm:$0xff]  ;;  %v7655_v56 = vld [vmem:[%s14558_s6 + $0x140] sm:$0xff] }
 0x7a2   :  { %7468 = vmatpush1.bf16.msra.mxu0 %v15327_v22  ;;  %7509 = vmatpush1.bf16.msra.mxu1 %v15328_v11  ;;  %v7659_v11 = vld [vmem:[%s14558_s6 + $0x160] sm:$0xff] }
 0x7a3   :  { %7469 = vmatprep.subr.bf16.mxu0 %v15329_v34  ;;  %7510 = vmatprep.subr.bf16.mxu1 %v15330_v44  ;;  %v7656_v34 = vld [vmem:[%s14558_s6 + $0x148] sm:$0xff] }
 0x7a4   :  { %v7660_v44 = vld [vmem:[%s14558_s6 + $0x168] sm:$0xff] }
 0x7a6   :  { %7470 = vmatpush1.bf16.msra.mxu0 %v15331_v53  ;;  %7511 = vmatpush1.bf16.msra.mxu1 %v15332_v58 }
 0x7a7   :  { %7471 = vmatprep.subr.bf16.mxu0 %v15333_v19  ;;  %7512 = vmatprep.subr.bf16.mxu1 %v15334_v6  ;;  %v9822_v19 = vcombine.high %v7655_v56, %v7659_v11  ;;  %v9824_v6 = vcombine.high %v7656_v34, %v7660_v44 }
 0x7aa   :  { %7472 = vmatpush1.bf16.msra.mxu0 %v15335_v39  ;;  %7513 = vmatpush1.bf16.msra.mxu1 %v15336_v3  ;;  %v7647_v39 = vld [vmem:[%s14558_s6 + $0x100] sm:$0xff] }
 0x7ab   :  { %7473 = vmatprep.subr.bf16.mxu0 %v15337_v51  ;;  %7514 = vmatprep.subr.bf16.mxu1 %v15338_v52  ;;  %v7651_v3 = vld [vmem:[%s14558_s6 + $0x120] sm:$0xff]  ;;  %v7648_v51 = vld [vmem:[%s14558_s6 + $0x108] sm:$0xff] }
 0x7ac   :  { %v7652_v52 = vld [vmem:[%s14558_s6 + $0x128] sm:$0xff] }
 0x7ae   :  { %7474 = vmatpush1.bf16.msra.mxu0 %v15339_v25  ;;  %7515 = vmatpush1.bf16.msra.mxu1 %v15340_v16  ;;  %v9821_v25 = vcombine.low %v7655_v56, %v7659_v11  ;;  %v9823_v16 = vcombine.low %v7656_v34, %v7660_v44  ;;  %v7727_v56 = vld [vmem:[%s14558_s6 + $0x380] sm:$0xff]  ;;  %v7728_v11 = vld [vmem:[%s14558_s6 + $0x388] sm:$0xff] }
 0x7af   :  { %7475 = vmatprep.subr.bf16.mxu0 %v15341_v27  ;;  %7516 = vmatprep.subr.bf16.mxu1 %v15342_v14  ;;  %v9814_v27 = vcombine.high %v7647_v39, %v7651_v3  ;;  %v9816_v14 = vcombine.high %v7648_v51, %v7652_v52  ;;  %v7732_v44 = vld [vmem:[%s14558_s6 + $0x3a8] sm:$0xff] }
 0x7b2   :  { %7476 = vmatpush1.bf16.msra.mxu0 %v15343_v18  ;;  %7517 = vmatpush1.bf16.msra.mxu1 %v15344_v9  ;;  %v9813_v18 = vcombine.low %v7647_v39, %v7651_v3  ;;  %v9815_v9 = vcombine.low %v7648_v51, %v7652_v52  ;;  %v7723_v39 = vld [vmem:[%s14558_s6 + $0x360] sm:$0xff]  ;;  %v7720_v3 = vld [vmem:[%s14558_s6 + $0x348] sm:$0xff] }
 0x7b3   :  { %7477 = vmatprep.subr.bf16.mxu0 %v15345_v63  ;;  %7518 = vmatprep.subr.bf16.mxu1 %v15346_v35  ;;  %v7639_v63 = vld [vmem:[%s14558_s6 + $0xc0] sm:$0xff]  ;;  %v7724_v52 = vld [vmem:[%s14558_s6 + $0x368] sm:$0xff] }
 0x7b4   :  { %v7643_v35 = vld [vmem:[%s14558_s6 + $0xe0] sm:$0xff] }
 0x7b6   :  { %7478 = vmatpush1.bf16.msra.mxu0 %v15347_v61  ;;  %7519 = vmatpush1.bf16.msra.mxu1 %v15348_v21  ;;  %v7640_v61 = vld [vmem:[%s14558_s6 + $0xc8] sm:$0xff]  ;;  %v9806_v21 = vcombine.high %v7639_v63, %v7643_v35 }
 0x7b7   :  { %7479 = vmatprep.subr.bf16.mxu0 %v15349_v17  ;;  %7520 = vmatprep.subr.bf16.mxu1 %v15350_v2  ;;  %v7644_v17 = vld [vmem:[%s14558_s6 + $0xe8] sm:$0xff]  ;;  %v9805_v2 = vcombine.low %v7639_v63, %v7643_v35 }
 0x7ba   :  { %7480 = vmatpush2.bf16.msra.mxu0 %v15351_v30  ;;  %7521 = vmatpush2.bf16.msra.mxu1 %v15352_v49  ;;  %v9807_v30 = vcombine.low %v7640_v61, %v7644_v17  ;;  %v9808_v49 = vcombine.high %v7640_v61, %v7644_v17  ;;  %v7716_v61 = vld [vmem:[%s14558_s6 + $0x328] sm:$0xff]  ;;  %v7707_v17 = vld [vmem:[%s14558_s6 + $0x2e0] sm:$0xff] }
 0x7bb   :  { %7481 = vmatprep.subr.bf16.mxu0 %v15353_v4  ;;  %7522 = vmatprep.subr.bf16.mxu1 %v15354_v26  ;;  %v7631_v4 = vld [vmem:[%s14558_s6 + $0x80] sm:$0xff] }
 0x7bc   :  { %v7635_v26 = vld [vmem:[%s14558_s6 + $0xa0] sm:$0xff] }
 0x7be   :  { %7482 = vmatpush2.bf16.msra.mxu0 %v15355_v33  ;;  %7523 = vmatpush2.bf16.msra.mxu1 %v15356_v54  ;;  %v7632_v33 = vld [vmem:[%s14558_s6 + $0x88] sm:$0xff]  ;;  %v9798_v54 = vcombine.high %v7631_v4, %v7635_v26 }
 0x7bf   :  { %7483 = vmatprep.subr.bf16.mxu0 %v15357_v20  ;;  %7524 = vmatprep.subr.bf16.mxu1 %v15358_v31  ;;  %v7636_v20 = vld [vmem:[%s14558_s6 + $0xa8] sm:$0xff]  ;;  %v9797_v31 = vcombine.low %v7631_v4, %v7635_v26 }
 0x7c0   :  { %v7704_v4 = vld [vmem:[%s14558_s6 + $0x2c8] sm:$0xff] }
 0x7c1   :  { %v7708_v26 = vld [vmem:[%s14558_s6 + $0x2e8] sm:$0xff] }
 0x7c2   :  { %7484 = vmatpush2.bf16.msra.mxu0 %v15359_v57  ;;  %7525 = vmatpush2.bf16.msra.mxu1 %v15360_v37  ;;  %v9799_v57 = vcombine.low %v7632_v33, %v7636_v20  ;;  %v9800_v37 = vcombine.high %v7632_v33, %v7636_v20  ;;  %v7695_v33 = vld [vmem:[%s14558_s6 + $0x280] sm:$0xff] }
 0x7c3   :  { %7485 = vmatprep.subr.bf16.mxu0 %v15361_v29  ;;  %7526 = vmatprep.subr.bf16.mxu1 %v15362_v48  ;;  %v7623_v29 = vld [vmem:[%s14558_s6 + $0x40] sm:$0xff] }
 0x7c4   :  { %v7627_v48 = vld [vmem:[%s14558_s6 + $0x60] sm:$0xff] }
 0x7c5   :  { %v7699_v20 = vld [vmem:[%s14558_s6 + $0x2a0] sm:$0xff] }
 0x7c6   :  { %7486 = vmatpush2.bf16.msra.mxu0 %v15363_v32  ;;  %7527 = vmatpush2.bf16.msra.mxu1 %v15364_v5  ;;  %v7624_v32 = vld [vmem:[%s14558_s6 + $0x48] sm:$0xff]  ;;  %v9790_v5 = vcombine.high %v7623_v29, %v7627_v48 }
 0x7c7   :  { %7487 = vmatprep.subr.bf16.mxu0 %v15365_v59  ;;  %7528 = vmatprep.subr.bf16.mxu1 %v15366_v62  ;;  %v7628_v59 = vld [vmem:[%s14558_s6 + $0x68] sm:$0xff]  ;;  %v9789_v62 = vcombine.low %v7623_v29, %v7627_v48  ;;  %v9871_v29 = vcombine.low %v7704_v4, %v7708_v26  ;;  %v9862_v48 = vcombine.high %v7695_v33, %v7699_v20 }
 0x7ca   :  { %7488 = vmatpush2.bf16.msra.mxu0 %v15367_v46  ;;  %7529 = vmatpush2.bf16.msra.mxu1 %v15368_v36  ;;  %v9791_v46 = vcombine.low %v7624_v32, %v7628_v59  ;;  %v9792_v36 = vcombine.high %v7624_v32, %v7628_v59  ;;  %v7691_v59 = vld [vmem:[%s14558_s6 + $0x260] sm:$0xff] }
 0x7cb   :  { %7489 = vmatprep.subr.bf16.mxu0 %v15369_v42  ;;  %7530 = vmatprep.subr.bf16.mxu1 %v15370_v13  ;;  %v7615_v42 = vld [vmem:[%s14558_s6] sm:$0xff] }
 0x7cc   :  { %v7619_v13 = vld [vmem:[%s14558_s6 + $0x20] sm:$0xff] }
 0x7ce   :  { %7490 = vmatpush2.bf16.msra.mxu0 %v15371_v50  ;;  %7531 = vmatpush2.bf16.msra.mxu1 %v13794_v60  ;;  %v7663_v60 = vld [vmem:[%s14558_s6 + $0x180] sm:$0xff]  ;;  %v7616_v50 = vld [vmem:[%s14558_s6 + $0x8] sm:$0xff] }
 0x7cf   :  { %7491 = vmatprep.subr.bf16.mxu0 %v13798_v8  ;;  %7532 = vmatprep.subr.bf16.mxu1 %v13800_v12  ;;  %v7671_v8 = vld [vmem:[%s14558_s6 + $0x1c0] sm:$0xff] }
 0x7d0   :  { %v7675_v12 = vld [vmem:[%s14558_s6 + $0x1e0] sm:$0xff] }
 0x7d2   :  { %7492 = vmatpush2.bf16.msra.mxu0 %v13816_v0  ;;  %7533 = vmatpush2.bf16.msra.mxu1 %v13818_v43  ;;  %v7667_v0 = vld [vmem:[%s14558_s6 + $0x1a0] sm:$0xff] }
 0x7d3   :  { %7493 = vmatprep.subr.bf16.mxu0 %v13822_v47  ;;  %7534 = vmatprep.subr.bf16.mxu1 %v13824_v15  ;;  %v7672_v47 = vld [vmem:[%s14558_s6 + $0x1c8] sm:$0xff]  ;;  %v9837_v15 = vcombine.low %v7671_v8, %v7675_v12  ;;  %v9830_v23 = vcombine.high %v7663_v60, %v7667_v0  ;;  %v9829_v53 = vcombine.low %v7663_v60, %v7667_v0  ;;  %v7739_v60 = vld [vmem:[%s14558_s6 + $0x3e0] sm:$0xff] }
 0x7d4   :  { %v7736_v0 = vld [vmem:[%s14558_s6 + $0x3c8] sm:$0xff] }
 0x7d6   :  { %7494 = vmatpush2.bf16.msra.mxu0 %v13828_v55  ;;  %7535 = vmatpush2.bf16.msra.mxu1 %v13830_v24  ;;  %v9838_v55 = vcombine.high %v7671_v8, %v7675_v12  ;;  %v7676_v24 = vld [vmem:[%s14558_s6 + $0x1e8] sm:$0xff]  ;;  %v9782_v8 = vcombine.high %v7615_v42, %v7619_v13 }
 0x7d7   :  { %v9839_v43 = vcombine.low %v7672_v47, %v7676_v24  ;;  %v9840_v28 = vcombine.high %v7672_v47, %v7676_v24  ;;  %v7620_v12 = vld [vmem:[%s14558_s6 + $0x28] sm:$0xff]  ;;  %v9781_v47 = vcombine.low %v7615_v42, %v7619_v13  ;;  %v7735_v24 = vld [vmem:[%s14558_s6 + $0x3c0] sm:$0xff] }
 0x7d8   :  { %8383 = vmatprep.subr.bf16.mxu0 %v9838_v55  ;;  %v9784_v55 = vcombine.high %v7616_v50, %v7620_v12 }
 0x7d9   :  { %7496 = vmatmul.mubr.bf16.vlgmr.msra.gmra.mxu0 %v13945_v38  ;;  %7537 = vmatmul.mubr.bf16.vlgmr.msra.gmra.mxu1 %v13945_v38  ;;  %v7664_v38 = vld [vmem:[%s14558_s6 + $0x188] sm:$0xff] }
 0x7da   :  { %v9832_v22 = vcombine.high %v7664_v38, %v7668_v45  ;;  %8424 = vmatprep.subr.bf16.mxu1 %v9840_v28  ;;  %8384 = vmatpush1.bf16.msra.mxu0 %v9837_v15  ;;  %v9831_v58 = vcombine.low %v7664_v38, %v7668_v45  ;;  %v9783_v15 = vcombine.low %v7616_v50, %v7620_v12  ;;  %v7740_v28 = vld [vmem:[%s14558_s6 + $0x3e8] sm:$0xff]  ;;  %v7683_v12 = vld [vmem:[%s14558_s6 + $0x220] sm:$0xff] }
 0x7db   :  { %8425 = vmatpush1.bf16.msra.mxu1 %v9839_v43  ;;  %8385 = vmatprep.subr.bf16.mxu0 %v9830_v23  ;;  %v9902_v43 = vcombine.high %v7735_v24, %v7739_v60  ;;  %v9901_v23 = vcombine.low %v7735_v24, %v7739_v60  ;;  %v9903_v38 = vcombine.low %v7736_v0, %v7740_v28 }
 0x7dc   :  { %8426 = vmatprep.subr.bf16.mxu1 %v9832_v22  ;;  %v9904_v45 = vcombine.high %v7736_v0, %v7740_v28  ;;  %v7731_v22 = vld [vmem:[%s14558_s6 + $0x3a0] sm:$0xff] }
 0x7dd   :  { %v9894_v34 = vcombine.high %v7727_v56, %v7731_v22 }
 0x7de   :  { %8386 = vmatpush1.bf16.msra.mxu0 %v9829_v53  ;;  %v9893_v53 = vcombine.low %v7727_v56, %v7731_v22 }
 0x7df   :  { %8427 = vmatpush1.bf16.msra.mxu1 %v9831_v58  ;;  %8387 = vmatprep.subr.bf16.mxu0 %v9822_v19  ;;  %v9895_v58 = vcombine.low %v7728_v11, %v7732_v44  ;;  %v9896_v19 = vcombine.high %v7728_v11, %v7732_v44  ;;  %v14230_v11 = vld [vmem:[%s14558_s6 + $0x1f8] sm:$0xff] }
 0x7e0   :  { %8428 = vmatprep.subr.bf16.mxu1 %v9824_v6  ;;  %v7719_v6 = vld [vmem:[%s14558_s6 + $0x340] sm:$0xff] }
 0x7e1   :  { %v9886_v51 = vcombine.high %v7719_v6, %v7723_v39 }
 0x7e2   :  { %8388 = vmatpush1.bf16.msra.mxu0 %v9821_v25  ;;  %v9885_v25 = vcombine.low %v7719_v6, %v7723_v39 }
 0x7e3   :  { %8429 = vmatpush1.bf16.msra.mxu1 %v9823_v16  ;;  %8389 = vmatprep.subr.bf16.mxu0 %v9814_v27  ;;  %v9887_v16 = vcombine.low %v7720_v3, %v7724_v52  ;;  %v9888_v27 = vcombine.high %v7720_v3, %v7724_v52  ;;  %v15373_v52 = vld [vmem:[#allocation15_spill] sm:$0xff] }
 0x7e4   :  { %8430 = vmatprep.subr.bf16.mxu1 %v9816_v14  ;;  %v7711_v14 = vld [vmem:[%s14558_s6 + $0x300] sm:$0xff] }
 0x7e6   :  { %8390 = vmatpush1.bf16.msra.mxu0 %v9813_v18  ;;  %v7715_v18 = vld [vmem:[%s14558_s6 + $0x320] sm:$0xff] }
 0x7e7   :  { %8431 = vmatpush1.bf16.msra.mxu1 %v9815_v9  ;;  %8391 = vmatprep.subr.bf16.mxu0 %v9806_v21  ;;  %v7712_v9 = vld [vmem:[%s14558_s6 + $0x308] sm:$0xff]  ;;  %v9877_v63 = vcombine.low %v7711_v14, %v7715_v18  ;;  %v9878_v35 = vcombine.high %v7711_v14, %v7715_v18  ;;  %v7703_v21 = vld [vmem:[%s14558_s6 + $0x2c0] sm:$0xff]  ;;  %v15374_v18 = vld [vmem:[#allocation45_spill] sm:$0xff] }
 0x7e8   :  { %8432 = vmatprep.subr.bf16.mxu1 %v9808_v49  ;;  %v9870_v49 = vcombine.high %v7703_v21, %v7707_v17 }
 0x7ea   :  { %8392 = vmatpush1.bf16.msra.mxu0 %v9805_v2  ;;  %v9879_v2 = vcombine.low %v7712_v9, %v7716_v61 }
 0x7eb   :  { %8433 = vmatpush1.bf16.msra.mxu1 %v9807_v30  ;;  %8393 = vmatprep.subr.bf16.mxu0 %v9798_v54  ;;  %v9880_v30 = vcombine.high %v7712_v9, %v7716_v61  ;;  %v9872_v54 = vcombine.high %v7704_v4, %v7708_v26  ;;  %v15375_v61 = vld [vmem:[#allocation43_spill] sm:$0xff] }
 0x7ec   :  { %8434 = vmatprep.subr.bf16.mxu1 %v9800_v37  ;;  %v9869_v37 = vcombine.low %v7703_v21, %v7707_v17 }
 0x7ee   :  { %8394 = vmatpush1.bf16.msra.mxu0 %v9797_v31  ;;  %v7696_v31 = vld [vmem:[%s14558_s6 + $0x288] sm:$0xff] }
 0x7ef   :  { %8435 = vmatpush1.bf16.msra.mxu1 %v9799_v57  ;;  %8395 = vmatprep.subr.bf16.mxu0 %v9790_v5  ;;  %v7700_v57 = vld [vmem:[%s14558_s6 + $0x2a8] sm:$0xff]  ;;  %v7687_v5 = vld [vmem:[%s14558_s6 + $0x240] sm:$0xff] }
 0x7f0   :  { %8436 = vmatprep.subr.bf16.mxu1 %v9792_v36  ;;  %v9864_v32 = vcombine.high %v7696_v31, %v7700_v57  ;;  %v9861_v36 = vcombine.low %v7695_v33, %v7699_v20  ;;  %v9863_v42 = vcombine.low %v7696_v31, %v7700_v57  ;;  %v9854_v13 = vcombine.high %v7687_v5, %v7691_v59 }
 0x7f2   :  { %8396 = vmatpush1.bf16.msra.mxu0 %v9789_v62  ;;  %v7688_v62 = vld [vmem:[%s14558_s6 + $0x248] sm:$0xff] }
 0x7f3   :  { %8437 = vmatpush1.bf16.msra.mxu1 %v9791_v46  ;;  %8397 = vmatprep.subr.bf16.mxu0 %v9782_v8  ;;  %v7692_v46 = vld [vmem:[%s14558_s6 + $0x268] sm:$0xff]  ;;  %v7679_v8 = vld [vmem:[%s14558_s6 + $0x200] sm:$0xff] }
 0x7f4   :  { %8438 = vmatprep.subr.bf16.mxu1 %v9784_v55  ;;  %v9856_v50 = vcombine.high %v7688_v62, %v7692_v46  ;;  %v9853_v55 = vcombine.low %v7687_v5, %v7691_v59  ;;  %v9855_v24 = vcombine.low %v7688_v62, %v7692_v46  ;;  %v9846_v60 = vcombine.high %v7679_v8, %v7683_v12 }
 0x7f6   :  { %8398 = vmatpush1.bf16.msra.mxu0 %v9781_v47  ;;  %v7680_v47 = vld [vmem:[%s14558_s6 + $0x208] sm:$0xff] }
 0x7f7   :  { %8439 = vmatpush1.bf16.msra.mxu1 %v9783_v15  ;;  %8399 = vmatprep.subr.bf16.mxu0 %v9902_v43  ;;  %v7684_v15 = vld [vmem:[%s14558_s6 + $0x228] sm:$0xff]  ;;  %v9845_v43 = vcombine.low %v7679_v8, %v7683_v12 }
 0x7f8   :  { %8440 = vmatprep.subr.bf16.mxu1 %v9904_v45  ;;  %v9848_v0 = vcombine.high %v7680_v47, %v7684_v15  ;;  %v9847_v28 = vcombine.low %v7680_v47, %v7684_v15  ;;  %v14221_v45 = vld [vmem:[%s14558_s6 + $0x1d8] sm:$0xff]  ;;  %v15377_v47 = vld [vmem:[#allocation26_spill] sm:$0xff] }
 0x7f9   :  { %v9844_v44 = vcombine.high %v14221_v45, %v14230_v11 }
 0x7fa   :  { %8400 = vmatpush2.bf16.msra.mxu0 %v9901_v23  ;;  %v14211_v23 = vld [vmem:[%s14558_s6 + $0x1d0] sm:$0xff] }
 0x7fb   :  { %8441 = vmatpush2.bf16.msra.mxu1 %v9903_v38  ;;  %8401 = vmatprep.subr.bf16.mxu0 %v9894_v34  ;;  %v14216_v38 = vld [vmem:[%s14558_s6 + $0x1f0] sm:$0xff]  ;;  %v9843_v34 = vcombine.low %v14221_v45, %v14230_v11  ;;  %v7654_v45 = vld [vmem:[%s14558_s6 + $0x138] sm:$0xff] }
 0x7fc   :  { %8442 = vmatprep.subr.bf16.mxu1 %v9896_v19  ;;  %v9841_v56 = vcombine.low %v14211_v23, %v14216_v38  ;;  %v9842_v22 = vcombine.high %v14211_v23, %v14216_v38  ;;  %v15372_v19 = vld [vmem:[#allocation13_spill] sm:$0xff]  ;;  %v7653_v23 = vld [vmem:[%s14558_s6 + $0x130] sm:$0xff] }
 0x7fd   :  { %v7650_v38 = vld [vmem:[%s14558_s6 + $0x118] sm:$0xff] }
 0x7fe   :  { %8402 = vmatpush2.bf16.msra.mxu0 %v9893_v53 }
 0x7ff   :  { %8443 = vmatpush2.bf16.msra.mxu1 %v9895_v58  ;;  %8403 = vmatprep.subr.bf16.mxu0 %v9886_v51 }
 0x800   :  { %8444 = vmatprep.subr.bf16.mxu1 %v9888_v27 }
 0x802   :  { %8404 = vmatpush2.bf16.msra.mxu0 %v9885_v25 }
 0x803   :  { %8445 = vmatpush2.bf16.msra.mxu1 %v9887_v16  ;;  %8405 = vmatprep.subr.bf16.mxu0 %v9878_v35 }
 0x804   :  { %8446 = vmatprep.subr.bf16.mxu1 %v9880_v30 }
 0x806   :  { %8406 = vmatpush2.bf16.msra.mxu0 %v9877_v63 }
 0x807   :  { %8447 = vmatpush2.bf16.msra.mxu1 %v9879_v2  ;;  %8407 = vmatprep.subr.bf16.mxu0 %v9870_v49 }
 0x808   :  { %8448 = vmatprep.subr.bf16.mxu1 %v9872_v54 }
 0x80a   :  { %8408 = vmatpush2.bf16.msra.mxu0 %v9869_v37 }
 0x80b   :  { %8449 = vmatpush2.bf16.msra.mxu1 %v9871_v29  ;;  %8409 = vmatprep.subr.bf16.mxu0 %v9862_v48 }
 0x80c   :  { %8450 = vmatprep.subr.bf16.mxu1 %v9864_v32 }
 0x80e   :  { %8410 = vmatpush2.bf16.msra.mxu0 %v9861_v36 }
 0x80f   :  { %8451 = vmatpush2.bf16.msra.mxu1 %v9863_v42  ;;  %8411 = vmatprep.subr.bf16.mxu0 %v9854_v13  ;;  %v15376_v13 = vld [vmem:[#allocation24_spill] sm:$0xff] }
 0x810   :  { %8452 = vmatprep.subr.bf16.mxu1 %v9856_v50 }
 0x812   :  { %8412 = vmatpush2.bf16.msra.mxu0 %v9853_v55 }
 0x813   :  { %8453 = vmatpush2.bf16.msra.mxu1 %v9855_v24  ;;  %8413 = vmatprep.subr.bf16.mxu0 %v9846_v60 }
 0x814   :  { %8454 = vmatprep.subr.bf16.mxu1 %v9848_v0  ;;  %v15378_v0 = vld [vmem:[#allocation52_spill] sm:$0xff] }
 0x816   :  { %8414 = vmatpush2.bf16.msra.mxu0 %v9845_v43 }
 0x817   :  { %8455 = vmatpush2.bf16.msra.mxu1 %v9847_v28  ;;  %8465 = vmatprep.subr.bf16.mxu0 %v9842_v22 }
 0x818   :  { %8506 = vmatprep.subr.bf16.mxu1 %v9844_v44  ;;  %v15379_v44 = vld [vmem:[#allocation51_spill] sm:$0xff] }
 0x859   :  { %v7415_v53 = vpop.f32.mrf.mxu0  ;;  %v7456_v58 = vpop.f32.mrf.mxu1 }
 0x85a   :  { %v7545_v6 = vadd.f32 %v7415_v53, %v15372_v19  ;;  %v7547_v21 = vadd.f32 %v7456_v58, %v15375_v61 }
 0x85b   :  { %v7417_v39 = vpop.f32.mrf.mxu0  ;;  %v7458_v3 = vpop.f32.mrf.mxu1 }
 0x85c   :  { %v7549_v51 = vmul.f32 0.5, %v7545_v6  ;;  %v7546_v25 = vadd.f32 %v7417_v39, %v15373_v52  ;;  %v7548_v9 = vadd.f32 %v7458_v3, %v15374_v18  ;;  %v7557_v17 = vmul.f32 0.5, %v7547_v21 }
 0x85d   :  { %v7419_v16 = vpop.f32.mrf.mxu0  ;;  %v7460_v27 = vpop.f32.mrf.mxu1 }
 0x85e   :  { %10122 = vtanh.f32 %v7549_v51  ;;  %v7553_v14 = vmul.f32 0.5, %v7546_v25 }
 0x85f   :  { %v7420_v63 = vpop.f32.mrf.mxu0  ;;  %v7461_v35 = vpop.f32.mrf.mxu1 }
 0x860   :  { %10124 = vtanh.f32 %v7553_v14 }
 0x861   :  { %10126 = vtanh.f32 %v7548_v9 }
 0x862   :  { %10128 = vtanh.f32 %v7557_v17 }
 0x86b   :  { %v10123_v2 = vpop.eup %10122 }
 0x86c   :  { %v7551_v30 = vmul.f32 0.5, %v10123_v2  ;;  %v7665_v2 = vld [vmem:[%s14558_s6 + $0x190] sm:$0xff] }
 0x86d   :  { %v10125_v49 = vpop.eup %10124 }
 0x86e   :  { %v7552_v4 = vadd.f32 0.5, %v7551_v30  ;;  %v7555_v26 = vmul.f32 0.5, %v10125_v49  ;;  %v10127_v33 = vpop.eup %10126  ;;  %v7669_v49 = vld [vmem:[%s14558_s6 + $0x1b0] sm:$0xff] }
 0x86f   :  { %v10129_v29 = vpop.eup %10128 }
 0x870   :  { %v7556_v54 = vadd.f32 0.5, %v7555_v26  ;;  %v7563_v20 = vmul.f32 %v10127_v33, %v7552_v4  ;;  %v7559_v48 = vmul.f32 0.5, %v10129_v29  ;;  %v7670_v4 = vld [vmem:[%s14558_s6 + $0x1b8] sm:$0xff] }
 0x871   :  { %v7658_v29 = vld [vmem:[%s14558_s6 + $0x158] sm:$0xff] }
 0x872   :  { %v7562_v31 = vmul.f32 %v7556_v54, %v13912_v40  ;;  %v7560_v32 = vadd.f32 0.5, %v7559_v48  ;;  %v7657_v54 = vld [vmem:[%s14558_s6 + $0x150] sm:$0xff]  ;;  %v7662_v48 = vld [vmem:[%s14558_s6 + $0x178] sm:$0xff] }
 0x873   :  { %v9827_v11 = vcombine.low %v7658_v29, %v7662_v48 }
 0x874   :  { %v7564_v57 = vadd.f32 %v7563_v20, %v7562_v31  ;;  %v9834_v20 = vcombine.high %v7665_v2, %v7669_v49 }
 0x876   :  { %10130 = vtanh.f32 %v7564_v57  ;;  %v14244_v37 = vsel %vm2570_vm6, %v7564_v57, %v13912_v40  ;;  %v7661_v57 = vld [vmem:[%s14558_s6 + $0x170] sm:$0xff] }
 0x883   :  { %v10131_v5 = vpop.eup %10130 }
 0x884   :  { %v7566_v59 = vmul.f32 %v10131_v5, %v7560_v32  ;;  %v9833_v32 = vcombine.low %v7665_v2, %v7669_v49  ;;  %v7741_v2 = vld [vmem:[%s14558_s6 + $0x3f0] sm:$0xff]  ;;  %v7742_v49 = vld [vmem:[%s14558_s6 + $0x3f8] sm:$0xff] }
 0x886   :  { %v7593_v62 = vsel %vm2570_vm6, %v7566_v59, 0.0  ;;  %v14264_v17 = vsel %vm2570_vm6, %v7566_v59, %v13932_v7  ;;  %v7666_v7 = vld [vmem:[%s14558_s6 + $0x198] sm:$0xff]  ;;  %v9826_v59 = vcombine.high %v7657_v54, %v7661_v57 }
 0x887   :  { %v7594_v46 = vpack.c.bf16 %v7593_v62, %v7593_v62  ;;  %v14289_v33 = vpack.c.bf16 %v14264_v17, %v14264_v17  ;;  %v9836_v31 = vcombine.high %v7666_v7, %v7670_v4  ;;  %v9835_v5 = vcombine.low %v7666_v7, %v7670_v4 }
 0x888   :  { %v9828_v62 = vcombine.high %v7658_v29, %v7662_v48 }
 0x889   :  { %9779 = vst [vmem:[%s14561_s9 + $0x18] sm:$0xf] %v7594_v46  ;;  %v7649_v46 = vld [vmem:[%s14558_s6 + $0x110] sm:$0xff] }
 0x899   :  { %v7497_v36 = vpop.f32.mrf.mxu0  ;;  %v7538_v42 = vpop.f32.mrf.mxu1 }
 0x89a   :  { %v7567_v50 = vadd.f32 %v7497_v36, %v15376_v13  ;;  %v7569_v53 = vadd.f32 %v7538_v42, %v15379_v44  ;;  %v9820_v36 = vcombine.high %v7650_v38, %v7654_v45  ;;  %v7641_v42 = vld [vmem:[%s14558_s6 + $0xd0] sm:$0xff] }
 0x89b   :  { %v7499_v8 = vpop.f32.mrf.mxu0  ;;  %v7540_v40 = vpop.f32.mrf.mxu1  ;;  %v7645_v13 = vld [vmem:[%s14558_s6 + $0xf0] sm:$0xff] }
 0x89c   :  { %v7571_v12 = vmul.f32 0.5, %v7567_v50  ;;  %v7568_v15 = vadd.f32 %v7499_v8, %v15377_v47  ;;  %v7570_v43 = vadd.f32 %v7540_v40, %v15378_v0  ;;  %v7579_v58 = vmul.f32 0.5, %v7569_v53  ;;  %v7642_v50 = vld [vmem:[%s14558_s6 + $0xd8] sm:$0xff]  ;;  %v7625_v53 = vld [vmem:[%s14558_s6 + $0x50] sm:$0xff] }
 0x89d   :  { %v7501_v55 = vpop.f32.mrf.mxu0  ;;  %v7542_v24 = vpop.f32.mrf.mxu1  ;;  %v7646_v8 = vld [vmem:[%s14558_s6 + $0xf8] sm:$0xff]  ;;  %v9817_v40 = vcombine.low %v7649_v46, %v7653_v23  ;;  %v9810_v47 = vcombine.high %v7641_v42, %v7645_v13 }
 0x89e   :  { %10132 = vtanh.f32 %v7571_v12  ;;  %v7575_v60 = vmul.f32 0.5, %v7568_v15  ;;  %v9819_v12 = vcombine.low %v7650_v38, %v7654_v45  ;;  %v9812_v15 = vcombine.high %v7642_v50, %v7646_v8  ;;  %v7633_v55 = vld [vmem:[%s14558_s6 + $0x90] sm:$0xff]  ;;  %v7638_v0 = vld [vmem:[%s14558_s6 + $0xb8] sm:$0xff] }
 0x89f   :  { %v7502_v28 = vpop.f32.mrf.mxu0  ;;  %v7543_v22 = vpop.f32.mrf.mxu1  ;;  %v7637_v24 = vld [vmem:[%s14558_s6 + $0xb0] sm:$0xff] }
 0x8a0   :  { %10134 = vtanh.f32 %v7575_v60  ;;  %v7634_v60 = vld [vmem:[%s14558_s6 + $0x98] sm:$0xff]  ;;  %v9811_v28 = vcombine.low %v7642_v50, %v7646_v8  ;;  %v9802_v22 = vcombine.high %v7633_v55, %v7637_v24 }
 0x8a1   :  { %10136 = vtanh.f32 %v7570_v43  ;;  %v9809_v43 = vcombine.low %v7641_v42, %v7645_v13  ;;  %v9804_v44 = vcombine.high %v7634_v60, %v7638_v0  ;;  %v7714_v42 = vld [vmem:[%s14558_s6 + $0x318] sm:$0xff] }
 0x8a2   :  { %10138 = vtanh.f32 %v7579_v58  ;;  %v7629_v58 = vld [vmem:[%s14558_s6 + $0x70] sm:$0xff]  ;;  %v7718_v13 = vld [vmem:[%s14558_s6 + $0x338] sm:$0xff] }
 0x8ab   :  { %v10133_v19 = vpop.eup %10132 }
 0x8ac   :  { %v7573_v6 = vmul.f32 0.5, %v10133_v19  ;;  %v7626_v19 = vld [vmem:[%s14558_s6 + $0x58] sm:$0xff] }
 0x8ad   :  { %v10135_v39 = vpop.eup %10134 }
 0x8ae   :  { %v7574_v3 = vadd.f32 0.5, %v7573_v6  ;;  %v7577_v51 = vmul.f32 0.5, %v10135_v39  ;;  %v10137_v52 = vpop.eup %10136  ;;  %v7630_v6 = vld [vmem:[%s14558_s6 + $0x78] sm:$0xff]  ;;  %v9801_v39 = vcombine.low %v7633_v55, %v7637_v24 }
 0x8af   :  { %v10139_v9 = vpop.eup %10138  ;;  %v7706_v55 = vld [vmem:[%s14558_s6 + $0x2d8] sm:$0xff] }
 0x8b0   :  { %v7578_v25 = vadd.f32 0.5, %v7577_v51  ;;  %v7585_v16 = vmul.f32 %v10137_v52, %v7574_v3  ;;  %v7581_v63 = vmul.f32 0.5, %v10139_v9  ;;  %v9803_v3 = vcombine.low %v7634_v60, %v7638_v0  ;;  %v7710_v24 = vld [vmem:[%s14558_s6 + $0x2f8] sm:$0xff] }
 0x8b1   :  { %v9794_v51 = vcombine.high %v7625_v53, %v7629_v58  ;;  %v9796_v52 = vcombine.high %v7626_v19, %v7630_v6  ;;  %v9793_v9 = vcombine.low %v7625_v53, %v7629_v58  ;;  %v9883_v0 = vcombine.low %v7714_v42, %v7718_v13  ;;  %v7698_v53 = vld [vmem:[%s14558_s6 + $0x298] sm:$0xff] }
 0x8b2   :  { %v7584_v27 = vmul.f32 %v7578_v25, %v13927_v41  ;;  %v7582_v35 = vadd.f32 0.5, %v7581_v63  ;;  %v7617_v25 = vld [vmem:[%s14558_s6 + $0x10] sm:$0xff]  ;;  %v9795_v63 = vcombine.low %v7626_v19, %v7630_v6  ;;  %v7702_v58 = vld [vmem:[%s14558_s6 + $0x2b8] sm:$0xff]  ;;  %v9875_v6 = vcombine.low %v7706_v55, %v7710_v24 }
 0x8b4   :  { %v7586_v14 = vadd.f32 %v7585_v16, %v7584_v27  ;;  %v7621_v16 = vld [vmem:[%s14558_s6 + $0x30] sm:$0xff]  ;;  %v7618_v27 = vld [vmem:[%s14558_s6 + $0x18] sm:$0xff] }
 0x8b5   :  { %v9785_v7 = vcombine.low %v7617_v25, %v7621_v16 }
 0x8b6   :  { %10140 = vtanh.f32 %v7586_v14  ;;  %v14259_v18 = vsel %vm2569_vm5, %v7586_v14, %v13927_v41  ;;  %v7622_v14 = vld [vmem:[%s14558_s6 + $0x38] sm:$0xff] }
 0x8b7   :  { %v9787_v4 = vcombine.low %v7618_v27, %v7622_v14 }
 0x8c3   :  { %v10141_v61 = vpop.eup %10140 }
 0x8c4   :  { %v7588_v21 = vmul.f32 %v10141_v61, %v7582_v35  ;;  %v9786_v35 = vcombine.high %v7617_v25, %v7621_v16  ;;  %v9788_v61 = vcombine.high %v7618_v27, %v7622_v14  ;;  %v7690_v25 = vld [vmem:[%s14558_s6 + $0x258] sm:$0xff]  ;;  %v9867_v14 = vcombine.low %v7698_v53, %v7702_v58 }
 0x8c5   :  { %v7694_v16 = vld [vmem:[%s14558_s6 + $0x278] sm:$0xff] }
 0x8c6   :  { %v14272_v30 = vsel %vm2569_vm5, %v7588_v21, %v13937_v10  ;;  %v7597_v41 = vsel %vm2569_vm5, %v7588_v21, 0.0  ;;  %v7737_v21 = vld [vmem:[%s14558_s6 + $0x3d0] sm:$0xff] }
 0x8c7   :  { %v7598_v26 = vpack.c.bf16 %v7597_v41, %v7597_v41  ;;  %v7614_v10 = vpack.c.bf16 %v14272_v30, %v14272_v30  ;;  %v7738_v41 = vld [vmem:[%s14558_s6 + $0x3d8] sm:$0xff]  ;;  %v9905_v29 = vcombine.low %v7737_v21, %v7741_v2 }
 0x8c8   :  { %v9907_v48 = vcombine.low %v7738_v41, %v7742_v49 }
 0x8c9   :  { %9780 = vst [vmem:[%s14561_s9 + $0x24] sm:$0xf] %v7598_v26  ;;  %8415 = vmatprep.mubr.bf16.mxu0 %v7614_v10  ;;  %8456 = vmatprep.mubr.bf16.mxu1 %v7614_v10  ;;  %v9906_v26 = vcombine.high %v7737_v21, %v7741_v2  ;;  %v7682_v21 = vld [vmem:[%s14558_s6 + $0x218] sm:$0xff] }
 0x8ca   :  { %8416 = vmatmul.mubr.bf16.vlgmr.msra.gmra.mxu0 %v14289_v33  ;;  %8457 = vmatmul.mubr.bf16.vlgmr.msra.gmra.mxu1 %v14289_v33  ;;  %v7686_v2 = vld [vmem:[%s14558_s6 + $0x238] sm:$0xff] }
 0x8cb   :  { %8466 = vmatpush1.bf16.msra.mxu0 %v9841_v56  ;;  %8507 = vmatpush1.bf16.msra.mxu1 %v9843_v34  ;;  %v9825_v56 = vcombine.low %v7657_v54, %v7661_v57  ;;  %v9818_v34 = vcombine.high %v7649_v46, %v7653_v23  ;;  %v7729_v54 = vld [vmem:[%s14558_s6 + $0x390] sm:$0xff]  ;;  %v7734_v57 = vld [vmem:[%s14558_s6 + $0x3b8] sm:$0xff] }
 0x8cc   :  { %8497 = vmatprep.mubr.bf16.mxu0 %v7614_v10  ;;  %8538 = vmatprep.mubr.bf16.mxu1 %v7614_v10  ;;  %v9908_v10 = vcombine.high %v7738_v41, %v7742_v49  ;;  %v7722_v46 = vld [vmem:[%s14558_s6 + $0x358] sm:$0xff]  ;;  %v9859_v49 = vcombine.low %v7690_v25, %v7694_v16 }
 0x8cd   :  { %8467 = vmatprep.subr.bf16.mxu0 %v9834_v20  ;;  %8508 = vmatprep.subr.bf16.mxu1 %v9836_v31  ;;  %v7733_v20 = vld [vmem:[%s14558_s6 + $0x3b0] sm:$0xff]  ;;  %v7730_v31 = vld [vmem:[%s14558_s6 + $0x398] sm:$0xff] }
 0x8ce   :  { %v7726_v23 = vld [vmem:[%s14558_s6 + $0x378] sm:$0xff]  ;;  %v9897_v38 = vcombine.low %v7729_v54, %v7733_v20  ;;  %v9899_v45 = vcombine.low %v7730_v31, %v7734_v57 }
 0x8cf   :  { %8468 = vmatpush1.bf16.msra.mxu0 %v9833_v32  ;;  %8509 = vmatpush1.bf16.msra.mxu1 %v9835_v5  ;;  %v9898_v32 = vcombine.high %v7729_v54, %v7733_v20  ;;  %v9900_v5 = vcombine.high %v7730_v31, %v7734_v57  ;;  %v9891_v8 = vcombine.low %v7722_v46, %v7726_v23  ;;  %v9986_v54 = vld [vmem:[%s14559_s7 + $0x78] sm:$0xff]   ;;  %v9988_v31 = vld [vmem:[%s14559_s7 + $0x70] sm:$0xff]  }
 0x8d0   :  { %8469 = vmatprep.subr.bf16.mxu0 %v9826_v59  ;;  %8510 = vmatprep.subr.bf16.mxu1 %v9828_v62  ;;  %v7721_v59 = vld [vmem:[%s14558_s6 + $0x350] sm:$0xff]  ;;  %v9987_v20 = vld [vmem:[%s14559_s7 + $0x38] sm:$0xff]  }
 0x8d1   :  { %v7725_v62 = vld [vmem:[%s14558_s6 + $0x370] sm:$0xff] }
 0x8d2   :  { %v9889_v50 = vcombine.low %v7721_v59, %v7725_v62  ;;  %v9989_v57 = vld [vmem:[%s14559_s7 + $0x30] sm:$0xff]  }
 0x8d3   :  { %8470 = vmatpush1.bf16.msra.mxu0 %v9825_v56  ;;  %8511 = vmatpush1.bf16.msra.mxu1 %v9827_v11  ;;  %v9890_v56 = vcombine.high %v7721_v59, %v7725_v62  ;;  %v9892_v11 = vcombine.high %v7722_v46, %v7726_v23  ;;  %v9995_v59 = vld [vmem:[%s14559_s7 + $0x18] sm:$0xff]   ;;  %v9996_v62 = vld [vmem:[%s14559_s7 + $0x50] sm:$0xff]   ;;  %v9998_v23 = vld [vmem:[%s14559_s7 + $0x48] sm:$0xff]  }
 0x8d4   :  { %8471 = vmatprep.subr.bf16.mxu0 %v9818_v34  ;;  %8512 = vmatprep.subr.bf16.mxu1 %v9820_v36  ;;  %v7713_v34 = vld [vmem:[%s14558_s6 + $0x310] sm:$0xff] }
 0x8d5   :  { %v7717_v36 = vld [vmem:[%s14558_s6 + $0x330] sm:$0xff] }
 0x8d6   :  { %v9881_v60 = vcombine.low %v7713_v34, %v7717_v36  ;;  %v9997_v46 = vld [vmem:[%s14559_s7 + $0x10] sm:$0xff]  }
 0x8d7   :  { %8472 = vmatpush1.bf16.msra.mxu0 %v9817_v40  ;;  %8513 = vmatpush1.bf16.msra.mxu1 %v9819_v12  ;;  %v9882_v40 = vcombine.high %v7713_v34, %v7717_v36  ;;  %v9884_v12 = vcombine.high %v7714_v42, %v7718_v13  ;;  %v15380_v36 = vld [vmem:[#allocation17_spill] sm:$0xff] }
 0x8d8   :  { %8473 = vmatprep.subr.bf16.mxu0 %v9810_v47  ;;  %8514 = vmatprep.subr.bf16.mxu1 %v9812_v15  ;;  %v7705_v47 = vld [vmem:[%s14558_s6 + $0x2d0] sm:$0xff] }
 0x8d9   :  { %v7709_v15 = vld [vmem:[%s14558_s6 + $0x2f0] sm:$0xff] }
 0x8da   :  { %v9873_v19 = vcombine.low %v7705_v47, %v7709_v15 }
 0x8db   :  { %8474 = vmatpush1.bf16.msra.mxu0 %v9809_v43  ;;  %8515 = vmatpush1.bf16.msra.mxu1 %v9811_v28  ;;  %v9874_v43 = vcombine.high %v7705_v47, %v7709_v15  ;;  %v9876_v28 = vcombine.high %v7706_v55, %v7710_v24  ;;  %v15382_v24 = vld [vmem:[#allocation48_spill] sm:$0xff] }
 0x8dc   :  { %8475 = vmatprep.subr.bf16.mxu0 %v9802_v22  ;;  %8516 = vmatprep.subr.bf16.mxu1 %v9804_v44  ;;  %v7697_v22 = vld [vmem:[%s14558_s6 + $0x290] sm:$0xff] }
 0x8dd   :  { %v7701_v44 = vld [vmem:[%s14558_s6 + $0x2b0] sm:$0xff] }
 0x8de   :  { %v9865_v27 = vcombine.low %v7697_v22, %v7701_v44 }
 0x8df   :  { %8476 = vmatpush1.bf16.msra.mxu0 %v9801_v39  ;;  %8517 = vmatpush1.bf16.msra.mxu1 %v9803_v3  ;;  %v9866_v39 = vcombine.high %v7697_v22, %v7701_v44  ;;  %v9868_v3 = vcombine.high %v7698_v53, %v7702_v58 }
 0x8e0   :  { %8477 = vmatprep.subr.bf16.mxu0 %v9794_v51  ;;  %8518 = vmatprep.subr.bf16.mxu1 %v9796_v52  ;;  %v7689_v51 = vld [vmem:[%s14558_s6 + $0x250] sm:$0xff] }
 0x8e1   :  { %v7693_v52 = vld [vmem:[%s14558_s6 + $0x270] sm:$0xff] }
 0x8e2   :  { %v9857_v41 = vcombine.low %v7689_v51, %v7693_v52 }
 0x8e3   :  { %8478 = vmatpush1.bf16.msra.mxu0 %v9793_v9  ;;  %8519 = vmatpush1.bf16.msra.mxu1 %v9795_v63  ;;  %v9858_v9 = vcombine.high %v7689_v51, %v7693_v52  ;;  %v9860_v63 = vcombine.high %v7690_v25, %v7694_v16 }
 0x8e4   :  { %8479 = vmatprep.subr.bf16.mxu0 %v9786_v35  ;;  %8520 = vmatprep.subr.bf16.mxu1 %v9788_v61  ;;  %v7681_v35 = vld [vmem:[%s14558_s6 + $0x210] sm:$0xff] }
 0x8e5   :  { %v7685_v61 = vld [vmem:[%s14558_s6 + $0x230] sm:$0xff] }
 0x8e7   :  { %8480 = vmatpush1.bf16.msra.mxu0 %v9785_v7  ;;  %8521 = vmatpush1.bf16.msra.mxu1 %v9787_v4  ;;  %v9850_v7 = vcombine.high %v7681_v35, %v7685_v61  ;;  %v9852_v4 = vcombine.high %v7682_v21, %v7686_v2 }
 0x8e8   :  { %8481 = vmatprep.subr.bf16.mxu0 %v9906_v26  ;;  %8522 = vmatprep.subr.bf16.mxu1 %v9908_v10  ;;  %v9849_v26 = vcombine.low %v7681_v35, %v7685_v61  ;;  %v9851_v10 = vcombine.low %v7682_v21, %v7686_v2 }
 0x8eb   :  { %8482 = vmatpush2.bf16.msra.mxu0 %v9905_v29  ;;  %8523 = vmatpush2.bf16.msra.mxu1 %v9907_v48  ;;  %v9991_v29 = vld [vmem:[%s14559_s7 + $0x28] sm:$0xff]   ;;  %v9992_v48 = vld [vmem:[%s14559_s7 + $0x60] sm:$0xff]  }
 0x8ec   :  { %8483 = vmatprep.subr.bf16.mxu0 %v9898_v32  ;;  %8524 = vmatprep.subr.bf16.mxu1 %v9900_v5  ;;  %v9993_v32 = vld [vmem:[%s14559_s7 + $0x20] sm:$0xff]   ;;  %v9994_v5 = vld [vmem:[%s14559_s7 + $0x58] sm:$0xff]  }
 0x8ef   :  { %8484 = vmatpush2.bf16.msra.mxu0 %v9897_v38  ;;  %8525 = vmatpush2.bf16.msra.mxu1 %v9899_v45  ;;  %v9999_v38 = vld [vmem:[%s14559_s7 + $0x8] sm:$0xff]   ;;  %v10000_v45 = vld [vmem:[%s14559_s7 + $0x40] sm:$0xff]  }
 0x8f0   :  { %8485 = vmatprep.subr.bf16.mxu0 %v9890_v56  ;;  %8526 = vmatprep.subr.bf16.mxu1 %v9892_v11  ;;  %v10001_v56 = vld [vmem:[%s14559_s7] sm:$0xff]  }
 0x8f3   :  { %8486 = vmatpush2.bf16.msra.mxu0 %v9889_v50  ;;  %8527 = vmatpush2.bf16.msra.mxu1 %v9891_v8 }
 0x8f4   :  { %8487 = vmatprep.subr.bf16.mxu0 %v9882_v40  ;;  %8528 = vmatprep.subr.bf16.mxu1 %v9884_v12  ;;  %v15381_v40 = vld [vmem:[#allocation19_spill] sm:$0xff] }
 0x8f7   :  { %8488 = vmatpush2.bf16.msra.mxu0 %v9881_v60  ;;  %8529 = vmatpush2.bf16.msra.mxu1 %v9883_v0 }
 0x8f8   :  { %8489 = vmatprep.subr.bf16.mxu0 %v9874_v43  ;;  %8530 = vmatprep.subr.bf16.mxu1 %v9876_v28  ;;  %v15383_v28 = vld [vmem:[#allocation47_spill] sm:$0xff] }
 0x8fb   :  { %8490 = vmatpush2.bf16.msra.mxu0 %v9873_v19  ;;  %8531 = vmatpush2.bf16.msra.mxu1 %v9875_v6 }
 0x8fc   :  { %8491 = vmatprep.subr.bf16.mxu0 %v9866_v39  ;;  %8532 = vmatprep.subr.bf16.mxu1 %v9868_v3 }
 0x8ff   :  { %8492 = vmatpush2.bf16.msra.mxu0 %v9865_v27  ;;  %8533 = vmatpush2.bf16.msra.mxu1 %v9867_v14 }
 0x900   :  { %8493 = vmatprep.subr.bf16.mxu0 %v9858_v9  ;;  %8534 = vmatprep.subr.bf16.mxu1 %v9860_v63 }
 0x903   :  { %8494 = vmatpush2.bf16.msra.mxu0 %v9857_v41  ;;  %8535 = vmatpush2.bf16.msra.mxu1 %v9859_v49  ;;  %v15384_v49 = vld [vmem:[#allocation21_spill] sm:$0xff] }
 0x904   :  { %8495 = vmatprep.subr.bf16.mxu0 %v9850_v7  ;;  %8536 = vmatprep.subr.bf16.mxu1 %v9852_v4 }
 0x907   :  { %8496 = vmatpush2.bf16.msra.mxu0 %v9849_v26  ;;  %8537 = vmatpush2.bf16.msra.mxu1 %v9851_v10  ;;  %v15385_v10 = vld [vmem:[#allocation22_spill] sm:$0xff] }
 0x908   :  { %9928 = vmatprep.subr.bf16.mxu0 %v9986_v54 }
 0x90a   :  { %8498 = vmatmul.mubr.bf16.vlgmr.msra.gmra.mxu0 %v14289_v33  ;;  %8539 = vmatmul.mubr.bf16.vlgmr.msra.gmra.mxu1 %v14289_v33  ;;  %v9990_v33 = vld [vmem:[%s14559_s7 + $0x68] sm:$0xff]  }
 0x90b   :  { %9929 = vmatpush3.bf16.msra.mxu0 %v9987_v20 }
 0x90c   :  { %9930 = vmatprep.subr.bf16.mxu0 %v9988_v31 }
 0x90f   :  { %9931 = vmatpush3.bf16.msra.mxu0 %v9989_v57 }
 0x910   :  { %9932 = vmatprep.subr.bf16.mxu0 %v9990_v33  ;;  %v15386_v33 = vld [vmem:[#allocation50_spill] sm:$0xff] }
 0x913   :  { %9933 = vmatpush3.bf16.msra.mxu0 %v9991_v29 }
 0x914   :  { %9934 = vmatprep.subr.bf16.mxu0 %v9992_v48 }
 0x917   :  { %9935 = vmatpush3.bf16.msra.mxu0 %v9993_v32 }
 0x918   :  { %9936 = vmatprep.subr.bf16.mxu0 %v9994_v5  ;;  %v15387_v5 = vld [vmem:[#allocation49_spill] sm:$0xff] }
 0x91b   :  { %9937 = vmatpush3.bf16.msra.mxu0 %v9995_v59 }
 0x91c   :  { %9938 = vmatprep.subr.bf16.mxu0 %v9996_v62 }
 0x91f   :  { %9939 = vmatpush3.bf16.msra.mxu0 %v9997_v46 }
 0x920   :  { %9940 = vmatprep.subr.bf16.mxu0 %v9998_v23 }
 0x923   :  { %9941 = vmatpush3.bf16.msra.mxu0 %v9999_v38 }
 0x924   :  { %9942 = vmatprep.subr.bf16.mxu0 %v10000_v45 }
 0x927   :  { %9943 = vmatpush3.bf16.msra.mxu0 %v10001_v56 }
 0x98a   :  { %v8417_v11 = vpop.f32.mrf.mxu0  ;;  %v8458_v34 = vpop.f32.mrf.mxu1 }
 0x98b   :  { %v8547_v42 = vadd.f32 %v8417_v11, %v15380_v36  ;;  %v8549_v22 = vadd.f32 %v8458_v34, %v15383_v28 }
 0x98c   :  { %v8419_v13 = vpop.f32.mrf.mxu0  ;;  %v8460_v50 = vpop.f32.mrf.mxu1 }
 0x98d   :  { %v8551_v8 = vmul.f32 0.5, %v8547_v42  ;;  %v8548_v12 = vadd.f32 %v8419_v13, %v15381_v40  ;;  %v8550_v60 = vadd.f32 %v8460_v50, %v15382_v24  ;;  %v8559_v44 = vmul.f32 0.5, %v8549_v22 }
 0x98e   :  { %v8421_v47 = vpop.f32.mrf.mxu0  ;;  %v8462_v15 = vpop.f32.mrf.mxu1 }
 0x98f   :  { %10142 = vtanh.f32 %v8551_v8  ;;  %v8555_v55 = vmul.f32 0.5, %v8548_v12 }
 0x990   :  { %v8422_v0 = vpop.f32.mrf.mxu0  ;;  %v8463_v43 = vpop.f32.mrf.mxu1 }
 0x991   :  { %10144 = vtanh.f32 %v8555_v55 }
 0x992   :  { %10146 = vtanh.f32 %v8550_v60 }
 0x993   :  { %10148 = vtanh.f32 %v8559_v44 }
 0x99c   :  { %v10143_v53 = vpop.eup %10142 }
 0x99d   :  { %v8553_v58 = vmul.f32 0.5, %v10143_v53 }
 0x99e   :  { %v10145_v19 = vpop.eup %10144 }
 0x99f   :  { %v8554_v6 = vadd.f32 0.5, %v8553_v58  ;;  %v8557_v39 = vmul.f32 0.5, %v10145_v19  ;;  %v10147_v3 = vpop.eup %10146 }
 0x9a0   :  { %v10149_v27 = vpop.eup %10148 }
 0x9a1   :  { %v8558_v51 = vadd.f32 0.5, %v8557_v39  ;;  %v8565_v52 = vmul.f32 %v10147_v3, %v8554_v6  ;;  %v8561_v14 = vmul.f32 0.5, %v10149_v27 }
 0x9a3   :  { %v8564_v25 = vmul.f32 %v8558_v51, %v14244_v37  ;;  %v8562_v9 = vadd.f32 0.5, %v8561_v14 }
 0x9a5   :  { %v8566_v16 = vadd.f32 %v8565_v52, %v8564_v25 }
 0x9a7   :  { %10150 = vtanh.f32 %v8566_v16 }
 0x9b4   :  { %v10151_v63 = vpop.eup %10150 }
 0x9b5   :  { %v8568_v35 = vmul.f32 %v10151_v63, %v8562_v9 }
 0x9b7   :  { %v8593_v61 = vsel %vm1569_vm2, %v8568_v35, 0.0  ;;  %v8591_v15 = vsel %vm1569_vm2, %v8568_v35, %v14264_v17  ;;  %v9911_v17 = vld [vmem:[%s14560_s8] ss:$0 sm:$0xff] }
 0x9b8   :  { %v8594_v21 = vpack.c.bf16 %v8593_v61, %v8593_v61  ;;  %v8601_v0 = vpack.c.bf16 %v8591_v15, %v8591_v15 }
 0x9ba   :  { %9909 = vst [vmem:[%s14561_s9 + $0x1c] sm:$0xf] %v8594_v21 }
 0x9ca   :  { %v8499_v2 = vpop.f32.mrf.mxu0  ;;  %v8540_v41 = vpop.f32.mrf.mxu1 }
 0x9cb   :  { %v8569_v7 = vadd.f32 %v8499_v2, %v15384_v49  ;;  %v8571_v59 = vadd.f32 %v8540_v41, %v15387_v5 }
 0x9cc   :  { %v8501_v37 = vpop.f32.mrf.mxu0  ;;  %v8542_v4 = vpop.f32.mrf.mxu1 }
 0x9cd   :  { %v8573_v26 = vmul.f32 0.5, %v8569_v7  ;;  %v8570_v54 = vadd.f32 %v8501_v37, %v15385_v10  ;;  %v8572_v29 = vadd.f32 %v8542_v4, %v15386_v33  ;;  %v8581_v62 = vmul.f32 0.5, %v8571_v59 }
 0x9ce   :  { %v8503_v20 = vpop.f32.mrf.mxu0  ;;  %v8544_v31 = vpop.f32.mrf.mxu1 }
 0x9cf   :  { %10152 = vtanh.f32 %v8573_v26  ;;  %v8577_v57 = vmul.f32 0.5, %v8570_v54 }
 0x9d0   :  { %v8504_v48 = vpop.f32.mrf.mxu0  ;;  %v8545_v32 = vpop.f32.mrf.mxu1 }
 0x9d1   :  { %10154 = vtanh.f32 %v8577_v57 }
 0x9d2   :  { %10156 = vtanh.f32 %v8572_v29 }
 0x9d3   :  { %10158 = vtanh.f32 %v8581_v62 }
 0x9dc   :  { %v10153_v46 = vpop.eup %10152 }
 0x9dd   :  { %v8575_v23 = vmul.f32 0.5, %v10153_v46 }
 0x9de   :  { %v10155_v38 = vpop.eup %10154 }
 0x9df   :  { %v8576_v45 = vadd.f32 0.5, %v8575_v23  ;;  %v8579_v56 = vmul.f32 0.5, %v10155_v38  ;;  %v10157_v11 = vpop.eup %10156 }
 0x9e0   :  { %v10159_v50 = vpop.eup %10158 }
 0x9e1   :  { %v8580_v34 = vadd.f32 0.5, %v8579_v56  ;;  %v8587_v36 = vmul.f32 %v10157_v11, %v8576_v45  ;;  %v8583_v8 = vmul.f32 0.5, %v10159_v50 }
 0x9e3   :  { %v8586_v42 = vmul.f32 %v8580_v34, %v14259_v18  ;;  %v8584_v40 = vadd.f32 0.5, %v8583_v8 }
 0x9e5   :  { %v8588_v13 = vadd.f32 %v8587_v36, %v8586_v42 }
 0x9e7   :  { %10160 = vtanh.f32 %v8588_v13 }
 0x9f4   :  { %v10161_v12 = vpop.eup %10160 }
 0x9f5   :  { %v8590_v47 = vmul.f32 %v10161_v12, %v8584_v40 }
 0x9f7   :  { %v8592_v55 = vsel %vm1568_vm1, %v8590_v47, %v14272_v30  ;;  %v8597_v24 = vsel %vm1568_vm1, %v8590_v47, 0.0 }
 0x9f8   :  { %v8598_v60 = vpack.c.bf16 %v8597_v24, %v8597_v24  ;;  %v8602_v18 = vpack.c.bf16 %v8592_v55, %v8592_v55 }
 0x9fa   :  { %9910 = vst [vmem:[%s14561_s9 + $0x20] sm:$0xf] %v8598_v60  ;;  %8770 = vmatprep.mubr.bf16.mxu0 %v8602_v18 }
 0x9fb   :  { %8771 = vmatmul.mubr.bf16.vlgmr.msra.gmra.mxu0 %v8601_v0 }
 0xabb   :  { %v9944_v43 = vpop.f32.mrf.mxu0 }
 0xabd   :  { %v9945_v28 = vpop.f32.mrf.mxu0 }
 0xabe   :  { %v9946_v22 = vadd.f32 %v9945_v28, %v9944_v43 }
 0xabf   :  { %v9947_v30 = vpop.f32.mrf.mxu0 }
 0xac0   :  { %v8773_v44 = vadd.f32 %v9946_v22, %v9911_v17 }
 0xac1   :  { %v9948_v1 = vpop.f32.mrf.mxu0 }
 0xac2   :  { %10162 = vtanh.f32 %v8773_v44 }
 0xacf   :  { %v10163_v53 = vpop.eup %10162 }
 0xad0   :  { %8779 = vst [vmem:[#allocation4] sm:$0xff] %v10163_v53 }
 0xad1   :  { %10175 = shalt.err (!%p10172_p4)
}
 0xad2   :  { %8791 = dma.vmem_to_hbm [thread:$0]  %s8789_s1, 128, %s14562_s10, [#allocation5]  }
 0xad3   :  { %10184 = dma.done.wait [#allocation5], 128  }
 0xad4   :  { %10185 = vsyncadd [#allocation5], 4294967168 }
 0xad5   :  { %8797 = vsyncpa [#allocation5], 1 }

</bundles_post_ra>
